<compile_context>
chip_gen: v7x
topology: tpu7x:2x2x1
jax: 0.10.0
libtpu: 0.0.40
codegen_flags: <defaults>
</compile_context>

<pallas_src>
import functools

import jax
import jax.numpy as jnp
from jax import lax
from jax.experimental import pallas as pl
from jax.experimental.pallas import tpu as pltpu

LANES = 128  # all channel/class dims are carried lane-padded to a full vreg width


# ---------------------------------------------------------------------------
# Pallas kernels
# ---------------------------------------------------------------------------
def _cnn_fused_kernel(x1_ref, w1_ref, b1_ref, w2_ref, b2_ref, w3_ref, b3_ref,
                      o_ref,
                      c1_ref, xm1_ref, p2_ref, c2_ref, xm2_ref, p3_ref, c3_ref,
                      *, BB):
    """Whole conv stack for BB images.  Row layouts (lane dim = 128, real channels in
    the low lanes, remaining lanes zero):

      x1_ref : (BB*784, 9*Cin)   layer-1 im2col, rows (b, y, x), cols (ky, kx, ci)
      c1_ref : (BB*784, 128)     conv1 out, rows (b, y*28+x)
      xm1_ref: (BB*392, 128)     x-pooled conv1, rows (b, y*14+i)
      p2_ref : (BB*256+40, 128)  zero-padded pool1, rows (b, yp*16+xp), 16x16 / image
      c2_ref : (BB*256, 128)     conv2 "wide" out, rows (b, y*16+x)
      xm2_ref: (BB*128, 128)     x-pooled conv2, rows (b, y*8+i)
      p3_ref : (BB*144+40, 128)  zero-padded pool2, rows (b, yp*16+xp), 9x16 / image
      c3_ref : (BB*144, 128)     conv3 "wide" out, rows (b, y*16+x)
      o_ref  : (BB*56, 128)      compacted conv3, rows (b, y*8+x); x==7 unused by FC
    """
    f32 = jnp.float32

    # Padded buffers must be zero at padding positions.  Re-zero every step so the
    # kernel is correct regardless of which core / order the "parallel" grid runs in.
    p2_ref[...] = jnp.zeros_like(p2_ref)
    p3_ref[...] = jnp.zeros_like(p3_ref)

    # ---- conv1 (3x3, pad 1) + bias + ReLU: one MXU matmul over all BB images -------
    a1 = jnp.dot(x1_ref[...], w1_ref[...], preferred_element_type=f32)
    c1_ref[...] = jnp.maximum(a1 + b1_ref[...], 0.0)

    # ---- maxpool1 (2x2, stride 2): x-direction via two whole-buffer stride-2 loads,
    #      then one row-pair max per pooled row written into p2's interior ------------
    n1 = BB * 392
    xm1_ref[...] = jnp.maximum(c1_ref[pl.ds(0, n1, 2), :], c1_ref[pl.ds(1, n1, 2), :])
    for b in range(BB):
        xb, pb = b * 392, b * 256
        for j in range(14):
            r0 = xm1_ref[pl.ds(xb + 28 * j, 14), :]       # y = 2j
            r1 = xm1_ref[pl.ds(xb + 28 * j + 14, 14), :]  # y = 2j + 1
            p2_ref[pl.ds(pb + (j + 1) * 16 + 1, 14), :] = jnp.maximum(r0, r1)

    # ---- conv2: 9 lane-dense K=128 tap matmuls on contiguous slices of p2 -----------
    M2 = BB * 256
    acc = jnp.dot(p2_ref[pl.ds(0, M2), :], w2_ref[0], preferred_element_type=f32)
    for t in range(1, 9):
        off = (t // 3) * 16 + (t % 3)
        acc = acc + jnp.dot(p2_ref[pl.ds(off, M2), :], w2_ref[t],
                            preferred_element_type=f32)
    c2_ref[...] = jnp.maximum(acc + b2_ref[...], 0.0)

    # ---- maxpool2 --------------------------------------------------------------------
    n2 = BB * 128
    xm2_ref[...] = jnp.maximum(c2_ref[pl.ds(0, n2, 2), :], c2_ref[pl.ds(1, n2, 2), :])
    for b in range(BB):
        xb, pb = b * 128, b * 144
        for j in range(7):
            m = jnp.maximum(xm2_ref[pl.ds(xb + 16 * j, 8), :],
                            xm2_ref[pl.ds(xb + 16 * j + 8, 8), :])
            p3_ref[pl.ds(pb + (j + 1) * 16 + 1, 7), :] = m[0:7, :]

    # ---- conv3: 9 tap matmuls on p3 + bias + ReLU -------------------------------------
    M3 = BB * 144
    acc = jnp.dot(p3_ref[pl.ds(0, M3), :], w3_ref[0], preferred_element_type=f32)
    for t in range(1, 9):
        off = (t // 3) * 16 + (t % 3)
        acc = acc + jnp.dot(p3_ref[pl.ds(off, M3), :], w3_ref[t],
                            preferred_element_type=f32)
    c3_ref[...] = jnp.maximum(acc + b3_ref[...], 0.0)

    # ---- compact the valid 7x7 window into the lane-dense output (8-row aligned copies)
    for b in range(BB):
        cb, ob = b * 144, b * 56
        for y in range(7):
            o_ref[pl.ds(ob + y * 8, 8), :] = c3_ref[pl.ds(cb + y * 16, 8), :]


def _matmul_bias_kernel(x_ref, w_ref, b_ref, o_ref):
    """o = x @ w + b  (x:(bm,K), w:(K,128), b:(1,128), all f32)."""
    o_ref[...] = (jnp.dot(x_ref[...], w_ref[...], preferred_element_type=jnp.float32)
                  + b_ref[...]).astype(o_ref.dtype)


# ---------------------------------------------------------------------------
# pallas_call wrappers
# ---------------------------------------------------------------------------
def _fused_conv_stack(x1, w1, b1, w2, b2, w3, b3, *, BB, n_blocks):
    K1 = x1.shape[-1]
    kernel = functools.partial(_cnn_fused_kernel, BB=BB)
    return pl.pallas_call(
        kernel,
        out_shape=jax.ShapeDtypeStruct((n_blocks * BB * 56, LANES), jnp.float32),
        grid=(n_blocks,),
        in_specs=[
            pl.BlockSpec((BB * 784, K1), lambda i: (i, 0)),
            pl.BlockSpec((K1, LANES), lambda i: (0, 0)),
            pl.BlockSpec((1, LANES), lambda i: (0, 0)),
            pl.BlockSpec((9, LANES, LANES), lambda i: (0, 0, 0)),
            pl.BlockSpec((1, LANES), lambda i: (0, 0)),
            pl.BlockSpec((9, LANES, LANES), lambda i: (0, 0, 0)),
            pl.BlockSpec((1, LANES), lambda i: (0, 0)),
        ],
        out_specs=pl.BlockSpec((BB * 56, LANES), lambda i: (i, 0)),
        scratch_shapes=[
            pltpu.VMEM((BB * 784, LANES), jnp.float32),        # c1
            pltpu.VMEM((BB * 392, LANES), jnp.float32),        # xm1
            pltpu.VMEM((BB * 256 + 40, LANES), jnp.float32),   # p2 (16x16 pad + slack)
            pltpu.VMEM((BB * 256, LANES), jnp.float32),        # c2
            pltpu.VMEM((BB * 128, LANES), jnp.float32),        # xm2
            pltpu.VMEM((BB * 144 + 40, LANES), jnp.float32),   # p3 (9x16 pad + slack)
            pltpu.VMEM((BB * 144, LANES), jnp.float32),        # c3
        ],
        compiler_params=pltpu.CompilerParams(
            dimension_semantics=("parallel",),
            vmem_limit_bytes=32 * 1024 * 1024),
    )(x1, w1, b1, w2, b2, w3, b3)


def _linear_padded(x, w, b):
    """x: (Bp, K) f32, w: (K, 128) f32, b: (1, 128) f32 -> (Bp, 128) f32."""
    Bp, K = x.shape
    bm = Bp
    if Bp > 256:
        for cand in (256, 128, 64, 32, 16, 8):
            if Bp % cand == 0:
                bm = cand
                break
    return pl.pallas_call(
        _matmul_bias_kernel,
        out_shape=jax.ShapeDtypeStruct((Bp, LANES), jnp.float32),
        grid=(Bp // bm,),
        in_specs=[
            pl.BlockSpec((bm, K), lambda i: (i, 0)),
            pl.BlockSpec((K, LANES), lambda i: (0, 0)),
            pl.BlockSpec((1, LANES), lambda i: (0, 0)),
        ],
        out_specs=pl.BlockSpec((bm, LANES), lambda i: (i, 0)),
        compiler_params=pltpu.CompilerParams(
            dimension_semantics=("parallel",),
            vmem_limit_bytes=32 * 1024 * 1024),
    )(x, w, b)


# ---------------------------------------------------------------------------
# Parameter packing (done ONCE, outside the forward pass)
# ---------------------------------------------------------------------------
def prepare_params(params):
    w1, b1 = params["w1"], params["b1"]        # (3,3,Cin,8), (8,)
    w2, b2 = params["w2"], params["b2"]        # (3,3,8,16), (16,)
    w3, b3 = params["w3"], params["b3"]        # (3,3,16,8), (8,)
    wfc, bfc = params["wfc"], params["bfc"]    # (392, NC) rows in torch (c,y,x) order
    cin, nc = w1.shape[2], wfc.shape[1]
    f32 = jnp.float32

    def pad_lanes(v):
        return jnp.pad(v.astype(f32), (0, LANES - v.shape[0])).reshape(1, LANES)

    w1p = jnp.pad(w1.astype(f32).reshape(9 * cin, 8), ((0, 0), (0, LANES - 8)))
    w2p = jnp.zeros((9, LANES, LANES), f32).at[:, :8, :16].set(
        w2.astype(f32).reshape(9, 8, 16))
    w3p = jnp.zeros((9, LANES, LANES), f32).at[:, :16, :8].set(
        w3.astype(f32).reshape(9, 16, 8))

    # fc weight: rows re-ordered from torch-flatten (c,y,x) to the kernel's compacted
    # layout (y, x<8, c<128); padded / unused positions stay zero.
    wt = jnp.transpose(wfc.astype(f32).reshape(8, 7, 7, nc), (1, 2, 0, 3))  # (y,x,c,n)
    wt = jnp.pad(wt, ((0, 0), (0, 1), (0, LANES - 8), (0, LANES - nc)))
    wfcp = wt.reshape(7 * 8 * LANES, LANES)

    return {"w1": w1p, "b1": pad_lanes(b1),
            "w2": w2p, "b2": pad_lanes(b2),
            "w3": w3p, "b3": pad_lanes(b3),
            "wfc": wfcp, "bfc": pad_lanes(bfc)}


# ---------------------------------------------------------------------------
# Forward pass (mirrors the PyTorch module)
# ---------------------------------------------------------------------------
def cnn_forward(x_nchw, prepared, *, num_classes=10):
    B, Cin, H, W = x_nchw.shape
    assert (H, W) == (28, 28), "fc layer (8*7*7) implies 28x28 spatial input"

    BB = max(1, min(8, -(-B // 2)))        # >=2 grid steps whenever B >= 2, BB <= 8
    n_blocks = -(-B // BB)
    B_pad = n_blocks * BB

    # The only per-forward XLA prep: layer-1 im2col (turns the Cin=1 layout into a
    # lane-friendly (784, 9*Cin) matrix).  Everything else stays inside the kernel.
    x = jnp.transpose(x_nchw, (0, 2, 3, 1)).astype(jnp.float32)           # NHWC
    if B_pad != B:
        x = jnp.pad(x, ((0, B_pad - B), (0, 0), (0, 0), (0, 0)))
    xp = jnp.pad(x, ((0, 0), (1, 1), (1, 1), (0, 0)))
    taps = [xp[:, ky:ky + 28, kx:kx + 28, :] for ky in range(3) for kx in range(3)]
    x1 = jnp.concatenate(taps, axis=-1).reshape(B_pad * 784, 9 * Cin)

    h = _fused_conv_stack(x1, prepared["w1"], prepared["b1"],
                          prepared["w2"], prepared["b2"],
                          prepared["w3"], prepared["b3"],
                          BB=BB, n_blocks=n_blocks)                       # (B_pad*56, 128)

    hf = h.reshape(B_pad, 56 * LANES)                                     # free reshape
    logits = _linear_padded(hf, prepared["wfc"], prepared["bfc"])         # (B_pad, 128)
    return logits[:B, :num_classes]


# ---------------------------------------------------------------------------
# Init + pure-JAX reference (for a tolerance check)
# ---------------------------------------------------------------------------
def init_params(key, in_channels=1, num_classes=10):
    ks = jax.random.split(key, 8)

    def u(k, shape, fan_in):
        bound = 1.0 / jnp.sqrt(fan_in)
        return jax.random.uniform(k, shape, jnp.float32, -bound, bound)

    return {
        "w1": u(ks[0], (3, 3, in_channels, 8), 3 * 3 * in_channels),
        "b1": u(ks[1], (8,), 3 * 3 * in_channels),
        "w2": u(ks[2], (3, 3, 8, 16), 3 * 3 * 8),
        "b2": u(ks[3], (16,), 3 * 3 * 8),
        "w3": u(ks[4], (3, 3, 16, 8), 3 * 3 * 16),
        "b3": u(ks[5], (8,), 3 * 3 * 16),
        "wfc": u(ks[6], (8 * 7 * 7, num_classes), 8 * 7 * 7),
        "bfc": u(ks[7], (num_classes,), 8 * 7 * 7),
    }


def cnn_reference(x_nchw, params):
    hp = lax.Precision.HIGHEST

    def conv(h, w, b):
        out = lax.conv_general_dilated(
            h, w, window_strides=(1, 1), padding=((1, 1), (1, 1)),
            dimension_numbers=("NCHW", "HWIO", "NCHW"), precision=hp)
        return jax.nn.relu(out + b[None, :, None, None])

    def pool(h):
        return lax.reduce_window(h, -jnp.inf, lax.max,
                                 (1, 1, 2, 2), (1, 1, 2, 2), "VALID")

    h = pool(conv(x_nchw.astype(jnp.float32), params["w1"], params["b1"]))
    h = pool(conv(h, params["w2"], params["b2"]))
    h = conv(h, params["w3"], params["b3"])
    hf = h.reshape(h.shape[0], -1)                     # torch flatten order (c, y, x)
    return jnp.dot(hf, params["wfc"], precision=hp) + params["bfc"]


if __name__ == "__main__":
    key = jax.random.PRNGKey(0)
    pkey, xkey = jax.random.split(key)
    params = init_params(pkey)
    prepared = prepare_params(params)

    # fc layer (8*7*7) implies 28x28 spatial input; batch=2, in_channels=1.
    x = jax.random.normal(xkey, (2, 1, 28, 28), dtype=jnp.float32)

    out = jax.block_until_ready(jax.jit(cnn_forward)(x, prepared))
    assert out.shape == (2, 10), out.shape

    ref = cnn_reference(x, params)
    err = float(jnp.max(jnp.abs(out - ref)))
    assert err < 5e-2, f"max abs error vs reference: {err}"

    print("KERNEL_OK")
</pallas_src>

<mosaic_0001>
module attributes {stable_mosaic.version = 11 : i64} {
  func.func @_cnn_fused_kernel(%arg0: i32, %arg1: memref<784x9xf32, #tpu.memory_space<vmem>>, %arg2: memref<9x128xf32, #tpu.memory_space<vmem>>, %arg3: memref<1x128xf32, #tpu.memory_space<vmem>>, %arg4: memref<9x128x128xf32, #tpu.memory_space<vmem>>, %arg5: memref<1x128xf32, #tpu.memory_space<vmem>>, %arg6: memref<9x128x128xf32, #tpu.memory_space<vmem>>, %arg7: memref<1x128xf32, #tpu.memory_space<vmem>>, %arg8: memref<56x128xf32, #tpu.memory_space<vmem>>, %arg9: memref<784x128xf32, #tpu.memory_space<vmem>>, %arg10: memref<392x128xf32, #tpu.memory_space<vmem>>, %arg11: memref<296x128xf32, #tpu.memory_space<vmem>>, %arg12: memref<256x128xf32, #tpu.memory_space<vmem>>, %arg13: memref<128x128xf32, #tpu.memory_space<vmem>>, %arg14: memref<184x128xf32, #tpu.memory_space<vmem>>, %arg15: memref<144x128xf32, #tpu.memory_space<vmem>>) attributes {dimension_semantics = [#tpu.dimension_semantics<parallel>], iteration_bounds = array<i64: 2>, scalar_prefetch = 0 : i64, scratch_operands = 7 : i64, tpu.core_type = #tpu.core_type<tc>, window_params = [{transform_indices = @transform_0, window_bounds = array<i64: 784, 9>}, {pipeline_mode = #tpu.pipeline_mode<synchronous>, transform_indices = @transform_1, window_bounds = array<i64: 9, 128>}, {pipeline_mode = #tpu.pipeline_mode<synchronous>, transform_indices = @transform_2, window_bounds = array<i64: 1, 128>}, {pipeline_mode = #tpu.pipeline_mode<synchronous>, transform_indices = @transform_3, window_bounds = array<i64: 9, 128, 128>}, {pipeline_mode = #tpu.pipeline_mode<synchronous>, transform_indices = @transform_4, window_bounds = array<i64: 1, 128>}, {pipeline_mode = #tpu.pipeline_mode<synchronous>, transform_indices = @transform_5, window_bounds = array<i64: 9, 128, 128>}, {pipeline_mode = #tpu.pipeline_mode<synchronous>, transform_indices = @transform_6, window_bounds = array<i64: 1, 128>}, {transform_indices = @transform_7, window_bounds = array<i64: 56, 128>}]} {
    %cst = arith.constant 0.000000e+00 : f32
    %0 = vector.broadcast %cst : f32 to vector<296x128xf32>
    %c0 = arith.constant 0 : index
    %c0_0 = arith.constant 0 : index
    %1 = vector.load %arg11[%c0, %c0_0] : memref<296x128xf32, #tpu.memory_space<vmem>>, vector<296x128xf32>
    tpu.vector_store %arg11[%c0, %c0_0], %0 {strides = array<i32>} : memref<296x128xf32, #tpu.memory_space<vmem>>, vector<296x128xf32>,
    %cst_1 = arith.constant 0.000000e+00 : f32
    %2 = vector.broadcast %cst_1 : f32 to vector<184x128xf32>
    %c0_2 = arith.constant 0 : index
    %c0_3 = arith.constant 0 : index
    %3 = vector.load %arg14[%c0_2, %c0_3] : memref<184x128xf32, #tpu.memory_space<vmem>>, vector<184x128xf32>
    tpu.vector_store %arg14[%c0_2, %c0_3], %2 {strides = array<i32>} : memref<184x128xf32, #tpu.memory_space<vmem>>, vector<184x128xf32>,
    %c0_4 = arith.constant 0 : index
    %c0_5 = arith.constant 0 : index
    %4 = vector.load %arg1[%c0_4, %c0_5] : memref<784x9xf32, #tpu.memory_space<vmem>>, vector<784x9xf32>
    %c0_6 = arith.constant 0 : index
    %c0_7 = arith.constant 0 : index
    %5 = vector.load %arg2[%c0_6, %c0_7] : memref<9x128xf32, #tpu.memory_space<vmem>>, vector<9x128xf32>
    %cst_8 = arith.constant dense<0.000000e+00> : vector<784x128xf32>
    %6 = tpu.matmul %4, %5, %cst_8 {dimension_numbers = #tpu.dot_dimension_numbers<[1], [0], [0], [1], [0, 0, 1, 1], [], []>} : vector<784x9xf32>, vector<9x128xf32>, vector<784x128xf32> -> vector<784x128xf32>
    %c0_9 = arith.constant 0 : index
    %c0_10 = arith.constant 0 : index
    %7 = vector.load %arg3[%c0_9, %c0_10] : memref<1x128xf32, #tpu.memory_space<vmem>>, vector<1x128xf32>
    %8 = vector.broadcast %7 : vector<1x128xf32> to vector<784x128xf32>
    %9 = arith.addf %6, %8 : vector<784x128xf32>
    %cst_11 = arith.constant 0.000000e+00 : f32
    %10 = vector.broadcast %cst_11 : f32 to vector<784x128xf32>
    %11 = arith.maximumf %9, %10 : vector<784x128xf32>
    %c0_12 = arith.constant 0 : index
    %c0_13 = arith.constant 0 : index
    %12 = vector.load %arg9[%c0_12, %c0_13] : memref<784x128xf32, #tpu.memory_space<vmem>>, vector<784x128xf32>
    tpu.vector_store %arg9[%c0_12, %c0_13], %11 {strides = array<i32>} : memref<784x128xf32, #tpu.memory_space<vmem>>, vector<784x128xf32>,
    %c0_14 = arith.constant 0 : index
    %c0_15 = arith.constant 0 : index
    %13 = tpu.strided_load %arg9[%c0_14, %c0_15] {strides = array<i32: 2, 1>} : memref<784x128xf32, #tpu.memory_space<vmem>>, vector<392x128xf32>
    %c1 = arith.constant 1 : index
    %c0_16 = arith.constant 0 : index
    %14 = tpu.strided_load %arg9[%c1, %c0_16] {strides = array<i32: 2, 1>} : memref<784x128xf32, #tpu.memory_space<vmem>>, vector<392x128xf32>
    %15 = arith.maximumf %13, %14 : vector<392x128xf32>
    %c0_17 = arith.constant 0 : index
    %c0_18 = arith.constant 0 : index
    %16 = vector.load %arg10[%c0_17, %c0_18] : memref<392x128xf32, #tpu.memory_space<vmem>>, vector<392x128xf32>
    tpu.vector_store %arg10[%c0_17, %c0_18], %15 {strides = array<i32>} : memref<392x128xf32, #tpu.memory_space<vmem>>, vector<392x128xf32>,
    %c0_19 = arith.constant 0 : index
    %c0_20 = arith.constant 0 : index
    %17 = vector.load %arg10[%c0_19, %c0_20] : memref<392x128xf32, #tpu.memory_space<vmem>>, vector<14x128xf32>
    %c14 = arith.constant 14 : index
    %c0_21 = arith.constant 0 : index
    %18 = vector.load %arg10[%c14, %c0_21] : memref<392x128xf32, #tpu.memory_space<vmem>>, vector<14x128xf32>
    %19 = arith.maximumf %17, %18 : vector<14x128xf32>
    %c17 = arith.constant 17 : index
    %c0_22 = arith.constant 0 : index
    %20 = vector.load %arg11[%c17, %c0_22] : memref<296x128xf32, #tpu.memory_space<vmem>>, vector<14x128xf32>
    tpu.vector_store %arg11[%c17, %c0_22], %19 {strides = array<i32>} : memref<296x128xf32, #tpu.memory_space<vmem>>, vector<14x128xf32>,
    %c28 = arith.constant 28 : index
    %c0_23 = arith.constant 0 : index
    %21 = vector.load %arg10[%c28, %c0_23] : memref<392x128xf32, #tpu.memory_space<vmem>>, vector<14x128xf32>
    %c42 = arith.constant 42 : index
    %c0_24 = arith.constant 0 : index
    %22 = vector.load %arg10[%c42, %c0_24] : memref<392x128xf32, #tpu.memory_space<vmem>>, vector<14x128xf32>
    %23 = arith.maximumf %21, %22 : vector<14x128xf32>
    %c33 = arith.constant 33 : index
    %c0_25 = arith.constant 0 : index
    %24 = vector.load %arg11[%c33, %c0_25] : memref<296x128xf32, #tpu.memory_space<vmem>>, vector<14x128xf32>
    tpu.vector_store %arg11[%c33, %c0_25], %23 {strides = array<i32>} : memref<296x128xf32, #tpu.memory_space<vmem>>, vector<14x128xf32>,
    %c56 = arith.constant 56 : index
    %c0_26 = arith.constant 0 : index
    %25 = vector.load %arg10[%c56, %c0_26] : memref<392x128xf32, #tpu.memory_space<vmem>>, vector<14x128xf32>
    %c70 = arith.constant 70 : index
    %c0_27 = arith.constant 0 : index
    %26 = vector.load %arg10[%c70, %c0_27] : memref<392x128xf32, #tpu.memory_space<vmem>>, vector<14x128xf32>
    %27 = arith.maximumf %25, %26 : vector<14x128xf32>
    %c49 = arith.constant 49 : index
    %c0_28 = arith.constant 0 : index
    %28 = vector.load %arg11[%c49, %c0_28] : memref<296x128xf32, #tpu.memory_space<vmem>>, vector<14x128xf32>
    tpu.vector_store %arg11[%c49, %c0_28], %27 {strides = array<i32>} : memref<296x128xf32, #tpu.memory_space<vmem>>, vector<14x128xf32>,
    %c84 = arith.constant 84 : index
    %c0_29 = arith.constant 0 : index
    %29 = vector.load %arg10[%c84, %c0_29] : memref<392x128xf32, #tpu.memory_space<vmem>>, vector<14x128xf32>
    %c98 = arith.constant 98 : index
    %c0_30 = arith.constant 0 : index
    %30 = vector.load %arg10[%c98, %c0_30] : memref<392x128xf32, #tpu.memory_space<vmem>>, vector<14x128xf32>
    %31 = arith.maximumf %29, %30 : vector<14x128xf32>
    %c65 = arith.constant 65 : index
    %c0_31 = arith.constant 0 : index
    %32 = vector.load %arg11[%c65, %c0_31] : memref<296x128xf32, #tpu.memory_space<vmem>>, vector<14x128xf32>
    tpu.vector_store %arg11[%c65, %c0_31], %31 {strides = array<i32>} : memref<296x128xf32, #tpu.memory_space<vmem>>, vector<14x128xf32>,
    %c112 = arith.constant 112 : index
    %c0_32 = arith.constant 0 : index
    %33 = vector.load %arg10[%c112, %c0_32] : memref<392x128xf32, #tpu.memory_space<vmem>>, vector<14x128xf32>
    %c126 = arith.constant 126 : index
    %c0_33 = arith.constant 0 : index
    %34 = vector.load %arg10[%c126, %c0_33] : memref<392x128xf32, #tpu.memory_space<vmem>>, vector<14x128xf32>
    %35 = arith.maximumf %33, %34 : vector<14x128xf32>
    %c81 = arith.constant 81 : index
    %c0_34 = arith.constant 0 : index
    %36 = vector.load %arg11[%c81, %c0_34] : memref<296x128xf32, #tpu.memory_space<vmem>>, vector<14x128xf32>
    tpu.vector_store %arg11[%c81, %c0_34], %35 {strides = array<i32>} : memref<296x128xf32, #tpu.memory_space<vmem>>, vector<14x128xf32>,
    %c140 = arith.constant 140 : index
    %c0_35 = arith.constant 0 : index
    %37 = vector.load %arg10[%c140, %c0_35] : memref<392x128xf32, #tpu.memory_space<vmem>>, vector<14x128xf32>
    %c154 = arith.constant 154 : index
    %c0_36 = arith.constant 0 : index
    %38 = vector.load %arg10[%c154, %c0_36] : memref<392x128xf32, #tpu.memory_space<vmem>>, vector<14x128xf32>
    %39 = arith.maximumf %37, %38 : vector<14x128xf32>
    %c97 = arith.constant 97 : index
    %c0_37 = arith.constant 0 : index
    %40 = vector.load %arg11[%c97, %c0_37] : memref<296x128xf32, #tpu.memory_space<vmem>>, vector<14x128xf32>
    tpu.vector_store %arg11[%c97, %c0_37], %39 {strides = array<i32>} : memref<296x128xf32, #tpu.memory_space<vmem>>, vector<14x128xf32>,
    %c168 = arith.constant 168 : index
    %c0_38 = arith.constant 0 : index
    %41 = vector.load %arg10[%c168, %c0_38] : memref<392x128xf32, #tpu.memory_space<vmem>>, vector<14x128xf32>
    %c182 = arith.constant 182 : index
    %c0_39 = arith.constant 0 : index
    %42 = vector.load %arg10[%c182, %c0_39] : memref<392x128xf32, #tpu.memory_space<vmem>>, vector<14x128xf32>
    %43 = arith.maximumf %41, %42 : vector<14x128xf32>
    %c113 = arith.constant 113 : index
    %c0_40 = arith.constant 0 : index
    %44 = vector.load %arg11[%c113, %c0_40] : memref<296x128xf32, #tpu.memory_space<vmem>>, vector<14x128xf32>
    tpu.vector_store %arg11[%c113, %c0_40], %43 {strides = array<i32>} : memref<296x128xf32, #tpu.memory_space<vmem>>, vector<14x128xf32>,
    %c196 = arith.constant 196 : index
    %c0_41 = arith.constant 0 : index
    %45 = vector.load %arg10[%c196, %c0_41] : memref<392x128xf32, #tpu.memory_space<vmem>>, vector<14x128xf32>
    %c210 = arith.constant 210 : index
    %c0_42 = arith.constant 0 : index
    %46 = vector.load %arg10[%c210, %c0_42] : memref<392x128xf32, #tpu.memory_space<vmem>>, vector<14x128xf32>
    %47 = arith.maximumf %45, %46 : vector<14x128xf32>
    %c129 = arith.constant 129 : index
    %c0_43 = arith.constant 0 : index
    %48 = vector.load %arg11[%c129, %c0_43] : memref<296x128xf32, #tpu.memory_space<vmem>>, vector<14x128xf32>
    tpu.vector_store %arg11[%c129, %c0_43], %47 {strides = array<i32>} : memref<296x128xf32, #tpu.memory_space<vmem>>, vector<14x128xf32>,
    %c224 = arith.constant 224 : index
    %c0_44 = arith.constant 0 : index
    %49 = vector.load %arg10[%c224, %c0_44] : memref<392x128xf32, #tpu.memory_space<vmem>>, vector<14x128xf32>
    %c238 = arith.constant 238 : index
    %c0_45 = arith.constant 0 : index
    %50 = vector.load %arg10[%c238, %c0_45] : memref<392x128xf32, #tpu.memory_space<vmem>>, vector<14x128xf32>
    %51 = arith.maximumf %49, %50 : vector<14x128xf32>
    %c145 = arith.constant 145 : index
    %c0_46 = arith.constant 0 : index
    %52 = vector.load %arg11[%c145, %c0_46] : memref<296x128xf32, #tpu.memory_space<vmem>>, vector<14x128xf32>
    tpu.vector_store %arg11[%c145, %c0_46], %51 {strides = array<i32>} : memref<296x128xf32, #tpu.memory_space<vmem>>, vector<14x128xf32>,
    %c252 = arith.constant 252 : index
    %c0_47 = arith.constant 0 : index
    %53 = vector.load %arg10[%c252, %c0_47] : memref<392x128xf32, #tpu.memory_space<vmem>>, vector<14x128xf32>
    %c266 = arith.constant 266 : index
    %c0_48 = arith.constant 0 : index
    %54 = vector.load %arg10[%c266, %c0_48] : memref<392x128xf32, #tpu.memory_space<vmem>>, vector<14x128xf32>
    %55 = arith.maximumf %53, %54 : vector<14x128xf32>
    %c161 = arith.constant 161 : index
    %c0_49 = arith.constant 0 : index
    %56 = vector.load %arg11[%c161, %c0_49] : memref<296x128xf32, #tpu.memory_space<vmem>>, vector<14x128xf32>
    tpu.vector_store %arg11[%c161, %c0_49], %55 {strides = array<i32>} : memref<296x128xf32, #tpu.memory_space<vmem>>, vector<14x128xf32>,
    %c280 = arith.constant 280 : index
    %c0_50 = arith.constant 0 : index
    %57 = vector.load %arg10[%c280, %c0_50] : memref<392x128xf32, #tpu.memory_space<vmem>>, vector<14x128xf32>
    %c294 = arith.constant 294 : index
    %c0_51 = arith.constant 0 : index
    %58 = vector.load %arg10[%c294, %c0_51] : memref<392x128xf32, #tpu.memory_space<vmem>>, vector<14x128xf32>
    %59 = arith.maximumf %57, %58 : vector<14x128xf32>
    %c177 = arith.constant 177 : index
    %c0_52 = arith.constant 0 : index
    %60 = vector.load %arg11[%c177, %c0_52] : memref<296x128xf32, #tpu.memory_space<vmem>>, vector<14x128xf32>
    tpu.vector_store %arg11[%c177, %c0_52], %59 {strides = array<i32>} : memref<296x128xf32, #tpu.memory_space<vmem>>, vector<14x128xf32>,
    %c308 = arith.constant 308 : index
    %c0_53 = arith.constant 0 : index
    %61 = vector.load %arg10[%c308, %c0_53] : memref<392x128xf32, #tpu.memory_space<vmem>>, vector<14x128xf32>
    %c322 = arith.constant 322 : index
    %c0_54 = arith.constant 0 : index
    %62 = vector.load %arg10[%c322, %c0_54] : memref<392x128xf32, #tpu.memory_space<vmem>>, vector<14x128xf32>
    %63 = arith.maximumf %61, %62 : vector<14x128xf32>
    %c193 = arith.constant 193 : index
    %c0_55 = arith.constant 0 : index
    %64 = vector.load %arg11[%c193, %c0_55] : memref<296x128xf32, #tpu.memory_space<vmem>>, vector<14x128xf32>
    tpu.vector_store %arg11[%c193, %c0_55], %63 {strides = array<i32>} : memref<296x128xf32, #tpu.memory_space<vmem>>, vector<14x128xf32>,
    %c336 = arith.constant 336 : index
    %c0_56 = arith.constant 0 : index
    %65 = vector.load %arg10[%c336, %c0_56] : memref<392x128xf32, #tpu.memory_space<vmem>>, vector<14x128xf32>
    %c350 = arith.constant 350 : index
    %c0_57 = arith.constant 0 : index
    %66 = vector.load %arg10[%c350, %c0_57] : memref<392x128xf32, #tpu.memory_space<vmem>>, vector<14x128xf32>
    %67 = arith.maximumf %65, %66 : vector<14x128xf32>
    %c209 = arith.constant 209 : index
    %c0_58 = arith.constant 0 : index
    %68 = vector.load %arg11[%c209, %c0_58] : memref<296x128xf32, #tpu.memory_space<vmem>>, vector<14x128xf32>
    tpu.vector_store %arg11[%c209, %c0_58], %67 {strides = array<i32>} : memref<296x128xf32, #tpu.memory_space<vmem>>, vector<14x128xf32>,
    %c364 = arith.constant 364 : index
    %c0_59 = arith.constant 0 : index
    %69 = vector.load %arg10[%c364, %c0_59] : memref<392x128xf32, #tpu.memory_space<vmem>>, vector<14x128xf32>
    %c378 = arith.constant 378 : index
    %c0_60 = arith.constant 0 : index
    %70 = vector.load %arg10[%c378, %c0_60] : memref<392x128xf32, #tpu.memory_space<vmem>>, vector<14x128xf32>
    %71 = arith.maximumf %69, %70 : vector<14x128xf32>
    %c225 = arith.constant 225 : index
    %c0_61 = arith.constant 0 : index
    %72 = vector.load %arg11[%c225, %c0_61] : memref<296x128xf32, #tpu.memory_space<vmem>>, vector<14x128xf32>
    tpu.vector_store %arg11[%c225, %c0_61], %71 {strides = array<i32>} : memref<296x128xf32, #tpu.memory_space<vmem>>, vector<14x128xf32>,
    %c0_62 = arith.constant 0 : index
    %c0_63 = arith.constant 0 : index
    %73 = vector.load %arg11[%c0_62, %c0_63] : memref<296x128xf32, #tpu.memory_space<vmem>>, vector<256x128xf32>
    %c0_64 = arith.constant 0 : index
    %c0_65 = arith.constant 0 : index
    %c0_66 = arith.constant 0 : index
    %74 = vector.load %arg4[%c0_64, %c0_65, %c0_66] : memref<9x128x128xf32, #tpu.memory_space<vmem>>, vector<1x128x128xf32>
    %75 = vector.shape_cast %74 : vector<1x128x128xf32> to vector<128x128xf32>
    %cst_67 = arith.constant dense<0.000000e+00> : vector<256x128xf32>
    %76 = tpu.matmul %73, %75, %cst_67 {dimension_numbers = #tpu.dot_dimension_numbers<[1], [0], [0], [1], [0, 0, 1, 1], [], []>} : vector<256x128xf32>, vector<128x128xf32>, vector<256x128xf32> -> vector<256x128xf32>
    %c1_68 = arith.constant 1 : index
    %c0_69 = arith.constant 0 : index
    %77 = vector.load %arg11[%c1_68, %c0_69] : memref<296x128xf32, #tpu.memory_space<vmem>>, vector<256x128xf32>
    %c1_70 = arith.constant 1 : index
    %c0_71 = arith.constant 0 : index
    %c0_72 = arith.constant 0 : index
    %78 = vector.load %arg4[%c1_70, %c0_71, %c0_72] : memref<9x128x128xf32, #tpu.memory_space<vmem>>, vector<1x128x128xf32>
    %79 = vector.shape_cast %78 : vector<1x128x128xf32> to vector<128x128xf32>
    %cst_73 = arith.constant dense<0.000000e+00> : vector<256x128xf32>
    %80 = tpu.matmul %77, %79, %cst_73 {dimension_numbers = #tpu.dot_dimension_numbers<[1], [0], [0], [1], [0, 0, 1, 1], [], []>} : vector<256x128xf32>, vector<128x128xf32>, vector<256x128xf32> -> vector<256x128xf32>
    %81 = arith.addf %76, %80 : vector<256x128xf32>
    %c2 = arith.constant 2 : index
    %c0_74 = arith.constant 0 : index
    %82 = vector.load %arg11[%c2, %c0_74] : memref<296x128xf32, #tpu.memory_space<vmem>>, vector<256x128xf32>
    %c2_75 = arith.constant 2 : index
    %c0_76 = arith.constant 0 : index
    %c0_77 = arith.constant 0 : index
    %83 = vector.load %arg4[%c2_75, %c0_76, %c0_77] : memref<9x128x128xf32, #tpu.memory_space<vmem>>, vector<1x128x128xf32>
    %84 = vector.shape_cast %83 : vector<1x128x128xf32> to vector<128x128xf32>
    %cst_78 = arith.constant dense<0.000000e+00> : vector<256x128xf32>
    %85 = tpu.matmul %82, %84, %cst_78 {dimension_numbers = #tpu.dot_dimension_numbers<[1], [0], [0], [1], [0, 0, 1, 1], [], []>} : vector<256x128xf32>, vector<128x128xf32>, vector<256x128xf32> -> vector<256x128xf32>
    %86 = arith.addf %81, %85 : vector<256x128xf32>
    %c16 = arith.constant 16 : index
    %c0_79 = arith.constant 0 : index
    %87 = vector.load %arg11[%c16, %c0_79] : memref<296x128xf32, #tpu.memory_space<vmem>>, vector<256x128xf32>
    %c3 = arith.constant 3 : index
    %c0_80 = arith.constant 0 : index
    %c0_81 = arith.constant 0 : index
    %88 = vector.load %arg4[%c3, %c0_80, %c0_81] : memref<9x128x128xf32, #tpu.memory_space<vmem>>, vector<1x128x128xf32>
    %89 = vector.shape_cast %88 : vector<1x128x128xf32> to vector<128x128xf32>
    %cst_82 = arith.constant dense<0.000000e+00> : vector<256x128xf32>
    %90 = tpu.matmul %87, %89, %cst_82 {dimension_numbers = #tpu.dot_dimension_numbers<[1], [0], [0], [1], [0, 0, 1, 1], [], []>} : vector<256x128xf32>, vector<128x128xf32>, vector<256x128xf32> -> vector<256x128xf32>
    %91 = arith.addf %86, %90 : vector<256x128xf32>
    %c17_83 = arith.constant 17 : index
    %c0_84 = arith.constant 0 : index
    %92 = vector.load %arg11[%c17_83, %c0_84] : memref<296x128xf32, #tpu.memory_space<vmem>>, vector<256x128xf32>
    %c4 = arith.constant 4 : index
    %c0_85 = arith.constant 0 : index
    %c0_86 = arith.constant 0 : index
    %93 = vector.load %arg4[%c4, %c0_85, %c0_86] : memref<9x128x128xf32, #tpu.memory_space<vmem>>, vector<1x128x128xf32>
    %94 = vector.shape_cast %93 : vector<1x128x128xf32> to vector<128x128xf32>
    %cst_87 = arith.constant dense<0.000000e+00> : vector<256x128xf32>
    %95 = tpu.matmul %92, %94, %cst_87 {dimension_numbers = #tpu.dot_dimension_numbers<[1], [0], [0], [1], [0, 0, 1, 1], [], []>} : vector<256x128xf32>, vector<128x128xf32>, vector<256x128xf32> -> vector<256x128xf32>
    %96 = arith.addf %91, %95 : vector<256x128xf32>
    %c18 = arith.constant 18 : index
    %c0_88 = arith.constant 0 : index
    %97 = vector.load %arg11[%c18, %c0_88] : memref<296x128xf32, #tpu.memory_space<vmem>>, vector<256x128xf32>
    %c5 = arith.constant 5 : index
    %c0_89 = arith.constant 0 : index
    %c0_90 = arith.constant 0 : index
    %98 = vector.load %arg4[%c5, %c0_89, %c0_90] : memref<9x128x128xf32, #tpu.memory_space<vmem>>, vector<1x128x128xf32>
    %99 = vector.shape_cast %98 : vector<1x128x128xf32> to vector<128x128xf32>
    %cst_91 = arith.constant dense<0.000000e+00> : vector<256x128xf32>
    %100 = tpu.matmul %97, %99, %cst_91 {dimension_numbers = #tpu.dot_dimension_numbers<[1], [0], [0], [1], [0, 0, 1, 1], [], []>} : vector<256x128xf32>, vector<128x128xf32>, vector<256x128xf32> -> vector<256x128xf32>
    %101 = arith.addf %96, %100 : vector<256x128xf32>
    %c32 = arith.constant 32 : index
    %c0_92 = arith.constant 0 : index
    %102 = vector.load %arg11[%c32, %c0_92] : memref<296x128xf32, #tpu.memory_space<vmem>>, vector<256x128xf32>
    %c6 = arith.constant 6 : index
    %c0_93 = arith.constant 0 : index
    %c0_94 = arith.constant 0 : index
    %103 = vector.load %arg4[%c6, %c0_93, %c0_94] : memref<9x128x128xf32, #tpu.memory_space<vmem>>, vector<1x128x128xf32>
    %104 = vector.shape_cast %103 : vector<1x128x128xf32> to vector<128x128xf32>
    %cst_95 = arith.constant dense<0.000000e+00> : vector<256x128xf32>
    %105 = tpu.matmul %102, %104, %cst_95 {dimension_numbers = #tpu.dot_dimension_numbers<[1], [0], [0], [1], [0, 0, 1, 1], [], []>} : vector<256x128xf32>, vector<128x128xf32>, vector<256x128xf32> -> vector<256x128xf32>
    %106 = arith.addf %101, %105 : vector<256x128xf32>
    %c33_96 = arith.constant 33 : index
    %c0_97 = arith.constant 0 : index
    %107 = vector.load %arg11[%c33_96, %c0_97] : memref<296x128xf32, #tpu.memory_space<vmem>>, vector<256x128xf32>
    %c7 = arith.constant 7 : index
    %c0_98 = arith.constant 0 : index
    %c0_99 = arith.constant 0 : index
    %108 = vector.load %arg4[%c7, %c0_98, %c0_99] : memref<9x128x128xf32, #tpu.memory_space<vmem>>, vector<1x128x128xf32>
    %109 = vector.shape_cast %108 : vector<1x128x128xf32> to vector<128x128xf32>
    %cst_100 = arith.constant dense<0.000000e+00> : vector<256x128xf32>
    %110 = tpu.matmul %107, %109, %cst_100 {dimension_numbers = #tpu.dot_dimension_numbers<[1], [0], [0], [1], [0, 0, 1, 1], [], []>} : vector<256x128xf32>, vector<128x128xf32>, vector<256x128xf32> -> vector<256x128xf32>
    %111 = arith.addf %106, %110 : vector<256x128xf32>
    %c34 = arith.constant 34 : index
    %c0_101 = arith.constant 0 : index
    %112 = vector.load %arg11[%c34, %c0_101] : memref<296x128xf32, #tpu.memory_space<vmem>>, vector<256x128xf32>
    %c8 = arith.constant 8 : index
    %c0_102 = arith.constant 0 : index
    %c0_103 = arith.constant 0 : index
    %113 = vector.load %arg4[%c8, %c0_102, %c0_103] : memref<9x128x128xf32, #tpu.memory_space<vmem>>, vector<1x128x128xf32>
    %114 = vector.shape_cast %113 : vector<1x128x128xf32> to vector<128x128xf32>
    %cst_104 = arith.constant dense<0.000000e+00> : vector<256x128xf32>
    %115 = tpu.matmul %112, %114, %cst_104 {dimension_numbers = #tpu.dot_dimension_numbers<[1], [0], [0], [1], [0, 0, 1, 1], [], []>} : vector<256x128xf32>, vector<128x128xf32>, vector<256x128xf32> -> vector<256x128xf32>
    %116 = arith.addf %111, %115 : vector<256x128xf32>
    %c0_105 = arith.constant 0 : index
    %c0_106 = arith.constant 0 : index
    %117 = vector.load %arg5[%c0_105, %c0_106] : memref<1x128xf32, #tpu.memory_space<vmem>>, vector<1x128xf32>
    %118 = vector.broadcast %117 : vector<1x128xf32> to vector<256x128xf32>
    %119 = arith.addf %116, %118 : vector<256x128xf32>
    %cst_107 = arith.constant 0.000000e+00 : f32
    %120 = vector.broadcast %cst_107 : f32 to vector<256x128xf32>
    %121 = arith.maximumf %119, %120 : vector<256x128xf32>
    %c0_108 = arith.constant 0 : index
    %c0_109 = arith.constant 0 : index
    %122 = vector.load %arg12[%c0_108, %c0_109] : memref<256x128xf32, #tpu.memory_space<vmem>>, vector<256x128xf32>
    tpu.vector_store %arg12[%c0_108, %c0_109], %121 {strides = array<i32>} : memref<256x128xf32, #tpu.memory_space<vmem>>, vector<256x128xf32>,
    %c0_110 = arith.constant 0 : index
    %c0_111 = arith.constant 0 : index
    %123 = tpu.strided_load %arg12[%c0_110, %c0_111] {strides = array<i32: 2, 1>} : memref<256x128xf32, #tpu.memory_space<vmem>>, vector<128x128xf32>
    %c1_112 = arith.constant 1 : index
    %c0_113 = arith.constant 0 : index
    %124 = tpu.strided_load %arg12[%c1_112, %c0_113] {strides = array<i32: 2, 1>} : memref<256x128xf32, #tpu.memory_space<vmem>>, vector<128x128xf32>
    %125 = arith.maximumf %123, %124 : vector<128x128xf32>
    %c0_114 = arith.constant 0 : index
    %c0_115 = arith.constant 0 : index
    %126 = vector.load %arg13[%c0_114, %c0_115] : memref<128x128xf32, #tpu.memory_space<vmem>>, vector<128x128xf32>
    tpu.vector_store %arg13[%c0_114, %c0_115], %125 {strides = array<i32>} : memref<128x128xf32, #tpu.memory_space<vmem>>, vector<128x128xf32>,
    %c0_116 = arith.constant 0 : index
    %c0_117 = arith.constant 0 : index
    %127 = vector.load %arg13[%c0_116, %c0_117] : memref<128x128xf32, #tpu.memory_space<vmem>>, vector<8x128xf32>
    %c8_118 = arith.constant 8 : index
    %c0_119 = arith.constant 0 : index
    %128 = vector.load %arg13[%c8_118, %c0_119] : memref<128x128xf32, #tpu.memory_space<vmem>>, vector<8x128xf32>
    %129 = arith.maximumf %127, %128 : vector<8x128xf32>
    %130 = vector.extract_strided_slice %129 {offsets = [0, 0], sizes = [7, 128], strides = [1, 1]} : vector<8x128xf32> to vector<7x128xf32>
    %c17_120 = arith.constant 17 : index
    %c0_121 = arith.constant 0 : index
    %131 = vector.load %arg14[%c17_120, %c0_121] : memref<184x128xf32, #tpu.memory_space<vmem>>, vector<7x128xf32>
    tpu.vector_store %arg14[%c17_120, %c0_121], %130 {strides = array<i32>} : memref<184x128xf32, #tpu.memory_space<vmem>>, vector<7x128xf32>,
    %c16_122 = arith.constant 16 : index
    %c0_123 = arith.constant 0 : index
    %132 = vector.load %arg13[%c16_122, %c0_123] : memref<128x128xf32, #tpu.memory_space<vmem>>, vector<8x128xf32>
    %c24 = arith.constant 24 : index
    %c0_124 = arith.constant 0 : index
    %133 = vector.load %arg13[%c24, %c0_124] : memref<128x128xf32, #tpu.memory_space<vmem>>, vector<8x128xf32>
    %134 = arith.maximumf %132, %133 : vector<8x128xf32>
    %135 = vector.extract_strided_slice %134 {offsets = [0, 0], sizes = [7, 128], strides = [1, 1]} : vector<8x128xf32> to vector<7x128xf32>
    %c33_125 = arith.constant 33 : index
    %c0_126 = arith.constant 0 : index
    %136 = vector.load %arg14[%c33_125, %c0_126] : memref<184x128xf32, #tpu.memory_space<vmem>>, vector<7x128xf32>
    tpu.vector_store %arg14[%c33_125, %c0_126], %135 {strides = array<i32>} : memref<184x128xf32, #tpu.memory_space<vmem>>, vector<7x128xf32>,
    %c32_127 = arith.constant 32 : index
    %c0_128 = arith.constant 0 : index
    %137 = vector.load %arg13[%c32_127, %c0_128] : memref<128x128xf32, #tpu.memory_space<vmem>>, vector<8x128xf32>
    %c40 = arith.constant 40 : index
    %c0_129 = arith.constant 0 : index
    %138 = vector.load %arg13[%c40, %c0_129] : memref<128x128xf32, #tpu.memory_space<vmem>>, vector<8x128xf32>
    %139 = arith.maximumf %137, %138 : vector<8x128xf32>
    %140 = vector.extract_strided_slice %139 {offsets = [0, 0], sizes = [7, 128], strides = [1, 1]} : vector<8x128xf32> to vector<7x128xf32>
    %c49_130 = arith.constant 49 : index
    %c0_131 = arith.constant 0 : index
    %141 = vector.load %arg14[%c49_130, %c0_131] : memref<184x128xf32, #tpu.memory_space<vmem>>, vector<7x128xf32>
    tpu.vector_store %arg14[%c49_130, %c0_131], %140 {strides = array<i32>} : memref<184x128xf32, #tpu.memory_space<vmem>>, vector<7x128xf32>,
    %c48 = arith.constant 48 : index
    %c0_132 = arith.constant 0 : index
    %142 = vector.load %arg13[%c48, %c0_132] : memref<128x128xf32, #tpu.memory_space<vmem>>, vector<8x128xf32>
    %c56_133 = arith.constant 56 : index
    %c0_134 = arith.constant 0 : index
    %143 = vector.load %arg13[%c56_133, %c0_134] : memref<128x128xf32, #tpu.memory_space<vmem>>, vector<8x128xf32>
    %144 = arith.maximumf %142, %143 : vector<8x128xf32>
    %145 = vector.extract_strided_slice %144 {offsets = [0, 0], sizes = [7, 128], strides = [1, 1]} : vector<8x128xf32> to vector<7x128xf32>
    %c65_135 = arith.constant 65 : index
    %c0_136 = arith.constant 0 : index
    %146 = vector.load %arg14[%c65_135, %c0_136] : memref<184x128xf32, #tpu.memory_space<vmem>>, vector<7x128xf32>
    tpu.vector_store %arg14[%c65_135, %c0_136], %145 {strides = array<i32>} : memref<184x128xf32, #tpu.memory_space<vmem>>, vector<7x128xf32>,
    %c64 = arith.constant 64 : index
    %c0_137 = arith.constant 0 : index
    %147 = vector.load %arg13[%c64, %c0_137] : memref<128x128xf32, #tpu.memory_space<vmem>>, vector<8x128xf32>
    %c72 = arith.constant 72 : index
    %c0_138 = arith.constant 0 : index
    %148 = vector.load %arg13[%c72, %c0_138] : memref<128x128xf32, #tpu.memory_space<vmem>>, vector<8x128xf32>
    %149 = arith.maximumf %147, %148 : vector<8x128xf32>
    %150 = vector.extract_strided_slice %149 {offsets = [0, 0], sizes = [7, 128], strides = [1, 1]} : vector<8x128xf32> to vector<7x128xf32>
    %c81_139 = arith.constant 81 : index
    %c0_140 = arith.constant 0 : index
    %151 = vector.load %arg14[%c81_139, %c0_140] : memref<184x128xf32, #tpu.memory_space<vmem>>, vector<7x128xf32>
    tpu.vector_store %arg14[%c81_139, %c0_140], %150 {strides = array<i32>} : memref<184x128xf32, #tpu.memory_space<vmem>>, vector<7x128xf32>,
    %c80 = arith.constant 80 : index
    %c0_141 = arith.constant 0 : index
    %152 = vector.load %arg13[%c80, %c0_141] : memref<128x128xf32, #tpu.memory_space<vmem>>, vector<8x128xf32>
    %c88 = arith.constant 88 : index
    %c0_142 = arith.constant 0 : index
    %153 = vector.load %arg13[%c88, %c0_142] : memref<128x128xf32, #tpu.memory_space<vmem>>, vector<8x128xf32>
    %154 = arith.maximumf %152, %153 : vector<8x128xf32>
    %155 = vector.extract_strided_slice %154 {offsets = [0, 0], sizes = [7, 128], strides = [1, 1]} : vector<8x128xf32> to vector<7x128xf32>
    %c97_143 = arith.constant 97 : index
    %c0_144 = arith.constant 0 : index
    %156 = vector.load %arg14[%c97_143, %c0_144] : memref<184x128xf32, #tpu.memory_space<vmem>>, vector<7x128xf32>
    tpu.vector_store %arg14[%c97_143, %c0_144], %155 {strides = array<i32>} : memref<184x128xf32, #tpu.memory_space<vmem>>, vector<7x128xf32>,
    %c96 = arith.constant 96 : index
    %c0_145 = arith.constant 0 : index
    %157 = vector.load %arg13[%c96, %c0_145] : memref<128x128xf32, #tpu.memory_space<vmem>>, vector<8x128xf32>
    %c104 = arith.constant 104 : index
    %c0_146 = arith.constant 0 : index
    %158 = vector.load %arg13[%c104, %c0_146] : memref<128x128xf32, #tpu.memory_space<vmem>>, vector<8x128xf32>
    %159 = arith.maximumf %157, %158 : vector<8x128xf32>
    %160 = vector.extract_strided_slice %159 {offsets = [0, 0], sizes = [7, 128], strides = [1, 1]} : vector<8x128xf32> to vector<7x128xf32>
    %c113_147 = arith.constant 113 : index
    %c0_148 = arith.constant 0 : index
    %161 = vector.load %arg14[%c113_147, %c0_148] : memref<184x128xf32, #tpu.memory_space<vmem>>, vector<7x128xf32>
    tpu.vector_store %arg14[%c113_147, %c0_148], %160 {strides = array<i32>} : memref<184x128xf32, #tpu.memory_space<vmem>>, vector<7x128xf32>,
    %c0_149 = arith.constant 0 : index
    %c0_150 = arith.constant 0 : index
    %162 = vector.load %arg14[%c0_149, %c0_150] : memref<184x128xf32, #tpu.memory_space<vmem>>, vector<144x128xf32>
    %c0_151 = arith.constant 0 : index
    %c0_152 = arith.constant 0 : index
    %c0_153 = arith.constant 0 : index
    %163 = vector.load %arg6[%c0_151, %c0_152, %c0_153] : memref<9x128x128xf32, #tpu.memory_space<vmem>>, vector<1x128x128xf32>
    %164 = vector.shape_cast %163 : vector<1x128x128xf32> to vector<128x128xf32>
    %cst_154 = arith.constant dense<0.000000e+00> : vector<144x128xf32>
    %165 = tpu.matmul %162, %164, %cst_154 {dimension_numbers = #tpu.dot_dimension_numbers<[1], [0], [0], [1], [0, 0, 1, 1], [], []>} : vector<144x128xf32>, vector<128x128xf32>, vector<144x128xf32> -> vector<144x128xf32>
    %c1_155 = arith.constant 1 : index
    %c0_156 = arith.constant 0 : index
    %166 = vector.load %arg14[%c1_155, %c0_156] : memref<184x128xf32, #tpu.memory_space<vmem>>, vector<144x128xf32>
    %c1_157 = arith.constant 1 : index
    %c0_158 = arith.constant 0 : index
    %c0_159 = arith.constant 0 : index
    %167 = vector.load %arg6[%c1_157, %c0_158, %c0_159] : memref<9x128x128xf32, #tpu.memory_space<vmem>>, vector<1x128x128xf32>
    %168 = vector.shape_cast %167 : vector<1x128x128xf32> to vector<128x128xf32>
    %cst_160 = arith.constant dense<0.000000e+00> : vector<144x128xf32>
    %169 = tpu.matmul %166, %168, %cst_160 {dimension_numbers = #tpu.dot_dimension_numbers<[1], [0], [0], [1], [0, 0, 1, 1], [], []>} : vector<144x128xf32>, vector<128x128xf32>, vector<144x128xf32> -> vector<144x128xf32>
    %170 = arith.addf %165, %169 : vector<144x128xf32>
    %c2_161 = arith.constant 2 : index
    %c0_162 = arith.constant 0 : index
    %171 = vector.load %arg14[%c2_161, %c0_162] : memref<184x128xf32, #tpu.memory_space<vmem>>, vector<144x128xf32>
    %c2_163 = arith.constant 2 : index
    %c0_164 = arith.constant 0 : index
    %c0_165 = arith.constant 0 : index
    %172 = vector.load %arg6[%c2_163, %c0_164, %c0_165] : memref<9x128x128xf32, #tpu.memory_space<vmem>>, vector<1x128x128xf32>
    %173 = vector.shape_cast %172 : vector<1x128x128xf32> to vector<128x128xf32>
    %cst_166 = arith.constant dense<0.000000e+00> : vector<144x128xf32>
    %174 = tpu.matmul %171, %173, %cst_166 {dimension_numbers = #tpu.dot_dimension_numbers<[1], [0], [0], [1], [0, 0, 1, 1], [], []>} : vector<144x128xf32>, vector<128x128xf32>, vector<144x128xf32> -> vector<144x128xf32>
    %175 = arith.addf %170, %174 : vector<144x128xf32>
    %c16_167 = arith.constant 16 : index
    %c0_168 = arith.constant 0 : index
    %176 = vector.load %arg14[%c16_167, %c0_168] : memref<184x128xf32, #tpu.memory_space<vmem>>, vector<144x128xf32>
    %c3_169 = arith.constant 3 : index
    %c0_170 = arith.constant 0 : index
    %c0_171 = arith.constant 0 : index
    %177 = vector.load %arg6[%c3_169, %c0_170, %c0_171] : memref<9x128x128xf32, #tpu.memory_space<vmem>>, vector<1x128x128xf32>
    %178 = vector.shape_cast %177 : vector<1x128x128xf32> to vector<128x128xf32>
    %cst_172 = arith.constant dense<0.000000e+00> : vector<144x128xf32>
    %179 = tpu.matmul %176, %178, %cst_172 {dimension_numbers = #tpu.dot_dimension_numbers<[1], [0], [0], [1], [0, 0, 1, 1], [], []>} : vector<144x128xf32>, vector<128x128xf32>, vector<144x128xf32> -> vector<144x128xf32>
    %180 = arith.addf %175, %179 : vector<144x128xf32>
    %c17_173 = arith.constant 17 : index
    %c0_174 = arith.constant 0 : index
    %181 = vector.load %arg14[%c17_173, %c0_174] : memref<184x128xf32, #tpu.memory_space<vmem>>, vector<144x128xf32>
    %c4_175 = arith.constant 4 : index
    %c0_176 = arith.constant 0 : index
    %c0_177 = arith.constant 0 : index
    %182 = vector.load %arg6[%c4_175, %c0_176, %c0_177] : memref<9x128x128xf32, #tpu.memory_space<vmem>>, vector<1x128x128xf32>
    %183 = vector.shape_cast %182 : vector<1x128x128xf32> to vector<128x128xf32>
    %cst_178 = arith.constant dense<0.000000e+00> : vector<144x128xf32>
    %184 = tpu.matmul %181, %183, %cst_178 {dimension_numbers = #tpu.dot_dimension_numbers<[1], [0], [0], [1], [0, 0, 1, 1], [], []>} : vector<144x128xf32>, vector<128x128xf32>, vector<144x128xf32> -> vector<144x128xf32>
    %185 = arith.addf %180, %184 : vector<144x128xf32>
    %c18_179 = arith.constant 18 : index
    %c0_180 = arith.constant 0 : index
    %186 = vector.load %arg14[%c18_179, %c0_180] : memref<184x128xf32, #tpu.memory_space<vmem>>, vector<144x128xf32>
    %c5_181 = arith.constant 5 : index
    %c0_182 = arith.constant 0 : index
    %c0_183 = arith.constant 0 : index
    %187 = vector.load %arg6[%c5_181, %c0_182, %c0_183] : memref<9x128x128xf32, #tpu.memory_space<vmem>>, vector<1x128x128xf32>
    %188 = vector.shape_cast %187 : vector<1x128x128xf32> to vector<128x128xf32>
    %cst_184 = arith.constant dense<0.000000e+00> : vector<144x128xf32>
    %189 = tpu.matmul %186, %188, %cst_184 {dimension_numbers = #tpu.dot_dimension_numbers<[1], [0], [0], [1], [0, 0, 1, 1], [], []>} : vector<144x128xf32>, vector<128x128xf32>, vector<144x128xf32> -> vector<144x128xf32>
    %190 = arith.addf %185, %189 : vector<144x128xf32>
    %c32_185 = arith.constant 32 : index
    %c0_186 = arith.constant 0 : index
    %191 = vector.load %arg14[%c32_185, %c0_186] : memref<184x128xf32, #tpu.memory_space<vmem>>, vector<144x128xf32>
    %c6_187 = arith.constant 6 : index
    %c0_188 = arith.constant 0 : index
    %c0_189 = arith.constant 0 : index
    %192 = vector.load %arg6[%c6_187, %c0_188, %c0_189] : memref<9x128x128xf32, #tpu.memory_space<vmem>>, vector<1x128x128xf32>
    %193 = vector.shape_cast %192 : vector<1x128x128xf32> to vector<128x128xf32>
    %cst_190 = arith.constant dense<0.000000e+00> : vector<144x128xf32>
    %194 = tpu.matmul %191, %193, %cst_190 {dimension_numbers = #tpu.dot_dimension_numbers<[1], [0], [0], [1], [0, 0, 1, 1], [], []>} : vector<144x128xf32>, vector<128x128xf32>, vector<144x128xf32> -> vector<144x128xf32>
    %195 = arith.addf %190, %194 : vector<144x128xf32>
    %c33_191 = arith.constant 33 : index
    %c0_192 = arith.constant 0 : index
    %196 = vector.load %arg14[%c33_191, %c0_192] : memref<184x128xf32, #tpu.memory_space<vmem>>, vector<144x128xf32>
    %c7_193 = arith.constant 7 : index
    %c0_194 = arith.constant 0 : index
    %c0_195 = arith.constant 0 : index
    %197 = vector.load %arg6[%c7_193, %c0_194, %c0_195] : memref<9x128x128xf32, #tpu.memory_space<vmem>>, vector<1x128x128xf32>
    %198 = vector.shape_cast %197 : vector<1x128x128xf32> to vector<128x128xf32>
    %cst_196 = arith.constant dense<0.000000e+00> : vector<144x128xf32>
    %199 = tpu.matmul %196, %198, %cst_196 {dimension_numbers = #tpu.dot_dimension_numbers<[1], [0], [0], [1], [0, 0, 1, 1], [], []>} : vector<144x128xf32>, vector<128x128xf32>, vector<144x128xf32> -> vector<144x128xf32>
    %200 = arith.addf %195, %199 : vector<144x128xf32>
    %c34_197 = arith.constant 34 : index
    %c0_198 = arith.constant 0 : index
    %201 = vector.load %arg14[%c34_197, %c0_198] : memref<184x128xf32, #tpu.memory_space<vmem>>, vector<144x128xf32>
    %c8_199 = arith.constant 8 : index
    %c0_200 = arith.constant 0 : index
    %c0_201 = arith.constant 0 : index
    %202 = vector.load %arg6[%c8_199, %c0_200, %c0_201] : memref<9x128x128xf32, #tpu.memory_space<vmem>>, vector<1x128x128xf32>
    %203 = vector.shape_cast %202 : vector<1x128x128xf32> to vector<128x128xf32>
    %cst_202 = arith.constant dense<0.000000e+00> : vector<144x128xf32>
    %204 = tpu.matmul %201, %203, %cst_202 {dimension_numbers = #tpu.dot_dimension_numbers<[1], [0], [0], [1], [0, 0, 1, 1], [], []>} : vector<144x128xf32>, vector<128x128xf32>, vector<144x128xf32> -> vector<144x128xf32>
    %205 = arith.addf %200, %204 : vector<144x128xf32>
    %c0_203 = arith.constant 0 : index
    %c0_204 = arith.constant 0 : index
    %206 = vector.load %arg7[%c0_203, %c0_204] : memref<1x128xf32, #tpu.memory_space<vmem>>, vector<1x128xf32>
    %207 = vector.broadcast %206 : vector<1x128xf32> to vector<144x128xf32>
    %208 = arith.addf %205, %207 : vector<144x128xf32>
    %cst_205 = arith.constant 0.000000e+00 : f32
    %209 = vector.broadcast %cst_205 : f32 to vector<144x128xf32>
    %210 = arith.maximumf %208, %209 : vector<144x128xf32>
    %c0_206 = arith.constant 0 : index
    %c0_207 = arith.constant 0 : index
    %211 = vector.load %arg15[%c0_206, %c0_207] : memref<144x128xf32, #tpu.memory_space<vmem>>, vector<144x128xf32>
    tpu.vector_store %arg15[%c0_206, %c0_207], %210 {strides = array<i32>} : memref<144x128xf32, #tpu.memory_space<vmem>>, vector<144x128xf32>,
    %c0_208 = arith.constant 0 : index
    %c0_209 = arith.constant 0 : index
    %212 = vector.load %arg15[%c0_208, %c0_209] : memref<144x128xf32, #tpu.memory_space<vmem>>, vector<8x128xf32>
    %c0_210 = arith.constant 0 : index
    %c0_211 = arith.constant 0 : index
    %213 = vector.load %arg8[%c0_210, %c0_211] : memref<56x128xf32, #tpu.memory_space<vmem>>, vector<8x128xf32>
    tpu.vector_store %arg8[%c0_210, %c0_211], %212 {strides = array<i32>} : memref<56x128xf32, #tpu.memory_space<vmem>>, vector<8x128xf32>,
    %c16_212 = arith.constant 16 : index
    %c0_213 = arith.constant 0 : index
    %214 = vector.load %arg15[%c16_212, %c0_213] : memref<144x128xf32, #tpu.memory_space<vmem>>, vector<8x128xf32>
    %c8_214 = arith.constant 8 : index
    %c0_215 = arith.constant 0 : index
    %215 = vector.load %arg8[%c8_214, %c0_215] : memref<56x128xf32, #tpu.memory_space<vmem>>, vector<8x128xf32>
    tpu.vector_store %arg8[%c8_214, %c0_215], %214 {strides = array<i32>} : memref<56x128xf32, #tpu.memory_space<vmem>>, vector<8x128xf32>,
    %c32_216 = arith.constant 32 : index
    %c0_217 = arith.constant 0 : index
    %216 = vector.load %arg15[%c32_216, %c0_217] : memref<144x128xf32, #tpu.memory_space<vmem>>, vector<8x128xf32>
    %c16_218 = arith.constant 16 : index
    %c0_219 = arith.constant 0 : index
    %217 = vector.load %arg8[%c16_218, %c0_219] : memref<56x128xf32, #tpu.memory_space<vmem>>, vector<8x128xf32>
    tpu.vector_store %arg8[%c16_218, %c0_219], %216 {strides = array<i32>} : memref<56x128xf32, #tpu.memory_space<vmem>>, vector<8x128xf32>,
    %c48_220 = arith.constant 48 : index
    %c0_221 = arith.constant 0 : index
    %218 = vector.load %arg15[%c48_220, %c0_221] : memref<144x128xf32, #tpu.memory_space<vmem>>, vector<8x128xf32>
    %c24_222 = arith.constant 24 : index
    %c0_223 = arith.constant 0 : index
    %219 = vector.load %arg8[%c24_222, %c0_223] : memref<56x128xf32, #tpu.memory_space<vmem>>, vector<8x128xf32>
    tpu.vector_store %arg8[%c24_222, %c0_223], %218 {strides = array<i32>} : memref<56x128xf32, #tpu.memory_space<vmem>>, vector<8x128xf32>,
    %c64_224 = arith.constant 64 : index
    %c0_225 = arith.constant 0 : index
    %220 = vector.load %arg15[%c64_224, %c0_225] : memref<144x128xf32, #tpu.memory_space<vmem>>, vector<8x128xf32>
    %c32_226 = arith.constant 32 : index
    %c0_227 = arith.constant 0 : index
    %221 = vector.load %arg8[%c32_226, %c0_227] : memref<56x128xf32, #tpu.memory_space<vmem>>, vector<8x128xf32>
    tpu.vector_store %arg8[%c32_226, %c0_227], %220 {strides = array<i32>} : memref<56x128xf32, #tpu.memory_space<vmem>>, vector<8x128xf32>,
    %c80_228 = arith.constant 80 : index
    %c0_229 = arith.constant 0 : index
    %222 = vector.load %arg15[%c80_228, %c0_229] : memref<144x128xf32, #tpu.memory_space<vmem>>, vector<8x128xf32>
    %c40_230 = arith.constant 40 : index
    %c0_231 = arith.constant 0 : index
    %223 = vector.load %arg8[%c40_230, %c0_231] : memref<56x128xf32, #tpu.memory_space<vmem>>, vector<8x128xf32>
    tpu.vector_store %arg8[%c40_230, %c0_231], %222 {strides = array<i32>} : memref<56x128xf32, #tpu.memory_space<vmem>>, vector<8x128xf32>,
    %c96_232 = arith.constant 96 : index
    %c0_233 = arith.constant 0 : index
    %224 = vector.load %arg15[%c96_232, %c0_233] : memref<144x128xf32, #tpu.memory_space<vmem>>, vector<8x128xf32>
    %c48_234 = arith.constant 48 : index
    %c0_235 = arith.constant 0 : index
    %225 = vector.load %arg8[%c48_234, %c0_235] : memref<56x128xf32, #tpu.memory_space<vmem>>, vector<8x128xf32>
    tpu.vector_store %arg8[%c48_234, %c0_235], %224 {strides = array<i32>} : memref<56x128xf32, #tpu.memory_space<vmem>>, vector<8x128xf32>,
    return
  }
  func.func @transform_0(%arg0: i32) -> (i32, i32) {
    %c0_i32 = arith.constant 0 : i32
    %c0_i32_0 = arith.constant 0 : i32
    return %arg0, %c0_i32 : i32, i32
  }
  func.func @transform_1(%arg0: i32) -> (i32, i32) {
    %c0_i32 = arith.constant 0 : i32
    %c0_i32_0 = arith.constant 0 : i32
    %c0_i32_1 = arith.constant 0 : i32
    return %c0_i32, %c0_i32_0 : i32, i32
  }
  func.func @transform_2(%arg0: i32) -> (i32, i32) {
    %c0_i32 = arith.constant 0 : i32
    %c0_i32_0 = arith.constant 0 : i32
    %c0_i32_1 = arith.constant 0 : i32
    return %c0_i32, %c0_i32_0 : i32, i32
  }
  func.func @transform_3(%arg0: i32) -> (i32, i32, i32) {
    %c0_i32 = arith.constant 0 : i32
    %c0_i32_0 = arith.constant 0 : i32
    %c0_i32_1 = arith.constant 0 : i32
    %c0_i32_2 = arith.constant 0 : i32
    return %c0_i32, %c0_i32_0, %c0_i32_1 : i32, i32, i32
  }
  func.func @transform_4(%arg0: i32) -> (i32, i32) {
    %c0_i32 = arith.constant 0 : i32
    %c0_i32_0 = arith.constant 0 : i32
    %c0_i32_1 = arith.constant 0 : i32
    return %c0_i32, %c0_i32_0 : i32, i32
  }
  func.func @transform_5(%arg0: i32) -> (i32, i32, i32) {
    %c0_i32 = arith.constant 0 : i32
    %c0_i32_0 = arith.constant 0 : i32
    %c0_i32_1 = arith.constant 0 : i32
    %c0_i32_2 = arith.constant 0 : i32
    return %c0_i32, %c0_i32_0, %c0_i32_1 : i32, i32, i32
  }
  func.func @transform_6(%arg0: i32) -> (i32, i32) {
    %c0_i32 = arith.constant 0 : i32
    %c0_i32_0 = arith.constant 0 : i32
    %c0_i32_1 = arith.constant 0 : i32
    return %c0_i32, %c0_i32_0 : i32, i32
  }
  func.func @transform_7(%arg0: i32) -> (i32, i32) {
    %c0_i32 = arith.constant 0 : i32
    %c0_i32_0 = arith.constant 0 : i32
    return %arg0, %c0_i32 : i32, i32
  }
}

module attributes {stable_mosaic.version = 11 : i64} {
  func.func @_matmul_bias_kernel(%arg0: i32, %arg1: memref<2x7168xf32, #tpu.memory_space<vmem>>, %arg2: memref<7168x128xf32, #tpu.memory_space<vmem>>, %arg3: memref<1x128xf32, #tpu.memory_space<vmem>>, %arg4: memref<2x128xf32, #tpu.memory_space<vmem>>) attributes {dimension_semantics = [#tpu.dimension_semantics<parallel>], iteration_bounds = array<i64: 1>, scalar_prefetch = 0 : i64, scratch_operands = 0 : i64, tpu.core_type = #tpu.core_type<tc>, window_params = [{transform_indices = @transform_0, window_bounds = array<i64: 2, 7168>}, {pipeline_mode = #tpu.pipeline_mode<synchronous>, transform_indices = @transform_1, window_bounds = array<i64: 7168, 128>}, {pipeline_mode = #tpu.pipeline_mode<synchronous>, transform_indices = @transform_2, window_bounds = array<i64: 1, 128>}, {transform_indices = @transform_3, window_bounds = array<i64: 2, 128>}]} {
    %c0 = arith.constant 0 : index
    %c0_0 = arith.constant 0 : index
    %0 = vector.load %arg1[%c0, %c0_0] : memref<2x7168xf32, #tpu.memory_space<vmem>>, vector<2x7168xf32>
    %c0_1 = arith.constant 0 : index
    %c0_2 = arith.constant 0 : index
    %1 = vector.load %arg2[%c0_1, %c0_2] : memref<7168x128xf32, #tpu.memory_space<vmem>>, vector<7168x128xf32>
    %cst = arith.constant dense<0.000000e+00> : vector<2x128xf32>
    %2 = tpu.matmul %0, %1, %cst {dimension_numbers = #tpu.dot_dimension_numbers<[1], [0], [0], [1], [0, 0, 1, 1], [], []>} : vector<2x7168xf32>, vector<7168x128xf32>, vector<2x128xf32> -> vector<2x128xf32>
    %c0_3 = arith.constant 0 : index
    %c0_4 = arith.constant 0 : index
    %3 = vector.load %arg3[%c0_3, %c0_4] : memref<1x128xf32, #tpu.memory_space<vmem>>, vector<1x128xf32>
    %4 = vector.broadcast %3 : vector<1x128xf32> to vector<2x128xf32>
    %5 = arith.addf %2, %4 : vector<2x128xf32>
    %c0_5 = arith.constant 0 : index
    %c0_6 = arith.constant 0 : index
    %6 = vector.load %arg4[%c0_5, %c0_6] : memref<2x128xf32, #tpu.memory_space<vmem>>, vector<2x128xf32>
    tpu.vector_store %arg4[%c0_5, %c0_6], %5 {strides = array<i32>} : memref<2x128xf32, #tpu.memory_space<vmem>>, vector<2x128xf32>,
    return
  }
  func.func @transform_0(%arg0: i32) -> (i32, i32) {
    %c0_i32 = arith.constant 0 : i32
    %c0_i32_0 = arith.constant 0 : i32
    return %arg0, %c0_i32 : i32, i32
  }
  func.func @transform_1(%arg0: i32) -> (i32, i32) {
    %c0_i32 = arith.constant 0 : i32
    %c0_i32_0 = arith.constant 0 : i32
    %c0_i32_1 = arith.constant 0 : i32
    return %c0_i32, %c0_i32_0 : i32, i32
  }
  func.func @transform_2(%arg0: i32) -> (i32, i32) {
    %c0_i32 = arith.constant 0 : i32
    %c0_i32_0 = arith.constant 0 : i32
    %c0_i32_1 = arith.constant 0 : i32
    return %c0_i32, %c0_i32_0 : i32, i32
  }
  func.func @transform_3(%arg0: i32) -> (i32, i32) {
    %c0_i32 = arith.constant 0 : i32
    %c0_i32_0 = arith.constant 0 : i32
    return %arg0, %c0_i32 : i32, i32
  }
}

</mosaic_0001>

<bundles_post_ra>
// kernel: cnn_forward.3
= control target key start
LH: loop header
LB: loop body
LE: loop exit
PB: predicated region body
PF: predicated region fallthrough
CT: control target
= control target key end

     0   :  { %v5132_v47 = vmov 1983009808   ;;  %v950_v49 = vlaneseq  ;;  %s8077_s0 = inlined_call_operand.vmem [shape: f32[2,7168], index: 0, kind: input, shape index: {}]   ;;  %s8078_s1 = inlined_call_operand.vmem [shape: f32[7168,128], index: 1, kind: input, shape index: {}]   ;;  %s8079_s2 = inlined_call_operand.vmem [shape: f32[1,128], index: 2, kind: input, shape index: {}]   ;;  %s8080_s3 = inlined_call_operand.hbm [shape: f32[2,128], index: 3, kind: output, shape index: {}]  }
   0x1   :  { %v45_v0 = vld [vmem:[%s8078_s1 + $0x80] sm:$0xff]  ;;  %v46_v1 = vld [vmem:[%s8078_s1 + $0x88] sm:$0xff]  ;;  %v47_v11 = vld [vmem:[%s8078_s1 + $0x90] sm:$0xff]  ;;  %v948_v48 = vunpack.c.l.s4 %v5132_v47 }
   0x2   :  { %v29_v2 = vld [vmem:[%s8078_s1] sm:$0xff]  ;;  %v4196_v3 = vpack.c.bf16 %v46_v1, %v45_v0  ;;  %v30_v4 = vld [vmem:[%s8078_s1 + $0x8] sm:$0xff]  ;;  %v48_v13 = vld [vmem:[%s8078_s1 + $0x98] sm:$0xff]  ;;  %v951_v0 = vshrl.u32 %v950_v49, 7 }
   0x3   :  { %v77_v5 = vld [vmem:[%s8078_s1 + $0x180] sm:$0xff]  ;;  %v78_v6 = vld [vmem:[%s8078_s1 + $0x188] sm:$0xff]  ;;  %v4198_v7 = vpack.c.bf16 %v30_v4, %v29_v2  ;;  %v31_v14 = vld [vmem:[%s8078_s1 + $0x10] sm:$0xff]  ;;  %v4200_v16 = vpack.c.bf16 %v48_v13, %v47_v11  ;;  %v949_v63 = vunpack.c.0.s8 %v948_v48 }
   0x4   :  { %v4228_v8 = vpack.c.bf16 %v78_v6, %v77_v5  ;;  %v61_v9 = vld [vmem:[%s8078_s1 + $0x100] sm:$0xff]  ;;  %v62_v10 = vld [vmem:[%s8078_s1 + $0x108] sm:$0xff]  ;;  %4197 = vmatprep.subr.bf16.mxu0 %v4196_v3  ;;  %v32_v15 = vld [vmem:[%s8078_s1 + $0x18] sm:$0xff] }
   0x5   :  { %v4230_v12 = vpack.c.bf16 %v62_v10, %v61_v9  ;;  %4199 = vmatpush3.bf16.msra.mxu0 %v4198_v7  ;;  %v4202_v17 = vpack.c.bf16 %v32_v15, %v31_v14  ;;  %v79_v18 = vld [vmem:[%s8078_s1 + $0x190] sm:$0xff]  ;;  %v80_v19 = vld [vmem:[%s8078_s1 + $0x198] sm:$0xff]  ;;  %v49_v23 = vld [vmem:[%s8078_s1 + $0xa0] sm:$0xff]  ;;  %v5304_v13 = vsub.s32 %v949_v63, %v951_v0 }
   0x6   :  { %4229 = vmatprep.subr.bf16.mxu1 %v4228_v8  ;;  %v63_v20 = vld [vmem:[%s8078_s1 + $0x110] sm:$0xff]  ;;  %v4232_v21 = vpack.c.bf16 %v80_v19, %v79_v18  ;;  %v64_v22 = vld [vmem:[%s8078_s1 + $0x118] sm:$0xff]  ;;  %v50_v24 = vld [vmem:[%s8078_s1 + $0xa8] sm:$0xff]  ;;  %4201 = vmatprep.subr.bf16.mxu0 %v4200_v16 }
   0x7   :  { %4231 = vmatpush3.bf16.msra.mxu1 %v4230_v12  ;;  %v4234_v25 = vpack.c.bf16 %v64_v22, %v63_v20  ;;  %v4204_v26 = vpack.c.bf16 %v50_v24, %v49_v23  ;;  %v33_v27 = vld [vmem:[%s8078_s1 + $0x20] sm:$0xff]  ;;  %v34_v28 = vld [vmem:[%s8078_s1 + $0x28] sm:$0xff]  ;;  %v51_v35 = vld [vmem:[%s8078_s1 + $0xb0] sm:$0xff] }
   0x8   :  { %v81_v29 = vld [vmem:[%s8078_s1 + $0x1a0] sm:$0xff]  ;;  %4233 = vmatprep.subr.bf16.mxu1 %v4232_v21  ;;  %v82_v30 = vld [vmem:[%s8078_s1 + $0x1a8] sm:$0xff]  ;;  %v4206_v33 = vpack.c.bf16 %v34_v28, %v33_v27  ;;  %v52_v36 = vld [vmem:[%s8078_s1 + $0xb8] sm:$0xff] }
   0x9   :  { %v65_v31 = vld [vmem:[%s8078_s1 + $0x120] sm:$0xff]  ;;  %v66_v32 = vld [vmem:[%s8078_s1 + $0x128] sm:$0xff]  ;;  %4203 = vmatpush3.bf16.msra.mxu0 %v4202_v17  ;;  %v4236_v34 = vpack.c.bf16 %v82_v30, %v81_v29  ;;  %v35_v37 = vld [vmem:[%s8078_s1 + $0x30] sm:$0xff]  ;;  %v4208_v39 = vpack.c.bf16 %v52_v36, %v51_v35 }
   0xa   :  { %4205 = vmatprep.subr.bf16.mxu0 %v4204_v26  ;;  %v4238_v38 = vpack.c.bf16 %v66_v32, %v65_v31  ;;  %v36_v40 = vld [vmem:[%s8078_s1 + $0x38] sm:$0xff]  ;;  %v83_v41 = vld [vmem:[%s8078_s1 + $0x1b0] sm:$0xff]  ;;  %v53_v46 = vld [vmem:[%s8078_s1 + $0xc0] sm:$0xff] }
   0xb   :  { %4235 = vmatpush3.bf16.msra.mxu1 %v4234_v25  ;;  %v84_v42 = vld [vmem:[%s8078_s1 + $0x1b8] sm:$0xff]  ;;  %v67_v44 = vld [vmem:[%s8078_s1 + $0x130] sm:$0xff]  ;;  %v54_v50 = vld [vmem:[%s8078_s1 + $0xc8] sm:$0xff]  ;;  %v4210_v51 = vpack.c.bf16 %v36_v40, %v35_v37 }
   0xc   :  { %4237 = vmatprep.subr.bf16.mxu1 %v4236_v34  ;;  %v4240_v43 = vpack.c.bf16 %v84_v42, %v83_v41  ;;  %v68_v45 = vld [vmem:[%s8078_s1 + $0x138] sm:$0xff]  ;;  %v85_v52 = vld [vmem:[%s8078_s1 + $0x1c0] sm:$0xff]  ;;  %v86_v53 = vld [vmem:[%s8078_s1 + $0x1c8] sm:$0xff]  ;;  %v4212_v55 = vpack.c.bf16 %v54_v50, %v53_v46 }
   0xd   :  { %4207 = vmatpush3.bf16.msra.mxu0 %v4206_v33  ;;  %v4242_v54 = vpack.c.bf16 %v68_v45, %v67_v44  ;;  %v37_v56 = vld [vmem:[%s8078_s1 + $0x40] sm:$0xff]  ;;  %v38_v57 = vld [vmem:[%s8078_s1 + $0x48] sm:$0xff]  ;;  %v4244_v59 = vpack.c.bf16 %v86_v53, %v85_v52  ;;  %v55_v61 = vld [vmem:[%s8078_s1 + $0xd0] sm:$0xff] }
   0xe   :  { %4209 = vmatprep.subr.bf16.mxu0 %v4208_v39  ;;  %v69_v58 = vld [vmem:[%s8078_s1 + $0x140] sm:$0xff]  ;;  %v70_v60 = vld [vmem:[%s8078_s1 + $0x148] sm:$0xff]  ;;  %v56_v62 = vld [vmem:[%s8078_s1 + $0xd8] sm:$0xff]  ;;  %v4214_v3 = vpack.c.bf16 %v38_v57, %v37_v56 }
   0xf   :  { %4239 = vmatpush3.bf16.msra.mxu1 %v4238_v38  ;;  %v87_v1 = vld [vmem:[%s8078_s1 + $0x1d0] sm:$0xff]  ;;  %v88_v2 = vld [vmem:[%s8078_s1 + $0x1d8] sm:$0xff]  ;;  %v4246_v4 = vpack.c.bf16 %v70_v60, %v69_v58  ;;  %v4216_v5 = vpack.c.bf16 %v56_v62, %v55_v61  ;;  %v57_v11 = vld [vmem:[%s8078_s1 + $0xe0] sm:$0xff] }
  0x10   :  { %4241 = vmatprep.subr.bf16.mxu1 %v4240_v43  ;;  %v39_v6 = vld [vmem:[%s8078_s1 + $0x50] sm:$0xff]  ;;  %v40_v7 = vld [vmem:[%s8078_s1 + $0x58] sm:$0xff]  ;;  %v4248_v9 = vpack.c.bf16 %v88_v2, %v87_v1  ;;  %v58_v12 = vld [vmem:[%s8078_s1 + $0xe8] sm:$0xff] }
  0x11   :  { %4211 = vmatpush3.bf16.msra.mxu0 %v4210_v51  ;;  %v71_v8 = vld [vmem:[%s8078_s1 + $0x150] sm:$0xff]  ;;  %v72_v10 = vld [vmem:[%s8078_s1 + $0x158] sm:$0xff]  ;;  %v89_v14 = vld [vmem:[%s8078_s1 + $0x1e0] sm:$0xff]  ;;  %v4218_v16 = vpack.c.bf16 %v40_v7, %v39_v6  ;;  %v4220_v19 = vpack.c.bf16 %v58_v12, %v57_v11 }
  0x12   :  { %4213 = vmatprep.subr.bf16.mxu0 %v4212_v55  ;;  %v90_v15 = vld [vmem:[%s8078_s1 + $0x1e8] sm:$0xff]  ;;  %v41_v17 = vld [vmem:[%s8078_s1 + $0x60] sm:$0xff]  ;;  %v4250_v18 = vpack.c.bf16 %v72_v10, %v71_v8  ;;  %v59_v25 = vld [vmem:[%s8078_s1 + $0xf0] sm:$0xff] }
  0x13   :  { %4243 = vmatpush3.bf16.msra.mxu1 %v4242_v54  ;;  %v42_v20 = vld [vmem:[%s8078_s1 + $0x68] sm:$0xff]  ;;  %v73_v21 = vld [vmem:[%s8078_s1 + $0x160] sm:$0xff]  ;;  %v4252_v23 = vpack.c.bf16 %v90_v15, %v89_v14  ;;  %v60_v26 = vld [vmem:[%s8078_s1 + $0xf8] sm:$0xff] }
  0x14   :  { %4245 = vmatprep.subr.bf16.mxu1 %v4244_v59  ;;  %v15_v22 = vld [vmem:[%s8077_s0] sm:$0xff]  ;;  %v74_v24 = vld [vmem:[%s8078_s1 + $0x168] sm:$0xff]  ;;  %v91_v29 = vld [vmem:[%s8078_s1 + $0x1f0] sm:$0xff]  ;;  %v4222_v31 = vpack.c.bf16 %v42_v20, %v41_v17  ;;  %v4224_v35 = vpack.c.bf16 %v60_v26, %v59_v25 }
  0x15   :  { %4215 = vmatpush3.bf16.msra.mxu0 %v4214_v3  ;;  %v953_v27 = vrot.slane %v15_v22, %v5304_v13  ;;  %v946_v28 = vcombine.high %v15_v22, %v15_v22  ;;  %v92_v30 = vld [vmem:[%s8078_s1 + $0x1f8] sm:$0xff]  ;;  %v4254_v34 = vpack.c.bf16 %v74_v24, %v73_v21  ;;  %v43_v36 = vld [vmem:[%s8078_s1 + $0x70] sm:$0xff]  ;;  %v109_v41 = vld [vmem:[%s8078_s1 + $0x280] sm:$0xff] }
  0x16   :  { %4217 = vmatprep.subr.bf16.mxu0 %v4216_v5  ;;  %v44_v37 = vld [vmem:[%s8078_s1 + $0x78] sm:$0xff]  ;;  %v75_v38 = vld [vmem:[%s8078_s1 + $0x170] sm:$0xff]  ;;  %v4256_v39 = vpack.c.bf16 %v92_v30, %v91_v29  ;;  %v110_v42 = vld [vmem:[%s8078_s1 + $0x288] sm:$0xff] }
  0x17   :  { %4247 = vmatpush3.bf16.msra.mxu1 %v4246_v4  ;;  %v961_v32 = vcombine.high %v953_v27, %v953_v27  ;;  %v960_v33 = vrot.slane %v946_v28, %v5304_v13  ;;  %v76_v40 = vld [vmem:[%s8078_s1 + $0x178] sm:$0xff]  ;;  %v141_v44 = vld [vmem:[%s8078_s1 + $0x380] sm:$0xff]  ;;  %v142_v45 = vld [vmem:[%s8078_s1 + $0x388] sm:$0xff]  ;;  %v4226_v46 = vpack.c.bf16 %v44_v37, %v43_v36  ;;  %v4260_v48 = vpack.c.bf16 %v110_v42, %v109_v41 }
  0x18   :  { %4249 = vmatprep.subr.bf16.mxu1 %v4248_v9  ;;  %v4258_v47 = vpack.c.bf16 %v76_v40, %v75_v38  ;;  %v93_v49 = vld [vmem:[%s8078_s1 + $0x200] sm:$0xff]  ;;  %v94_v50 = vld [vmem:[%s8078_s1 + $0x208] sm:$0xff]  ;;  %v4292_v52 = vpack.c.bf16 %v142_v45, %v141_v44  ;;  %v111_v54 = vld [vmem:[%s8078_s1 + $0x290] sm:$0xff] }
  0x19   :  { %4219 = vmatpush3.bf16.msra.mxu0 %v4218_v16  ;;  %1304 = vmatprep.mubr.f32.mxu0 %v961_v32  ;;  %v962_v43 = vcombine.high %v960_v33, %v960_v33  ;;  %v125_v51 = vld [vmem:[%s8078_s1 + $0x300] sm:$0xff]  ;;  %v126_v53 = vld [vmem:[%s8078_s1 + $0x308] sm:$0xff]  ;;  %v112_v55 = vld [vmem:[%s8078_s1 + $0x298] sm:$0xff]  ;;  %v4262_v58 = vpack.c.bf16 %v94_v50, %v93_v49 }
  0x1a   :  { %4221 = vmatprep.subr.bf16.mxu0 %v4220_v19  ;;  %v143_v56 = vld [vmem:[%s8078_s1 + $0x390] sm:$0xff]  ;;  %v144_v57 = vld [vmem:[%s8078_s1 + $0x398] sm:$0xff]  ;;  %v4294_v59 = vpack.c.bf16 %v126_v53, %v125_v51  ;;  %v4264_v60 = vpack.c.bf16 %v112_v55, %v111_v54  ;;  %v113_v2 = vld [vmem:[%s8078_s1 + $0x2a0] sm:$0xff] }
  0x1b   :  { %4251 = vmatpush3.bf16.msra.mxu1 %v4250_v18  ;;  %1374 = vmatprep.mubr.f32.mxu1 %v962_v43  ;;  %v95_v61 = vld [vmem:[%s8078_s1 + $0x210] sm:$0xff]  ;;  %v96_v62 = vld [vmem:[%s8078_s1 + $0x218] sm:$0xff]  ;;  %v4296_v0 = vpack.c.bf16 %v144_v57, %v143_v56  ;;  %v114_v3 = vld [vmem:[%s8078_s1 + $0x2a8] sm:$0xff] }
  0x1c   :  { %4253 = vmatprep.subr.bf16.mxu1 %v4252_v23  ;;  %v127_v63 = vld [vmem:[%s8078_s1 + $0x310] sm:$0xff]  ;;  %v128_v1 = vld [vmem:[%s8078_s1 + $0x318] sm:$0xff]  ;;  %v145_v4 = vld [vmem:[%s8078_s1 + $0x3a0] sm:$0xff]  ;;  %v4266_v6 = vpack.c.bf16 %v96_v62, %v95_v61  ;;  %v4268_v8 = vpack.c.bf16 %v114_v3, %v113_v2 }
  0x1d   :  { %4223 = vmatpush3.bf16.msra.mxu0 %v4222_v31  ;;  %v146_v5 = vld [vmem:[%s8078_s1 + $0x3a8] sm:$0xff]  ;;  %v4298_v7 = vpack.c.bf16 %v128_v1, %v127_v63  ;;  %v97_v9 = vld [vmem:[%s8078_s1 + $0x220] sm:$0xff]  ;;  %v115_v15 = vld [vmem:[%s8078_s1 + $0x2b0] sm:$0xff] }
  0x1e   :  { %4225 = vmatprep.subr.bf16.mxu0 %v4224_v35  ;;  %v98_v10 = vld [vmem:[%s8078_s1 + $0x228] sm:$0xff]  ;;  %v129_v11 = vld [vmem:[%s8078_s1 + $0x320] sm:$0xff]  ;;  %v4300_v12 = vpack.c.bf16 %v146_v5, %v145_v4  ;;  %v116_v16 = vld [vmem:[%s8078_s1 + $0x2b8] sm:$0xff] }
  0x1f   :  { %4255 = vmatpush3.bf16.msra.mxu1 %v4254_v34  ;;  %v130_v14 = vld [vmem:[%s8078_s1 + $0x328] sm:$0xff]  ;;  %v147_v17 = vld [vmem:[%s8078_s1 + $0x3b0] sm:$0xff]  ;;  %v148_v18 = vld [vmem:[%s8078_s1 + $0x3b8] sm:$0xff]  ;;  %v4270_v19 = vpack.c.bf16 %v98_v10, %v97_v9  ;;  %v4272_v21 = vpack.c.bf16 %v116_v16, %v115_v15 }
  0x20   :  { %4257 = vmatprep.subr.bf16.mxu1 %v4256_v39  ;;  %v4302_v20 = vpack.c.bf16 %v130_v14, %v129_v11  ;;  %v99_v22 = vld [vmem:[%s8078_s1 + $0x230] sm:$0xff]  ;;  %v100_v23 = vld [vmem:[%s8078_s1 + $0x238] sm:$0xff]  ;;  %v4304_v25 = vpack.c.bf16 %v148_v18, %v147_v17  ;;  %v118_v28 = vld [vmem:[%s8078_s1 + $0x2c8] sm:$0xff] }
  0x21   :  { %4227 = vmatpush3.bf16.msra.mxu0 %v4226_v46  ;;  %v131_v24 = vld [vmem:[%s8078_s1 + $0x330] sm:$0xff]  ;;  %v132_v26 = vld [vmem:[%s8078_s1 + $0x338] sm:$0xff]  ;;  %v149_v29 = vld [vmem:[%s8078_s1 + $0x3c0] sm:$0xff]  ;;  %v4274_v32 = vpack.c.bf16 %v100_v23, %v99_v22 }
  0x22   :  { %4261 = vmatprep.subr.bf16.mxu0 %v4260_v48  ;;  %v150_v30 = vld [vmem:[%s8078_s1 + $0x3c8] sm:$0xff]  ;;  %v4306_v35 = vpack.c.bf16 %v132_v26, %v131_v24  ;;  %v101_v37 = vld [vmem:[%s8078_s1 + $0x240] sm:$0xff]  ;;  %v119_v42 = vld [vmem:[%s8078_s1 + $0x2d0] sm:$0xff] }
  0x23   :  { %4259 = vmatpush3.bf16.msra.mxu1 %v4258_v47  ;;  %v16_v31 = vld [vmem:[%s8077_s0 + $0x8] sm:$0xff]  ;;  %v133_v39 = vld [vmem:[%s8078_s1 + $0x340] sm:$0xff]  ;;  %v4308_v40 = vpack.c.bf16 %v150_v30, %v149_v29  ;;  %v120_v43 = vld [vmem:[%s8078_s1 + $0x2d8] sm:$0xff] }
  0x24   :  { %4293 = vmatprep.subr.bf16.mxu1 %v4292_v52  ;;  %1305 = vmatmul.mubr.f32.vlgmr.msra.gmra.mrb[0].mxu0 %v953_v27  ;;  %v117_v27 = vld [vmem:[%s8078_s1 + $0x2c0] sm:$0xff]  ;;  %v963_v34 = vcombine.high %v16_v31, %v16_v31  ;;  %v102_v38 = vld [vmem:[%s8078_s1 + $0x248] sm:$0xff]  ;;  %v151_v46 = vld [vmem:[%s8078_s1 + $0x3d0] sm:$0xff]  ;;  %v4280_v51 = vpack.c.bf16 %v120_v43, %v119_v42 }
  0x25   :  { %4263 = vmatpush3.bf16.msra.mxu0 %v4262_v58  ;;  %v4276_v36 = vpack.c.bf16 %v118_v28, %v117_v27  ;;  %v134_v41 = vld [vmem:[%s8078_s1 + $0x348] sm:$0xff]  ;;  %v152_v47 = vld [vmem:[%s8078_s1 + $0x3d8] sm:$0xff]  ;;  %v4278_v48 = vpack.c.bf16 %v102_v38, %v101_v37  ;;  %v103_v52 = vld [vmem:[%s8078_s1 + $0x250] sm:$0xff] }
  0x26   :  { %1375 = vmatmul.mubr.f32.vlgmr.msra.gmra.mrb[0].mxu1 %v960_v33  ;;  %4265 = vmatprep.subr.bf16.mxu0 %v4264_v60  ;;  %v5465_v33 = vrot.slane %v16_v31, %v5304_v13  ;;  %v5488_v45 = vrot.slane %v963_v34, %v5304_v13  ;;  %v4310_v50 = vpack.c.bf16 %v134_v41, %v133_v39  ;;  %v104_v53 = vld [vmem:[%s8078_s1 + $0x258] sm:$0xff]  ;;  %v135_v54 = vld [vmem:[%s8078_s1 + $0x350] sm:$0xff]  ;;  %v121_v57 = vld [vmem:[%s8078_s1 + $0x2e0] sm:$0xff] }
  0x27   :  { %4295 = vmatpush3.bf16.msra.mxu1 %v4294_v59  ;;  %v4312_v55 = vpack.c.bf16 %v152_v47, %v151_v46  ;;  %v136_v56 = vld [vmem:[%s8078_s1 + $0x358] sm:$0xff]  ;;  %v122_v58 = vld [vmem:[%s8078_s1 + $0x2e8] sm:$0xff]  ;;  %v153_v59 = vld [vmem:[%s8078_s1 + $0x3e0] sm:$0xff]  ;;  %v4282_v61 = vpack.c.bf16 %v104_v53, %v103_v52 }
  0x28   :  { %4297 = vmatprep.subr.bf16.mxu1 %v4296_v0  ;;  %v978_v44 = vcombine.high %v5465_v33, %v5465_v33  ;;  %v979_v49 = vcombine.high %v5488_v45, %v5488_v45  ;;  %v154_v60 = vld [vmem:[%s8078_s1 + $0x3e8] sm:$0xff]  ;;  %v4314_v62 = vpack.c.bf16 %v136_v56, %v135_v54  ;;  %v4284_v63 = vpack.c.bf16 %v122_v58, %v121_v57  ;;  %v105_v0 = vld [vmem:[%s8078_s1 + $0x260] sm:$0xff]  ;;  %v123_v5 = vld [vmem:[%s8078_s1 + $0x2f0] sm:$0xff] }
  0x29   :  { %4267 = vmatpush3.bf16.msra.mxu0 %v4266_v6  ;;  %v106_v1 = vld [vmem:[%s8078_s1 + $0x268] sm:$0xff]  ;;  %v137_v2 = vld [vmem:[%s8078_s1 + $0x360] sm:$0xff]  ;;  %v4316_v3 = vpack.c.bf16 %v154_v60, %v153_v59  ;;  %v124_v6 = vld [vmem:[%s8078_s1 + $0x2f8] sm:$0xff] }
  0x2a   :  { %4269 = vmatprep.subr.bf16.mxu0 %v4268_v8  ;;  %1444 = vmatprep.mubr.f32.mxu0 %v978_v44  ;;  %v138_v4 = vld [vmem:[%s8078_s1 + $0x368] sm:$0xff]  ;;  %v156_v8 = vld [vmem:[%s8078_s1 + $0x3f8] sm:$0xff]  ;;  %v4286_v9 = vpack.c.bf16 %v106_v1, %v105_v0  ;;  %v4288_v11 = vpack.c.bf16 %v124_v6, %v123_v5  ;;  %v139_v15 = vld [vmem:[%s8078_s1 + $0x370] sm:$0xff] }
  0x2b   :  { %4299 = vmatpush3.bf16.msra.mxu1 %v4298_v7  ;;  %1514 = vmatprep.mubr.f32.mxu1 %v979_v49  ;;  %v155_v7 = vld [vmem:[%s8078_s1 + $0x3f0] sm:$0xff]  ;;  %v4318_v10 = vpack.c.bf16 %v138_v4, %v137_v2  ;;  %v108_v14 = vld [vmem:[%s8078_s1 + $0x278] sm:$0xff]  ;;  %v173_v18 = vld [vmem:[%s8078_s1 + $0x480] sm:$0xff] }
  0x2c   :  { %4301 = vmatprep.subr.bf16.mxu1 %v4300_v12  ;;  %v107_v12 = vld [vmem:[%s8078_s1 + $0x270] sm:$0xff]  ;;  %v4320_v16 = vpack.c.bf16 %v156_v8, %v155_v7  ;;  %v140_v17 = vld [vmem:[%s8078_s1 + $0x378] sm:$0xff]  ;;  %v157_v23 = vld [vmem:[%s8078_s1 + $0x400] sm:$0xff] }
  0x2d   :  { %4271 = vmatpush3.bf16.msra.mxu0 %v4270_v19  ;;  %v174_v19 = vld [vmem:[%s8078_s1 + $0x488] sm:$0xff]  ;;  %v4290_v22 = vpack.c.bf16 %v108_v14, %v107_v12  ;;  %v4322_v24 = vpack.c.bf16 %v140_v17, %v139_v15  ;;  %v189_v27 = vld [vmem:[%s8078_s1 + $0x500] sm:$0xff]  ;;  %v175_v30 = vld [vmem:[%s8078_s1 + $0x490] sm:$0xff] }
  0x2e   :  { %4273 = vmatprep.subr.bf16.mxu0 %v4272_v21  ;;  %v206_v21 = vld [vmem:[%s8078_s1 + $0x588] sm:$0xff]  ;;  %v176_v31 = vld [vmem:[%s8078_s1 + $0x498] sm:$0xff]  ;;  %v17_v37 = vld [vmem:[%s8077_s0 + $0x10] sm:$0xff] }
  0x2f   :  { %4303 = vmatpush3.bf16.msra.mxu1 %v4302_v20  ;;  %v205_v20 = vld [vmem:[%s8078_s1 + $0x580] sm:$0xff]  ;;  %v158_v26 = vld [vmem:[%s8078_s1 + $0x408] sm:$0xff]  ;;  %v208_v34 = vld [vmem:[%s8078_s1 + $0x598] sm:$0xff]  ;;  %v4328_v38 = vpack.c.bf16 %v176_v31, %v175_v30  ;;  %v5607_v42 = vrot.slane %v17_v37, %v5304_v13  ;;  %v980_v43 = vcombine.high %v17_v37, %v17_v37 }
  0x30   :  { %4305 = vmatprep.subr.bf16.mxu1 %v4304_v25  ;;  %v4324_v25 = vpack.c.bf16 %v174_v19, %v173_v18  ;;  %v190_v28 = vld [vmem:[%s8078_s1 + $0x508] sm:$0xff]  ;;  %v4356_v29 = vpack.c.bf16 %v206_v21, %v205_v20  ;;  %v159_v39 = vld [vmem:[%s8078_s1 + $0x410] sm:$0xff]  ;;  %v192_v46 = vld [vmem:[%s8078_s1 + $0x518] sm:$0xff] }
  0x31   :  { %4275 = vmatpush3.bf16.msra.mxu0 %v4274_v32  ;;  %v207_v32 = vld [vmem:[%s8078_s1 + $0x590] sm:$0xff]  ;;  %v177_v47 = vld [vmem:[%s8078_s1 + $0x4a0] sm:$0xff]  ;;  %v5628_v52 = vrot.slane %v980_v43, %v5304_v13  ;;  %v162_v56 = vld [vmem:[%s8078_s1 + $0x428] sm:$0xff] }
  0x32   :  { %4277 = vmatprep.subr.bf16.mxu0 %v4276_v36  ;;  %v4358_v36 = vpack.c.bf16 %v190_v28, %v189_v27  ;;  %v191_v41 = vld [vmem:[%s8078_s1 + $0x510] sm:$0xff]  ;;  %v4360_v44 = vpack.c.bf16 %v208_v34, %v207_v32  ;;  %v209_v49 = vld [vmem:[%s8078_s1 + $0x5a0] sm:$0xff]  ;;  %v194_v59 = vld [vmem:[%s8078_s1 + $0x528] sm:$0xff] }
  0x33   :  { %4307 = vmatpush3.bf16.msra.mxu1 %v4306_v35  ;;  %v4326_v35 = vpack.c.bf16 %v158_v26, %v157_v23  ;;  %v193_v57 = vld [vmem:[%s8078_s1 + $0x520] sm:$0xff]  ;;  %v179_v60 = vld [vmem:[%s8078_s1 + $0x4b0] sm:$0xff]  ;;  %v164_v4 = vld [vmem:[%s8078_s1 + $0x438] sm:$0xff] }
  0x34   :  { %4309 = vmatprep.subr.bf16.mxu1 %v4308_v40  ;;  %v160_v40 = vld [vmem:[%s8078_s1 + $0x418] sm:$0xff]  ;;  %v4366_v1 = vpack.c.bf16 %v194_v59, %v193_v57  ;;  %v195_v5 = vld [vmem:[%s8078_s1 + $0x530] sm:$0xff]  ;;  %v181_v8 = vld [vmem:[%s8078_s1 + $0x4c0] sm:$0xff] }
  0x35   :  { %4279 = vmatpush3.bf16.msra.mxu0 %v4278_v48  ;;  %v178_v48 = vld [vmem:[%s8078_s1 + $0x4a8] sm:$0xff]  ;;  %v4330_v53 = vpack.c.bf16 %v160_v40, %v159_v39  ;;  %v196_v7 = vld [vmem:[%s8078_s1 + $0x538] sm:$0xff]  ;;  %v197_v18 = vld [vmem:[%s8078_s1 + $0x540] sm:$0xff] }
  0x36   :  { %4281 = vmatprep.subr.bf16.mxu0 %v4280_v51  ;;  %v995_v51 = vcombine.high %v5607_v42, %v5607_v42  ;;  %v4332_v54 = vpack.c.bf16 %v178_v48, %v177_v47  ;;  %v4370_v14 = vpack.c.bf16 %v196_v7, %v195_v5  ;;  %v166_v17 = vld [vmem:[%s8078_s1 + $0x448] sm:$0xff]  ;;  %v183_v21 = vld [vmem:[%s8078_s1 + $0x4d0] sm:$0xff]  ;;  %v200_v32 = vld [vmem:[%s8078_s1 + $0x558] sm:$0xff] }
  0x37   :  { %4311 = vmatpush3.bf16.msra.mxu1 %v4310_v50  ;;  %v210_v50 = vld [vmem:[%s8078_s1 + $0x5a8] sm:$0xff]  ;;  %v215_v23 = vld [vmem:[%s8078_s1 + $0x5d0] sm:$0xff]  ;;  %v185_v34 = vld [vmem:[%s8078_s1 + $0x4e0] sm:$0xff] }
  0x38   :  { %4313 = vmatprep.subr.bf16.mxu1 %v4312_v55  ;;  %v161_v55 = vld [vmem:[%s8078_s1 + $0x420] sm:$0xff]  ;;  %v4364_v58 = vpack.c.bf16 %v210_v50, %v209_v49  ;;  %v198_v20 = vld [vmem:[%s8078_s1 + $0x548] sm:$0xff]  ;;  %v167_v28 = vld [vmem:[%s8078_s1 + $0x450] sm:$0xff] }
  0x39   :  { %4283 = vmatpush3.bf16.msra.mxu0 %v4282_v61  ;;  %v180_v61 = vld [vmem:[%s8078_s1 + $0x4b8] sm:$0xff]  ;;  %v4334_v0 = vpack.c.bf16 %v162_v56, %v161_v55  ;;  %v4374_v26 = vpack.c.bf16 %v198_v20, %v197_v18  ;;  %v199_v30 = vld [vmem:[%s8078_s1 + $0x550] sm:$0xff]  ;;  %v218_v37 = vld [vmem:[%s8078_s1 + $0x5e8] sm:$0xff] }
  0x3a   :  { %4285 = vmatprep.subr.bf16.mxu0 %v4284_v63  ;;  %v212_v63 = vld [vmem:[%s8078_s1 + $0x5b8] sm:$0xff]  ;;  %v4336_v2 = vpack.c.bf16 %v180_v61, %v179_v60  ;;  %v4378_v39 = vpack.c.bf16 %v200_v32, %v199_v30  ;;  %v170_v43 = vld [vmem:[%s8078_s1 + $0x468] sm:$0xff]  ;;  %v187_v48 = vld [vmem:[%s8078_s1 + $0x4f0] sm:$0xff] }
  0x3b   :  { %4315 = vmatpush3.bf16.msra.mxu1 %v4314_v62  ;;  %v211_v62 = vld [vmem:[%s8078_s1 + $0x5b0] sm:$0xff]  ;;  %v202_v47 = vld [vmem:[%s8078_s1 + $0x568] sm:$0xff]  ;;  %v188_v49 = vld [vmem:[%s8078_s1 + $0x4f8] sm:$0xff] }
  0x3c   :  { %4317 = vmatprep.subr.bf16.mxu1 %v4316_v3  ;;  %v163_v3 = vld [vmem:[%s8078_s1 + $0x430] sm:$0xff]  ;;  %v4368_v6 = vpack.c.bf16 %v212_v63, %v211_v62  ;;  %v4352_v55 = vpack.c.bf16 %v188_v49, %v187_v48  ;;  %v172_v57 = vld [vmem:[%s8078_s1 + $0x478] sm:$0xff]  ;;  %v237_v60 = vld [vmem:[%s8078_s1 + $0x680] sm:$0xff] }
  0x3d   :  { %4287 = vmatpush3.bf16.msra.mxu0 %v4286_v9  ;;  %v182_v9 = vld [vmem:[%s8078_s1 + $0x4c8] sm:$0xff]  ;;  %v4338_v12 = vpack.c.bf16 %v164_v4, %v163_v3  ;;  %v219_v50 = vld [vmem:[%s8078_s1 + $0x5f0] sm:$0xff]  ;;  %v204_v59 = vld [vmem:[%s8078_s1 + $0x578] sm:$0xff] }
  0x3e   :  { %4289 = vmatprep.subr.bf16.mxu0 %v4288_v11  ;;  %v214_v11 = vld [vmem:[%s8078_s1 + $0x5c8] sm:$0xff]  ;;  %v4340_v15 = vpack.c.bf16 %v182_v9, %v181_v8  ;;  %v171_v56 = vld [vmem:[%s8078_s1 + $0x470] sm:$0xff]  ;;  %v269_v62 = vld [vmem:[%s8078_s1 + $0x780] sm:$0xff] }
  0x3f   :  { %4319 = vmatpush3.bf16.msra.mxu1 %v4318_v10  ;;  %v213_v10 = vld [vmem:[%s8078_s1 + $0x5c0] sm:$0xff]  ;;  %v238_v61 = vld [vmem:[%s8078_s1 + $0x688] sm:$0xff]  ;;  %v239_v9 = vld [vmem:[%s8078_s1 + $0x690] sm:$0xff] }
  0x40   :  { %4321 = vmatprep.subr.bf16.mxu1 %v4320_v16  ;;  %v165_v16 = vld [vmem:[%s8078_s1 + $0x440] sm:$0xff]  ;;  %v4372_v19 = vpack.c.bf16 %v214_v11, %v213_v10  ;;  %v270_v63 = vld [vmem:[%s8078_s1 + $0x788] sm:$0xff]  ;;  %v4388_v3 = vpack.c.bf16 %v238_v61, %v237_v60  ;;  %v240_v10 = vld [vmem:[%s8078_s1 + $0x698] sm:$0xff] }
  0x41   :  { %4291 = vmatpush3.bf16.msra.mxu0 %v4290_v22  ;;  %v184_v22 = vld [vmem:[%s8078_s1 + $0x4d8] sm:$0xff]  ;;  %v221_v4 = vld [vmem:[%s8078_s1 + $0x600] sm:$0xff]  ;;  %v222_v5 = vld [vmem:[%s8078_s1 + $0x608] sm:$0xff]  ;;  %v4420_v7 = vpack.c.bf16 %v270_v63, %v269_v62  ;;  %v4392_v18 = vpack.c.bf16 %v240_v10, %v239_v9 }
  0x42   :  { %4325 = vmatprep.subr.bf16.mxu0 %v4324_v25  ;;  %v4342_v25 = vpack.c.bf16 %v166_v17, %v165_v16  ;;  %v4344_v27 = vpack.c.bf16 %v184_v22, %v183_v21  ;;  %v254_v8 = vld [vmem:[%s8078_s1 + $0x708] sm:$0xff]  ;;  %v4390_v16 = vpack.c.bf16 %v222_v5, %v221_v4  ;;  %v224_v20 = vld [vmem:[%s8078_s1 + $0x618] sm:$0xff]  ;;  %v255_v21 = vld [vmem:[%s8078_s1 + $0x710] sm:$0xff] }
  0x43   :  { %4323 = vmatpush3.bf16.msra.mxu1 %v4322_v24  ;;  %v216_v24 = vld [vmem:[%s8078_s1 + $0x5d8] sm:$0xff]  ;;  %v259_v48 = vld [vmem:[%s8078_s1 + $0x730] sm:$0xff]  ;;  %v262_v61 = vld [vmem:[%s8078_s1 + $0x748] sm:$0xff] }
  0x44   :  { %4357 = vmatprep.subr.bf16.mxu1 %v4356_v29  ;;  %1445 = vmatmul.mubr.f32.vlgmr.msra.gmra.mrb[2].mxu0 %v5465_v33  ;;  %v4362_v33 = vpack.c.bf16 %v192_v46, %v191_v41  ;;  %v168_v29 = vld [vmem:[%s8078_s1 + $0x458] sm:$0xff]  ;;  %v4376_v31 = vpack.c.bf16 %v216_v24, %v215_v23  ;;  %v169_v41 = vld [vmem:[%s8078_s1 + $0x460] sm:$0xff]  ;;  %v247_v62 = vld [vmem:[%s8078_s1 + $0x6d0] sm:$0xff] }
  0x45   :  { %4327 = vmatpush3.bf16.msra.mxu0 %v4326_v35  ;;  %1584 = vmatprep.mubr.f32.mxu0 %v995_v51  ;;  %v186_v35 = vld [vmem:[%s8078_s1 + $0x4e8] sm:$0xff]  ;;  %v220_v51 = vld [vmem:[%s8078_s1 + $0x5f8] sm:$0xff]  ;;  %v241_v24 = vld [vmem:[%s8078_s1 + $0x6a0] sm:$0xff] }
  0x46   :  { %1515 = vmatmul.mubr.f32.vlgmr.msra.gmra.mrb[2].mxu1 %v5488_v45  ;;  %4329 = vmatprep.subr.bf16.mxu0 %v4328_v38  ;;  %v996_v45 = vcombine.high %v5628_v52, %v5628_v52  ;;  %v4346_v38 = vpack.c.bf16 %v168_v29, %v167_v28  ;;  %v4348_v40 = vpack.c.bf16 %v186_v35, %v185_v34  ;;  %v256_v23 = vld [vmem:[%s8078_s1 + $0x718] sm:$0xff]  ;;  %v274_v28 = vld [vmem:[%s8078_s1 + $0x7a8] sm:$0xff]  ;;  %v257_v35 = vld [vmem:[%s8078_s1 + $0x720] sm:$0xff] }
  0x47   :  { %4359 = vmatpush3.bf16.msra.mxu1 %v4358_v36  ;;  %v217_v36 = vld [vmem:[%s8078_s1 + $0x5e0] sm:$0xff]  ;;  %v226_v34 = vld [vmem:[%s8078_s1 + $0x628] sm:$0xff]  ;;  %v248_v63 = vld [vmem:[%s8078_s1 + $0x6d8] sm:$0xff] }
  0x48   :  { %4361 = vmatprep.subr.bf16.mxu1 %v4360_v44  ;;  %1654 = vmatprep.mubr.f32.mxu1 %v996_v45  ;;  %v201_v44 = vld [vmem:[%s8078_s1 + $0x560] sm:$0xff]  ;;  %v4380_v46 = vpack.c.bf16 %v218_v37, %v217_v36  ;;  %v203_v45 = vld [vmem:[%s8078_s1 + $0x570] sm:$0xff]  ;;  %v4408_v4 = vpack.c.bf16 %v248_v63, %v247_v62  ;;  %v264_v9 = vld [vmem:[%s8078_s1 + $0x758] sm:$0xff] }
  0x49   :  { %4331 = vmatpush3.bf16.msra.mxu0 %v4330_v53  ;;  %v4350_v53 = vpack.c.bf16 %v170_v43, %v169_v41  ;;  %v243_v37 = vld [vmem:[%s8078_s1 + $0x6b0] sm:$0xff]  ;;  %v249_v10 = vld [vmem:[%s8078_s1 + $0x6e0] sm:$0xff] }
  0x4a   :  { %4333 = vmatprep.subr.bf16.mxu0 %v4332_v54  ;;  %v4382_v54 = vpack.c.bf16 %v202_v47, %v201_v44  ;;  %v228_v47 = vld [vmem:[%s8078_s1 + $0x638] sm:$0xff]  ;;  %v231_v5 = vld [vmem:[%s8078_s1 + $0x650] sm:$0xff] }
  0x4b   :  { %4363 = vmatpush3.bf16.msra.mxu1 %v4362_v33  ;;  %v18_v33 = vld [vmem:[%s8077_s0 + $0x18] sm:$0xff]  ;;  %v319_v62 = vld [vmem:[%s8078_s1 + $0x910] sm:$0xff] }
  0x4c   :  { %4365 = vmatprep.subr.bf16.mxu1 %v4364_v58  ;;  %v4384_v58 = vpack.c.bf16 %v220_v51, %v219_v50  ;;  %v5799_v11 = vrot.slane %v18_v33, %v5304_v13  ;;  %v260_v50 = vld [vmem:[%s8078_s1 + $0x738] sm:$0xff]  ;;  %v245_v51 = vld [vmem:[%s8078_s1 + $0x6c0] sm:$0xff] }
  0x4d   :  { %4335 = vmatpush3.bf16.msra.mxu0 %v4334_v0  ;;  %v997_v0 = vcombine.high %v18_v33, %v18_v33  ;;  %v277_v33 = vld [vmem:[%s8078_s1 + $0x7c0] sm:$0xff] }
  0x4e   :  { %4337 = vmatprep.subr.bf16.mxu0 %v4336_v2  ;;  %v4386_v2 = vpack.c.bf16 %v204_v59, %v203_v45  ;;  %v229_v45 = vld [vmem:[%s8078_s1 + $0x640] sm:$0xff] }
  0x4f   :  { %4367 = vmatpush3.bf16.msra.mxu1 %v4366_v1  ;;  %v4354_v1 = vpack.c.bf16 %v172_v57, %v171_v56  ;;  %v4434_v56 = vpack.c.bf16 %v260_v50, %v259_v48  ;;  %v261_v59 = vld [vmem:[%s8078_s1 + $0x740] sm:$0xff]  ;;  %v286_v48 = vld [vmem:[%s8078_s1 + $0x808] sm:$0xff] }
  0x50   :  { %4369 = vmatprep.subr.bf16.mxu1 %v4368_v6  ;;  %v253_v6 = vld [vmem:[%s8078_s1 + $0x700] sm:$0xff] }
  0x51   :  { %4339 = vmatpush3.bf16.msra.mxu0 %v4338_v12  ;;  %v271_v12 = vld [vmem:[%s8078_s1 + $0x790] sm:$0xff]  ;;  %v4422_v17 = vpack.c.bf16 %v254_v8, %v253_v6  ;;  %v232_v6 = vld [vmem:[%s8078_s1 + $0x658] sm:$0xff] }
  0x52   :  { %4341 = vmatprep.subr.bf16.mxu0 %v4340_v15  ;;  %v5808_v15 = vrot.slane %v997_v0, %v5304_v13  ;;  %v279_v0 = vld [vmem:[%s8078_s1 + $0x7d0] sm:$0xff] }
  0x53   :  { %4371 = vmatpush3.bf16.msra.mxu1 %v4370_v14  ;;  %v272_v14 = vld [vmem:[%s8078_s1 + $0x798] sm:$0xff] }
  0x54   :  { %4373 = vmatprep.subr.bf16.mxu1 %v4372_v19  ;;  %v223_v19 = vld [vmem:[%s8078_s1 + $0x610] sm:$0xff]  ;;  %v4424_v22 = vpack.c.bf16 %v272_v14, %v271_v12  ;;  %v1013_v29 = vcombine.high %v5808_v15, %v5808_v15  ;;  %v250_v12 = vld [vmem:[%s8078_s1 + $0x6e8] sm:$0xff]  ;;  %v281_v14 = vld [vmem:[%s8078_s1 + $0x7e0] sm:$0xff] }
  0x55   :  { %4343 = vmatpush3.bf16.msra.mxu0 %v4342_v25  ;;  %v242_v25 = vld [vmem:[%s8078_s1 + $0x6a8] sm:$0xff]  ;;  %v4394_v30 = vpack.c.bf16 %v224_v20, %v223_v19  ;;  %v4412_v19 = vpack.c.bf16 %v250_v12, %v249_v10  ;;  %v233_v20 = vld [vmem:[%s8078_s1 + $0x660] sm:$0xff] }
  0x56   :  { %4345 = vmatprep.subr.bf16.mxu0 %v4344_v27  ;;  %v273_v27 = vld [vmem:[%s8078_s1 + $0x7a0] sm:$0xff]  ;;  %v4396_v32 = vpack.c.bf16 %v242_v25, %v241_v24  ;;  %v266_v24 = vld [vmem:[%s8078_s1 + $0x768] sm:$0xff]  ;;  %v251_v25 = vld [vmem:[%s8078_s1 + $0x6f0] sm:$0xff] }
  0x57   :  { %4375 = vmatpush3.bf16.msra.mxu1 %v4374_v26  ;;  %v1012_v26 = vcombine.high %v5799_v11, %v5799_v11  ;;  %v4428_v36 = vpack.c.bf16 %v274_v28, %v273_v27  ;;  %v283_v27 = vld [vmem:[%s8078_s1 + $0x7f0] sm:$0xff]  ;;  %v284_v28 = vld [vmem:[%s8078_s1 + $0x7f8] sm:$0xff]  ;;  %v290_v10 = vld [vmem:[%s8078_s1 + $0x828] sm:$0xff] }
  0x58   :  { %4377 = vmatprep.subr.bf16.mxu1 %v4376_v31  ;;  %v4426_v31 = vpack.c.bf16 %v256_v23, %v255_v21  ;;  %v234_v21 = vld [vmem:[%s8078_s1 + $0x668] sm:$0xff]  ;;  %v321_v12 = vld [vmem:[%s8078_s1 + $0x920] sm:$0xff] }
  0x59   :  { %4347 = vmatpush3.bf16.msra.mxu0 %v4346_v38  ;;  %v244_v38 = vld [vmem:[%s8078_s1 + $0x6b8] sm:$0xff] }
  0x5a   :  { %4349 = vmatprep.subr.bf16.mxu0 %v4348_v40  ;;  %v276_v40 = vld [vmem:[%s8078_s1 + $0x7b8] sm:$0xff]  ;;  %v4400_v44 = vpack.c.bf16 %v244_v38, %v243_v37  ;;  %v301_v37 = vld [vmem:[%s8078_s1 + $0x880] sm:$0xff]  ;;  %v302_v38 = vld [vmem:[%s8078_s1 + $0x888] sm:$0xff] }
  0x5b   :  { %4379 = vmatpush3.bf16.msra.mxu1 %v4378_v39  ;;  %v275_v39 = vld [vmem:[%s8078_s1 + $0x7b0] sm:$0xff] }
  0x5c   :  { %4381 = vmatprep.subr.bf16.mxu1 %v4380_v46  ;;  %v227_v46 = vld [vmem:[%s8078_s1 + $0x630] sm:$0xff]  ;;  %v4432_v49 = vpack.c.bf16 %v276_v40, %v275_v39  ;;  %v333_v39 = vld [vmem:[%s8078_s1 + $0x980] sm:$0xff]  ;;  %v334_v40 = vld [vmem:[%s8078_s1 + $0x988] sm:$0xff] }
  0x5d   :  { %4351 = vmatpush3.bf16.msra.mxu0 %v4350_v53  ;;  %v246_v53 = vld [vmem:[%s8078_s1 + $0x6c8] sm:$0xff]  ;;  %v4484_v50 = vpack.c.bf16 %v334_v40, %v333_v39  ;;  %v311_v39 = vld [vmem:[%s8078_s1 + $0x8d0] sm:$0xff]  ;;  %v312_v40 = vld [vmem:[%s8078_s1 + $0x8d8] sm:$0xff] }
  0x5e   :  { %4353 = vmatprep.subr.bf16.mxu0 %v4352_v55  ;;  %v4402_v55 = vpack.c.bf16 %v228_v47, %v227_v46  ;;  %v4404_v57 = vpack.c.bf16 %v246_v53, %v245_v51  ;;  %v4452_v46 = vpack.c.bf16 %v302_v38, %v301_v37  ;;  %v285_v47 = vld [vmem:[%s8078_s1 + $0x800] sm:$0xff]  ;;  %v318_v51 = vld [vmem:[%s8078_s1 + $0x908] sm:$0xff]  ;;  %v303_v53 = vld [vmem:[%s8078_s1 + $0x890] sm:$0xff] }
  0x5f   :  { %4383 = vmatpush3.bf16.msra.mxu1 %v4382_v54  ;;  %v278_v54 = vld [vmem:[%s8078_s1 + $0x7c8] sm:$0xff] }
  0x60   :  { %4385 = vmatprep.subr.bf16.mxu1 %v4384_v58  ;;  %v230_v58 = vld [vmem:[%s8078_s1 + $0x648] sm:$0xff]  ;;  %v4436_v60 = vpack.c.bf16 %v278_v54, %v277_v33  ;;  %v304_v33 = vld [vmem:[%s8078_s1 + $0x898] sm:$0xff] }
  0x61   :  { %4355 = vmatpush3.bf16.msra.mxu0 %v4354_v1  ;;  %v280_v1 = vld [vmem:[%s8078_s1 + $0x7d8] sm:$0xff]  ;;  %v326_v38 = vld [vmem:[%s8078_s1 + $0x948] sm:$0xff] }
  0x62   :  { %4389 = vmatprep.subr.bf16.mxu0 %v4388_v3  ;;  %v4438_v3 = vpack.c.bf16 %v262_v61, %v261_v59  ;;  %v4440_v8 = vpack.c.bf16 %v280_v1, %v279_v0  ;;  %v4456_v59 = vpack.c.bf16 %v304_v33, %v303_v53  ;;  %v288_v61 = vld [vmem:[%s8078_s1 + $0x818] sm:$0xff]  ;;  %v305_v1 = vld [vmem:[%s8078_s1 + $0x8a0] sm:$0xff] }
  0x63   :  { %4387 = vmatpush3.bf16.msra.mxu1 %v4386_v2  ;;  %v4406_v2 = vpack.c.bf16 %v230_v58, %v229_v45  ;;  %v4454_v45 = vpack.c.bf16 %v286_v48, %v285_v47  ;;  %v320_v0 = vld [vmem:[%s8078_s1 + $0x918] sm:$0xff]  ;;  %v4472_v47 = vpack.c.bf16 %v312_v40, %v311_v39  ;;  %v295_v48 = vld [vmem:[%s8078_s1 + $0x850] sm:$0xff]  ;;  %v313_v33 = vld [vmem:[%s8078_s1 + $0x8e0] sm:$0xff] }
  0x64   :  { %4421 = vmatprep.subr.bf16.mxu1 %v4420_v7  ;;  %1585 = vmatmul.mubr.f32.vlgmr.msra.gmra.mrb[4].mxu0 %v5607_v42  ;;  %v225_v42 = vld [vmem:[%s8078_s1 + $0x620] sm:$0xff]  ;;  %v263_v7 = vld [vmem:[%s8078_s1 + $0x750] sm:$0xff]  ;;  %v328_v53 = vld [vmem:[%s8078_s1 + $0x958] sm:$0xff] }
  0x65   :  { %4391 = vmatpush3.bf16.msra.mxu0 %v4390_v16  ;;  %1724 = vmatprep.mubr.f32.mxu0 %v1012_v26  ;;  %v4398_v41 = vpack.c.bf16 %v226_v34, %v225_v42  ;;  %v282_v16 = vld [vmem:[%s8078_s1 + $0x7e8] sm:$0xff]  ;;  %v252_v26 = vld [vmem:[%s8078_s1 + $0x6f8] sm:$0xff]  ;;  %v235_v42 = vld [vmem:[%s8078_s1 + $0x670] sm:$0xff] }
  0x66   :  { %1655 = vmatmul.mubr.f32.vlgmr.msra.gmra.mrb[4].mxu1 %v5628_v52  ;;  %4393 = vmatprep.subr.bf16.mxu0 %v4392_v18  ;;  %v258_v52 = vld [vmem:[%s8078_s1 + $0x728] sm:$0xff]  ;;  %v4442_v18 = vpack.c.bf16 %v264_v9, %v263_v7  ;;  %v4444_v23 = vpack.c.bf16 %v282_v16, %v281_v14  ;;  %v236_v34 = vld [vmem:[%s8078_s1 + $0x678] sm:$0xff]  ;;  %v307_v16 = vld [vmem:[%s8078_s1 + $0x8b0] sm:$0xff] }
  0x67   :  { %4423 = vmatpush3.bf16.msra.mxu1 %v4422_v17  ;;  %1794 = vmatprep.mubr.f32.mxu1 %v1013_v29  ;;  %v4430_v43 = vpack.c.bf16 %v258_v52, %v257_v35  ;;  %v4410_v17 = vpack.c.bf16 %v232_v6, %v231_v5  ;;  %v4414_v29 = vpack.c.bf16 %v234_v21, %v233_v20  ;;  %v267_v35 = vld [vmem:[%s8078_s1 + $0x770] sm:$0xff]  ;;  %v268_v52 = vld [vmem:[%s8078_s1 + $0x778] sm:$0xff]  ;;  %v338_v5 = vld [vmem:[%s8078_s1 + $0x9a8] sm:$0xff] }
  0x68   :  { %4425 = vmatprep.subr.bf16.mxu1 %v4424_v22  ;;  %v265_v22 = vld [vmem:[%s8078_s1 + $0x760] sm:$0xff]  ;;  %v383_v39 = vld [vmem:[%s8078_s1 + $0xb10] sm:$0xff] }
  0x69   :  { %4395 = vmatpush3.bf16.msra.mxu0 %v4394_v30  ;;  %v19_v30 = vld [vmem:[%s8077_s0 + $0x20] sm:$0xff] }
  0x6a   :  { %4397 = vmatprep.subr.bf16.mxu0 %v4396_v32  ;;  %v4416_v32 = vpack.c.bf16 %v252_v26, %v251_v25  ;;  %v6006_v54 = vrot.slane %v19_v30, %v5304_v13  ;;  %v323_v25 = vld [vmem:[%s8078_s1 + $0x930] sm:$0xff] }
  0x6b   :  { %4427 = vmatpush3.bf16.msra.mxu1 %v4426_v31  ;;  %v4446_v31 = vpack.c.bf16 %v266_v24, %v265_v22  ;;  %v292_v24 = vld [vmem:[%s8078_s1 + $0x838] sm:$0xff] }
  0x6c   :  { %4429 = vmatprep.subr.bf16.mxu1 %v4428_v36  ;;  %v4448_v36 = vpack.c.bf16 %v284_v28, %v283_v27  ;;  %v324_v27 = vld [vmem:[%s8078_s1 + $0x938] sm:$0xff]  ;;  %v309_v28 = vld [vmem:[%s8078_s1 + $0x8c0] sm:$0xff] }
  0x6d   :  { %4399 = vmatpush3.bf16.msra.mxu0 %v4398_v41  ;;  %v1014_v41 = vcombine.high %v19_v30, %v19_v30  ;;  %v341_v30 = vld [vmem:[%s8078_s1 + $0x9c0] sm:$0xff] }
  0x6e   :  { %4401 = vmatprep.subr.bf16.mxu0 %v4400_v44  ;;  %v4450_v44 = vpack.c.bf16 %v268_v52, %v267_v35  ;;  %v293_v35 = vld [vmem:[%s8078_s1 + $0x840] sm:$0xff] }
  0x6f   :  { %4431 = vmatpush3.bf16.msra.mxu1 %v4430_v43  ;;  %v4418_v43 = vpack.c.bf16 %v236_v34, %v235_v42  ;;  %v4498_v42 = vpack.c.bf16 %v324_v27, %v323_v25  ;;  %v325_v52 = vld [vmem:[%s8078_s1 + $0x940] sm:$0xff]  ;;  %v350_v25 = vld [vmem:[%s8078_s1 + $0xa08] sm:$0xff] }
  0x70   :  { %4433 = vmatprep.subr.bf16.mxu1 %v4432_v49  ;;  %v317_v49 = vld [vmem:[%s8078_s1 + $0x900] sm:$0xff] }
  0x71   :  { %4403 = vmatpush3.bf16.msra.mxu0 %v4402_v55  ;;  %v335_v55 = vld [vmem:[%s8078_s1 + $0x990] sm:$0xff]  ;;  %v4486_v58 = vpack.c.bf16 %v318_v51, %v317_v49  ;;  %v296_v49 = vld [vmem:[%s8078_s1 + $0x858] sm:$0xff] }
  0x72   :  { %4405 = vmatprep.subr.bf16.mxu0 %v4404_v57  ;;  %v6015_v57 = vrot.slane %v1014_v41, %v5304_v13  ;;  %v343_v41 = vld [vmem:[%s8078_s1 + $0x9d0] sm:$0xff] }
  0x73   :  { %4435 = vmatpush3.bf16.msra.mxu1 %v4434_v56  ;;  %v336_v56 = vld [vmem:[%s8078_s1 + $0x998] sm:$0xff] }
  0x74   :  { %4437 = vmatprep.subr.bf16.mxu1 %v4436_v60  ;;  %v287_v60 = vld [vmem:[%s8078_s1 + $0x810] sm:$0xff]  ;;  %v4488_v63 = vpack.c.bf16 %v336_v56, %v335_v55  ;;  %v1030_v6 = vcombine.high %v6015_v57, %v6015_v57  ;;  %v314_v55 = vld [vmem:[%s8078_s1 + $0x8e8] sm:$0xff]  ;;  %v345_v56 = vld [vmem:[%s8078_s1 + $0x9e0] sm:$0xff] }
  0x75   :  { %4407 = vmatpush3.bf16.msra.mxu0 %v4406_v2  ;;  %v306_v2 = vld [vmem:[%s8078_s1 + $0x8a8] sm:$0xff]  ;;  %v4458_v7 = vpack.c.bf16 %v288_v61, %v287_v60  ;;  %v4476_v60 = vpack.c.bf16 %v314_v55, %v313_v33  ;;  %v297_v61 = vld [vmem:[%s8078_s1 + $0x860] sm:$0xff] }
  0x76   :  { %4409 = vmatprep.subr.bf16.mxu0 %v4408_v4  ;;  %v337_v4 = vld [vmem:[%s8078_s1 + $0x9a0] sm:$0xff]  ;;  %v4460_v9 = vpack.c.bf16 %v306_v2, %v305_v1  ;;  %v330_v1 = vld [vmem:[%s8078_s1 + $0x968] sm:$0xff]  ;;  %v315_v2 = vld [vmem:[%s8078_s1 + $0x8f0] sm:$0xff] }
  0x77   :  { %4439 = vmatpush3.bf16.msra.mxu1 %v4438_v3  ;;  %v1029_v3 = vcombine.high %v6006_v54, %v6006_v54  ;;  %v4492_v14 = vpack.c.bf16 %v338_v5, %v337_v4  ;;  %v347_v4 = vld [vmem:[%s8078_s1 + $0x9f0] sm:$0xff]  ;;  %v348_v5 = vld [vmem:[%s8078_s1 + $0x9f8] sm:$0xff]  ;;  %v354_v33 = vld [vmem:[%s8078_s1 + $0xa28] sm:$0xff] }
  0x78   :  { %4441 = vmatprep.subr.bf16.mxu1 %v4440_v8  ;;  %v4490_v8 = vpack.c.bf16 %v320_v0, %v319_v62  ;;  %v298_v62 = vld [vmem:[%s8078_s1 + $0x868] sm:$0xff]  ;;  %v385_v55 = vld [vmem:[%s8078_s1 + $0xb20] sm:$0xff] }
  0x79   :  { %4411 = vmatpush3.bf16.msra.mxu0 %v4410_v17  ;;  %v308_v17 = vld [vmem:[%s8078_s1 + $0x8b8] sm:$0xff] }
  0x7a   :  { %4413 = vmatprep.subr.bf16.mxu0 %v4412_v19  ;;  %v340_v19 = vld [vmem:[%s8078_s1 + $0x9b8] sm:$0xff]  ;;  %v4464_v22 = vpack.c.bf16 %v308_v17, %v307_v16  ;;  %v365_v16 = vld [vmem:[%s8078_s1 + $0xa80] sm:$0xff]  ;;  %v366_v17 = vld [vmem:[%s8078_s1 + $0xa88] sm:$0xff] }
  0x7b   :  { %4443 = vmatpush3.bf16.msra.mxu1 %v4442_v18  ;;  %v339_v18 = vld [vmem:[%s8078_s1 + $0x9b0] sm:$0xff] }
  0x7c   :  { %4445 = vmatprep.subr.bf16.mxu1 %v4444_v23  ;;  %v291_v23 = vld [vmem:[%s8078_s1 + $0x830] sm:$0xff]  ;;  %v4496_v26 = vpack.c.bf16 %v340_v19, %v339_v18  ;;  %v397_v18 = vld [vmem:[%s8078_s1 + $0xb80] sm:$0xff]  ;;  %v398_v19 = vld [vmem:[%s8078_s1 + $0xb88] sm:$0xff] }
  0x7d   :  { %4415 = vmatpush3.bf16.msra.mxu0 %v4414_v29  ;;  %v310_v29 = vld [vmem:[%s8078_s1 + $0x8c8] sm:$0xff]  ;;  %v4548_v27 = vpack.c.bf16 %v398_v19, %v397_v18  ;;  %v375_v18 = vld [vmem:[%s8078_s1 + $0xad0] sm:$0xff]  ;;  %v376_v19 = vld [vmem:[%s8078_s1 + $0xad8] sm:$0xff] }
  0x7e   :  { %4417 = vmatprep.subr.bf16.mxu0 %v4416_v32  ;;  %v4466_v32 = vpack.c.bf16 %v292_v24, %v291_v23  ;;  %v4468_v34 = vpack.c.bf16 %v310_v29, %v309_v28  ;;  %v4516_v23 = vpack.c.bf16 %v366_v17, %v365_v16  ;;  %v349_v24 = vld [vmem:[%s8078_s1 + $0xa00] sm:$0xff]  ;;  %v382_v28 = vld [vmem:[%s8078_s1 + $0xb08] sm:$0xff]  ;;  %v367_v29 = vld [vmem:[%s8078_s1 + $0xa90] sm:$0xff] }
  0x7f   :  { %4447 = vmatpush3.bf16.msra.mxu1 %v4446_v31  ;;  %v342_v31 = vld [vmem:[%s8078_s1 + $0x9c8] sm:$0xff] }
  0x80   :  { %4449 = vmatprep.subr.bf16.mxu1 %v4448_v36  ;;  %v294_v36 = vld [vmem:[%s8078_s1 + $0x848] sm:$0xff]  ;;  %v4500_v37 = vpack.c.bf16 %v342_v31, %v341_v30  ;;  %v368_v30 = vld [vmem:[%s8078_s1 + $0xa98] sm:$0xff] }
  0x81   :  { %4419 = vmatpush3.bf16.msra.mxu0 %v4418_v43  ;;  %v344_v43 = vld [vmem:[%s8078_s1 + $0x9d8] sm:$0xff]  ;;  %v390_v17 = vld [vmem:[%s8078_s1 + $0xb48] sm:$0xff] }
  0x82   :  { %4453 = vmatprep.subr.bf16.mxu0 %v4452_v46  ;;  %v4502_v46 = vpack.c.bf16 %v326_v38, %v325_v52  ;;  %v4504_v51 = vpack.c.bf16 %v344_v43, %v343_v41  ;;  %v4520_v52 = vpack.c.bf16 %v368_v30, %v367_v29  ;;  %v352_v38 = vld [vmem:[%s8078_s1 + $0xa18] sm:$0xff]  ;;  %v369_v43 = vld [vmem:[%s8078_s1 + $0xaa0] sm:$0xff] }
  0x83   :  { %4451 = vmatpush3.bf16.msra.mxu1 %v4450_v44  ;;  %v4470_v44 = vpack.c.bf16 %v294_v36, %v293_v35  ;;  %v4518_v35 = vpack.c.bf16 %v350_v25, %v349_v24  ;;  %v384_v41 = vld [vmem:[%s8078_s1 + $0xb18] sm:$0xff]  ;;  %v4536_v24 = vpack.c.bf16 %v376_v19, %v375_v18  ;;  %v359_v25 = vld [vmem:[%s8078_s1 + $0xa50] sm:$0xff]  ;;  %v377_v30 = vld [vmem:[%s8078_s1 + $0xae0] sm:$0xff] }
  0x84   :  { %4485 = vmatprep.subr.bf16.mxu1 %v4484_v50  ;;  %1725 = vmatmul.mubr.f32.vlgmr.msra.gmra.mrb[6].mxu0 %v5799_v11  ;;  %v289_v11 = vld [vmem:[%s8078_s1 + $0x820] sm:$0xff]  ;;  %v327_v50 = vld [vmem:[%s8078_s1 + $0x950] sm:$0xff]  ;;  %v392_v29 = vld [vmem:[%s8078_s1 + $0xb58] sm:$0xff] }
  0x85   :  { %4455 = vmatpush3.bf16.msra.mxu0 %v4454_v45  ;;  %1864 = vmatprep.mubr.f32.mxu0 %v1029_v3  ;;  %v4462_v20 = vpack.c.bf16 %v290_v10, %v289_v11  ;;  %v346_v45 = vld [vmem:[%s8078_s1 + $0x9e8] sm:$0xff]  ;;  %v316_v3 = vld [vmem:[%s8078_s1 + $0x8f8] sm:$0xff]  ;;  %v299_v11 = vld [vmem:[%s8078_s1 + $0x870] sm:$0xff] }
  0x86   :  { %1795 = vmatmul.mubr.f32.vlgmr.msra.gmra.mrb[6].mxu1 %v5808_v15  ;;  %4457 = vmatprep.subr.bf16.mxu0 %v4456_v59  ;;  %v322_v15 = vld [vmem:[%s8078_s1 + $0x928] sm:$0xff]  ;;  %v4506_v59 = vpack.c.bf16 %v328_v53, %v327_v50  ;;  %v4508_v0 = vpack.c.bf16 %v346_v45, %v345_v56  ;;  %v300_v10 = vld [vmem:[%s8078_s1 + $0x878] sm:$0xff]  ;;  %v371_v45 = vld [vmem:[%s8078_s1 + $0xab0] sm:$0xff] }
  0x87   :  { %4487 = vmatpush3.bf16.msra.mxu1 %v4486_v58  ;;  %1934 = vmatprep.mubr.f32.mxu1 %v1030_v6  ;;  %v4494_v21 = vpack.c.bf16 %v322_v15, %v321_v12  ;;  %v4474_v58 = vpack.c.bf16 %v296_v49, %v295_v48  ;;  %v4478_v6 = vpack.c.bf16 %v298_v62, %v297_v61  ;;  %v331_v12 = vld [vmem:[%s8078_s1 + $0x970] sm:$0xff]  ;;  %v332_v15 = vld [vmem:[%s8078_s1 + $0x978] sm:$0xff]  ;;  %v402_v48 = vld [vmem:[%s8078_s1 + $0xba8] sm:$0xff] }
  0x88   :  { %4489 = vmatprep.subr.bf16.mxu1 %v4488_v63  ;;  %v329_v63 = vld [vmem:[%s8078_s1 + $0x960] sm:$0xff]  ;;  %v447_v18 = vld [vmem:[%s8078_s1 + $0xd10] sm:$0xff] }
  0x89   :  { %4459 = vmatpush3.bf16.msra.mxu0 %v4458_v7  ;;  %v20_v7 = vld [vmem:[%s8077_s0 + $0x28] sm:$0xff] }
  0x8a   :  { %4461 = vmatprep.subr.bf16.mxu0 %v4460_v9  ;;  %v4480_v9 = vpack.c.bf16 %v316_v3, %v315_v2  ;;  %v6213_v31 = vrot.slane %v20_v7, %v5304_v13  ;;  %v387_v2 = vld [vmem:[%s8078_s1 + $0xb30] sm:$0xff] }
  0x8b   :  { %4491 = vmatpush3.bf16.msra.mxu1 %v4490_v8  ;;  %v4510_v8 = vpack.c.bf16 %v330_v1, %v329_v63  ;;  %v356_v1 = vld [vmem:[%s8078_s1 + $0xa38] sm:$0xff] }
  0x8c   :  { %4493 = vmatprep.subr.bf16.mxu1 %v4492_v14  ;;  %v4512_v14 = vpack.c.bf16 %v348_v5, %v347_v4  ;;  %v388_v4 = vld [vmem:[%s8078_s1 + $0xb38] sm:$0xff]  ;;  %v373_v5 = vld [vmem:[%s8078_s1 + $0xac0] sm:$0xff] }
  0x8d   :  { %4463 = vmatpush3.bf16.msra.mxu0 %v4462_v20  ;;  %v1031_v20 = vcombine.high %v20_v7, %v20_v7  ;;  %v405_v7 = vld [vmem:[%s8078_s1 + $0xbc0] sm:$0xff] }
  0x8e   :  { %4465 = vmatprep.subr.bf16.mxu0 %v4464_v22  ;;  %v4514_v22 = vpack.c.bf16 %v332_v15, %v331_v12  ;;  %v357_v12 = vld [vmem:[%s8078_s1 + $0xa40] sm:$0xff] }
  0x8f   :  { %4495 = vmatpush3.bf16.msra.mxu1 %v4494_v21  ;;  %v4482_v21 = vpack.c.bf16 %v300_v10, %v299_v11  ;;  %v4562_v11 = vpack.c.bf16 %v388_v4, %v387_v2  ;;  %v389_v15 = vld [vmem:[%s8078_s1 + $0xb40] sm:$0xff]  ;;  %v414_v2 = vld [vmem:[%s8078_s1 + $0xc08] sm:$0xff] }
  0x90   :  { %4497 = vmatprep.subr.bf16.mxu1 %v4496_v26  ;;  %v381_v26 = vld [vmem:[%s8078_s1 + $0xb00] sm:$0xff] }
  0x91   :  { %4467 = vmatpush3.bf16.msra.mxu0 %v4466_v32  ;;  %v399_v32 = vld [vmem:[%s8078_s1 + $0xb90] sm:$0xff]  ;;  %v4550_v36 = vpack.c.bf16 %v382_v28, %v381_v26  ;;  %v360_v26 = vld [vmem:[%s8078_s1 + $0xa58] sm:$0xff] }
  0x92   :  { %4469 = vmatprep.subr.bf16.mxu0 %v4468_v34  ;;  %v6222_v34 = vrot.slane %v1031_v20, %v5304_v13  ;;  %v407_v20 = vld [vmem:[%s8078_s1 + $0xbd0] sm:$0xff] }
  0x93   :  { %4499 = vmatpush3.bf16.msra.mxu1 %v4498_v42  ;;  %v400_v42 = vld [vmem:[%s8078_s1 + $0xb98] sm:$0xff] }
  0x94   :  { %4501 = vmatprep.subr.bf16.mxu1 %v4500_v37  ;;  %v351_v37 = vld [vmem:[%s8078_s1 + $0xa10] sm:$0xff]  ;;  %v4552_v40 = vpack.c.bf16 %v400_v42, %v399_v32  ;;  %v1047_v49 = vcombine.high %v6222_v34, %v6222_v34  ;;  %v378_v32 = vld [vmem:[%s8078_s1 + $0xae8] sm:$0xff]  ;;  %v409_v42 = vld [vmem:[%s8078_s1 + $0xbe0] sm:$0xff] }
  0x95   :  { %4471 = vmatpush3.bf16.msra.mxu0 %v4470_v44  ;;  %v370_v44 = vld [vmem:[%s8078_s1 + $0xaa8] sm:$0xff]  ;;  %v4522_v50 = vpack.c.bf16 %v352_v38, %v351_v37  ;;  %v4540_v37 = vpack.c.bf16 %v378_v32, %v377_v30  ;;  %v361_v38 = vld [vmem:[%s8078_s1 + $0xa60] sm:$0xff] }
  0x96   :  { %4473 = vmatprep.subr.bf16.mxu0 %v4472_v47  ;;  %v401_v47 = vld [vmem:[%s8078_s1 + $0xba0] sm:$0xff]  ;;  %v4524_v53 = vpack.c.bf16 %v370_v44, %v369_v43  ;;  %v394_v43 = vld [vmem:[%s8078_s1 + $0xb68] sm:$0xff]  ;;  %v379_v44 = vld [vmem:[%s8078_s1 + $0xaf0] sm:$0xff] }
  0x97   :  { %4503 = vmatpush3.bf16.msra.mxu1 %v4502_v46  ;;  %v1046_v46 = vcombine.high %v6213_v31, %v6213_v31  ;;  %v4556_v56 = vpack.c.bf16 %v402_v48, %v401_v47  ;;  %v411_v47 = vld [vmem:[%s8078_s1 + $0xbf0] sm:$0xff]  ;;  %v412_v48 = vld [vmem:[%s8078_s1 + $0xbf8] sm:$0xff]  ;;  %v418_v30 = vld [vmem:[%s8078_s1 + $0xc28] sm:$0xff] }
  0x98   :  { %4505 = vmatprep.subr.bf16.mxu1 %v4504_v51  ;;  %v4554_v51 = vpack.c.bf16 %v384_v41, %v383_v39  ;;  %v362_v39 = vld [vmem:[%s8078_s1 + $0xa68] sm:$0xff]  ;;  %v449_v32 = vld [vmem:[%s8078_s1 + $0xd20] sm:$0xff] }
  0x99   :  { %4475 = vmatpush3.bf16.msra.mxu0 %v4474_v58  ;;  %v372_v58 = vld [vmem:[%s8078_s1 + $0xab8] sm:$0xff] }
  0x9a   :  { %4477 = vmatprep.subr.bf16.mxu0 %v4476_v60  ;;  %v404_v60 = vld [vmem:[%s8078_s1 + $0xbb8] sm:$0xff]  ;;  %v4528_v63 = vpack.c.bf16 %v372_v58, %v371_v45  ;;  %v429_v45 = vld [vmem:[%s8078_s1 + $0xc80] sm:$0xff]  ;;  %v430_v58 = vld [vmem:[%s8078_s1 + $0xc88] sm:$0xff] }
  0x9b   :  { %4507 = vmatpush3.bf16.msra.mxu1 %v4506_v59  ;;  %v403_v59 = vld [vmem:[%s8078_s1 + $0xbb0] sm:$0xff] }
  0x9c   :  { %4509 = vmatprep.subr.bf16.mxu1 %v4508_v0  ;;  %v355_v0 = vld [vmem:[%s8078_s1 + $0xa30] sm:$0xff]  ;;  %v4560_v3 = vpack.c.bf16 %v404_v60, %v403_v59  ;;  %v461_v59 = vld [vmem:[%s8078_s1 + $0xd80] sm:$0xff]  ;;  %v462_v60 = vld [vmem:[%s8078_s1 + $0xd88] sm:$0xff] }
  0x9d   :  { %4479 = vmatpush3.bf16.msra.mxu0 %v4478_v6  ;;  %v374_v6 = vld [vmem:[%s8078_s1 + $0xac8] sm:$0xff]  ;;  %v4612_v4 = vpack.c.bf16 %v462_v60, %v461_v59  ;;  %v439_v59 = vld [vmem:[%s8078_s1 + $0xcd0] sm:$0xff]  ;;  %v440_v60 = vld [vmem:[%s8078_s1 + $0xcd8] sm:$0xff] }
  0x9e   :  { %4481 = vmatprep.subr.bf16.mxu0 %v4480_v9  ;;  %v4530_v9 = vpack.c.bf16 %v356_v1, %v355_v0  ;;  %v4532_v10 = vpack.c.bf16 %v374_v6, %v373_v5  ;;  %v4580_v0 = vpack.c.bf16 %v430_v58, %v429_v45  ;;  %v413_v1 = vld [vmem:[%s8078_s1 + $0xc00] sm:$0xff]  ;;  %v446_v5 = vld [vmem:[%s8078_s1 + $0xd08] sm:$0xff]  ;;  %v431_v6 = vld [vmem:[%s8078_s1 + $0xc90] sm:$0xff] }
  0x9f   :  { %4511 = vmatpush3.bf16.msra.mxu1 %v4510_v8  ;;  %v406_v8 = vld [vmem:[%s8078_s1 + $0xbc8] sm:$0xff] }
  0xa0   :  { %4513 = vmatprep.subr.bf16.mxu1 %v4512_v14  ;;  %v358_v14 = vld [vmem:[%s8078_s1 + $0xa48] sm:$0xff]  ;;  %v4564_v16 = vpack.c.bf16 %v406_v8, %v405_v7  ;;  %v432_v7 = vld [vmem:[%s8078_s1 + $0xc98] sm:$0xff] }
  0xa1   :  { %4483 = vmatpush3.bf16.msra.mxu0 %v4482_v21  ;;  %v408_v21 = vld [vmem:[%s8078_s1 + $0xbd8] sm:$0xff]  ;;  %v454_v58 = vld [vmem:[%s8078_s1 + $0xd48] sm:$0xff] }
  0xa2   :  { %4517 = vmatprep.subr.bf16.mxu0 %v4516_v23  ;;  %v4566_v23 = vpack.c.bf16 %v390_v17, %v389_v15  ;;  %v4568_v28 = vpack.c.bf16 %v408_v21, %v407_v20  ;;  %v4584_v15 = vpack.c.bf16 %v432_v7, %v431_v6  ;;  %v416_v17 = vld [vmem:[%s8078_s1 + $0xc18] sm:$0xff]  ;;  %v433_v21 = vld [vmem:[%s8078_s1 + $0xca0] sm:$0xff] }
  0xa3   :  { %4515 = vmatpush3.bf16.msra.mxu1 %v4514_v22  ;;  %v4534_v22 = vpack.c.bf16 %v358_v14, %v357_v12  ;;  %v4582_v12 = vpack.c.bf16 %v414_v2, %v413_v1  ;;  %v448_v20 = vld [vmem:[%s8078_s1 + $0xd18] sm:$0xff]  ;;  %v4600_v1 = vpack.c.bf16 %v440_v60, %v439_v59  ;;  %v423_v2 = vld [vmem:[%s8078_s1 + $0xc50] sm:$0xff]  ;;  %v441_v7 = vld [vmem:[%s8078_s1 + $0xce0] sm:$0xff] }
  0xa4   :  { %4549 = vmatprep.subr.bf16.mxu1 %v4548_v27  ;;  %1865 = vmatmul.mubr.f32.vlgmr.msra.gmra.mrb[8].mxu0 %v6006_v54  ;;  %v353_v54 = vld [vmem:[%s8078_s1 + $0xa20] sm:$0xff]  ;;  %v391_v27 = vld [vmem:[%s8078_s1 + $0xb50] sm:$0xff]  ;;  %v456_v6 = vld [vmem:[%s8078_s1 + $0xd58] sm:$0xff] }
  0xa5   :  { %4519 = vmatpush3.bf16.msra.mxu0 %v4518_v35  ;;  %2004 = vmatprep.mubr.f32.mxu0 %v1046_v46  ;;  %v4526_v61 = vpack.c.bf16 %v354_v33, %v353_v54  ;;  %v410_v35 = vld [vmem:[%s8078_s1 + $0xbe8] sm:$0xff]  ;;  %v380_v46 = vld [vmem:[%s8078_s1 + $0xaf8] sm:$0xff]  ;;  %v363_v54 = vld [vmem:[%s8078_s1 + $0xa70] sm:$0xff] }
  0xa6   :  { %1935 = vmatmul.mubr.f32.vlgmr.msra.gmra.mrb[8].mxu1 %v6015_v57  ;;  %4521 = vmatprep.subr.bf16.mxu0 %v4520_v52  ;;  %v386_v57 = vld [vmem:[%s8078_s1 + $0xb28] sm:$0xff]  ;;  %v4570_v52 = vpack.c.bf16 %v392_v29, %v391_v27  ;;  %v4572_v41 = vpack.c.bf16 %v410_v35, %v409_v42  ;;  %v364_v33 = vld [vmem:[%s8078_s1 + $0xa78] sm:$0xff]  ;;  %v435_v35 = vld [vmem:[%s8078_s1 + $0xcb0] sm:$0xff] }
  0xa7   :  { %4551 = vmatpush3.bf16.msra.mxu1 %v4550_v36  ;;  %2074 = vmatprep.mubr.f32.mxu1 %v1047_v49  ;;  %v4558_v62 = vpack.c.bf16 %v386_v57, %v385_v55  ;;  %v4538_v36 = vpack.c.bf16 %v360_v26, %v359_v25  ;;  %v4542_v49 = vpack.c.bf16 %v362_v39, %v361_v38  ;;  %v395_v55 = vld [vmem:[%s8078_s1 + $0xb70] sm:$0xff]  ;;  %v396_v57 = vld [vmem:[%s8078_s1 + $0xb78] sm:$0xff]  ;;  %v466_v25 = vld [vmem:[%s8078_s1 + $0xda8] sm:$0xff] }
  0xa8   :  { %4553 = vmatprep.subr.bf16.mxu1 %v4552_v40  ;;  %v393_v40 = vld [vmem:[%s8078_s1 + $0xb60] sm:$0xff]  ;;  %v511_v59 = vld [vmem:[%s8078_s1 + $0xf10] sm:$0xff] }
  0xa9   :  { %4523 = vmatpush3.bf16.msra.mxu0 %v4522_v50  ;;  %v21_v50 = vld [vmem:[%s8077_s0 + $0x30] sm:$0xff] }
  0xaa   :  { %4525 = vmatprep.subr.bf16.mxu0 %v4524_v53  ;;  %v4544_v53 = vpack.c.bf16 %v380_v46, %v379_v44  ;;  %v6420_v8 = vrot.slane %v21_v50, %v5304_v13  ;;  %v451_v44 = vld [vmem:[%s8078_s1 + $0xd30] sm:$0xff] }
  0xab   :  { %4555 = vmatpush3.bf16.msra.mxu1 %v4554_v51  ;;  %v4574_v51 = vpack.c.bf16 %v394_v43, %v393_v40  ;;  %v420_v43 = vld [vmem:[%s8078_s1 + $0xc38] sm:$0xff] }
  0xac   :  { %4557 = vmatprep.subr.bf16.mxu1 %v4556_v56  ;;  %v4576_v56 = vpack.c.bf16 %v412_v48, %v411_v47  ;;  %v452_v47 = vld [vmem:[%s8078_s1 + $0xd38] sm:$0xff]  ;;  %v437_v48 = vld [vmem:[%s8078_s1 + $0xcc0] sm:$0xff] }
  0xad   :  { %4527 = vmatpush3.bf16.msra.mxu0 %v4526_v61  ;;  %v1048_v61 = vcombine.high %v21_v50, %v21_v50  ;;  %v469_v50 = vld [vmem:[%s8078_s1 + $0xdc0] sm:$0xff] }
  0xae   :  { %4529 = vmatprep.subr.bf16.mxu0 %v4528_v63  ;;  %v4578_v63 = vpack.c.bf16 %v396_v57, %v395_v55  ;;  %v421_v55 = vld [vmem:[%s8078_s1 + $0xc40] sm:$0xff] }
  0xaf   :  { %4559 = vmatpush3.bf16.msra.mxu1 %v4558_v62  ;;  %v4546_v62 = vpack.c.bf16 %v364_v33, %v363_v54  ;;  %v4626_v54 = vpack.c.bf16 %v452_v47, %v451_v44  ;;  %v453_v57 = vld [vmem:[%s8078_s1 + $0xd40] sm:$0xff]  ;;  %v478_v44 = vld [vmem:[%s8078_s1 + $0xe08] sm:$0xff] }
  0xb0   :  { %4561 = vmatprep.subr.bf16.mxu1 %v4560_v3  ;;  %v445_v3 = vld [vmem:[%s8078_s1 + $0xd00] sm:$0xff] }
  0xb1   :  { %4531 = vmatpush3.bf16.msra.mxu0 %v4530_v9  ;;  %v463_v9 = vld [vmem:[%s8078_s1 + $0xd90] sm:$0xff]  ;;  %v4614_v14 = vpack.c.bf16 %v446_v5, %v445_v3  ;;  %v424_v3 = vld [vmem:[%s8078_s1 + $0xc58] sm:$0xff] }
  0xb2   :  { %4533 = vmatprep.subr.bf16.mxu0 %v4532_v10  ;;  %v6429_v10 = vrot.slane %v1048_v61, %v5304_v13  ;;  %v471_v61 = vld [vmem:[%s8078_s1 + $0xdd0] sm:$0xff] }
  0xb3   :  { %4563 = vmatpush3.bf16.msra.mxu1 %v4562_v11  ;;  %v464_v11 = vld [vmem:[%s8078_s1 + $0xd98] sm:$0xff] }
  0xb4   :  { %4565 = vmatprep.subr.bf16.mxu1 %v4564_v16  ;;  %v415_v16 = vld [vmem:[%s8078_s1 + $0xc10] sm:$0xff]  ;;  %v4616_v19 = vpack.c.bf16 %v464_v11, %v463_v9  ;;  %v1064_v26 = vcombine.high %v6429_v10, %v6429_v10  ;;  %v442_v9 = vld [vmem:[%s8078_s1 + $0xce8] sm:$0xff]  ;;  %v473_v11 = vld [vmem:[%s8078_s1 + $0xde0] sm:$0xff] }
  0xb5   :  { %4535 = vmatpush3.bf16.msra.mxu0 %v4534_v22  ;;  %v434_v22 = vld [vmem:[%s8078_s1 + $0xca8] sm:$0xff]  ;;  %v4586_v27 = vpack.c.bf16 %v416_v17, %v415_v16  ;;  %v4604_v16 = vpack.c.bf16 %v442_v9, %v441_v7  ;;  %v425_v17 = vld [vmem:[%s8078_s1 + $0xc60] sm:$0xff] }
  0xb6   :  { %4537 = vmatprep.subr.bf16.mxu0 %v4536_v24  ;;  %v465_v24 = vld [vmem:[%s8078_s1 + $0xda0] sm:$0xff]  ;;  %v4588_v29 = vpack.c.bf16 %v434_v22, %v433_v21  ;;  %v458_v21 = vld [vmem:[%s8078_s1 + $0xd68] sm:$0xff]  ;;  %v443_v22 = vld [vmem:[%s8078_s1 + $0xcf0] sm:$0xff] }
  0xb7   :  { %4567 = vmatpush3.bf16.msra.mxu1 %v4566_v23  ;;  %v1063_v23 = vcombine.high %v6420_v8, %v6420_v8  ;;  %v4620_v42 = vpack.c.bf16 %v466_v25, %v465_v24  ;;  %v475_v24 = vld [vmem:[%s8078_s1 + $0xdf0] sm:$0xff]  ;;  %v476_v25 = vld [vmem:[%s8078_s1 + $0xdf8] sm:$0xff]  ;;  %v482_v7 = vld [vmem:[%s8078_s1 + $0xe28] sm:$0xff] }
  0xb8   :  { %4569 = vmatprep.subr.bf16.mxu1 %v4568_v28  ;;  %v4618_v28 = vpack.c.bf16 %v448_v20, %v447_v18  ;;  %v426_v18 = vld [vmem:[%s8078_s1 + $0xc68] sm:$0xff]  ;;  %v513_v9 = vld [vmem:[%s8078_s1 + $0xf20] sm:$0xff] }
  0xb9   :  { %4539 = vmatpush3.bf16.msra.mxu0 %v4538_v36  ;;  %v436_v36 = vld [vmem:[%s8078_s1 + $0xcb8] sm:$0xff] }
  0xba   :  { %4541 = vmatprep.subr.bf16.mxu0 %v4540_v37  ;;  %v468_v37 = vld [vmem:[%s8078_s1 + $0xdb8] sm:$0xff]  ;;  %v4592_v40 = vpack.c.bf16 %v436_v36, %v435_v35  ;;  %v493_v35 = vld [vmem:[%s8078_s1 + $0xe80] sm:$0xff]  ;;  %v494_v36 = vld [vmem:[%s8078_s1 + $0xe88] sm:$0xff] }
  0xbb   :  { %4571 = vmatpush3.bf16.msra.mxu1 %v4570_v52  ;;  %v467_v52 = vld [vmem:[%s8078_s1 + $0xdb0] sm:$0xff] }
  0xbc   :  { %4573 = vmatprep.subr.bf16.mxu1 %v4572_v41  ;;  %v419_v41 = vld [vmem:[%s8078_s1 + $0xc30] sm:$0xff]  ;;  %v4624_v46 = vpack.c.bf16 %v468_v37, %v467_v52  ;;  %v525_v52 = vld [vmem:[%s8078_s1 + $0xf80] sm:$0xff]  ;;  %v526_v37 = vld [vmem:[%s8078_s1 + $0xf88] sm:$0xff] }
  0xbd   :  { %4543 = vmatpush3.bf16.msra.mxu0 %v4542_v49  ;;  %v438_v49 = vld [vmem:[%s8078_s1 + $0xcc8] sm:$0xff]  ;;  %v4676_v47 = vpack.c.bf16 %v526_v37, %v525_v52  ;;  %v503_v52 = vld [vmem:[%s8078_s1 + $0xed0] sm:$0xff]  ;;  %v504_v37 = vld [vmem:[%s8078_s1 + $0xed8] sm:$0xff] }
  0xbe   :  { %4545 = vmatprep.subr.bf16.mxu0 %v4544_v53  ;;  %v4594_v53 = vpack.c.bf16 %v420_v43, %v419_v41  ;;  %v4596_v33 = vpack.c.bf16 %v438_v49, %v437_v48  ;;  %v4644_v41 = vpack.c.bf16 %v494_v36, %v493_v35  ;;  %v477_v43 = vld [vmem:[%s8078_s1 + $0xe00] sm:$0xff]  ;;  %v510_v48 = vld [vmem:[%s8078_s1 + $0xf08] sm:$0xff]  ;;  %v495_v49 = vld [vmem:[%s8078_s1 + $0xe90] sm:$0xff] }
  0xbf   :  { %4575 = vmatpush3.bf16.msra.mxu1 %v4574_v51  ;;  %v470_v51 = vld [vmem:[%s8078_s1 + $0xdc8] sm:$0xff] }
  0xc0   :  { %4577 = vmatprep.subr.bf16.mxu1 %v4576_v56  ;;  %v422_v56 = vld [vmem:[%s8078_s1 + $0xc48] sm:$0xff]  ;;  %v4628_v45 = vpack.c.bf16 %v470_v51, %v469_v50  ;;  %v496_v50 = vld [vmem:[%s8078_s1 + $0xe98] sm:$0xff] }
  0xc1   :  { %4547 = vmatpush3.bf16.msra.mxu0 %v4546_v62  ;;  %v472_v62 = vld [vmem:[%s8078_s1 + $0xdd8] sm:$0xff]  ;;  %v518_v36 = vld [vmem:[%s8078_s1 + $0xf48] sm:$0xff] }
  0xc2   :  { %4581 = vmatprep.subr.bf16.mxu0 %v4580_v0  ;;  %v4630_v0 = vpack.c.bf16 %v454_v58, %v453_v57  ;;  %v4632_v5 = vpack.c.bf16 %v472_v62, %v471_v61  ;;  %v4648_v57 = vpack.c.bf16 %v496_v50, %v495_v49  ;;  %v480_v58 = vld [vmem:[%s8078_s1 + $0xe18] sm:$0xff]  ;;  %v497_v62 = vld [vmem:[%s8078_s1 + $0xea0] sm:$0xff] }
  0xc3   :  { %4579 = vmatpush3.bf16.msra.mxu1 %v4578_v63  ;;  %v4598_v63 = vpack.c.bf16 %v422_v56, %v421_v55  ;;  %v4646_v55 = vpack.c.bf16 %v478_v44, %v477_v43  ;;  %v512_v61 = vld [vmem:[%s8078_s1 + $0xf18] sm:$0xff]  ;;  %v4664_v43 = vpack.c.bf16 %v504_v37, %v503_v52  ;;  %v487_v44 = vld [vmem:[%s8078_s1 + $0xe50] sm:$0xff]  ;;  %v505_v50 = vld [vmem:[%s8078_s1 + $0xee0] sm:$0xff] }
  0xc4   :  { %4613 = vmatprep.subr.bf16.mxu1 %v4612_v4  ;;  %2005 = vmatmul.mubr.f32.vlgmr.msra.gmra.mrb[10].mxu0 %v6213_v31  ;;  %v417_v31 = vld [vmem:[%s8078_s1 + $0xc20] sm:$0xff]  ;;  %v455_v4 = vld [vmem:[%s8078_s1 + $0xd50] sm:$0xff]  ;;  %v520_v49 = vld [vmem:[%s8078_s1 + $0xf58] sm:$0xff] }
  0xc5   :  { %4583 = vmatpush3.bf16.msra.mxu0 %v4582_v12  ;;  %2144 = vmatprep.mubr.f32.mxu0 %v1063_v23  ;;  %v4590_v38 = vpack.c.bf16 %v418_v30, %v417_v31  ;;  %v474_v12 = vld [vmem:[%s8078_s1 + $0xde8] sm:$0xff]  ;;  %v444_v23 = vld [vmem:[%s8078_s1 + $0xcf8] sm:$0xff]  ;;  %v427_v31 = vld [vmem:[%s8078_s1 + $0xc70] sm:$0xff] }
  0xc6   :  { %2075 = vmatmul.mubr.f32.vlgmr.msra.gmra.mrb[10].mxu1 %v6222_v34  ;;  %4585 = vmatprep.subr.bf16.mxu0 %v4584_v15  ;;  %v450_v34 = vld [vmem:[%s8078_s1 + $0xd28] sm:$0xff]  ;;  %v4634_v15 = vpack.c.bf16 %v456_v6, %v455_v4  ;;  %v4636_v20 = vpack.c.bf16 %v474_v12, %v473_v11  ;;  %v428_v30 = vld [vmem:[%s8078_s1 + $0xc78] sm:$0xff]  ;;  %v499_v12 = vld [vmem:[%s8078_s1 + $0xeb0] sm:$0xff] }
  0xc7   :  { %4615 = vmatpush3.bf16.msra.mxu1 %v4614_v14  ;;  %2214 = vmatprep.mubr.f32.mxu1 %v1064_v26  ;;  %v4622_v39 = vpack.c.bf16 %v450_v34, %v449_v32  ;;  %v4602_v14 = vpack.c.bf16 %v424_v3, %v423_v2  ;;  %v4606_v26 = vpack.c.bf16 %v426_v18, %v425_v17  ;;  %v459_v32 = vld [vmem:[%s8078_s1 + $0xd70] sm:$0xff]  ;;  %v460_v34 = vld [vmem:[%s8078_s1 + $0xd78] sm:$0xff]  ;;  %v530_v2 = vld [vmem:[%s8078_s1 + $0xfa8] sm:$0xff] }
  0xc8   :  { %4617 = vmatprep.subr.bf16.mxu1 %v4616_v19  ;;  %v457_v19 = vld [vmem:[%s8078_s1 + $0xd60] sm:$0xff]  ;;  %v591_v37 = vld [vmem:[%s8078_s1 + $0x1190] sm:$0xff] }
  0xc9   :  { %4587 = vmatpush3.bf16.msra.mxu0 %v4586_v27  ;;  %v22_v27 = vld [vmem:[%s8077_s0 + $0x38] sm:$0xff] }
  0xca   :  { %4589 = vmatprep.subr.bf16.mxu0 %v4588_v29  ;;  %v4608_v29 = vpack.c.bf16 %v444_v23, %v443_v22  ;;  %v6627_v51 = vrot.slane %v22_v27, %v5304_v13  ;;  %v515_v22 = vld [vmem:[%s8078_s1 + $0xf30] sm:$0xff] }
  0xcb   :  { %4619 = vmatpush3.bf16.msra.mxu1 %v4618_v28  ;;  %v4638_v28 = vpack.c.bf16 %v458_v21, %v457_v19  ;;  %v484_v21 = vld [vmem:[%s8078_s1 + $0xe38] sm:$0xff] }
  0xcc   :  { %4621 = vmatprep.subr.bf16.mxu1 %v4620_v42  ;;  %v4640_v42 = vpack.c.bf16 %v476_v25, %v475_v24  ;;  %v516_v24 = vld [vmem:[%s8078_s1 + $0xf38] sm:$0xff]  ;;  %v501_v25 = vld [vmem:[%s8078_s1 + $0xec0] sm:$0xff] }
  0xcd   :  { %4591 = vmatpush3.bf16.msra.mxu0 %v4590_v38  ;;  %v1065_v38 = vcombine.high %v22_v27, %v22_v27  ;;  %v533_v27 = vld [vmem:[%s8078_s1 + $0xfc0] sm:$0xff] }
  0xce   :  { %4593 = vmatprep.subr.bf16.mxu0 %v4592_v40  ;;  %v4642_v40 = vpack.c.bf16 %v460_v34, %v459_v32  ;;  %v485_v32 = vld [vmem:[%s8078_s1 + $0xe40] sm:$0xff] }
  0xcf   :  { %4623 = vmatpush3.bf16.msra.mxu1 %v4622_v39  ;;  %v4610_v39 = vpack.c.bf16 %v428_v30, %v427_v31  ;;  %v4690_v31 = vpack.c.bf16 %v516_v24, %v515_v22  ;;  %v517_v34 = vld [vmem:[%s8078_s1 + $0xf40] sm:$0xff]  ;;  %v558_v22 = vld [vmem:[%s8078_s1 + $0x1088] sm:$0xff] }
  0xd0   :  { %4625 = vmatprep.subr.bf16.mxu1 %v4624_v46  ;;  %v509_v46 = vld [vmem:[%s8078_s1 + $0xf00] sm:$0xff]  ;;  %v590_v24 = vld [vmem:[%s8078_s1 + $0x1188] sm:$0xff] }
  0xd1   :  { %4595 = vmatpush3.bf16.msra.mxu0 %v4594_v53  ;;  %v527_v53 = vld [vmem:[%s8078_s1 + $0xf90] sm:$0xff]  ;;  %v4678_v56 = vpack.c.bf16 %v510_v48, %v509_v46  ;;  %v488_v46 = vld [vmem:[%s8078_s1 + $0xe58] sm:$0xff] }
  0xd2   :  { %4597 = vmatprep.subr.bf16.mxu0 %v4596_v33  ;;  %v6636_v33 = vrot.slane %v1065_v38, %v5304_v13  ;;  %v535_v38 = vld [vmem:[%s8078_s1 + $0xfd0] sm:$0xff] }
  0xd3   :  { %4627 = vmatpush3.bf16.msra.mxu1 %v4626_v54  ;;  %v528_v54 = vld [vmem:[%s8078_s1 + $0xf98] sm:$0xff] }
  0xd4   :  { %4629 = vmatprep.subr.bf16.mxu1 %v4628_v45  ;;  %v479_v45 = vld [vmem:[%s8078_s1 + $0xe10] sm:$0xff]  ;;  %v4680_v60 = vpack.c.bf16 %v528_v54, %v527_v53  ;;  %v1081_v3 = vcombine.high %v6636_v33, %v6636_v33  ;;  %v506_v53 = vld [vmem:[%s8078_s1 + $0xee8] sm:$0xff]  ;;  %v537_v54 = vld [vmem:[%s8078_s1 + $0xfe0] sm:$0xff] }
  0xd5   :  { %4599 = vmatpush3.bf16.msra.mxu0 %v4598_v63  ;;  %v498_v63 = vld [vmem:[%s8078_s1 + $0xea8] sm:$0xff]  ;;  %v4650_v4 = vpack.c.bf16 %v480_v58, %v479_v45  ;;  %v4668_v45 = vpack.c.bf16 %v506_v53, %v505_v50  ;;  %v489_v58 = vld [vmem:[%s8078_s1 + $0xe60] sm:$0xff] }
  0xd6   :  { %4601 = vmatprep.subr.bf16.mxu0 %v4600_v1  ;;  %v529_v1 = vld [vmem:[%s8078_s1 + $0xfa0] sm:$0xff]  ;;  %v4652_v6 = vpack.c.bf16 %v498_v63, %v497_v62  ;;  %v522_v63 = vld [vmem:[%s8078_s1 + $0xf68] sm:$0xff] }
  0xd7   :  { %4631 = vmatpush3.bf16.msra.mxu1 %v4630_v0  ;;  %v1080_v0 = vcombine.high %v6627_v51, %v6627_v51  ;;  %v4684_v11 = vpack.c.bf16 %v530_v2, %v529_v1  ;;  %v508_v1 = vld [vmem:[%s8078_s1 + $0xef8] sm:$0xff]  ;;  %v3215_v2 = vld [vmem:[%s8079_s2] ss:$0 sm:$0xff]  ;;  %v562_v53 = vld [vmem:[%s8078_s1 + $0x10a8] sm:$0xff] }
  0xd8   :  { %4633 = vmatprep.subr.bf16.mxu1 %v4632_v5  ;;  %v4682_v5 = vpack.c.bf16 %v512_v61, %v511_v59  ;;  %v490_v59 = vld [vmem:[%s8078_s1 + $0xe68] sm:$0xff]  ;;  %v561_v50 = vld [vmem:[%s8078_s1 + $0x10a0] sm:$0xff] }
  0xd9   :  { %4603 = vmatpush3.bf16.msra.mxu0 %v4602_v14  ;;  %v500_v14 = vld [vmem:[%s8078_s1 + $0xeb8] sm:$0xff] }
  0xda   :  { %4605 = vmatprep.subr.bf16.mxu0 %v4604_v16  ;;  %v532_v16 = vld [vmem:[%s8078_s1 + $0xfb8] sm:$0xff]  ;;  %v4656_v19 = vpack.c.bf16 %v500_v14, %v499_v12 }
  0xdb   :  { %4635 = vmatpush3.bf16.msra.mxu1 %v4634_v15  ;;  %v531_v15 = vld [vmem:[%s8078_s1 + $0xfb0] sm:$0xff] }
  0xdc   :  { %4637 = vmatprep.subr.bf16.mxu1 %v4636_v20  ;;  %v483_v20 = vld [vmem:[%s8078_s1 + $0xe30] sm:$0xff]  ;;  %v4688_v23 = vpack.c.bf16 %v532_v16, %v531_v15  ;;  %v492_v16 = vld [vmem:[%s8078_s1 + $0xe78] sm:$0xff] }
  0xdd   :  { %4607 = vmatpush3.bf16.msra.mxu0 %v4606_v26  ;;  %v502_v26 = vld [vmem:[%s8078_s1 + $0xec8] sm:$0xff]  ;;  %v491_v15 = vld [vmem:[%s8078_s1 + $0xe70] sm:$0xff] }
  0xde   :  { %4609 = vmatprep.subr.bf16.mxu0 %v4608_v29  ;;  %v4658_v29 = vpack.c.bf16 %v484_v21, %v483_v20  ;;  %v4660_v30 = vpack.c.bf16 %v502_v26, %v501_v25  ;;  %v524_v20 = vld [vmem:[%s8078_s1 + $0xf78] sm:$0xff]  ;;  %v557_v21 = vld [vmem:[%s8078_s1 + $0x1080] sm:$0xff] }
  0xdf   :  { %4639 = vmatpush3.bf16.msra.mxu1 %v4638_v28  ;;  %v534_v28 = vld [vmem:[%s8078_s1 + $0xfc8] sm:$0xff] }
  0xe0   :  { %4641 = vmatprep.subr.bf16.mxu1 %v4640_v42  ;;  %v486_v42 = vld [vmem:[%s8078_s1 + $0xe48] sm:$0xff]  ;;  %v4692_v35 = vpack.c.bf16 %v534_v28, %v533_v27  ;;  %v4674_v27 = vpack.c.bf16 %v492_v16, %v491_v15 }
  0xe1   :  { %4611 = vmatpush3.bf16.msra.mxu0 %v4610_v39  ;;  %v536_v39 = vld [vmem:[%s8078_s1 + $0xfd8] sm:$0xff]  ;;  %v598_v15 = vld [vmem:[%s8078_s1 + $0x11c8] sm:$0xff] }
  0xe2   :  { %4645 = vmatprep.subr.bf16.mxu0 %v4644_v41  ;;  %v4694_v41 = vpack.c.bf16 %v518_v36, %v517_v34  ;;  %v4696_v48 = vpack.c.bf16 %v536_v39, %v535_v38  ;;  %v574_v34 = vld [vmem:[%s8078_s1 + $0x1108] sm:$0xff]  ;;  %v560_v36 = vld [vmem:[%s8078_s1 + $0x1098] sm:$0xff] }
  0xe3   :  { %4643 = vmatpush3.bf16.msra.mxu1 %v4642_v40  ;;  %v4662_v40 = vpack.c.bf16 %v486_v42, %v485_v32  ;;  %v573_v32 = vld [vmem:[%s8078_s1 + $0x1100] sm:$0xff]  ;;  %v592_v38 = vld [vmem:[%s8078_s1 + $0x1198] sm:$0xff] }
  0xe4   :  { %4677 = vmatprep.subr.bf16.mxu1 %v4676_v47  ;;  %2145 = vmatmul.mubr.f32.vlgmr.msra.gmra.mrb[12].mxu0 %v6420_v8  ;;  %v481_v8 = vld [vmem:[%s8078_s1 + $0xe20] sm:$0xff]  ;;  %v519_v47 = vld [vmem:[%s8078_s1 + $0xf50] sm:$0xff] }
  0xe5   :  { %4647 = vmatpush3.bf16.msra.mxu0 %v4646_v55  ;;  %2284 = vmatprep.mubr.f32.mxu0 %v1080_v0  ;;  %v4654_v17 = vpack.c.bf16 %v482_v7, %v481_v8  ;;  %v538_v55 = vld [vmem:[%s8078_s1 + $0xfe8] sm:$0xff]  ;;  %v507_v0 = vld [vmem:[%s8078_s1 + $0xef0] sm:$0xff] }
  0xe6   :  { %2215 = vmatmul.mubr.f32.vlgmr.msra.gmra.mrb[12].mxu1 %v6429_v10  ;;  %4649 = vmatprep.subr.bf16.mxu0 %v4648_v57  ;;  %v514_v10 = vld [vmem:[%s8078_s1 + $0xf28] sm:$0xff]  ;;  %v4698_v57 = vpack.c.bf16 %v520_v49, %v519_v47  ;;  %v4700_v62 = vpack.c.bf16 %v538_v55, %v537_v54  ;;  %v4672_v14 = vpack.c.bf16 %v508_v1, %v507_v0  ;;  %v575_v47 = vld [vmem:[%s8078_s1 + $0x1110] sm:$0xff]  ;;  %v576_v49 = vld [vmem:[%s8078_s1 + $0x1118] sm:$0xff] }
  0xe7   :  { %4679 = vmatpush3.bf16.msra.mxu1 %v4678_v56  ;;  %2354 = vmatprep.mubr.f32.mxu1 %v1081_v3  ;;  %v4686_v18 = vpack.c.bf16 %v514_v10, %v513_v9  ;;  %v4666_v56 = vpack.c.bf16 %v488_v46, %v487_v44  ;;  %v4670_v9 = vpack.c.bf16 %v490_v59, %v489_v58  ;;  %v543_v44 = vld [vmem:[%s8078_s1 + $0x1010] sm:$0xff]  ;;  %v544_v46 = vld [vmem:[%s8078_s1 + $0x1018] sm:$0xff]  ;;  %v593_v55 = vld [vmem:[%s8078_s1 + $0x11a0] sm:$0xff] }
  0xe8   :  { %4681 = vmatprep.subr.bf16.mxu1 %v4680_v60  ;;  %v521_v60 = vld [vmem:[%s8078_s1 + $0xf60] sm:$0xff]  ;;  %v4746_v58 = vpack.c.bf16 %v576_v49, %v575_v47  ;;  %v4716_v59 = vpack.c.bf16 %v562_v53, %v561_v50  ;;  %v564_v0 = vld [vmem:[%s8078_s1 + $0x10b8] sm:$0xff]  ;;  %v595_v1 = vld [vmem:[%s8078_s1 + $0x11b0] sm:$0xff] }
  0xe9   :  { %4651 = vmatpush3.bf16.msra.mxu0 %v4650_v4  ;;  %v4702_v12 = vpack.c.bf16 %v522_v63, %v521_v60  ;;  %v546_v60 = vld [vmem:[%s8078_s1 + $0x1028] sm:$0xff]  ;;  %v563_v63 = vld [vmem:[%s8078_s1 + $0x10b0] sm:$0xff] }
  0xea   :  { %4653 = vmatprep.subr.bf16.mxu0 %v4652_v6  ;;  %v540_v6 = vld [vmem:[%s8078_s1 + $0xff8] sm:$0xff] }
  0xeb   :  { %4683 = vmatpush3.bf16.msra.mxu1 %v4682_v5  ;;  %v539_v5 = vld [vmem:[%s8078_s1 + $0xff0] sm:$0xff] }
  0xec   :  { %4685 = vmatprep.subr.bf16.mxu1 %v4684_v11  ;;  %v23_v11 = vld [vmem:[%s8077_s0 + $0x40] sm:$0xff] }
  0xed   :  { %4655 = vmatpush3.bf16.msra.mxu0 %v4654_v17  ;;  %v523_v17 = vld [vmem:[%s8078_s1 + $0xf70] sm:$0xff]  ;;  %v1082_v25 = vcombine.high %v23_v11, %v23_v11  ;;  %v6839_v52 = vrot.slane %v23_v11, %v5304_v13  ;;  %v580_v11 = vld [vmem:[%s8078_s1 + $0x1138] sm:$0xff] }
  0xee   :  { %4657 = vmatprep.subr.bf16.mxu0 %v4656_v19  ;;  %v4704_v19 = vpack.c.bf16 %v540_v6, %v539_v5  ;;  %v4706_v28 = vpack.c.bf16 %v524_v20, %v523_v17  ;;  %v4720_v5 = vpack.c.bf16 %v564_v0, %v563_v63  ;;  %v547_v6 = vld [vmem:[%s8078_s1 + $0x1030] sm:$0xff]  ;;  %v550_v20 = vld [vmem:[%s8078_s1 + $0x1048] sm:$0xff] }
  0xef   :  { %4687 = vmatpush3.bf16.msra.mxu1 %v4686_v18  ;;  %v6848_v39 = vrot.slane %v1082_v25, %v5304_v13  ;;  %v1097_v54 = vcombine.high %v6839_v52, %v6839_v52  ;;  %v568_v25 = vld [vmem:[%s8078_s1 + $0x10d8] sm:$0xff] }
  0xf0   :  { %4689 = vmatprep.subr.bf16.mxu1 %v4688_v23  ;;  %v589_v23 = vld [vmem:[%s8078_s1 + $0x1180] sm:$0xff] }
  0xf1   :  { %4659 = vmatpush3.bf16.msra.mxu0 %v4658_v29  ;;  %v4708_v29 = vpack.c.bf16 %v558_v22, %v557_v21  ;;  %v4740_v42 = vpack.c.bf16 %v590_v24, %v589_v23  ;;  %v581_v21 = vld [vmem:[%s8078_s1 + $0x1140] sm:$0xff]  ;;  %v582_v23 = vld [vmem:[%s8078_s1 + $0x1148] sm:$0xff]  ;;  %v567_v24 = vld [vmem:[%s8078_s1 + $0x10d0] sm:$0xff] }
  0xf2   :  { %4661 = vmatprep.subr.bf16.mxu0 %v4660_v30  ;;  %v542_v30 = vld [vmem:[%s8078_s1 + $0x1008] sm:$0xff] }
  0xf3   :  { %4691 = vmatpush3.bf16.msra.mxu1 %v4690_v31  ;;  %v541_v31 = vld [vmem:[%s8078_s1 + $0x1000] sm:$0xff] }
  0xf4   :  { %4693 = vmatprep.subr.bf16.mxu1 %v4692_v35  ;;  %v559_v35 = vld [vmem:[%s8078_s1 + $0x1090] sm:$0xff] }
  0xf5   :  { %4663 = vmatpush3.bf16.msra.mxu0 %v4662_v40  ;;  %v4710_v40 = vpack.c.bf16 %v542_v30, %v541_v31 }
  0xf6   :  { %4665 = vmatprep.subr.bf16.mxu0 %v4664_v43  ;;  %v4712_v43 = vpack.c.bf16 %v560_v36, %v559_v35 }
  0xf7   :  { %4695 = vmatpush3.bf16.msra.mxu1 %v4694_v41  ;;  %v3248_v61 = vpop.f32.mrb[0].mxu0  ;;  %v4742_v41 = vpack.c.bf16 %v574_v34, %v573_v32 }
  0xf8   :  { %4697 = vmatprep.subr.bf16.mxu1 %v4696_v48  ;;  %v3249_v3 = vpop.f32.mrb[1].mxu0  ;;  %v4744_v48 = vpack.c.bf16 %v592_v38, %v591_v37 }
  0xf9   :  { %v3283_v4 = vpop.f32.mrb[0].mxu1  ;;  %v3250_v8 = vadd.f32 %v3249_v3, %v3248_v61  ;;  %4667 = vmatpush3.bf16.msra.mxu0 %v4666_v56  ;;  %v594_v56 = vld [vmem:[%s8078_s1 + $0x11a8] sm:$0xff]  ;;  %v577_v61 = vld [vmem:[%s8078_s1 + $0x1120] sm:$0xff] }
  0xfa   :  { %v3284_v7 = vpop.f32.mrb[1].mxu1  ;;  %4669 = vmatprep.subr.bf16.mxu0 %v4668_v45  ;;  %v4714_v45 = vpack.c.bf16 %v544_v46, %v543_v44 }
  0xfb   :  { %v3285_v10 = vadd.f32 %v3284_v7, %v3283_v4  ;;  %4699 = vmatpush3.bf16.msra.mxu1 %v4698_v57  ;;  %v1307_v18 = vadd.f32 %v3250_v8, %v3215_v2  ;;  %v1098_v57 = vcombine.high %v6848_v39, %v6848_v39  ;;  %v596_v2 = vld [vmem:[%s8078_s1 + $0x11b8] sm:$0xff]  ;;  %v579_v7 = vld [vmem:[%s8078_s1 + $0x1130] sm:$0xff] }
  0xfc   :  { %4701 = vmatprep.subr.bf16.mxu1 %v4700_v62  ;;  %v4748_v62 = vpack.c.bf16 %v594_v56, %v593_v55  ;;  %v548_v8 = vld [vmem:[%s8078_s1 + $0x1038] sm:$0xff]  ;;  %v4754_v17 = vpack.c.bf16 %v580_v11, %v579_v7 }
  0xfd   :  { %v6818_v26 = vadd.f32 %v3285_v10, %v1307_v18  ;;  %4671 = vmatpush3.bf16.msra.mxu0 %v4670_v9  ;;  %v4752_v9 = vpack.c.bf16 %v596_v2, %v595_v1  ;;  %v565_v10 = vld [vmem:[%s8078_s1 + $0x10c0] sm:$0xff]  ;;  %v4722_v16 = vpack.c.bf16 %v548_v8, %v547_v6 }
  0xfe   :  { %4673 = vmatprep.subr.bf16.mxu0 %v4672_v14  ;;  %v597_v14 = vld [vmem:[%s8078_s1 + $0x11c0] sm:$0xff] }
  0xff   :  { %4703 = vmatpush3.bf16.msra.mxu1 %v4702_v12  ;;  %v566_v12 = vld [vmem:[%s8078_s1 + $0x10c8] sm:$0xff]  ;;  %v4756_v22 = vpack.c.bf16 %v598_v15, %v597_v14 }
 0x100   :  { %4705 = vmatprep.subr.bf16.mxu1 %v4704_v19  ;;  %v4724_v18 = vpack.c.bf16 %v566_v12, %v565_v10  ;;  %v549_v19 = vld [vmem:[%s8078_s1 + $0x1040] sm:$0xff] }
 0x101   :  { %4675 = vmatpush3.bf16.msra.mxu0 %v4674_v27  ;;  %v599_v27 = vld [vmem:[%s8078_s1 + $0x11d0] sm:$0xff] }
 0x102   :  { %4709 = vmatprep.subr.bf16.mxu0 %v4708_v29 }
 0x103   :  { %4707 = vmatpush3.bf16.msra.mxu1 %v4706_v28  ;;  %v600_v28 = vld [vmem:[%s8078_s1 + $0x11d8] sm:$0xff] }
 0x104   :  { %4741 = vmatprep.subr.bf16.mxu1 %v4740_v42  ;;  %2285 = vmatmul.mubr.f32.vlgmr.msra.gmra.mrb[14].mxu0 %v6627_v51  ;;  %v545_v51 = vld [vmem:[%s8078_s1 + $0x1020] sm:$0xff] }
 0x105   :  { %4711 = vmatpush3.bf16.msra.mxu0 %v4710_v40  ;;  %2424 = vmatprep.mubr.f32.mxu0 %v1097_v54  ;;  %v4718_v3 = vpack.c.bf16 %v546_v60, %v545_v51 }
 0x106   :  { %2355 = vmatmul.mubr.f32.vlgmr.msra.gmra.mrb[14].mxu1 %v6636_v33  ;;  %4713 = vmatprep.subr.bf16.mxu0 %v4712_v43  ;;  %v578_v33 = vld [vmem:[%s8078_s1 + $0x1128] sm:$0xff] }
 0x107   :  { %4743 = vmatpush3.bf16.msra.mxu1 %v4742_v41  ;;  %2494 = vmatprep.mubr.f32.mxu1 %v1098_v57  ;;  %v4750_v4 = vpack.c.bf16 %v578_v33, %v577_v61 }
 0x108   :  { %4745 = vmatprep.subr.bf16.mxu1 %v4744_v48 }
 0x109   :  { %4715 = vmatpush3.bf16.msra.mxu0 %v4714_v45 }
 0x10a   :  { %4717 = vmatprep.subr.bf16.mxu0 %v4716_v59 }
 0x10b   :  { %4747 = vmatpush3.bf16.msra.mxu1 %v4746_v58 }
 0x10c   :  { %4749 = vmatprep.subr.bf16.mxu1 %v4748_v62 }
 0x10d   :  { %4719 = vmatpush3.bf16.msra.mxu0 %v4718_v3 }
 0x10e   :  { %4721 = vmatprep.subr.bf16.mxu0 %v4720_v5 }
 0x10f   :  { %4751 = vmatpush3.bf16.msra.mxu1 %v4750_v4 }
 0x110   :  { %4753 = vmatprep.subr.bf16.mxu1 %v4752_v9 }
 0x111   :  { %8 = vsyncpa [#allocation3], 0  ;;  %4723 = vmatpush3.bf16.msra.mxu0 %v4722_v16  ;;  %v4726_v29 = vpack.c.bf16 %v550_v20, %v549_v19  ;;  %v4758_v31 = vpack.c.bf16 %v582_v23, %v581_v21  ;;  %v4728_v30 = vpack.c.bf16 %v568_v25, %v567_v24  ;;  %v551_v32 = vld [vmem:[%s8078_s1 + $0x1050] sm:$0xff]  ;;  %v552_v42 = vld [vmem:[%s8078_s1 + $0x1058] sm:$0xff]  ;;  %v4760_v35 = vpack.c.bf16 %v600_v28, %v599_v27 }
 0x112   :  { %4725 = vmatprep.subr.bf16.mxu0 %v4724_v18  ;;  %v583_v34 = vld [vmem:[%s8078_s1 + $0x1150] sm:$0xff]  ;;  %v584_v36 = vld [vmem:[%s8078_s1 + $0x1158] sm:$0xff]  ;;  %v569_v37 = vld [vmem:[%s8078_s1 + $0x10e0] sm:$0xff]  ;;  %v4730_v43 = vpack.c.bf16 %v552_v42, %v551_v32 }
 0x113   :  { %4755 = vmatpush3.bf16.msra.mxu1 %v4754_v17  ;;  %v570_v38 = vld [vmem:[%s8078_s1 + $0x10e8] sm:$0xff]  ;;  %v601_v40 = vld [vmem:[%s8078_s1 + $0x11e0] sm:$0xff]  ;;  %v4762_v44 = vpack.c.bf16 %v584_v36, %v583_v34  ;;  %v571_v55 = vld [vmem:[%s8078_s1 + $0x10f0] sm:$0xff] }
 0x114   :  { %4757 = vmatprep.subr.bf16.mxu1 %v4756_v22  ;;  %v602_v41 = vld [vmem:[%s8078_s1 + $0x11e8] sm:$0xff]  ;;  %v4732_v46 = vpack.c.bf16 %v570_v38, %v569_v37  ;;  %v553_v47 = vld [vmem:[%s8078_s1 + $0x1060] sm:$0xff]  ;;  %v572_v56 = vld [vmem:[%s8078_s1 + $0x10f8] sm:$0xff] }
 0x115   :  { %4727 = vmatpush3.bf16.msra.mxu0 %v4726_v29  ;;  %v554_v48 = vld [vmem:[%s8078_s1 + $0x1068] sm:$0xff]  ;;  %v585_v49 = vld [vmem:[%s8078_s1 + $0x1160] sm:$0xff]  ;;  %v4764_v53 = vpack.c.bf16 %v602_v41, %v601_v40  ;;  %v603_v58 = vld [vmem:[%s8078_s1 + $0x11f0] sm:$0xff]  ;;  %v4736_v0 = vpack.c.bf16 %v572_v56, %v571_v55 }
 0x116   :  { %4729 = vmatprep.subr.bf16.mxu0 %v4728_v30  ;;  %v586_v54 = vld [vmem:[%s8078_s1 + $0x1168] sm:$0xff]  ;;  %v604_v59 = vld [vmem:[%s8078_s1 + $0x11f8] sm:$0xff]  ;;  %v4734_v61 = vpack.c.bf16 %v554_v48, %v553_v47  ;;  %v555_v1 = vld [vmem:[%s8078_s1 + $0x1070] sm:$0xff] }
 0x117   :  { %4759 = vmatpush3.bf16.msra.mxu1 %v4758_v31  ;;  %v3318_v50 = vpop.f32.mrb[2].mxu0  ;;  %v24_v62 = vld [vmem:[%s8077_s0 + $0x48] sm:$0xff]  ;;  %v4766_v63 = vpack.c.bf16 %v586_v54, %v585_v49  ;;  %v556_v2 = vld [vmem:[%s8078_s1 + $0x1078] sm:$0xff]  ;;  %v587_v3 = vld [vmem:[%s8078_s1 + $0x1170] sm:$0xff]  ;;  %v4768_v5 = vpack.c.bf16 %v604_v59, %v603_v58 }
 0x118   :  { %4761 = vmatprep.subr.bf16.mxu1 %v4760_v35  ;;  %v3319_v57 = vpop.f32.mrb[3].mxu0  ;;  %v588_v6 = vld [vmem:[%s8078_s1 + $0x1178] sm:$0xff]  ;;  %v621_v8 = vld [vmem:[%s8078_s1 + $0x1280] sm:$0xff]  ;;  %v622_v7 = vld [vmem:[%s8078_s1 + $0x1288] sm:$0xff]  ;;  %v1099_v11 = vcombine.high %v24_v62, %v24_v62  ;;  %v4738_v12 = vpack.c.bf16 %v556_v2, %v555_v1  ;;  %v7049_v23 = vrot.slane %v24_v62, %v5304_v13 }
 0x119   :  { %v3353_v45 = vpop.f32.mrb[2].mxu1  ;;  %v3320_v51 = vadd.f32 %v3319_v57, %v3318_v50  ;;  %4731 = vmatpush3.bf16.msra.mxu0 %v4730_v43  ;;  %v653_v9 = vld [vmem:[%s8078_s1 + $0x1380] sm:$0xff]  ;;  %v4770_v14 = vpack.c.bf16 %v588_v6, %v587_v3  ;;  %v4772_v15 = vpack.c.bf16 %v622_v7, %v621_v8  ;;  %v606_v17 = vld [vmem:[%s8078_s1 + $0x1208] sm:$0xff]  ;;  %v623_v21 = vld [vmem:[%s8078_s1 + $0x1290] sm:$0xff] }
 0x11a   :  { %v3354_v60 = vpop.f32.mrb[3].mxu1  ;;  %4733 = vmatprep.subr.bf16.mxu0 %v4732_v46  ;;  %v605_v16 = vld [vmem:[%s8078_s1 + $0x1200] sm:$0xff]  ;;  %v638_v20 = vld [vmem:[%s8078_s1 + $0x1308] sm:$0xff]  ;;  %v624_v22 = vld [vmem:[%s8078_s1 + $0x1298] sm:$0xff]  ;;  %v7058_v27 = vrot.slane %v1099_v11, %v5304_v13  ;;  %v1114_v38 = vcombine.high %v7049_v23, %v7049_v23 }
 0x11b   :  { %v3355_v33 = vadd.f32 %v3354_v60, %v3353_v45  ;;  %4763 = vmatpush3.bf16.msra.mxu1 %v4762_v44  ;;  %v1447_v4 = vadd.f32 %v3320_v51, %v6818_v26  ;;  %v654_v26 = vld [vmem:[%s8078_s1 + $0x1388] sm:$0xff]  ;;  %v637_v18 = vld [vmem:[%s8078_s1 + $0x1300] sm:$0xff]  ;;  %v655_v24 = vld [vmem:[%s8078_s1 + $0x1390] sm:$0xff]  ;;  %v4774_v28 = vpack.c.bf16 %v606_v17, %v605_v16  ;;  %v4776_v31 = vpack.c.bf16 %v624_v22, %v623_v21 }
 0x11c   :  { %4765 = vmatprep.subr.bf16.mxu1 %v4764_v53  ;;  %v4804_v19 = vpack.c.bf16 %v654_v26, %v653_v9  ;;  %v656_v25 = vld [vmem:[%s8078_s1 + $0x1398] sm:$0xff]  ;;  %v4806_v29 = vpack.c.bf16 %v638_v20, %v637_v18  ;;  %v607_v30 = vld [vmem:[%s8078_s1 + $0x1210] sm:$0xff]  ;;  %v625_v36 = vld [vmem:[%s8078_s1 + $0x12a0] sm:$0xff]  ;;  %v1115_v43 = vcombine.high %v7058_v27, %v7058_v27 }
 0x11d   :  { %v7028_v10 = vadd.f32 %v3355_v33, %v1447_v4  ;;  %4735 = vmatpush3.bf16.msra.mxu0 %v4734_v61  ;;  %v608_v32 = vld [vmem:[%s8078_s1 + $0x1218] sm:$0xff]  ;;  %v639_v42 = vld [vmem:[%s8078_s1 + $0x1310] sm:$0xff]  ;;  %v4808_v34 = vpack.c.bf16 %v656_v25, %v655_v24  ;;  %v626_v37 = vld [vmem:[%s8078_s1 + $0x12a8] sm:$0xff] }
 0x11e   :  { %4737 = vmatprep.subr.bf16.mxu0 %v4736_v0  ;;  %v640_v35 = vld [vmem:[%s8078_s1 + $0x1318] sm:$0xff]  ;;  %v657_v40 = vld [vmem:[%s8078_s1 + $0x13a0] sm:$0xff]  ;;  %v658_v41 = vld [vmem:[%s8078_s1 + $0x13a8] sm:$0xff]  ;;  %v4778_v44 = vpack.c.bf16 %v608_v32, %v607_v30  ;;  %v4780_v47 = vpack.c.bf16 %v626_v37, %v625_v36 }
 0x11f   :  { %4767 = vmatpush3.bf16.msra.mxu1 %v4766_v63  ;;  %v4810_v46 = vpack.c.bf16 %v640_v35, %v639_v42  ;;  %v610_v48 = vld [vmem:[%s8078_s1 + $0x1228] sm:$0xff]  ;;  %v641_v49 = vld [vmem:[%s8078_s1 + $0x1320] sm:$0xff]  ;;  %v4812_v50 = vpack.c.bf16 %v658_v41, %v657_v40  ;;  %v627_v53 = vld [vmem:[%s8078_s1 + $0x12b0] sm:$0xff] }
 0x120   :  { %4769 = vmatprep.subr.bf16.mxu1 %v4768_v5  ;;  %v628_v54 = vld [vmem:[%s8078_s1 + $0x12b8] sm:$0xff]  ;;  %v659_v55 = vld [vmem:[%s8078_s1 + $0x13b0] sm:$0xff]  ;;  %v629_v33 = vld [vmem:[%s8078_s1 + $0x12c0] sm:$0xff] }
 0x121   :  { %4739 = vmatpush3.bf16.msra.mxu0 %v4738_v12  ;;  %v660_v56 = vld [vmem:[%s8078_s1 + $0x13b8] sm:$0xff]  ;;  %v4784_v58 = vpack.c.bf16 %v628_v54, %v627_v53  ;;  %v611_v59 = vld [vmem:[%s8078_s1 + $0x1230] sm:$0xff]  ;;  %v630_v63 = vld [vmem:[%s8078_s1 + $0x12c8] sm:$0xff] }
 0x122   :  { %4773 = vmatprep.subr.bf16.mxu0 %v4772_v15  ;;  %v612_v51 = vld [vmem:[%s8078_s1 + $0x1238] sm:$0xff]  ;;  %v643_v60 = vld [vmem:[%s8078_s1 + $0x1330] sm:$0xff]  ;;  %v4816_v61 = vpack.c.bf16 %v660_v56, %v659_v55  ;;  %v661_v0 = vld [vmem:[%s8078_s1 + $0x13c0] sm:$0xff]  ;;  %v4788_v4 = vpack.c.bf16 %v630_v63, %v629_v33 }
 0x123   :  { %4771 = vmatpush3.bf16.msra.mxu1 %v4770_v14  ;;  %v644_v62 = vld [vmem:[%s8078_s1 + $0x1338] sm:$0xff]  ;;  %v662_v1 = vld [vmem:[%s8078_s1 + $0x13c8] sm:$0xff]  ;;  %v4786_v2 = vpack.c.bf16 %v612_v51, %v611_v59  ;;  %v613_v5 = vld [vmem:[%s8078_s1 + $0x1240] sm:$0xff] }
 0x124   :  { %4805 = vmatprep.subr.bf16.mxu1 %v4804_v19  ;;  %2425 = vmatmul.mubr.f32.vlgmr.msra.gmra.mrb[16].mxu0 %v6839_v52  ;;  %v609_v52 = vld [vmem:[%s8078_s1 + $0x1220] sm:$0xff]  ;;  %v4818_v3 = vpack.c.bf16 %v644_v62, %v643_v60  ;;  %v614_v6 = vld [vmem:[%s8078_s1 + $0x1248] sm:$0xff]  ;;  %v4820_v7 = vpack.c.bf16 %v662_v1, %v661_v0  ;;  %v631_v26 = vld [vmem:[%s8078_s1 + $0x12d0] sm:$0xff] }
 0x125   :  { %4775 = vmatpush3.bf16.msra.mxu0 %v4774_v28  ;;  %2564 = vmatprep.mubr.f32.mxu0 %v1114_v38  ;;  %v4782_v57 = vpack.c.bf16 %v610_v48, %v609_v52  ;;  %v645_v8 = vld [vmem:[%s8078_s1 + $0x1340] sm:$0xff]  ;;  %v646_v9 = vld [vmem:[%s8078_s1 + $0x1348] sm:$0xff]  ;;  %v632_v11 = vld [vmem:[%s8078_s1 + $0x12d8] sm:$0xff]  ;;  %v4790_v15 = vpack.c.bf16 %v614_v6, %v613_v5 }
 0x126   :  { %2495 = vmatmul.mubr.f32.vlgmr.msra.gmra.mrb[16].mxu1 %v6848_v39  ;;  %4777 = vmatprep.subr.bf16.mxu0 %v4776_v31  ;;  %v642_v39 = vld [vmem:[%s8078_s1 + $0x1328] sm:$0xff]  ;;  %v663_v12 = vld [vmem:[%s8078_s1 + $0x13d0] sm:$0xff]  ;;  %v664_v14 = vld [vmem:[%s8078_s1 + $0x13d8] sm:$0xff]  ;;  %v4822_v16 = vpack.c.bf16 %v646_v9, %v645_v8  ;;  %v4792_v17 = vpack.c.bf16 %v632_v11, %v631_v26 }
 0x127   :  { %4807 = vmatpush3.bf16.msra.mxu1 %v4806_v29  ;;  %2634 = vmatprep.mubr.f32.mxu1 %v1115_v43  ;;  %v4814_v45 = vpack.c.bf16 %v642_v39, %v641_v49  ;;  %v615_v18 = vld [vmem:[%s8078_s1 + $0x1250] sm:$0xff]  ;;  %v616_v19 = vld [vmem:[%s8078_s1 + $0x1258] sm:$0xff]  ;;  %v4824_v21 = vpack.c.bf16 %v664_v14, %v663_v12  ;;  %v633_v24 = vld [vmem:[%s8078_s1 + $0x12e0] sm:$0xff] }
 0x128   :  { %4809 = vmatprep.subr.bf16.mxu1 %v4808_v34  ;;  %v647_v20 = vld [vmem:[%s8078_s1 + $0x1350] sm:$0xff]  ;;  %v648_v22 = vld [vmem:[%s8078_s1 + $0x1358] sm:$0xff]  ;;  %v634_v25 = vld [vmem:[%s8078_s1 + $0x12e8] sm:$0xff]  ;;  %v4794_v31 = vpack.c.bf16 %v616_v19, %v615_v18 }
 0x129   :  { %4779 = vmatpush3.bf16.msra.mxu0 %v4778_v44  ;;  %v665_v28 = vld [vmem:[%s8078_s1 + $0x13e0] sm:$0xff]  ;;  %v666_v29 = vld [vmem:[%s8078_s1 + $0x13e8] sm:$0xff]  ;;  %v4826_v30 = vpack.c.bf16 %v648_v22, %v647_v20  ;;  %v4796_v32 = vpack.c.bf16 %v634_v25, %v633_v24  ;;  %v635_v40 = vld [vmem:[%s8078_s1 + $0x12f0] sm:$0xff] }
 0x12a   :  { %4781 = vmatprep.subr.bf16.mxu0 %v4780_v47  ;;  %v617_v42 = vld [vmem:[%s8078_s1 + $0x1260] sm:$0xff]  ;;  %v618_v34 = vld [vmem:[%s8078_s1 + $0x1268] sm:$0xff]  ;;  %v4828_v37 = vpack.c.bf16 %v666_v29, %v665_v28  ;;  %v636_v41 = vld [vmem:[%s8078_s1 + $0x12f8] sm:$0xff] }
 0x12b   :  { %4811 = vmatpush3.bf16.msra.mxu1 %v4810_v46  ;;  %v649_v35 = vld [vmem:[%s8078_s1 + $0x1360] sm:$0xff]  ;;  %v650_v38 = vld [vmem:[%s8078_s1 + $0x1368] sm:$0xff]  ;;  %v667_v46 = vld [vmem:[%s8078_s1 + $0x13f0] sm:$0xff]  ;;  %v4798_v49 = vpack.c.bf16 %v618_v34, %v617_v42  ;;  %v4800_v54 = vpack.c.bf16 %v636_v41, %v635_v40 }
 0x12c   :  { %4813 = vmatprep.subr.bf16.mxu1 %v4812_v50  ;;  %v668_v47 = vld [vmem:[%s8078_s1 + $0x13f8] sm:$0xff]  ;;  %v25_v50 = vld [vmem:[%s8077_s0 + $0x50] sm:$0xff]  ;;  %v4830_v53 = vpack.c.bf16 %v650_v38, %v649_v35  ;;  %v685_v51 = vld [vmem:[%s8078_s1 + $0x1480] sm:$0xff] }
 0x12d   :  { %4783 = vmatpush3.bf16.msra.mxu0 %v4782_v57  ;;  %v619_v55 = vld [vmem:[%s8078_s1 + $0x1270] sm:$0xff]  ;;  %v620_v56 = vld [vmem:[%s8078_s1 + $0x1278] sm:$0xff]  ;;  %v686_v60 = vld [vmem:[%s8078_s1 + $0x1488] sm:$0xff]  ;;  %v1116_v62 = vcombine.high %v25_v50, %v25_v50  ;;  %v7259_v9 = vrot.slane %v25_v50, %v5304_v13 }
 0x12e   :  { %4785 = vmatprep.subr.bf16.mxu0 %v4784_v58  ;;  %v651_v57 = vld [vmem:[%s8078_s1 + $0x1370] sm:$0xff]  ;;  %v4832_v58 = vpack.c.bf16 %v668_v47, %v667_v46  ;;  %v652_v59 = vld [vmem:[%s8078_s1 + $0x1378] sm:$0xff]  ;;  %v4802_v63 = vpack.c.bf16 %v620_v56, %v619_v55  ;;  %v4836_v1 = vpack.c.bf16 %v686_v60, %v685_v51  ;;  %v702_v6 = vld [vmem:[%s8078_s1 + $0x1508] sm:$0xff] }
 0x12f   :  { %4815 = vmatpush3.bf16.msra.mxu1 %v4814_v45  ;;  %v4834_v0 = vpack.c.bf16 %v652_v59, %v651_v57  ;;  %v687_v8 = vld [vmem:[%s8078_s1 + $0x1490] sm:$0xff]  ;;  %v720_v11 = vld [vmem:[%s8078_s1 + $0x1598] sm:$0xff]  ;;  %v7268_v12 = vrot.slane %v1116_v62, %v5304_v13  ;;  %v689_v22 = vld [vmem:[%s8078_s1 + $0x14a0] sm:$0xff]  ;;  %v1131_v25 = vcombine.high %v7259_v9, %v7259_v9 }
 0x130   :  { %4817 = vmatprep.subr.bf16.mxu1 %v4816_v61  ;;  %v717_v61 = vld [vmem:[%s8078_s1 + $0x1580] sm:$0xff]  ;;  %v719_v26 = vld [vmem:[%s8078_s1 + $0x1590] sm:$0xff]  ;;  %v672_v18 = vld [vmem:[%s8078_s1 + $0x1418] sm:$0xff] }
 0x131   :  { %4787 = vmatpush3.bf16.msra.mxu0 %v4786_v2  ;;  %v669_v2 = vld [vmem:[%s8078_s1 + $0x1400] sm:$0xff]  ;;  %v703_v19 = vld [vmem:[%s8078_s1 + $0x1510] sm:$0xff]  ;;  %v4872_v20 = vpack.c.bf16 %v720_v11, %v719_v26  ;;  %v690_v24 = vld [vmem:[%s8078_s1 + $0x14a8] sm:$0xff] }
 0x132   :  { %4789 = vmatprep.subr.bf16.mxu0 %v4788_v4  ;;  %v701_v4 = vld [vmem:[%s8078_s1 + $0x1500] sm:$0xff]  ;;  %v722_v29 = vld [vmem:[%s8078_s1 + $0x15a8] sm:$0xff]  ;;  %v4844_v42 = vpack.c.bf16 %v690_v24, %v689_v22  ;;  %v692_v38 = vld [vmem:[%s8078_s1 + $0x14b8] sm:$0xff] }
 0x133   :  { %4819 = vmatpush3.bf16.msra.mxu1 %v4818_v3  ;;  %v670_v3 = vld [vmem:[%s8078_s1 + $0x1408] sm:$0xff]  ;;  %v721_v28 = vld [vmem:[%s8078_s1 + $0x15a0] sm:$0xff]  ;;  %v723_v40 = vld [vmem:[%s8078_s1 + $0x15b0] sm:$0xff] }
 0x134   :  { %4821 = vmatprep.subr.bf16.mxu1 %v4820_v7  ;;  %v688_v7 = vld [vmem:[%s8078_s1 + $0x1498] sm:$0xff]  ;;  %v4838_v14 = vpack.c.bf16 %v670_v3, %v669_v2  ;;  %v674_v34 = vld [vmem:[%s8078_s1 + $0x1428] sm:$0xff]  ;;  %v705_v35 = vld [vmem:[%s8078_s1 + $0x1520] sm:$0xff] }
 0x135   :  { %4791 = vmatpush3.bf16.msra.mxu0 %v4790_v15  ;;  %v4870_v15 = vpack.c.bf16 %v702_v6, %v701_v4  ;;  %v724_v41 = vld [vmem:[%s8078_s1 + $0x15b8] sm:$0xff]  ;;  %v675_v47 = vld [vmem:[%s8078_s1 + $0x1430] sm:$0xff]  ;;  %v726_v55 = vld [vmem:[%s8078_s1 + $0x15c8] sm:$0xff] }
 0x136   :  { %4793 = vmatprep.subr.bf16.mxu0 %v4792_v17  ;;  %v671_v17 = vld [vmem:[%s8078_s1 + $0x1410] sm:$0xff]  ;;  %v708_v50 = vld [vmem:[%s8078_s1 + $0x1538] sm:$0xff]  ;;  %v678_v59 = vld [vmem:[%s8078_s1 + $0x1448] sm:$0xff] }
 0x137   :  { %4823 = vmatpush3.bf16.msra.mxu1 %v4822_v16  ;;  %v3388_v36 = vpop.f32.mrb[4].mxu0  ;;  %v4840_v16 = vpack.c.bf16 %v688_v7, %v687_v8  ;;  %v709_v51 = vld [vmem:[%s8078_s1 + $0x1540] sm:$0xff]  ;;  %v696_v62 = vld [vmem:[%s8078_s1 + $0x14d8] sm:$0xff]  ;;  %v679_v4 = vld [vmem:[%s8078_s1 + $0x1450] sm:$0xff] }
 0x138   :  { %4825 = vmatprep.subr.bf16.mxu1 %v4824_v21  ;;  %v3389_v43 = vpop.f32.mrb[5].mxu0  ;;  %v704_v21 = vld [vmem:[%s8078_s1 + $0x1518] sm:$0xff]  ;;  %v711_v6 = vld [vmem:[%s8078_s1 + $0x1550] sm:$0xff]  ;;  %v697_v26 = vld [vmem:[%s8078_s1 + $0x14e0] sm:$0xff] }
 0x139   :  { %v3423_v44 = vpop.f32.mrb[4].mxu1  ;;  %v3390_v52 = vadd.f32 %v3389_v43, %v3388_v36  ;;  %4795 = vmatpush3.bf16.msra.mxu0 %v4794_v31  ;;  %v1132_v31 = vcombine.high %v7268_v12, %v7268_v12  ;;  %v4876_v36 = vpack.c.bf16 %v722_v29, %v721_v28  ;;  %v712_v7 = vld [vmem:[%s8078_s1 + $0x1558] sm:$0xff]  ;;  %v698_v11 = vld [vmem:[%s8078_s1 + $0x14e8] sm:$0xff]  ;;  %v699_v28 = vld [vmem:[%s8078_s1 + $0x14f0] sm:$0xff] }
 0x13a   :  { %v3424_v48 = vpop.f32.mrb[5].mxu1  ;;  %4797 = vmatprep.subr.bf16.mxu0 %v4796_v32  ;;  %v4874_v32 = vpack.c.bf16 %v704_v21, %v703_v19  ;;  %v681_v19 = vld [vmem:[%s8078_s1 + $0x1460] sm:$0xff]  ;;  %v700_v29 = vld [vmem:[%s8078_s1 + $0x14f8] sm:$0xff] }
 0x13b   :  { %v3425_v39 = vadd.f32 %v3424_v48, %v3423_v44  ;;  %4827 = vmatpush3.bf16.msra.mxu1 %v4826_v30  ;;  %v1587_v45 = vadd.f32 %v3390_v52, %v7028_v10  ;;  %v718_v10 = vld [vmem:[%s8078_s1 + $0x1588] sm:$0xff]  ;;  %v4842_v30 = vpack.c.bf16 %v672_v18, %v671_v17  ;;  %v676_v52 = vld [vmem:[%s8078_s1 + $0x1438] sm:$0xff]  ;;  %v707_v48 = vld [vmem:[%s8078_s1 + $0x1530] sm:$0xff]  ;;  %v4890_v17 = vpack.c.bf16 %v712_v7, %v711_v6 }
 0x13c   :  { %4829 = vmatprep.subr.bf16.mxu1 %v4828_v37  ;;  %v4868_v5 = vpack.c.bf16 %v718_v10, %v717_v61  ;;  %v691_v37 = vld [vmem:[%s8078_s1 + $0x14b0] sm:$0xff]  ;;  %v4850_v56 = vpack.c.bf16 %v676_v52, %v675_v47  ;;  %v4882_v57 = vpack.c.bf16 %v708_v50, %v707_v48  ;;  %v710_v61 = vld [vmem:[%s8078_s1 + $0x1548] sm:$0xff]  ;;  %v4860_v18 = vpack.c.bf16 %v698_v11, %v697_v26  ;;  %v713_v21 = vld [vmem:[%s8078_s1 + $0x1560] sm:$0xff] }
 0x13d   :  { %v7238_v33 = vadd.f32 %v3425_v39, %v1587_v45  ;;  %4799 = vmatpush3.bf16.msra.mxu0 %v4798_v49  ;;  %v4848_v46 = vpack.c.bf16 %v692_v38, %v691_v37  ;;  %v4880_v49 = vpack.c.bf16 %v724_v41, %v723_v40  ;;  %v693_v39 = vld [vmem:[%s8078_s1 + $0x14c0] sm:$0xff]  ;;  %v695_v10 = vld [vmem:[%s8078_s1 + $0x14d0] sm:$0xff]  ;;  %v4886_v2 = vpack.c.bf16 %v710_v61, %v709_v51  ;;  %v684_v41 = vld [vmem:[%s8078_s1 + $0x1478] sm:$0xff] }
 0x13e   :  { %4801 = vmatprep.subr.bf16.mxu0 %v4800_v54  ;;  %v725_v54 = vld [vmem:[%s8078_s1 + $0x15c0] sm:$0xff]  ;;  %v4856_v3 = vpack.c.bf16 %v696_v62, %v695_v10  ;;  %v4864_v38 = vpack.c.bf16 %v700_v29, %v699_v28  ;;  %v683_v40 = vld [vmem:[%s8078_s1 + $0x1470] sm:$0xff]  ;;  %v716_v47 = vld [vmem:[%s8078_s1 + $0x1578] sm:$0xff] }
 0x13f   :  { %4831 = vmatpush3.bf16.msra.mxu1 %v4830_v53  ;;  %v694_v53 = vld [vmem:[%s8078_s1 + $0x14c8] sm:$0xff]  ;;  %v4884_v60 = vpack.c.bf16 %v726_v55, %v725_v54  ;;  %v749_v52 = vld [vmem:[%s8078_s1 + $0x1680] sm:$0xff]  ;;  %v751_v51 = vld [vmem:[%s8078_s1 + $0x1690] sm:$0xff] }
 0x140   :  { %4833 = vmatprep.subr.bf16.mxu1 %v4832_v58  ;;  %v4852_v45 = vpack.c.bf16 %v694_v53, %v693_v39  ;;  %v677_v58 = vld [vmem:[%s8078_s1 + $0x1440] sm:$0xff]  ;;  %v750_v48 = vld [vmem:[%s8078_s1 + $0x1688] sm:$0xff]  ;;  %v4866_v53 = vpack.c.bf16 %v684_v41, %v683_v40  ;;  %v783_v10 = vld [vmem:[%s8078_s1 + $0x1790] sm:$0xff] }
 0x141   :  { %4803 = vmatpush3.bf16.msra.mxu0 %v4802_v63  ;;  %v727_v63 = vld [vmem:[%s8078_s1 + $0x15d0] sm:$0xff]  ;;  %v4900_v55 = vpack.c.bf16 %v750_v48, %v749_v52  ;;  %v784_v62 = vld [vmem:[%s8078_s1 + $0x1798] sm:$0xff]  ;;  %v753_v7 = vld [vmem:[%s8078_s1 + $0x16a0] sm:$0xff] }
 0x142   :  { %4837 = vmatprep.subr.bf16.mxu0 %v4836_v1  ;;  %v4854_v1 = vpack.c.bf16 %v678_v59, %v677_v58  ;;  %v766_v59 = vld [vmem:[%s8078_s1 + $0x1708] sm:$0xff]  ;;  %v4936_v6 = vpack.c.bf16 %v784_v62, %v783_v10  ;;  %v787_v28 = vld [vmem:[%s8078_s1 + $0x17b0] sm:$0xff]  ;;  %v788_v29 = vld [vmem:[%s8078_s1 + $0x17b8] sm:$0xff] }
 0x143   :  { %4835 = vmatpush3.bf16.msra.mxu1 %v4834_v0  ;;  %v728_v0 = vld [vmem:[%s8078_s1 + $0x15d8] sm:$0xff]  ;;  %v754_v26 = vld [vmem:[%s8078_s1 + $0x16a8] sm:$0xff]  ;;  %v773_v52 = vld [vmem:[%s8078_s1 + $0x1740] sm:$0xff] }
 0x144   :  { %4869 = vmatprep.subr.bf16.mxu1 %v4868_v5  ;;  %2565 = vmatmul.mubr.f32.vlgmr.msra.gmra.mrb[18].mxu0 %v7049_v23  ;;  %v673_v23 = vld [vmem:[%s8078_s1 + $0x1420] sm:$0xff]  ;;  %v680_v5 = vld [vmem:[%s8078_s1 + $0x1458] sm:$0xff]  ;;  %v4888_v8 = vpack.c.bf16 %v728_v0, %v727_v63  ;;  %v790_v40 = vld [vmem:[%s8078_s1 + $0x17c8] sm:$0xff] }
 0x145   :  { %4839 = vmatpush3.bf16.msra.mxu0 %v4838_v14  ;;  %2704 = vmatprep.mubr.f32.mxu0 %v1131_v25  ;;  %v4846_v43 = vpack.c.bf16 %v674_v34, %v673_v23  ;;  %v729_v14 = vld [vmem:[%s8078_s1 + $0x15e0] sm:$0xff]  ;;  %v714_v25 = vld [vmem:[%s8078_s1 + $0x1568] sm:$0xff] }
 0x146   :  { %2635 = vmatmul.mubr.f32.vlgmr.msra.gmra.mrb[18].mxu1 %v7058_v27  ;;  %4841 = vmatprep.subr.bf16.mxu0 %v4840_v16  ;;  %v706_v27 = vld [vmem:[%s8078_s1 + $0x1528] sm:$0xff]  ;;  %v4858_v16 = vpack.c.bf16 %v680_v5, %v679_v4  ;;  %v4894_v37 = vpack.c.bf16 %v714_v25, %v713_v21  ;;  %v736_v4 = vld [vmem:[%s8078_s1 + $0x1618] sm:$0xff]  ;;  %v767_v5 = vld [vmem:[%s8078_s1 + $0x1710] sm:$0xff] }
 0x147   :  { %4871 = vmatpush3.bf16.msra.mxu1 %v4870_v15  ;;  %2774 = vmatprep.mubr.f32.mxu1 %v1132_v31  ;;  %v4878_v44 = vpack.c.bf16 %v706_v27, %v705_v35  ;;  %v730_v15 = vld [vmem:[%s8078_s1 + $0x15e8] sm:$0xff]  ;;  %v769_v21 = vld [vmem:[%s8078_s1 + $0x1720] sm:$0xff]  ;;  %v756_v25 = vld [vmem:[%s8078_s1 + $0x16b8] sm:$0xff] }
 0x148   :  { %4873 = vmatprep.subr.bf16.mxu1 %v4872_v20  ;;  %v682_v20 = vld [vmem:[%s8078_s1 + $0x1468] sm:$0xff]  ;;  %v4892_v24 = vpack.c.bf16 %v730_v15, %v729_v14  ;;  %v785_v14 = vld [vmem:[%s8078_s1 + $0x17a0] sm:$0xff] }
 0x149   :  { %4843 = vmatpush3.bf16.msra.mxu0 %v4842_v30  ;;  %v4862_v35 = vpack.c.bf16 %v682_v20, %v681_v19  ;;  %v786_v15 = vld [vmem:[%s8078_s1 + $0x17a8] sm:$0xff]  ;;  %v4908_v19 = vpack.c.bf16 %v754_v26, %v753_v7  ;;  %v761_v10 = vld [vmem:[%s8078_s1 + $0x16e0] sm:$0xff] }
 0x14a   :  { %4845 = vmatprep.subr.bf16.mxu0 %v4844_v42  ;;  %v732_v42 = vld [vmem:[%s8078_s1 + $0x15f8] sm:$0xff]  ;;  %v738_v20 = vld [vmem:[%s8078_s1 + $0x1628] sm:$0xff] }
 0x14b   :  { %4875 = vmatpush3.bf16.msra.mxu1 %v4874_v32  ;;  %v731_v32 = vld [vmem:[%s8078_s1 + $0x15f0] sm:$0xff]  ;;  %v762_v62 = vld [vmem:[%s8078_s1 + $0x16e8] sm:$0xff] }
 0x14c   :  { %4877 = vmatprep.subr.bf16.mxu1 %v4876_v36  ;;  %v26_v36 = vld [vmem:[%s8077_s0 + $0x58] sm:$0xff] }
 0x14d   :  { %4847 = vmatpush3.bf16.msra.mxu0 %v4846_v43  ;;  %v715_v43 = vld [vmem:[%s8078_s1 + $0x1570] sm:$0xff]  ;;  %v1133_v50 = vcombine.high %v26_v36, %v26_v36  ;;  %v7469_v61 = vrot.slane %v26_v36, %v5304_v13  ;;  %v772_v36 = vld [vmem:[%s8078_s1 + $0x1738] sm:$0xff] }
 0x14e   :  { %4849 = vmatprep.subr.bf16.mxu0 %v4848_v46  ;;  %v4896_v46 = vpack.c.bf16 %v732_v42, %v731_v32  ;;  %v4898_v54 = vpack.c.bf16 %v716_v47, %v715_v43  ;;  %v739_v42 = vld [vmem:[%s8078_s1 + $0x1630] sm:$0xff]  ;;  %v742_v47 = vld [vmem:[%s8078_s1 + $0x1648] sm:$0xff] }
 0x14f   :  { %4879 = vmatpush3.bf16.msra.mxu1 %v4878_v44  ;;  %v7478_v63 = vrot.slane %v1133_v50, %v5304_v13  ;;  %v1148_v11 = vcombine.high %v7469_v61, %v7469_v61  ;;  %v760_v50 = vld [vmem:[%s8078_s1 + $0x16d8] sm:$0xff] }
 0x150   :  { %4881 = vmatprep.subr.bf16.mxu1 %v4880_v49  ;;  %v781_v49 = vld [vmem:[%s8078_s1 + $0x1780] sm:$0xff] }
 0x151   :  { %4851 = vmatpush3.bf16.msra.mxu0 %v4850_v56  ;;  %v733_v56 = vld [vmem:[%s8078_s1 + $0x1600] sm:$0xff] }
 0x152   :  { %4853 = vmatprep.subr.bf16.mxu0 %v4852_v45  ;;  %v765_v45 = vld [vmem:[%s8078_s1 + $0x1700] sm:$0xff] }
 0x153   :  { %4883 = vmatpush3.bf16.msra.mxu1 %v4882_v57  ;;  %v734_v57 = vld [vmem:[%s8078_s1 + $0x1608] sm:$0xff] }
 0x154   :  { %4885 = vmatprep.subr.bf16.mxu1 %v4884_v60  ;;  %v752_v60 = vld [vmem:[%s8078_s1 + $0x1698] sm:$0xff]  ;;  %v4902_v0 = vpack.c.bf16 %v734_v57, %v733_v56 }
 0x155   :  { %4855 = vmatpush3.bf16.msra.mxu0 %v4854_v1  ;;  %v4934_v1 = vpack.c.bf16 %v766_v59, %v765_v45  ;;  %v743_v45 = vld [vmem:[%s8078_s1 + $0x1650] sm:$0xff] }
 0x156   :  { %4857 = vmatprep.subr.bf16.mxu0 %v4856_v3  ;;  %v735_v3 = vld [vmem:[%s8078_s1 + $0x1610] sm:$0xff] }
 0x157   :  { %4887 = vmatpush3.bf16.msra.mxu1 %v4886_v2  ;;  %v3458_v22 = vpop.f32.mrb[6].mxu0  ;;  %v4904_v2 = vpack.c.bf16 %v752_v60, %v751_v51  ;;  %v775_v59 = vld [vmem:[%s8078_s1 + $0x1750] sm:$0xff]  ;;  %v776_v60 = vld [vmem:[%s8078_s1 + $0x1758] sm:$0xff] }
 0x158   :  { %4889 = vmatprep.subr.bf16.mxu1 %v4888_v8  ;;  %v3459_v31 = vpop.f32.mrb[7].mxu0  ;;  %v768_v8 = vld [vmem:[%s8078_s1 + $0x1718] sm:$0xff] }
 0x159   :  { %v3493_v30 = vpop.f32.mrb[6].mxu1  ;;  %v3460_v23 = vadd.f32 %v3459_v31, %v3458_v22  ;;  %4859 = vmatpush3.bf16.msra.mxu0 %v4858_v16  ;;  %v1149_v16 = vcombine.high %v7478_v63, %v7478_v63  ;;  %v4940_v22 = vpack.c.bf16 %v786_v15, %v785_v14  ;;  %v763_v14 = vld [vmem:[%s8078_s1 + $0x16f0] sm:$0xff]  ;;  %v764_v15 = vld [vmem:[%s8078_s1 + $0x16f8] sm:$0xff] }
 0x15a   :  { %v3494_v34 = vpop.f32.mrb[7].mxu1  ;;  %4861 = vmatprep.subr.bf16.mxu0 %v4860_v18  ;;  %v4938_v18 = vpack.c.bf16 %v768_v8, %v767_v5  ;;  %v745_v5 = vld [vmem:[%s8078_s1 + $0x1660] sm:$0xff] }
 0x15b   :  { %v3495_v27 = vadd.f32 %v3494_v34, %v3493_v30  ;;  %4891 = vmatpush3.bf16.msra.mxu1 %v4890_v17  ;;  %v1727_v44 = vadd.f32 %v3460_v23, %v7238_v33  ;;  %v782_v33 = vld [vmem:[%s8078_s1 + $0x1788] sm:$0xff]  ;;  %v4906_v17 = vpack.c.bf16 %v736_v4, %v735_v3  ;;  %v740_v23 = vld [vmem:[%s8078_s1 + $0x1638] sm:$0xff]  ;;  %v771_v34 = vld [vmem:[%s8078_s1 + $0x1730] sm:$0xff]  ;;  %v4954_v3 = vpack.c.bf16 %v776_v60, %v775_v59 }
 0x15c   :  { %4893 = vmatprep.subr.bf16.mxu1 %v4892_v24  ;;  %v4932_v58 = vpack.c.bf16 %v782_v33, %v781_v49  ;;  %v755_v24 = vld [vmem:[%s8078_s1 + $0x16b0] sm:$0xff]  ;;  %v4914_v41 = vpack.c.bf16 %v740_v23, %v739_v42  ;;  %v4946_v43 = vpack.c.bf16 %v772_v36, %v771_v34  ;;  %v774_v49 = vld [vmem:[%s8078_s1 + $0x1748] sm:$0xff]  ;;  %v4924_v4 = vpack.c.bf16 %v762_v62, %v761_v10  ;;  %v777_v8 = vld [vmem:[%s8078_s1 + $0x1760] sm:$0xff] }
 0x15d   :  { %v7448_v39 = vadd.f32 %v3495_v27, %v1727_v44  ;;  %4863 = vmatpush3.bf16.msra.mxu0 %v4862_v35  ;;  %v4912_v32 = vpack.c.bf16 %v756_v25, %v755_v24  ;;  %v4944_v35 = vpack.c.bf16 %v788_v29, %v787_v28  ;;  %v757_v27 = vld [vmem:[%s8078_s1 + $0x16c0] sm:$0xff]  ;;  %v759_v33 = vld [vmem:[%s8078_s1 + $0x16d0] sm:$0xff]  ;;  %v4950_v56 = vpack.c.bf16 %v774_v49, %v773_v52  ;;  %v748_v29 = vld [vmem:[%s8078_s1 + $0x1678] sm:$0xff] }
 0x15e   :  { %4865 = vmatprep.subr.bf16.mxu0 %v4864_v38  ;;  %v789_v38 = vld [vmem:[%s8078_s1 + $0x17c0] sm:$0xff]  ;;  %v4920_v57 = vpack.c.bf16 %v760_v50, %v759_v33  ;;  %v4928_v25 = vpack.c.bf16 %v764_v15, %v763_v14  ;;  %v747_v28 = vld [vmem:[%s8078_s1 + $0x1670] sm:$0xff]  ;;  %v780_v42 = vld [vmem:[%s8078_s1 + $0x1778] sm:$0xff] }
 0x15f   :  { %4895 = vmatpush3.bf16.msra.mxu1 %v4894_v37  ;;  %v758_v37 = vld [vmem:[%s8078_s1 + $0x16c8] sm:$0xff]  ;;  %v4948_v48 = vpack.c.bf16 %v790_v40, %v789_v38  ;;  %v813_v23 = vld [vmem:[%s8078_s1 + $0x1880] sm:$0xff]  ;;  %v815_v52 = vld [vmem:[%s8078_s1 + $0x1890] sm:$0xff] }
 0x160   :  { %4897 = vmatprep.subr.bf16.mxu1 %v4896_v46  ;;  %v4916_v44 = vpack.c.bf16 %v758_v37, %v757_v27  ;;  %v741_v46 = vld [vmem:[%s8078_s1 + $0x1640] sm:$0xff]  ;;  %v814_v34 = vld [vmem:[%s8078_s1 + $0x1888] sm:$0xff]  ;;  %v4930_v37 = vpack.c.bf16 %v748_v29, %v747_v28  ;;  %v847_v33 = vld [vmem:[%s8078_s1 + $0x1990] sm:$0xff] }
 0x161   :  { %4867 = vmatpush3.bf16.msra.mxu0 %v4866_v53  ;;  %v791_v53 = vld [vmem:[%s8078_s1 + $0x17d0] sm:$0xff]  ;;  %v4964_v40 = vpack.c.bf16 %v814_v34, %v813_v23  ;;  %v848_v50 = vld [vmem:[%s8078_s1 + $0x1998] sm:$0xff]  ;;  %v817_v60 = vld [vmem:[%s8078_s1 + $0x18a0] sm:$0xff] }
 0x162   :  { %4901 = vmatprep.subr.bf16.mxu0 %v4900_v55  ;;  %v4918_v55 = vpack.c.bf16 %v742_v47, %v741_v46  ;;  %v830_v47 = vld [vmem:[%s8078_s1 + $0x1908] sm:$0xff]  ;;  %v5000_v59 = vpack.c.bf16 %v848_v50, %v847_v33  ;;  %v851_v14 = vld [vmem:[%s8078_s1 + $0x19b0] sm:$0xff]  ;;  %v852_v15 = vld [vmem:[%s8078_s1 + $0x19b8] sm:$0xff] }
 0x163   :  { %4899 = vmatpush3.bf16.msra.mxu1 %v4898_v54  ;;  %v792_v54 = vld [vmem:[%s8078_s1 + $0x17d8] sm:$0xff]  ;;  %v818_v10 = vld [vmem:[%s8078_s1 + $0x18a8] sm:$0xff]  ;;  %v837_v23 = vld [vmem:[%s8078_s1 + $0x1940] sm:$0xff] }
 0x164   :  { %4933 = vmatprep.subr.bf16.mxu1 %v4932_v58  ;;  %2705 = vmatmul.mubr.f32.vlgmr.msra.gmra.mrb[20].mxu0 %v7259_v9  ;;  %v737_v9 = vld [vmem:[%s8078_s1 + $0x1620] sm:$0xff]  ;;  %v744_v58 = vld [vmem:[%s8078_s1 + $0x1658] sm:$0xff]  ;;  %v4952_v51 = vpack.c.bf16 %v792_v54, %v791_v53  ;;  %v854_v28 = vld [vmem:[%s8078_s1 + $0x19c8] sm:$0xff] }
 0x165   :  { %4903 = vmatpush3.bf16.msra.mxu0 %v4902_v0  ;;  %2844 = vmatprep.mubr.f32.mxu0 %v1148_v11  ;;  %v4910_v31 = vpack.c.bf16 %v738_v20, %v737_v9  ;;  %v793_v0 = vld [vmem:[%s8078_s1 + $0x17e0] sm:$0xff]  ;;  %v778_v11 = vld [vmem:[%s8078_s1 + $0x1768] sm:$0xff] }
 0x166   :  { %2775 = vmatmul.mubr.f32.vlgmr.msra.gmra.mrb[20].mxu1 %v7268_v12  ;;  %4905 = vmatprep.subr.bf16.mxu0 %v4904_v2  ;;  %v770_v12 = vld [vmem:[%s8078_s1 + $0x1728] sm:$0xff]  ;;  %v4922_v2 = vpack.c.bf16 %v744_v58, %v743_v45  ;;  %v4958_v24 = vpack.c.bf16 %v778_v11, %v777_v8  ;;  %v800_v45 = vld [vmem:[%s8078_s1 + $0x1818] sm:$0xff]  ;;  %v831_v58 = vld [vmem:[%s8078_s1 + $0x1910] sm:$0xff] }
 0x167   :  { %4935 = vmatpush3.bf16.msra.mxu1 %v4934_v1  ;;  %2914 = vmatprep.mubr.f32.mxu1 %v1149_v16  ;;  %v4942_v30 = vpack.c.bf16 %v770_v12, %v769_v21  ;;  %v794_v1 = vld [vmem:[%s8078_s1 + $0x17e8] sm:$0xff]  ;;  %v833_v8 = vld [vmem:[%s8078_s1 + $0x1920] sm:$0xff]  ;;  %v820_v11 = vld [vmem:[%s8078_s1 + $0x18b8] sm:$0xff] }
 0x168   :  { %4937 = vmatprep.subr.bf16.mxu1 %v4936_v6  ;;  %v746_v6 = vld [vmem:[%s8078_s1 + $0x1668] sm:$0xff]  ;;  %v4956_v26 = vpack.c.bf16 %v794_v1, %v793_v0  ;;  %v849_v0 = vld [vmem:[%s8078_s1 + $0x19a0] sm:$0xff] }
 0x169   :  { %4907 = vmatpush3.bf16.msra.mxu0 %v4906_v17  ;;  %v4926_v21 = vpack.c.bf16 %v746_v6, %v745_v5  ;;  %v850_v1 = vld [vmem:[%s8078_s1 + $0x19a8] sm:$0xff]  ;;  %v4972_v5 = vpack.c.bf16 %v818_v10, %v817_v60  ;;  %v825_v33 = vld [vmem:[%s8078_s1 + $0x18e0] sm:$0xff] }
 0x16a   :  { %4909 = vmatprep.subr.bf16.mxu0 %v4908_v19  ;;  %v796_v19 = vld [vmem:[%s8078_s1 + $0x17f8] sm:$0xff]  ;;  %v802_v6 = vld [vmem:[%s8078_s1 + $0x1828] sm:$0xff] }
 0x16b   :  { %4939 = vmatpush3.bf16.msra.mxu1 %v4938_v18  ;;  %v795_v18 = vld [vmem:[%s8078_s1 + $0x17f0] sm:$0xff]  ;;  %v826_v50 = vld [vmem:[%s8078_s1 + $0x18e8] sm:$0xff] }
 0x16c   :  { %4941 = vmatprep.subr.bf16.mxu1 %v4940_v22  ;;  %v27_v22 = vld [vmem:[%s8077_s0 + $0x60] sm:$0xff] }
 0x16d   :  { %4911 = vmatpush3.bf16.msra.mxu0 %v4910_v31  ;;  %v779_v31 = vld [vmem:[%s8078_s1 + $0x1770] sm:$0xff]  ;;  %v1150_v36 = vcombine.high %v27_v22, %v27_v22  ;;  %v7679_v49 = vrot.slane %v27_v22, %v5304_v13  ;;  %v836_v22 = vld [vmem:[%s8078_s1 + $0x1938] sm:$0xff] }
 0x16e   :  { %4913 = vmatprep.subr.bf16.mxu0 %v4912_v32  ;;  %v4960_v32 = vpack.c.bf16 %v796_v19, %v795_v18  ;;  %v4962_v38 = vpack.c.bf16 %v780_v42, %v779_v31  ;;  %v803_v19 = vld [vmem:[%s8078_s1 + $0x1830] sm:$0xff]  ;;  %v806_v42 = vld [vmem:[%s8078_s1 + $0x1848] sm:$0xff] }
 0x16f   :  { %4943 = vmatpush3.bf16.msra.mxu1 %v4942_v30  ;;  %v7688_v53 = vrot.slane %v1150_v36, %v5304_v13  ;;  %v1165_v62 = vcombine.high %v7679_v49, %v7679_v49  ;;  %v824_v36 = vld [vmem:[%s8078_s1 + $0x18d8] sm:$0xff] }
 0x170   :  { %4945 = vmatprep.subr.bf16.mxu1 %v4944_v35  ;;  %v845_v35 = vld [vmem:[%s8078_s1 + $0x1980] sm:$0xff] }
 0x171   :  { %4915 = vmatpush3.bf16.msra.mxu0 %v4914_v41  ;;  %v797_v41 = vld [vmem:[%s8078_s1 + $0x1800] sm:$0xff] }
 0x172   :  { %4917 = vmatprep.subr.bf16.mxu0 %v4916_v44  ;;  %v829_v44 = vld [vmem:[%s8078_s1 + $0x1900] sm:$0xff] }
 0x173   :  { %4947 = vmatpush3.bf16.msra.mxu1 %v4946_v43  ;;  %v798_v43 = vld [vmem:[%s8078_s1 + $0x1808] sm:$0xff] }
 0x174   :  { %4949 = vmatprep.subr.bf16.mxu1 %v4948_v48  ;;  %v816_v48 = vld [vmem:[%s8078_s1 + $0x1898] sm:$0xff]  ;;  %v4966_v54 = vpack.c.bf16 %v798_v43, %v797_v41 }
 0x175   :  { %4919 = vmatpush3.bf16.msra.mxu0 %v4918_v55  ;;  %v4998_v55 = vpack.c.bf16 %v830_v47, %v829_v44  ;;  %v807_v44 = vld [vmem:[%s8078_s1 + $0x1850] sm:$0xff] }
 0x176   :  { %4921 = vmatprep.subr.bf16.mxu0 %v4920_v57  ;;  %v799_v57 = vld [vmem:[%s8078_s1 + $0x1810] sm:$0xff] }
 0x177   :  { %4951 = vmatpush3.bf16.msra.mxu1 %v4950_v56  ;;  %v3528_v7 = vpop.f32.mrb[8].mxu0  ;;  %v4968_v56 = vpack.c.bf16 %v816_v48, %v815_v52  ;;  %v839_v47 = vld [vmem:[%s8078_s1 + $0x1950] sm:$0xff]  ;;  %v840_v48 = vld [vmem:[%s8078_s1 + $0x1958] sm:$0xff] }
 0x178   :  { %4953 = vmatprep.subr.bf16.mxu1 %v4952_v51  ;;  %v3529_v16 = vpop.f32.mrb[9].mxu0  ;;  %v832_v51 = vld [vmem:[%s8078_s1 + $0x1918] sm:$0xff] }
 0x179   :  { %v3563_v17 = vpop.f32.mrb[8].mxu1  ;;  %v3530_v9 = vadd.f32 %v3529_v16, %v3528_v7  ;;  %4923 = vmatpush3.bf16.msra.mxu0 %v4922_v2  ;;  %v1166_v2 = vcombine.high %v7688_v53, %v7688_v53  ;;  %v5004_v7 = vpack.c.bf16 %v850_v1, %v849_v0  ;;  %v827_v0 = vld [vmem:[%s8078_s1 + $0x18f0] sm:$0xff]  ;;  %v828_v1 = vld [vmem:[%s8078_s1 + $0x18f8] sm:$0xff] }
 0x17a   :  { %v3564_v20 = vpop.f32.mrb[9].mxu1  ;;  %4925 = vmatprep.subr.bf16.mxu0 %v4924_v4  ;;  %v5002_v4 = vpack.c.bf16 %v832_v51, %v831_v58  ;;  %v809_v58 = vld [vmem:[%s8078_s1 + $0x1860] sm:$0xff] }
 0x17b   :  { %v3565_v12 = vadd.f32 %v3564_v20, %v3563_v17  ;;  %4955 = vmatpush3.bf16.msra.mxu1 %v4954_v3  ;;  %v1867_v30 = vadd.f32 %v3530_v9, %v7448_v39  ;;  %v846_v39 = vld [vmem:[%s8078_s1 + $0x1988] sm:$0xff]  ;;  %v4970_v3 = vpack.c.bf16 %v800_v45, %v799_v57  ;;  %v804_v9 = vld [vmem:[%s8078_s1 + $0x1838] sm:$0xff]  ;;  %v835_v20 = vld [vmem:[%s8078_s1 + $0x1930] sm:$0xff]  ;;  %v5018_v57 = vpack.c.bf16 %v840_v48, %v839_v47 }
 0x17c   :  { %4957 = vmatprep.subr.bf16.mxu1 %v4956_v26  ;;  %v4996_v46 = vpack.c.bf16 %v846_v39, %v845_v35  ;;  %v819_v26 = vld [vmem:[%s8078_s1 + $0x18b0] sm:$0xff]  ;;  %v4978_v29 = vpack.c.bf16 %v804_v9, %v803_v19  ;;  %v5010_v31 = vpack.c.bf16 %v836_v22, %v835_v20  ;;  %v838_v35 = vld [vmem:[%s8078_s1 + $0x1948] sm:$0xff]  ;;  %v4988_v45 = vpack.c.bf16 %v826_v50, %v825_v33  ;;  %v841_v51 = vld [vmem:[%s8078_s1 + $0x1960] sm:$0xff] }
 0x17d   :  { %v7658_v27 = vadd.f32 %v3565_v12, %v1867_v30  ;;  %4927 = vmatpush3.bf16.msra.mxu0 %v4926_v21  ;;  %v4976_v18 = vpack.c.bf16 %v820_v11, %v819_v26  ;;  %v5008_v21 = vpack.c.bf16 %v852_v15, %v851_v14  ;;  %v821_v12 = vld [vmem:[%s8078_s1 + $0x18c0] sm:$0xff]  ;;  %v823_v39 = vld [vmem:[%s8078_s1 + $0x18d0] sm:$0xff]  ;;  %v5014_v41 = vpack.c.bf16 %v838_v35, %v837_v23  ;;  %v812_v15 = vld [vmem:[%s8078_s1 + $0x1878] sm:$0xff] }
 0x17e   :  { %4929 = vmatprep.subr.bf16.mxu0 %v4928_v25  ;;  %v853_v25 = vld [vmem:[%s8078_s1 + $0x19c0] sm:$0xff]  ;;  %v4984_v43 = vpack.c.bf16 %v824_v36, %v823_v39  ;;  %v4992_v11 = vpack.c.bf16 %v828_v1, %v827_v0  ;;  %v811_v14 = vld [vmem:[%s8078_s1 + $0x1870] sm:$0xff]  ;;  %v844_v19 = vld [vmem:[%s8078_s1 + $0x1978] sm:$0xff] }
 0x17f   :  { %4959 = vmatpush3.bf16.msra.mxu1 %v4958_v24  ;;  %v822_v24 = vld [vmem:[%s8078_s1 + $0x18c8] sm:$0xff]  ;;  %v5012_v34 = vpack.c.bf16 %v854_v28, %v853_v25  ;;  %v877_v9 = vld [vmem:[%s8078_s1 + $0x1a80] sm:$0xff]  ;;  %v879_v23 = vld [vmem:[%s8078_s1 + $0x1a90] sm:$0xff] }
 0x180   :  { %4961 = vmatprep.subr.bf16.mxu1 %v4960_v32  ;;  %v4980_v30 = vpack.c.bf16 %v822_v24, %v821_v12  ;;  %v805_v32 = vld [vmem:[%s8078_s1 + $0x1840] sm:$0xff]  ;;  %v878_v20 = vld [vmem:[%s8078_s1 + $0x1a88] sm:$0xff]  ;;  %v4994_v24 = vpack.c.bf16 %v812_v15, %v811_v14  ;;  %v911_v39 = vld [vmem:[%s8078_s1 + $0x1b90] sm:$0xff] }
 0x181   :  { %4931 = vmatpush3.bf16.msra.mxu0 %v4930_v37  ;;  %v855_v37 = vld [vmem:[%s8078_s1 + $0x19d0] sm:$0xff]  ;;  %v5028_v28 = vpack.c.bf16 %v878_v20, %v877_v9  ;;  %v912_v36 = vld [vmem:[%s8078_s1 + $0x1b98] sm:$0xff]  ;;  %v882_v48 = vld [vmem:[%s8078_s1 + $0x1aa8] sm:$0xff] }
 0x182   :  { %4965 = vmatprep.subr.bf16.mxu0 %v4964_v40  ;;  %v4982_v40 = vpack.c.bf16 %v806_v42, %v805_v32  ;;  %v894_v42 = vld [vmem:[%s8078_s1 + $0x1b08] sm:$0xff]  ;;  %v896_v47 = vld [vmem:[%s8078_s1 + $0x1b18] sm:$0xff]  ;;  %v913_v50 = vld [vmem:[%s8078_s1 + $0x1ba0] sm:$0xff] }
 0x183   :  { %4963 = vmatpush3.bf16.msra.mxu1 %v4962_v38  ;;  %v856_v38 = vld [vmem:[%s8078_s1 + $0x19d8] sm:$0xff]  ;;  %v902_v20 = vld [vmem:[%s8078_s1 + $0x1b48] sm:$0xff] }
 0x184   :  { %4997 = vmatprep.subr.bf16.mxu1 %v4996_v46  ;;  %2845 = vmatmul.mubr.f32.vlgmr.msra.gmra.mrb[22].mxu0 %v7469_v61  ;;  %v801_v61 = vld [vmem:[%s8078_s1 + $0x1820] sm:$0xff]  ;;  %v808_v46 = vld [vmem:[%s8078_s1 + $0x1858] sm:$0xff]  ;;  %v5016_v52 = vpack.c.bf16 %v856_v38, %v855_v37 }
 0x185   :  { %4967 = vmatpush3.bf16.msra.mxu0 %v4966_v54  ;;  %2984 = vmatprep.mubr.f32.mxu0 %v1165_v62  ;;  %v4974_v16 = vpack.c.bf16 %v802_v6, %v801_v61  ;;  %v857_v54 = vld [vmem:[%s8078_s1 + $0x19e0] sm:$0xff]  ;;  %v842_v62 = vld [vmem:[%s8078_s1 + $0x1968] sm:$0xff]  ;;  %v916_v0 = vld [vmem:[%s8078_s1 + $0x1bb8] sm:$0xff] }
 0x186   :  { %2915 = vmatmul.mubr.f32.vlgmr.msra.gmra.mrb[22].mxu1 %v7478_v63  ;;  %4969 = vmatprep.subr.bf16.mxu0 %v4968_v56  ;;  %v834_v63 = vld [vmem:[%s8078_s1 + $0x1928] sm:$0xff]  ;;  %v4986_v56 = vpack.c.bf16 %v808_v46, %v807_v44  ;;  %v5022_v26 = vpack.c.bf16 %v842_v62, %v841_v51  ;;  %v864_v44 = vld [vmem:[%s8078_s1 + $0x1a18] sm:$0xff]  ;;  %v895_v46 = vld [vmem:[%s8078_s1 + $0x1b10] sm:$0xff] }
 0x187   :  { %4999 = vmatpush3.bf16.msra.mxu1 %v4998_v55  ;;  %3054 = vmatprep.mubr.f32.mxu1 %v1166_v2  ;;  %v5006_v17 = vpack.c.bf16 %v834_v63, %v833_v8  ;;  %v858_v55 = vld [vmem:[%s8078_s1 + $0x19e8] sm:$0xff]  ;;  %v915_v62 = vld [vmem:[%s8078_s1 + $0x1bb0] sm:$0xff] }
 0x188   :  { %5001 = vmatprep.subr.bf16.mxu1 %v5000_v59  ;;  %v810_v59 = vld [vmem:[%s8078_s1 + $0x1868] sm:$0xff]  ;;  %v5020_v10 = vpack.c.bf16 %v858_v55, %v857_v54 }
 0x189   :  { %4971 = vmatpush3.bf16.msra.mxu0 %v4970_v3  ;;  %v4990_v8 = vpack.c.bf16 %v810_v59, %v809_v58  ;;  %v914_v54 = vld [vmem:[%s8078_s1 + $0x1ba8] sm:$0xff]  ;;  %v897_v59 = vld [vmem:[%s8078_s1 + $0x1b20] sm:$0xff] }
 0x18a   :  { %4973 = vmatprep.subr.bf16.mxu0 %v4972_v5  ;;  %v860_v5 = vld [vmem:[%s8078_s1 + $0x19f8] sm:$0xff]  ;;  %v866_v58 = vld [vmem:[%s8078_s1 + $0x1a28] sm:$0xff]  ;;  %v5068_v51 = vpack.c.bf16 %v914_v54, %v913_v50 }
 0x18b   :  { %5003 = vmatpush3.bf16.msra.mxu1 %v5002_v4  ;;  %v859_v4 = vld [vmem:[%s8078_s1 + $0x19f0] sm:$0xff]  ;;  %v892_v50 = vld [vmem:[%s8078_s1 + $0x1af8] sm:$0xff] }
 0x18c   :  { %5005 = vmatprep.subr.bf16.mxu1 %v5004_v7  ;;  %v28_v7 = vld [vmem:[%s8077_s0 + $0x68] sm:$0xff] }
 0x18d   :  { %4975 = vmatpush3.bf16.msra.mxu0 %v4974_v16  ;;  %v843_v16 = vld [vmem:[%s8078_s1 + $0x1970] sm:$0xff]  ;;  %v1167_v22 = vcombine.high %v28_v7, %v28_v7  ;;  %v7889_v35 = vrot.slane %v28_v7, %v5304_v13  ;;  %v885_v7 = vld [vmem:[%s8078_s1 + $0x1ac0] sm:$0xff] }
 0x18e   :  { %4977 = vmatprep.subr.bf16.mxu0 %v4976_v18  ;;  %v5024_v18 = vpack.c.bf16 %v860_v5, %v859_v4  ;;  %v5026_v25 = vpack.c.bf16 %v844_v19, %v843_v16  ;;  %v867_v4 = vld [vmem:[%s8078_s1 + $0x1a30] sm:$0xff]  ;;  %v868_v5 = vld [vmem:[%s8078_s1 + $0x1a38] sm:$0xff]  ;;  %v901_v19 = vld [vmem:[%s8078_s1 + $0x1b40] sm:$0xff] }
 0x18f   :  { %5007 = vmatpush3.bf16.msra.mxu1 %v5006_v17  ;;  %v7898_v37 = vrot.slane %v1167_v22, %v5304_v13  ;;  %v5064_v13 = vpack.c.bf16 %v912_v36, %v911_v39  ;;  %v1182_v33 = vcombine.high %v7889_v35, %v7889_v35  ;;  %v5042_v14 = vpack.c.bf16 %v868_v5, %v867_v4  ;;  %v919_v22 = vld [vmem:[%s8078_s1 + $0x1bd0] sm:$0xff]  ;;  %v890_v39 = vld [vmem:[%s8078_s1 + $0x1ae8] sm:$0xff]  ;;  %v921_v36 = vld [vmem:[%s8078_s1 + $0x1be0] sm:$0xff] }
 0x190   :  { %5009 = vmatprep.subr.bf16.mxu1 %v5008_v21  ;;  %v909_v21 = vld [vmem:[%s8078_s1 + $0x1b80] sm:$0xff] }
 0x191   :  { %4979 = vmatpush3.bf16.msra.mxu0 %v4978_v29  ;;  %v861_v29 = vld [vmem:[%s8078_s1 + $0x1a00] sm:$0xff]  ;;  %v1183_v55 = vcombine.high %v7898_v37, %v7898_v37 }
 0x192   :  { %4981 = vmatprep.subr.bf16.mxu0 %v4980_v30  ;;  %v893_v30 = vld [vmem:[%s8078_s1 + $0x1b00] sm:$0xff] }
 0x193   :  { %5011 = vmatpush3.bf16.msra.mxu1 %v5010_v31  ;;  %v862_v31 = vld [vmem:[%s8078_s1 + $0x1a08] sm:$0xff] }
 0x194   :  { %5013 = vmatprep.subr.bf16.mxu1 %v5012_v34  ;;  %v880_v34 = vld [vmem:[%s8078_s1 + $0x1a98] sm:$0xff]  ;;  %v5030_v38 = vpack.c.bf16 %v862_v31, %v861_v29  ;;  %v871_v31 = vld [vmem:[%s8078_s1 + $0x1a50] sm:$0xff] }
 0x195   :  { %4983 = vmatpush3.bf16.msra.mxu0 %v4982_v40  ;;  %v5062_v40 = vpack.c.bf16 %v894_v42, %v893_v30  ;;  %v872_v30 = vld [vmem:[%s8078_s1 + $0x1a58] sm:$0xff] }
 0x196   :  { %4985 = vmatprep.subr.bf16.mxu0 %v4984_v43  ;;  %v863_v43 = vld [vmem:[%s8078_s1 + $0x1a10] sm:$0xff] }
 0x197   :  { %5015 = vmatpush3.bf16.msra.mxu1 %v5014_v41  ;;  %v3598_v60 = vpop.f32.mrb[10].mxu0  ;;  %v5032_v41 = vpack.c.bf16 %v880_v34, %v879_v23  ;;  %v904_v23 = vld [vmem:[%s8078_s1 + $0x1b58] sm:$0xff]  ;;  %v889_v34 = vld [vmem:[%s8078_s1 + $0x1ae0] sm:$0xff] }
 0x198   :  { %5017 = vmatprep.subr.bf16.mxu1 %v5016_v52  ;;  %v3599_v2 = vpop.f32.mrb[11].mxu0  ;;  %v881_v52 = vld [vmem:[%s8078_s1 + $0x1aa0] sm:$0xff] }
 0x199   :  { %v3633_v3 = vpop.f32.mrb[10].mxu1  ;;  %v3600_v61 = vadd.f32 %v3599_v2, %v3598_v60  ;;  %4987 = vmatpush3.bf16.msra.mxu0 %v4986_v56  ;;  %v5034_v56 = vpack.c.bf16 %v864_v44, %v863_v43  ;;  %v883_v60 = vld [vmem:[%s8078_s1 + $0x1ab0] sm:$0xff]  ;;  %v5052_v43 = vpack.c.bf16 %v890_v39, %v889_v34  ;;  %v873_v44 = vld [vmem:[%s8078_s1 + $0x1a60] sm:$0xff] }
 0x19a   :  { %v3634_v6 = vpop.f32.mrb[11].mxu1  ;;  %4989 = vmatprep.subr.bf16.mxu0 %v4988_v45  ;;  %v5036_v45 = vpack.c.bf16 %v882_v48, %v881_v52  ;;  %v906_v48 = vld [vmem:[%s8078_s1 + $0x1b68] sm:$0xff] }
 0x19b   :  { %v3635_v63 = vadd.f32 %v3634_v6, %v3633_v3  ;;  %5019 = vmatpush3.bf16.msra.mxu1 %v5018_v57  ;;  %v2007_v17 = vadd.f32 %v3600_v61, %v7658_v27  ;;  %v910_v27 = vld [vmem:[%s8078_s1 + $0x1b88] sm:$0xff]  ;;  %v5066_v57 = vpack.c.bf16 %v896_v47, %v895_v46  ;;  %v899_v61 = vld [vmem:[%s8078_s1 + $0x1b30] sm:$0xff]  ;;  %v5072_v6 = vpack.c.bf16 %v916_v0, %v915_v62 }
 0x19c   :  { %5021 = vmatprep.subr.bf16.mxu1 %v5020_v10  ;;  %v5060_v32 = vpack.c.bf16 %v910_v27, %v909_v21  ;;  %v884_v10 = vld [vmem:[%s8078_s1 + $0x1ab8] sm:$0xff]  ;;  %v887_v21 = vld [vmem:[%s8078_s1 + $0x1ad0] sm:$0xff]  ;;  %v874_v46 = vld [vmem:[%s8078_s1 + $0x1a68] sm:$0xff] }
 0x19d   :  { %v7868_v12 = vadd.f32 %v3635_v63, %v2007_v17  ;;  %4991 = vmatpush3.bf16.msra.mxu0 %v4990_v8  ;;  %v5040_v3 = vpack.c.bf16 %v884_v10, %v883_v60  ;;  %v900_v8 = vld [vmem:[%s8078_s1 + $0x1b38] sm:$0xff]  ;;  %v886_v63 = vld [vmem:[%s8078_s1 + $0x1ac8] sm:$0xff]  ;;  %v869_v17 = vld [vmem:[%s8078_s1 + $0x1a40] sm:$0xff] }
 0x19e   :  { %4993 = vmatprep.subr.bf16.mxu0 %v4992_v11  ;;  %v918_v11 = vld [vmem:[%s8078_s1 + $0x1bc8] sm:$0xff]  ;;  %v5074_v15 = vpack.c.bf16 %v900_v8, %v899_v61  ;;  %v5044_v16 = vpack.c.bf16 %v886_v63, %v885_v7  ;;  %v888_v27 = vld [vmem:[%s8078_s1 + $0x1ad8] sm:$0xff]  ;;  %v875_v60 = vld [vmem:[%s8078_s1 + $0x1a70] sm:$0xff] }
 0x19f   :  { %5023 = vmatpush3.bf16.msra.mxu1 %v5022_v26  ;;  %v917_v26 = vld [vmem:[%s8078_s1 + $0x1bc0] sm:$0xff]  ;;  %v5048_v29 = vpack.c.bf16 %v888_v27, %v887_v21  ;;  %v876_v10 = vld [vmem:[%s8078_s1 + $0x1a78] sm:$0xff] }
 0x1a0   :  { %5025 = vmatprep.subr.bf16.mxu1 %v5024_v18  ;;  %v870_v18 = vld [vmem:[%s8078_s1 + $0x1a48] sm:$0xff]  ;;  %v5076_v9 = vpack.c.bf16 %v918_v11, %v917_v26  ;;  %v5058_v4 = vpack.c.bf16 %v876_v10, %v875_v60 }
 0x1a1   :  { %4995 = vmatpush3.bf16.msra.mxu0 %v4994_v24  ;;  %v920_v24 = vld [vmem:[%s8078_s1 + $0x1bd8] sm:$0xff] }
 0x1a2   :  { %5029 = vmatprep.subr.bf16.mxu0 %v5028_v28  ;;  %v5078_v28 = vpack.c.bf16 %v902_v20, %v901_v19  ;;  %v5080_v42 = vpack.c.bf16 %v920_v24, %v919_v22 }
 0x1a3   :  { %5027 = vmatpush3.bf16.msra.mxu1 %v5026_v25  ;;  %v5046_v25 = vpack.c.bf16 %v870_v18, %v869_v17 }
 0x1a4   :  { %5061 = vmatprep.subr.bf16.mxu1 %v5060_v32  ;;  %2985 = vmatmul.mubr.f32.vlgmr.msra.gmra.mrb[24].mxu0 %v7679_v49  ;;  %v865_v49 = vld [vmem:[%s8078_s1 + $0x1a20] sm:$0xff]  ;;  %v903_v32 = vld [vmem:[%s8078_s1 + $0x1b50] sm:$0xff] }
 0x1a5   :  { %5031 = vmatpush3.bf16.msra.mxu0 %v5030_v38  ;;  %3124 = vmatprep.mubr.f32.mxu0 %v1182_v33  ;;  %v5038_v1 = vpack.c.bf16 %v866_v58, %v865_v49  ;;  %v922_v38 = vld [vmem:[%s8078_s1 + $0x1be8] sm:$0xff]  ;;  %v891_v33 = vld [vmem:[%s8078_s1 + $0x1af0] sm:$0xff]  ;;  %v5054_v58 = vpack.c.bf16 %v874_v46, %v873_v44 }
 0x1a6   :  { %3055 = vmatmul.mubr.f32.vlgmr.msra.gmra.mrb[24].mxu1 %v7688_v53  ;;  %5033 = vmatprep.subr.bf16.mxu0 %v5032_v41  ;;  %v898_v53 = vld [vmem:[%s8078_s1 + $0x1b28] sm:$0xff]  ;;  %v5082_v41 = vpack.c.bf16 %v904_v23, %v903_v32  ;;  %v5084_v52 = vpack.c.bf16 %v922_v38, %v921_v36 }
 0x1a7   :  { %5063 = vmatpush3.bf16.msra.mxu1 %v5062_v40  ;;  %3194 = vmatprep.mubr.f32.mxu1 %v1183_v55  ;;  %v5070_v2 = vpack.c.bf16 %v898_v53, %v897_v59  ;;  %v5050_v40 = vpack.c.bf16 %v872_v30, %v871_v31  ;;  %v5056_v53 = vpack.c.bf16 %v892_v50, %v891_v33 }
 0x1a8   :  { %5065 = vmatprep.subr.bf16.mxu1 %v5064_v13  ;;  %v905_v13 = vld [vmem:[%s8078_s1 + $0x1b60] sm:$0xff] }
 0x1a9   :  { %5035 = vmatpush3.bf16.msra.mxu0 %v5034_v56  ;;  %v923_v56 = vld [vmem:[%s8078_s1 + $0x1bf0] sm:$0xff] }
 0x1aa   :  { %5037 = vmatprep.subr.bf16.mxu0 %v5036_v45 }
 0x1ab   :  { %5067 = vmatpush3.bf16.msra.mxu1 %v5066_v57  ;;  %v924_v57 = vld [vmem:[%s8078_s1 + $0x1bf8] sm:$0xff] }
 0x1ac   :  { %5069 = vmatprep.subr.bf16.mxu1 %v5068_v51  ;;  %v5086_v51 = vpack.c.bf16 %v906_v48, %v905_v13  ;;  %v5088_v0 = vpack.c.bf16 %v924_v57, %v923_v56 }
 0x1ad   :  { %5039 = vmatpush3.bf16.msra.mxu0 %v5038_v1  ;;  %v907_v1 = vld [vmem:[%s8078_s1 + $0x1b70] sm:$0xff] }
 0x1ae   :  { %5041 = vmatprep.subr.bf16.mxu0 %v5040_v3 }
 0x1af   :  { %5071 = vmatpush3.bf16.msra.mxu1 %v5070_v2  ;;  %v908_v2 = vld [vmem:[%s8078_s1 + $0x1b78] sm:$0xff]  ;;  %s5133_s1 = smov [#allocation2]  }
 0x1b0   :  { %5073 = vmatprep.subr.bf16.mxu1 %v5072_v6  ;;  %v5090_v5 = vpack.c.bf16 %v908_v2, %v907_v1  ;;  %s3207_s19 = sshll.u32 %s5133_s1, 4  ;;  %s3208_s19 = int_to_ptr.vmem [resolvable:$true] %s3207_s19 }
 0x1b1   :  { %5043 = vmatpush3.bf16.msra.mxu0 %v5042_v14  ;;  %s5108_s20 = scalar_lea.vmem %s3208_s19, 32  ;;  %p5113_p1 = scmp.lt.s32.totalorder %s3208_s19, %s3208_s19 }
 0x1b2   :  { %5045 = vmatprep.subr.bf16.mxu0 %v5044_v16  ;;  %p5109_p0 = scmp.ne.s32.totalorder %s3208_s19, %s5108_s20  ;;  %p5114_p2 = scmp.lt.s32.totalorder %s5108_s20, %s5108_s20 }
 0x1b3   :  { %5075 = vmatpush3.bf16.msra.mxu1 %v5074_v15 }
 0x1b4   :  { %5077 = vmatprep.subr.bf16.mxu1 %v5076_v9  ;;  %p5115_p3 = por %p5114_p2, %p5113_p1 }
 0x1b5   :  { %5047 = vmatpush3.bf16.msra.mxu0 %v5046_v25 }
 0x1b6   :  { %5049 = vmatprep.subr.bf16.mxu0 %v5048_v29  ;;  %p5116_p4 = pnand %p5115_p3, %p5109_p0 }
 0x1b7   :  { %5079 = vmatpush3.bf16.msra.mxu1 %v5078_v28  ;;  %v3668_v47 = vpop.f32.mrb[12].mxu0 }
 0x1b8   :  { %5081 = vmatprep.subr.bf16.mxu1 %v5080_v42  ;;  %v3669_v54 = vpop.f32.mrb[13].mxu0 }
 0x1b9   :  { %v3703_v55 = vpop.f32.mrb[12].mxu1  ;;  %v3670_v45 = vadd.f32 %v3669_v54, %v3668_v47  ;;  %5051 = vmatpush3.bf16.msra.mxu0 %v5050_v40 }
 0x1ba   :  { %v3704_v49 = vpop.f32.mrb[13].mxu1  ;;  %5053 = vmatprep.subr.bf16.mxu0 %v5052_v43 }
 0x1bb   :  { %v3705_v59 = vadd.f32 %v3704_v49, %v3703_v55  ;;  %5083 = vmatpush3.bf16.msra.mxu1 %v5082_v41  ;;  %v2147_v62 = vadd.f32 %v3670_v45, %v7868_v12 }
 0x1bc   :  { %5085 = vmatprep.subr.bf16.mxu1 %v5084_v52 }
 0x1bd   :  { %v2217_v3 = vadd.f32 %v3705_v59, %v2147_v62  ;;  %5055 = vmatpush3.bf16.msra.mxu0 %v5054_v58 }
 0x1be   :  { %5057 = vmatprep.subr.bf16.mxu0 %v5056_v53 }
 0x1bf   :  { %5087 = vmatpush3.bf16.msra.mxu1 %v5086_v51 }
 0x1c0   :  { %5089 = vmatprep.subr.bf16.mxu1 %v5088_v0 }
 0x1c1   :  { %5059 = vmatpush3.bf16.msra.mxu0 %v5058_v4 }
 0x1c3   :  { %5091 = vmatpush3.bf16.msra.mxu1 %v5090_v5 }
 0x1c4   :  { %3125 = vmatmul.mubr.f32.vlgmr.msra.gmra.mrb[26].mxu0 %v7889_v35 }
 0x1c6   :  { %3195 = vmatmul.mubr.f32.vlgmr.msra.gmra.mrb[26].mxu1 %v7898_v37 }
 0x1d7   :  { %v3738_v12 = vpop.f32.mrb[14].mxu0 }
 0x1d8   :  { %v3739_v61 = vpop.f32.mrb[15].mxu0 }
 0x1d9   :  { %v3773_v6 = vpop.f32.mrb[14].mxu1  ;;  %v3740_v8 = vadd.f32 %v3739_v61, %v3738_v12 }
 0x1da   :  { %v3774_v7 = vpop.f32.mrb[15].mxu1 }
 0x1db   :  { %v3775_v63 = vadd.f32 %v3774_v7, %v3773_v6  ;;  %v2287_v26 = vadd.f32 %v3740_v8, %v2217_v3 }
 0x1dd   :  { %v2357_v11 = vadd.f32 %v3775_v63, %v2287_v26 }
 0x1f7   :  { %v3808_v14 = vpop.f32.mrb[16].mxu0 }
 0x1f8   :  { %v3809_v15 = vpop.f32.mrb[17].mxu0 }
 0x1f9   :  { %v3843_v16 = vpop.f32.mrb[16].mxu1  ;;  %v3810_v17 = vadd.f32 %v3809_v15, %v3808_v14 }
 0x1fa   :  { %v3844_v18 = vpop.f32.mrb[17].mxu1 }
 0x1fb   :  { %v3845_v19 = vadd.f32 %v3844_v18, %v3843_v16  ;;  %v2427_v9 = vadd.f32 %v3810_v17, %v2357_v11 }
 0x1fd   :  { %v2497_v20 = vadd.f32 %v3845_v19, %v2427_v9 }
 0x217   :  { %v3878_v21 = vpop.f32.mrb[18].mxu0 }
 0x218   :  { %v3879_v35 = vpop.f32.mrb[19].mxu0 }
 0x219   :  { %v3913_v27 = vpop.f32.mrb[18].mxu1  ;;  %v3880_v37 = vadd.f32 %v3879_v35, %v3878_v21 }
 0x21a   :  { %v3914_v22 = vpop.f32.mrb[19].mxu1 }
 0x21b   :  { %v3915_v24 = vadd.f32 %v3914_v22, %v3913_v27  ;;  %v2567_v25 = vadd.f32 %v3880_v37, %v2497_v20 }
 0x21d   :  { %v2637_v28 = vadd.f32 %v3915_v24, %v2567_v25 }
 0x237   :  { %v3948_v29 = vpop.f32.mrb[20].mxu0 }
 0x238   :  { %v3949_v31 = vpop.f32.mrb[21].mxu0 }
 0x239   :  { %v3983_v30 = vpop.f32.mrb[20].mxu1  ;;  %v3950_v32 = vadd.f32 %v3949_v31, %v3948_v29 }
 0x23a   :  { %v3984_v42 = vpop.f32.mrb[21].mxu1 }
 0x23b   :  { %v3985_v23 = vadd.f32 %v3984_v42, %v3983_v30  ;;  %v2707_v34 = vadd.f32 %v3950_v32, %v2637_v28 }
 0x23d   :  { %v2777_v39 = vadd.f32 %v3985_v23, %v2707_v34 }
 0x257   :  { %v4018_v36 = vpop.f32.mrb[22].mxu0 }
 0x258   :  { %v4019_v38 = vpop.f32.mrb[23].mxu0 }
 0x259   :  { %v4053_v40 = vpop.f32.mrb[22].mxu1  ;;  %v4020_v41 = vadd.f32 %v4019_v38, %v4018_v36 }
 0x25a   :  { %v4054_v43 = vpop.f32.mrb[23].mxu1 }
 0x25b   :  { %v4055_v44 = vadd.f32 %v4054_v43, %v4053_v40  ;;  %v2847_v46 = vadd.f32 %v4020_v41, %v2777_v39 }
 0x25d   :  { %v2917_v13 = vadd.f32 %v4055_v44, %v2847_v46 }
 0x277   :  { %v4088_v47 = vpop.f32.mrb[24].mxu0 }
 0x278   :  { %v4089_v52 = vpop.f32.mrb[25].mxu0 }
 0x279   :  { %v4123_v48 = vpop.f32.mrb[24].mxu1  ;;  %v4090_v33 = vadd.f32 %v4089_v52, %v4088_v47 }
 0x27a   :  { %v4124_v50 = vpop.f32.mrb[25].mxu1 }
 0x27b   :  { %v4125_v54 = vadd.f32 %v4124_v50, %v4123_v48  ;;  %v2987_v55 = vadd.f32 %v4090_v33, %v2917_v13 }
 0x27d   :  { %v3057_v56 = vadd.f32 %v4125_v54, %v2987_v55 }
 0x297   :  { %v4158_v57 = vpop.f32.mrb[26].mxu0 }
 0x298   :  { %v4159_v45 = vpop.f32.mrb[27].mxu0 }
 0x299   :  { %v4193_v49 = vpop.f32.mrb[26].mxu1  ;;  %v4160_v58 = vadd.f32 %v4159_v45, %v4158_v57 }
 0x29a   :  { %v4194_v59 = vpop.f32.mrb[27].mxu1 }
 0x29b   :  { %v4195_v51 = vadd.f32 %v4194_v59, %v4193_v49  ;;  %v3127_v53 = vadd.f32 %v4160_v58, %v3057_v56 }
 0x29d   :  { %v3197_v60 = vadd.f32 %v4195_v51, %v3127_v53 }
 0x29f   :  { %3200 = vst [vmem:[#allocation2] sm:$0x3] %v3197_v60 }
 0x2a0   :  { %5119 = shalt.err (!%p5116_p4)
}
 0x2a1   :  { %s5120_s22 = scalar_lea.hbm %s8080_s3, 32 }
 0x2a2   :  { %p5121_p5 = scmp.ne.s32.totalorder %s8080_s3, %s5120_s22  ;;  %p5124_p6 = scmp.lt.u32.totalorder %s5120_s22, %s8080_s3 }
 0x2a4   :  { %p5126_p7 = pnand %p5124_p6, %p5121_p5 }
 0x2a6   :  { %5129 = shalt.err (!%p5126_p7)
}
 0x2a7   :  { %3210 = dma.vmem_to_hbm [thread:$0]  %s3208_s19, 32, %s8080_s3, [#allocation3]  }
 0x2a8   :  { %5130 = dma.done.wait [#allocation3], 32  }
 0x2a9   :  { %5131 = vsyncadd [#allocation3], 4294967264 }
 0x2aa   :  { %3214 = vsyncpa [#allocation3], 1 }

// kernel: cnn_forward.2
= control target key start
LH: loop header
LB: loop body
LE: loop exit
PB: predicated region body
PF: predicated region fallthrough
CT: control target
= control target key end

     0   :  { %12 = vsyncpa [#allocation10], 0  ;;  %s11828_s0 = inlined_call_operand.vmem [shape: f32[1568,9], index: 0, kind: input, shape index: {}]   ;;  %s11829_s1 = inlined_call_operand.hbm [shape: f32[9,128], index: 1, kind: input, shape index: {}]   ;;  %s11830_s2 = inlined_call_operand.hbm [shape: f32[1,128], index: 2, kind: input, shape index: {}]   ;;  %s11831_s3 = inlined_call_operand.hbm [shape: f32[9,128,128], index: 3, kind: input, shape index: {}]   ;;  %s11832_s4 = inlined_call_operand.hbm [shape: f32[1,128], index: 4, kind: input, shape index: {}]   ;;  %s11833_s5 = inlined_call_operand.hbm [shape: f32[9,128,128], index: 5, kind: input, shape index: {}]   ;;  %s11834_s6 = inlined_call_operand.hbm [shape: f32[1,128], index: 6, kind: input, shape index: {}]   ;;  %s11835_s7 = inlined_call_operand.vmem [shape: f32[112,128], index: 7, kind: output, shape index: {}]  }
   0x1   :  { %13 = vsyncpa [#allocation12], 0 }
   0x2   :  { %14 = vsyncpa [#allocation15], 0 }
   0x3   :  { %15 = vsyncpa [#allocation18], 0  ;;  %s10463_s24 = smov 0  }
   0x4 LB: > { %s10413_s25 = smov [#allocation11]   ;;  %s10469_s27 = sadd.s32 4294967295, %s10411_s24   ;;  %s10411_s24 = sphi %s10463_s24, %s21_s24  }
   0x5   : > { %s230_s26 = sshll.u32 %s10413_s25, 4  ;;  %p6929_p0 = scmp.ge.s32.totalorder %s10411_s24, 1  ;;  %s10474_s26 = int_to_ptr.vmem [resolvable:$true] %s230_s26 }
   0x6   : > { %p204_p1 = scmp.lt.s32.totalorder %s10411_s24, 3  ;;  %p11836_p2 = scmp.eq.s32.totalorder %s10469_s27, 0 }
   0x7   : > { %s10414_s29 = smov [#allocation14]   ;;  %s10415_s8 = smov [#allocation9]  }
   0x8   : > { %p10476_p3 = pnand %p6929_p0, %p204_p1  ;;  %s254_s30 = sshll.u32 %s10414_s29, 4  ;;  %s10482_s30 = int_to_ptr.vmem [resolvable:$true] %s254_s30 }
   0x9   : > { %s216_s9 = sshll.u32 %s10415_s8, 4  ;;  %s10416_s11 = smov [#allocation13]   ;;  %s10490_s9 = int_to_ptr.vmem [resolvable:$true] %s216_s9 }
   0xa   : > { %s11860_s28 = scalar_select %p10476_p3, 1, 0 }
   0xb   : > { %p10168_p4 = pneg %p10476_p3  ;;  %s10492_s12 = sshll.u32 %s10416_s11, 4  ;;  %s241_s12 = int_to_ptr.vmem [resolvable:$true] %s10492_s12 }
   0xc   : > { %s10221_s15 = scalar_lea.hbm %s11830_s2, 16 }
   0xd   : > { %p10486_p5 = pnand %p11836_p2, %p10168_p4  ;;  %p10222_p6 = scmp.ne.s32.totalorder %s11830_s2, %s10221_s15 }
   0xe   : > { %p10228_p10 = scmp.lt.u32.totalorder %s10221_s15, %s11830_s2 }
   0xf   : > { %p10502_p7 = pneg %p10486_p5 }
  0x11   : > { %p10224_p8 = pnand %p10502_p7, %p10222_p6 }
  0x13   : > { %p10225_p9 = pneg %p10224_p8 }
  0x15   : > { %p10230_p11 = pnand %p10228_p10, %p10225_p9 }
  0x17   : > { %10233 = shalt.err (!%p10230_p11)
}
  0x18   : > { %s10234_s21 = scalar_lea.vmem %s10474_s26, 16  ;;  %s10241_s22 = scalar_lea.vmem %s10474_s26, 32 }
  0x19   : > { %p10235_p12 = scmp.ne.s32.totalorder %s10474_s26, %s10234_s21  ;;  %p10242_p1 = scmp.lt.s32.totalorder %s10474_s26, %s10474_s26 }
  0x1a   : > { %p10243_p4 = scmp.lt.s32.totalorder %s10241_s22, %s10234_s21 }
  0x1b   : > { %p10237_p13 = pnand %p10235_p12, %p10502_p7 }
  0x1c   : > { %p10244_p6 = por %p10243_p4, %p10242_p1 }
  0x1d   : > { %p10238_p0 = pneg %p10237_p13 }
  0x1f   : > { %p10245_p8 = pnand %p10244_p6, %p10238_p0 }
  0x21   : > { %10248 = shalt.err (!%p10245_p8)
}
  0x22   : > { %10174 = dma.hbm_to_vmem [thread:$0]  (!%p10486_p5), %s11830_s2, 16, %s10474_s26, [#allocation12]  }
  0x23   : > { %s10249_s11 = scalar_lea.hbm %s11832_s4, 16 }
  0x24   : > { %p10250_p9 = scmp.ne.s32.totalorder %s11832_s4, %s10249_s11  ;;  %p10256_p12 = scmp.lt.u32.totalorder %s10249_s11, %s11832_s4 }
  0x26   : > { %p10252_p10 = pnand %p10250_p9, %p10502_p7 }
  0x28   : > { %p10253_p11 = pneg %p10252_p10 }
  0x2a   : > { %p10258_p13 = pnand %p10256_p12, %p10253_p11 }
  0x2c   : > { %10261 = shalt.err (!%p10258_p13)
}
  0x2d   : > { %s10262_s26 = scalar_lea.vmem %s10482_s30, 16  ;;  %s10269_s17 = scalar_lea.vmem %s10482_s30, 32 }
  0x2e   : > { %p10263_p0 = scmp.ne.s32.totalorder %s10482_s30, %s10262_s26  ;;  %p10270_p6 = scmp.lt.s32.totalorder %s10482_s30, %s10482_s30 }
  0x2f   : > { %p10271_p8 = scmp.lt.s32.totalorder %s10269_s17, %s10262_s26 }
  0x30   : > { %p10265_p1 = pnand %p10263_p0, %p10502_p7 }
  0x31   : > { %p10272_p9 = por %p10271_p8, %p10270_p6 }
  0x32   : > { %p10266_p4 = pneg %p10265_p1 }
  0x34   : > { %p10273_p10 = pnand %p10272_p9, %p10266_p4 }
  0x36   : > { %10276 = shalt.err (!%p10273_p10)
}
  0x37   : > { %10180 = dma.hbm_to_vmem [thread:$0]  (!%p10486_p5), %s11832_s4, 16, %s10482_s30, [#allocation15]  }
  0x38   : > { %s10277_s23 = scalar_lea.hbm %s11829_s1, 256 }
  0x39   : > { %p10278_p11 = scmp.ne.s32.totalorder %s11829_s1, %s10277_s23  ;;  %p10284_p0 = scmp.lt.u32.totalorder %s10277_s23, %s11829_s1 }
  0x3b   : > { %p10280_p12 = pnand %p10278_p11, %p10502_p7 }
  0x3d   : > { %p10281_p13 = pneg %p10280_p12 }
  0x3f   : > { %p10286_p1 = pnand %p10284_p0, %p10281_p13 }
  0x41   : > { %10289 = shalt.err (!%p10286_p1)
}
  0x42   : > { %s10290_s30 = scalar_lea.vmem %s10490_s9, 256  ;;  %p10298_p9 = scmp.lt.s32.totalorder %s10490_s9, %s10490_s9 }
  0x43   : > { %p10291_p4 = scmp.ne.s32.totalorder %s10490_s9, %s10290_s30  ;;  %p10299_p10 = scmp.lt.s32.totalorder %s10290_s30, %s10290_s30 }
  0x45   : > { %p10293_p6 = pnand %p10291_p4, %p10502_p7  ;;  %p10300_p11 = por %p10299_p10, %p10298_p9 }
  0x47   : > { %p10294_p8 = pneg %p10293_p6 }
  0x49   : > { %p10301_p12 = pnand %p10300_p11, %p10294_p8 }
  0x4b   : > { %10304 = shalt.err (!%p10301_p12)
}
  0x4c   : > { %s10417_s13 = smov 128   ;;  %s10418_s14 = smov 8  }
  0x4d   : > { %10171 = dma.hbm_to_vmem [thread:$0]  (!%p10486_p5), %s11829_s1, 256, %s10490_s9, [#allocation10], %s10417_s13, %s10417_s13, %s10418_s14  }
  0x4e   : > { %s10305_s19 = scalar_lea.hbm %s11831_s3, 18432 }
  0x4f   : > { %p10306_p13 = scmp.ne.s32.totalorder %s11831_s3, %s10305_s19  ;;  %p10312_p4 = scmp.lt.u32.totalorder %s10305_s19, %s11831_s3 }
  0x51   : > { %p10308_p0 = pnand %p10306_p13, %p10502_p7 }
  0x53   : > { %p10309_p1 = pneg %p10308_p0 }
  0x55   : > { %p10314_p6 = pnand %p10312_p4, %p10309_p1 }
  0x57   : > { %10317 = shalt.err (!%p10314_p6)
}
  0x58   : > { %s10318_s25 = scalar_lea.vmem %s241_s12, 18432  ;;  %p10326_p11 = scmp.lt.s32.totalorder %s241_s12, %s241_s12 }
  0x59   : > { %p10319_p8 = scmp.ne.s32.totalorder %s241_s12, %s10318_s25  ;;  %p10327_p12 = scmp.lt.s32.totalorder %s10318_s25, %s10318_s25 }
  0x5b   : > { %p10321_p9 = pnand %p10319_p8, %p10502_p7  ;;  %p10328_p2 = por %p10327_p12, %p10326_p11 }
  0x5d   : > { %p10322_p10 = pneg %p10321_p9 }
  0x5f   : > { %p10329_p3 = pnand %p10328_p2, %p10322_p10 }
  0x61   : > { %10332 = shalt.err (!%p10329_p3)
}
  0x62   : > { %10177 = dma.hbm_to_vmem [thread:$0]  (!%p10486_p5), %s11831_s3, 18432, %s241_s12, [#allocation12], %s10417_s13, %s10417_s13, %s10418_s14  }
  0x63   : > { %s10419_s8 = smov [#allocation16]   ;;  %s10420_s30 = smov [#allocation17]  }
  0x64   : > { %s264_s11 = sshll.u32 %s10419_s8, 4  ;;  %s278_s15 = sshll.u32 %s10420_s30, 4  ;;  %s265_s11 = int_to_ptr.vmem [resolvable:$true] %s264_s11  ;;  %s279_s15 = int_to_ptr.vmem [resolvable:$true] %s278_s15 }
  0x65   : > { %s10333_s17 = scalar_lea.hbm %s11833_s5, 18432 }
  0x66   : > { %p10334_p2 = scmp.ne.s32.totalorder %s11833_s5, %s10333_s17  ;;  %p10340_p0 = scmp.lt.u32.totalorder %s10333_s17, %s11833_s5 }
  0x68   : > { %p10336_p3 = pnand %p10334_p2, %p10502_p7 }
  0x6a   : > { %p10337_p13 = pneg %p10336_p3 }
  0x6c   : > { %p10342_p1 = pnand %p10340_p0, %p10337_p13 }
  0x6e   : > { %10345 = shalt.err (!%p10342_p1)
}
  0x6f   : > { %s10346_s12 = scalar_lea.vmem %s265_s11, 18432  ;;  %p10354_p9 = scmp.lt.s32.totalorder %s265_s11, %s265_s11 }
  0x70   : > { %p10347_p4 = scmp.ne.s32.totalorder %s265_s11, %s10346_s12  ;;  %p10355_p10 = scmp.lt.s32.totalorder %s10346_s12, %s10346_s12 }
  0x72   : > { %p10349_p6 = pnand %p10347_p4, %p10502_p7  ;;  %p10356_p11 = por %p10355_p10, %p10354_p9 }
  0x74   : > { %p10350_p8 = pneg %p10349_p6 }
  0x76   : > { %p10357_p12 = pnand %p10356_p11, %p10350_p8 }
  0x78   : > { %10360 = shalt.err (!%p10357_p12)
}
  0x79   : > { %10183 = dma.hbm_to_vmem [thread:$0]  (!%p10486_p5), %s11833_s5, 18432, %s265_s11, [#allocation15], %s10417_s13, %s10417_s13, %s10418_s14  }
  0x7a   : > { %s10361_s8 = scalar_lea.hbm %s11834_s6, 16 }
  0x7b   : > { %p10362_p2 = scmp.ne.s32.totalorder %s11834_s6, %s10361_s8  ;;  %p10368_p0 = scmp.lt.u32.totalorder %s10361_s8, %s11834_s6 }
  0x7d   : > { %p10364_p3 = pnand %p10362_p2, %p10502_p7 }
  0x7f   : > { %p10365_p13 = pneg %p10364_p3 }
  0x81   : > { %p10370_p1 = pnand %p10368_p0, %p10365_p13 }
  0x83   : > { %10373 = shalt.err (!%p10370_p1)
}
  0x84   : > { %s10374_s19 = scalar_lea.vmem %s279_s15, 16  ;;  %s10381_s13 = scalar_lea.vmem %s279_s15, 32 }
  0x85   : > { %p10375_p4 = scmp.ne.s32.totalorder %s279_s15, %s10374_s19  ;;  %p10382_p9 = scmp.lt.s32.totalorder %s279_s15, %s279_s15 }
  0x86   : > { %p10383_p10 = scmp.lt.s32.totalorder %s10381_s13, %s10374_s19 }
  0x87   : > { %p10377_p6 = pnand %p10375_p4, %p10502_p7 }
  0x88   : > { %p10384_p11 = por %p10383_p10, %p10382_p9 }
  0x89   : > { %p10378_p8 = pneg %p10377_p6 }
  0x8b   : > { %p10385_p12 = pnand %p10384_p11, %p10378_p8 }
  0x8d   : > { %10388 = shalt.err (!%p10385_p12)
}
  0x8e   : > { %10186 = dma.hbm_to_vmem [thread:$0]  (!%p10486_p5), %s11834_s6, 16, %s279_s15, [#allocation18]  }
  0x8f   : > { %p11863_p2 = scmp.ne.s32.totalorder %s11860_s28, 0 }
  0x91   : > { %300 = sbr.rel (%p11863_p2) target bundleno = 1822 (0x71e), region = 48 }
  0x98   : > { %p11864_p3 = scmp.eq.s32.totalorder %s10469_s27, 0 }
  0x9a   : > { %10394 = dma.done.wait (%p11864_p3), [#allocation10], 256   ;;  %p11865_p7 = pmov %p11864_p3 }
  0x9b   : > { %p11866_p13 = pmov %p11864_p3 }
  0x9c   : > { %10396 = vsyncadd (%p11865_p7), [#allocation10], 4294967040 }
  0x9d   : > { %10398 = dma.done.wait (%p11866_p13), [#allocation12], 18448   ;;  %p11867_p0 = pmov %p11864_p3 }
  0x9f   : > { %10400 = vsyncadd (%p11867_p0), [#allocation12], 4294948848  ;;  %p11868_p1 = pmov %p11867_p0 }
  0xa0   : > { %p11869_p5 = pmov %p11867_p0 }
  0xa1   : > { %10402 = dma.done.wait (%p11868_p1), [#allocation15], 18448  }
  0xa2   : > { %10404 = vsyncadd (%p11869_p5), [#allocation15], 4294948848  ;;  %p11870_p4 = pmov %p11867_p0 }
  0xa3   : > { %p11871_p6 = pmov %p11867_p0 }
  0xa4   : > { %10406 = dma.done.wait (%p11870_p4), [#allocation18], 16  }
  0xa5   : > { %10408 = vsyncadd (%p11871_p6), [#allocation18], 4294967280  ;;  %s352_s28 = smul.u32 98, %s10469_s27  ;;  %vm826_vm0 = vcmask 1040384   ;;  %vm531_vm1 = vcmask 72704   ;;  %v522_v0 = vld [vmem:[#allocation9] sm:$0xff] }
  0xa6   : > { %v523_v1 = vld [vmem:[#allocation9 + $0x8] sm:$0x1]  ;;  %vm10421_vm2 = vmmov 1   ;;  %v2067_v47 = vld [vmem:[#allocation13 + $0x80] sm:$0xff]  ;;  %v2068_v48 = vld [vmem:[#allocation13 + $0x88] sm:$0xff]  ;;  %s358_s21 = smul.u32 7, %s10469_s27 }
  0xa7   : > { %p353_p8 = scmp.lt.s32.totalorder %s352_s28, 195  ;;  %vm9291_vm3 = vmpackc.low %vm826_vm0, %vm10421_vm2  ;;  %v9290_v2 = vpack.c.bf16 %v523_v1, %v522_v0  ;;  %v9296_v50 = vpack.c.bf16 %v2068_v48, %v2067_v47  ;;  %v2069_v52 = vld [vmem:[#allocation13 + $0x90] sm:$0xff]  ;;  %v2070_v53 = vld [vmem:[#allocation13 + $0x98] sm:$0xff] }
  0xa8   : > { %v9300_v55 = vpack.c.bf16 %v2070_v53, %v2069_v52  ;;  %v2071_v57 = vld [vmem:[#allocation13 + $0xa0] sm:$0xff]  ;;  %v2072_v58 = vld [vmem:[#allocation13 + $0xa8] sm:$0xff]  ;;  %v2073_v62 = vld [vmem:[#allocation13 + $0xb0] sm:$0xff]  ;;  %p359_p9 = scmp.lt.s32.totalorder %s358_s21, 13 }
  0xa9   : > { %s11923_s28 = smov (!%p353_p8, %s352_s28), 195  ;;  %9292 = vmatprep.subr.msk.bf16.mxu0 %vm9291_vm3, %v9290_v2  ;;  %9297 = vmatprep.subr.bf16.mxu1 %v9296_v50  ;;  %v9304_v60 = vpack.c.bf16 %v2072_v58, %v2071_v57  ;;  %v2074_v63 = vld [vmem:[#allocation13 + $0xb8] sm:$0xff] }
  0xaa   : > { %s6944_s10 = sshll.u32 %s11923_s28, 3  ;;  %9295 = vmatpush3.bf16.msk.msra.mxu0 %vm9291_vm3, %v9290_v2  ;;  %9299 = vmatpush3.bf16.msra.mxu1 %v9296_v50  ;;  %v9308_v1 = vpack.c.bf16 %v2074_v63, %v2073_v62  ;;  %v4411_v50 = vld [vmem:[#allocation13 + $0x448] sm:$0xff]  ;;  %s11925_s21 = smov (!%p359_p9, %s358_s21), 13 }
  0xab   : > { %s10657_s20 = scalar_lea.vmem %s11828_s0, %s6944_s10  ;;  %9301 = vmatprep.subr.bf16.mxu1 %v9300_v55  ;;  %s6945_s22 = sshll.u32 %s11925_s21, 3 }
  0xac   : > { %v424_v3 = vld [vmem:[%s10657_s20] sm:$0xff]  ;;  %v425_v4 = vld [vmem:[%s10657_s20 + $0x8] sm:$0xff]  ;;  %v426_v5 = vld [vmem:[%s10657_s20 + $0x10] sm:$0xff]  ;;  %s11816_s25 = scalar_lea.vmem %s11835_s7, %s6945_s22 }
  0xad   : > { %7892 = vmatprep.mubr.msk.f32.mxu0 %vm531_vm1, %v424_v3  ;;  %v427_v6 = vld [vmem:[%s10657_s20 + $0x18] sm:$0xff]  ;;  %v428_v7 = vld [vmem:[%s10657_s20 + $0x20] sm:$0xff]  ;;  %v429_v8 = vld [vmem:[%s10657_s20 + $0x28] sm:$0xff] }
  0xae   : > { %7893 = vmatmul.mubr.msk.f32.vlgmr.msra.gmra.mrb[0].mxu0 %vm531_vm1, %v425_v4  ;;  %v430_v9 = vld [vmem:[%s10657_s20 + $0x30] sm:$0xff]  ;;  %v431_v10 = vld [vmem:[%s10657_s20 + $0x38] sm:$0xff]  ;;  %v432_v11 = vld [vmem:[%s10657_s20 + $0x40] sm:$0xff]  ;;  %9303 = vmatpush3.bf16.msra.mxu1 %v9300_v55 }
  0xaf   : > { %7895 = vmatprep.mubr.msk.f32.mxu0 %vm531_vm1, %v426_v5  ;;  %v433_v12 = vld [vmem:[%s10657_s20 + $0x48] sm:$0xff]  ;;  %v434_v13 = vld [vmem:[%s10657_s20 + $0x50] sm:$0xff]  ;;  %v435_v14 = vld [vmem:[%s10657_s20 + $0x58] sm:$0xff]  ;;  %9305 = vmatprep.subr.bf16.mxu1 %v9304_v60 }
  0xb0   : > { %v436_v15 = vld [vmem:[%s10657_s20 + $0x60] sm:$0xff]  ;;  %v437_v16 = vld [vmem:[%s10657_s20 + $0x68] sm:$0xff]  ;;  %v438_v17 = vld [vmem:[%s10657_s20 + $0x70] sm:$0xff] }
  0xb1   : > { %v439_v18 = vld [vmem:[%s10657_s20 + $0x78] sm:$0xff]  ;;  %v440_v19 = vld [vmem:[%s10657_s20 + $0x80] sm:$0xff]  ;;  %v441_v20 = vld [vmem:[%s10657_s20 + $0x88] sm:$0xff] }
  0xb2   : > { %7896 = vmatmul.mubr.msk.f32.gmra.mrb[2].mxu0 %vm531_vm1, %v427_v6  ;;  %v442_v21 = vld [vmem:[%s10657_s20 + $0x90] sm:$0xff]  ;;  %v443_v22 = vld [vmem:[%s10657_s20 + $0x98] sm:$0xff]  ;;  %v444_v23 = vld [vmem:[%s10657_s20 + $0xa0] sm:$0xff]  ;;  %9307 = vmatpush3.bf16.msra.mxu1 %v9304_v60 }
  0xb3   : > { %7898 = vmatprep.mubr.msk.f32.mxu0 %vm531_vm1, %v428_v7  ;;  %v445_v24 = vld [vmem:[%s10657_s20 + $0xa8] sm:$0xff]  ;;  %v446_v25 = vld [vmem:[%s10657_s20 + $0xb0] sm:$0xff]  ;;  %v447_v26 = vld [vmem:[%s10657_s20 + $0xb8] sm:$0xff]  ;;  %9309 = vmatprep.subr.bf16.mxu1 %v9308_v1 }
  0xb4   : > { %v448_v27 = vld [vmem:[%s10657_s20 + $0xc0] sm:$0xff]  ;;  %v449_v28 = vld [vmem:[%s10657_s20 + $0xc8] sm:$0xff]  ;;  %v450_v29 = vld [vmem:[%s10657_s20 + $0xd0] sm:$0xff] }
  0xb5   : > { %v451_v30 = vld [vmem:[%s10657_s20 + $0xd8] sm:$0xff]  ;;  %v452_v31 = vld [vmem:[%s10657_s20 + $0xe0] sm:$0xff]  ;;  %v453_v32 = vld [vmem:[%s10657_s20 + $0xe8] sm:$0xff] }
  0xb6   : > { %7899 = vmatmul.mubr.msk.f32.gmra.mrb[4].mxu0 %vm531_vm1, %v429_v8  ;;  %v454_v33 = vld [vmem:[%s10657_s20 + $0xf0] sm:$0xff]  ;;  %v455_v34 = vld [vmem:[%s10657_s20 + $0xf8] sm:$0xff]  ;;  %v456_v35 = vld [vmem:[%s10657_s20 + $0x100] sm:$0xff]  ;;  %9311 = vmatpush3.bf16.msra.mxu1 %v9308_v1 }
  0xb7   : > { %7901 = vmatprep.mubr.msk.f32.mxu0 %vm531_vm1, %v430_v9  ;;  %v457_v36 = vld [vmem:[%s10657_s20 + $0x108] sm:$0xff]  ;;  %v458_v37 = vld [vmem:[%s10657_s20 + $0x110] sm:$0xff]  ;;  %v459_v38 = vld [vmem:[%s10657_s20 + $0x118] sm:$0xff] }
  0xb8   : > { %v460_v39 = vld [vmem:[%s10657_s20 + $0x120] sm:$0xff]  ;;  %v461_v40 = vld [vmem:[%s10657_s20 + $0x128] sm:$0xff]  ;;  %v462_v41 = vld [vmem:[%s10657_s20 + $0x130] sm:$0xff] }
  0xb9   : > { %v463_v42 = vld [vmem:[%s10657_s20 + $0x138] sm:$0xff]  ;;  %v464_v43 = vld [vmem:[%s10657_s20 + $0x140] sm:$0xff]  ;;  %v465_v44 = vld [vmem:[%s10657_s20 + $0x148] sm:$0xff] }
  0xba   : > { %7902 = vmatmul.mubr.msk.f32.gmra.mrb[6].mxu0 %vm531_vm1, %v431_v10  ;;  %v466_v45 = vld [vmem:[%s10657_s20 + $0x150] sm:$0xff]  ;;  %v467_v46 = vld [vmem:[%s10657_s20 + $0x158] sm:$0xff]  ;;  %v468_v49 = vld [vmem:[%s10657_s20 + $0x160] sm:$0xff] }
  0xbb   : > { %7904 = vmatprep.mubr.msk.f32.mxu0 %vm531_vm1, %v432_v11  ;;  %v469_v51 = vld [vmem:[%s10657_s20 + $0x168] sm:$0xff]  ;;  %v470_v54 = vld [vmem:[%s10657_s20 + $0x170] sm:$0xff]  ;;  %v471_v56 = vld [vmem:[%s10657_s20 + $0x178] sm:$0xff] }
  0xbc   : > { %v472_v59 = vld [vmem:[%s10657_s20 + $0x180] sm:$0xff]  ;;  %v473_v61 = vld [vmem:[%s10657_s20 + $0x188] sm:$0xff]  ;;  %v474_v0 = vld [vmem:[%s10657_s20 + $0x190] sm:$0xff] }
  0xbd   : > { %v475_v2 = vld [vmem:[%s10657_s20 + $0x198] sm:$0xff]  ;;  %v2075_v3 = vld [vmem:[#allocation13 + $0xc0] sm:$0xff]  ;;  %v476_v5 = vld [vmem:[%s10657_s20 + $0x1a0] sm:$0xff] }
  0xbe   : > { %7905 = vmatmul.mubr.msk.f32.gmra.mrb[8].mxu0 %vm531_vm1, %v433_v12  ;;  %v2076_v4 = vld [vmem:[#allocation13 + $0xc8] sm:$0xff]  ;;  %v477_v7 = vld [vmem:[%s10657_s20 + $0x1a8] sm:$0xff]  ;;  %v2077_v8 = vld [vmem:[#allocation13 + $0xd0] sm:$0xff] }
  0xbf   : > { %7907 = vmatprep.mubr.msk.f32.mxu0 %vm531_vm1, %v434_v13  ;;  %v9312_v6 = vpack.c.bf16 %v2076_v4, %v2075_v3  ;;  %v2078_v9 = vld [vmem:[#allocation13 + $0xd8] sm:$0xff]  ;;  %v478_v10 = vld [vmem:[%s10657_s20 + $0x1b0] sm:$0xff]  ;;  %v10770_v12 = vld [vmem:[%s10657_s20 + $0x1b8] sm:$0xff] }
  0xc0   : > { %v9316_v11 = vpack.c.bf16 %v2078_v9, %v2077_v8  ;;  %v2079_v13 = vld [vmem:[#allocation13 + $0xe0] sm:$0xff]  ;;  %v495_v52 = vld [vmem:[%s10657_s20 + $0x238] sm:$0xff]  ;;  %v496_v53 = vld [vmem:[%s10657_s20 + $0x240] sm:$0xff] }
  0xc1   : > { %9313 = vmatprep.subr.bf16.mxu1 %v9312_v6  ;;  %v493_v47 = vld [vmem:[%s10657_s20 + $0x228] sm:$0xff]  ;;  %v494_v48 = vld [vmem:[%s10657_s20 + $0x230] sm:$0xff]  ;;  %v499_v62 = vld [vmem:[%s10657_s20 + $0x258] sm:$0xff] }
  0xc2   : > { %7908 = vmatmul.mubr.msk.f32.gmra.mrb[10].mxu0 %vm531_vm1, %v435_v14  ;;  %9315 = vmatpush3.bf16.msra.mxu1 %v9312_v6  ;;  %v2080_v14 = vld [vmem:[#allocation13 + $0xe8] sm:$0xff]  ;;  %v4413_v55 = vld [vmem:[#allocation13 + $0x458] sm:$0xff] }
  0xc3   : > { %7910 = vmatprep.mubr.msk.f32.mxu0 %vm531_vm1, %v436_v15  ;;  %9317 = vmatprep.subr.bf16.mxu1 %v9316_v11  ;;  %v10773_v15 = vld [vmem:[%s10657_s20 + $0x1c0] sm:$0xff]  ;;  %v497_v57 = vld [vmem:[%s10657_s20 + $0x248] sm:$0xff]  ;;  %v498_v58 = vld [vmem:[%s10657_s20 + $0x250] sm:$0xff] }
  0xc4   : > { %v4415_v60 = vld [vmem:[#allocation13 + $0x468] sm:$0xff]  ;;  %v500_v63 = vld [vmem:[%s10657_s20 + $0x260] sm:$0xff]  ;;  %v501_v3 = vld [vmem:[%s10657_s20 + $0x268] sm:$0xff] }
  0xc5   : > { %v4417_v1 = vld [vmem:[#allocation13 + $0x478] sm:$0xff]  ;;  %v502_v4 = vld [vmem:[%s10657_s20 + $0x270] sm:$0xff]  ;;  %v507_v9 = vld [vmem:[%s10657_s20 + $0x298] sm:$0xff] }
  0xc6   : > { %7911 = vmatmul.mubr.msk.f32.gmra.mrb[12].mxu0 %vm531_vm1, %v437_v16  ;;  %9319 = vmatpush3.bf16.msra.mxu1 %v9316_v11  ;;  %v10775_v16 = vpack.c.bf16 %v2080_v14, %v2079_v13  ;;  %v504_v6 = vld [vmem:[%s10657_s20 + $0x280] sm:$0xff]  ;;  %v506_v8 = vld [vmem:[%s10657_s20 + $0x290] sm:$0xff]  ;;  %v509_v11 = vld [vmem:[%s10657_s20 + $0x2a8] sm:$0xff] }
  0xc7   : > { %7913 = vmatprep.mubr.msk.f32.mxu0 %vm531_vm1, %v438_v17  ;;  %v10422_v17 = vmov 0.0   ;;  %v511_v13 = vld [vmem:[%s10657_s20 + $0x2b8] sm:$0xff]  ;;  %v512_v14 = vld [vmem:[%s10657_s20 + $0x2c0] sm:$0xff] }
  0xc8   : > { %364 = vst [vmem:[#allocation4] sm:$0xff] %v10422_v17  ;;  %365 = vst [vmem:[#allocation4 + $0x8] sm:$0xff] %v10422_v17  ;;  %9321 = vmatprep.subr.bf16.mxu1 %v10775_v16 }
  0xc9   : > { %366 = vst [vmem:[#allocation4 + $0x10] sm:$0xff] %v10422_v17  ;;  %367 = vst [vmem:[#allocation4 + $0x18] sm:$0xff] %v10422_v17 }
  0xca   : > { %7914 = vmatmul.mubr.msk.f32.gmra.mrb[14].mxu0 %vm531_vm1, %v439_v18  ;;  %368 = vst [vmem:[#allocation4 + $0x20] sm:$0xff] %v10422_v17  ;;  %369 = vst [vmem:[#allocation4 + $0x28] sm:$0xff] %v10422_v17  ;;  %v481_v18 = vld [vmem:[%s10657_s20 + $0x1c8] sm:$0xff]  ;;  %9323 = vmatpush3.bf16.msra.mxu1 %v10775_v16  ;;  %v514_v16 = vld [vmem:[%s10657_s20 + $0x2d0] sm:$0xff] }
  0xcb   : > { %7916 = vmatprep.mubr.msk.f32.mxu0 %vm531_vm1, %v440_v19  ;;  %370 = vst [vmem:[#allocation4 + $0x30] sm:$0xff] %v10422_v17  ;;  %371 = vst [vmem:[#allocation4 + $0x38] sm:$0xff] %v10422_v17  ;;  %v2081_v19 = vld [vmem:[#allocation13 + $0xf0] sm:$0xff] }
  0xcc   : > { %372 = vst [vmem:[#allocation4 + $0x40] sm:$0xff] %v10422_v17  ;;  %373 = vst [vmem:[#allocation4 + $0x48] sm:$0xff] %v10422_v17 }
  0xcd   : > { %374 = vst [vmem:[#allocation4 + $0x50] sm:$0xff] %v10422_v17  ;;  %375 = vst [vmem:[#allocation4 + $0x58] sm:$0xff] %v10422_v17 }
  0xce   : > { %7917 = vmatmul.mubr.msk.f32.gmra.mrb[16].mxu0 %vm531_vm1, %v441_v20  ;;  %376 = vst [vmem:[#allocation4 + $0x60] sm:$0xff] %v10422_v17  ;;  %377 = vst [vmem:[#allocation4 + $0x68] sm:$0xff] %v10422_v17  ;;  %v2082_v20 = vld [vmem:[#allocation13 + $0xf8] sm:$0xff] }
  0xcf   : > { %7919 = vmatprep.mubr.msk.f32.mxu0 %vm531_vm1, %v442_v21  ;;  %378 = vst [vmem:[#allocation4 + $0x70] sm:$0xff] %v10422_v17  ;;  %379 = vst [vmem:[#allocation4 + $0x78] sm:$0xff] %v10422_v17  ;;  %v482_v21 = vld [vmem:[%s10657_s20 + $0x1d0] sm:$0xff] }
  0xd0   : > { %380 = vst [vmem:[#allocation4 + $0x80] sm:$0xff] %v10422_v17  ;;  %381 = vst [vmem:[#allocation4 + $0x88] sm:$0xff] %v10422_v17 }
  0xd1   : > { %382 = vst [vmem:[#allocation4 + $0x90] sm:$0xff] %v10422_v17  ;;  %383 = vst [vmem:[#allocation4 + $0x98] sm:$0xff] %v10422_v17 }
  0xd2   : > { %7920 = vmatmul.mubr.msk.f32.gmra.mrb[18].mxu0 %vm531_vm1, %v443_v22  ;;  %384 = vst [vmem:[#allocation4 + $0xa0] sm:$0xff] %v10422_v17  ;;  %385 = vst [vmem:[#allocation4 + $0xa8] sm:$0xff] %v10422_v17  ;;  %v9324_v22 = vpack.c.bf16 %v2082_v20, %v2081_v19  ;;  %v517_v19 = vld [vmem:[%s10657_s20 + $0x2e8] sm:$0xff]  ;;  %v518_v20 = vld [vmem:[%s10657_s20 + $0x2f0] sm:$0xff] }
  0xd3   : > { %7922 = vmatprep.mubr.msk.f32.mxu0 %vm531_vm1, %v444_v23  ;;  %386 = vst [vmem:[#allocation4 + $0xb0] sm:$0xff] %v10422_v17  ;;  %387 = vst [vmem:[#allocation4 + $0xb8] sm:$0xff] %v10422_v17  ;;  %v483_v23 = vld [vmem:[%s10657_s20 + $0x1d8] sm:$0xff] }
  0xd4   : > { %388 = vst [vmem:[#allocation4 + $0xc0] sm:$0xff] %v10422_v17  ;;  %389 = vst [vmem:[#allocation4 + $0xc8] sm:$0xff] %v10422_v17  ;;  %9325 = vmatprep.subr.bf16.mxu1 %v9324_v22 }
  0xd5   : > { %390 = vst [vmem:[#allocation4 + $0xd0] sm:$0xff] %v10422_v17  ;;  %391 = vst [vmem:[#allocation4 + $0xd8] sm:$0xff] %v10422_v17  ;;  %9327 = vmatpush3.bf16.msra.mxu1 %v9324_v22  ;;  %v520_v22 = vld [vmem:[%s10657_s20 + $0x300] sm:$0xff] }
  0xd6   : > { %7923 = vmatmul.mubr.msk.f32.gmra.mrb[20].mxu0 %vm531_vm1, %v445_v24  ;;  %392 = vst [vmem:[#allocation4 + $0xe0] sm:$0xff] %v10422_v17  ;;  %393 = vst [vmem:[#allocation4 + $0xe8] sm:$0xff] %v10422_v17  ;;  %v484_v24 = vld [vmem:[%s10657_s20 + $0x1e0] sm:$0xff] }
  0xd7   : > { %7925 = vmatprep.mubr.msk.f32.mxu0 %vm531_vm1, %v446_v25  ;;  %394 = vst [vmem:[#allocation4 + $0xf0] sm:$0xff] %v10422_v17  ;;  %395 = vst [vmem:[#allocation4 + $0xf8] sm:$0xff] %v10422_v17  ;;  %v2034_v25 = vld [vmem:[#allocation4 + $0x1] sm:$0xff] }
  0xd8   : > { %396 = vst [vmem:[#allocation4 + $0x100] sm:$0xff] %v10422_v17  ;;  %397 = vst [vmem:[#allocation4 + $0x108] sm:$0xff] %v10422_v17  ;;  %8071 = vmatprep.mubr.f32.mxu1 %v2034_v25 }
  0xd9   : > { %398 = vst [vmem:[#allocation4 + $0x110] sm:$0xff] %v10422_v17  ;;  %399 = vst [vmem:[#allocation4 + $0x118] sm:$0xff] %v10422_v17 }
  0xda   : > { %7926 = vmatmul.mubr.msk.f32.gmra.mrb[22].mxu0 %vm531_vm1, %v447_v26  ;;  %400 = vst [vmem:[#allocation4 + $0x120] sm:$0xff] %v10422_v17  ;;  %401 = vst [vmem:[#allocation7] sm:$0xff] %v10422_v17  ;;  %v2035_v26 = vld [vmem:[#allocation4 + $0x9] sm:$0xff] }
  0xdb   : > { %7928 = vmatprep.mubr.msk.f32.mxu0 %vm531_vm1, %v448_v27  ;;  %402 = vst [vmem:[#allocation7 + $0x8] sm:$0xff] %v10422_v17  ;;  %403 = vst [vmem:[#allocation7 + $0x10] sm:$0xff] %v10422_v17  ;;  %8072 = vmatmul.mubr.f32.vlgmr.msra.gmra.mrb[0].mxu1 %v2035_v26  ;;  %v485_v27 = vld [vmem:[%s10657_s20 + $0x1e8] sm:$0xff] }
  0xdc   : > { %404 = vst [vmem:[#allocation7 + $0x18] sm:$0xff] %v10422_v17  ;;  %405 = vst [vmem:[#allocation7 + $0x20] sm:$0xff] %v10422_v17 }
  0xdd   : > { %406 = vst [vmem:[#allocation7 + $0x28] sm:$0xff] %v10422_v17  ;;  %407 = vst [vmem:[#allocation7 + $0x30] sm:$0xff] %v10422_v17 }
  0xde   : > { %7929 = vmatmul.mubr.msk.f32.gmra.mrb[24].mxu0 %vm531_vm1, %v449_v28  ;;  %408 = vst [vmem:[#allocation7 + $0x38] sm:$0xff] %v10422_v17  ;;  %409 = vst [vmem:[#allocation7 + $0x40] sm:$0xff] %v10422_v17  ;;  %v486_v28 = vld [vmem:[%s10657_s20 + $0x1f0] sm:$0xff] }
  0xdf   : > { %7931 = vmatprep.mubr.msk.f32.mxu0 %vm531_vm1, %v450_v29  ;;  %410 = vst [vmem:[#allocation7 + $0x48] sm:$0xff] %v10422_v17  ;;  %411 = vst [vmem:[#allocation7 + $0x50] sm:$0xff] %v10422_v17  ;;  %v4402_v29 = vld [vmem:[#allocation13 + $0x400] sm:$0xff] }
  0xe0   : > { %412 = vst [vmem:[#allocation7 + $0x58] sm:$0xff] %v10422_v17  ;;  %413 = vst [vmem:[#allocation7 + $0x60] sm:$0xff] %v10422_v17 }
  0xe1   : > { %414 = vst [vmem:[#allocation7 + $0x68] sm:$0xff] %v10422_v17  ;;  %415 = vst [vmem:[#allocation7 + $0x70] sm:$0xff] %v10422_v17 }
  0xe2   : > { %7932 = vmatmul.mubr.msk.f32.gmra.mrb[26].mxu0 %vm531_vm1, %v451_v30  ;;  %416 = vst [vmem:[#allocation7 + $0x78] sm:$0xff] %v10422_v17  ;;  %417 = vst [vmem:[#allocation7 + $0x80] sm:$0xff] %v10422_v17  ;;  %v4403_v30 = vld [vmem:[#allocation13 + $0x408] sm:$0xff] }
  0xe3   : > { %7934 = vmatprep.mubr.msk.f32.mxu0 %vm531_vm1, %v452_v31  ;;  %418 = vst [vmem:[#allocation7 + $0x88] sm:$0xff] %v10422_v17  ;;  %419 = vst [vmem:[#allocation7 + $0x90] sm:$0xff] %v10422_v17  ;;  %v10793_v31 = vpack.c.bf16 %v4403_v30, %v4402_v29 }
  0xe4   : > { %420 = vst [vmem:[#allocation7 + $0x98] sm:$0xff] %v10422_v17  ;;  %421 = vst [vmem:[#allocation7 + $0xa0] sm:$0xff] %v10422_v17 }
  0xe5   : > { %422 = vst [vmem:[#allocation7 + $0xa8] sm:$0xff] %v10422_v17  ;;  %423 = vst [vmem:[#allocation7 + $0xb0] sm:$0xff] %v10422_v17  ;;  %9553 = vmatprep.subr.bf16.mxu0 %v10793_v31  ;;  %v515_v17 = vld [vmem:[%s10657_s20 + $0x2d8] sm:$0xff] }
  0xe6   : > { %7935 = vmatmul.mubr.msk.f32.gmra.mrb[28].mxu0 %vm531_vm1, %v453_v32  ;;  %11872 = vst [vmem:[#allocation23_spill] sm:$0xff] %v10793_v31  ;;  %v487_v32 = vld [vmem:[%s10657_s20 + $0x1f8] sm:$0xff] }
  0xe7   : > { %7937 = vmatprep.mubr.msk.f32.mxu0 %vm531_vm1, %v454_v33  ;;  %v488_v33 = vld [vmem:[%s10657_s20 + $0x200] sm:$0xff]  ;;  %9555 = vmatpush3.bf16.msra.mxu0 %v10793_v31 }
  0xe8   : > { %v2883_v31 = vld [vmem:[#allocation13 + $0x1d8] sm:$0xff] }
  0xea   : > { %7938 = vmatmul.mubr.msk.f32.gmra.mrb[30].mxu0 %vm531_vm1, %v455_v34  ;;  %v4404_v34 = vld [vmem:[#allocation13 + $0x410] sm:$0xff] }
  0xeb   : > { %7940 = vmatprep.mubr.msk.f32.mxu0 %vm531_vm1, %v456_v35  ;;  %v4405_v35 = vld [vmem:[#allocation13 + $0x418] sm:$0xff] }
  0xee   : > { %7941 = vmatmul.mubr.msk.f32.gmra.mrb[32].mxu0 %vm531_vm1, %v457_v36  ;;  %v10801_v36 = vpack.c.bf16 %v4405_v35, %v4404_v34 }
  0xef   : > { %7943 = vmatprep.mubr.msk.f32.mxu0 %vm531_vm1, %v458_v37  ;;  %v489_v37 = vld [vmem:[%s10657_s20 + $0x208] sm:$0xff] }
  0xf0   : > { %11873 = vst [vmem:[#allocation24_spill] sm:$0xff] %v10801_v36  ;;  %9557 = vmatprep.subr.bf16.mxu0 %v10801_v36 }
  0xf1   : > { %9559 = vmatpush3.bf16.msra.mxu0 %v10801_v36 }
  0xf2   : > { %7944 = vmatmul.mubr.msk.f32.gmra.mrb[34].mxu0 %vm531_vm1, %v459_v38  ;;  %v490_v38 = vld [vmem:[%s10657_s20 + $0x210] sm:$0xff] }
  0xf3   : > { %7946 = vmatprep.mubr.msk.f32.mxu0 %vm531_vm1, %v460_v39  ;;  %v4406_v39 = vld [vmem:[#allocation13 + $0x420] sm:$0xff] }
  0xf6   : > { %7947 = vmatmul.mubr.msk.f32.gmra.mrb[36].mxu0 %vm531_vm1, %v461_v40  ;;  %v4407_v40 = vld [vmem:[#allocation13 + $0x428] sm:$0xff] }
  0xf7   : > { %7949 = vmatprep.mubr.msk.f32.mxu0 %vm531_vm1, %v462_v41  ;;  %v10809_v41 = vpack.c.bf16 %v4407_v40, %v4406_v39 }
  0xf9   : > { %11874 = vst [vmem:[#allocation25_spill] sm:$0xff] %v10809_v41  ;;  %9561 = vmatprep.subr.bf16.mxu0 %v10809_v41 }
  0xfa   : > { %7950 = vmatmul.mubr.msk.f32.gmra.mrb[38].mxu0 %vm531_vm1, %v463_v42  ;;  %v491_v42 = vld [vmem:[%s10657_s20 + $0x218] sm:$0xff] }
  0xfb   : > { %7952 = vmatprep.mubr.msk.f32.mxu0 %vm531_vm1, %v464_v43  ;;  %v492_v43 = vld [vmem:[%s10657_s20 + $0x220] sm:$0xff]  ;;  %9563 = vmatpush3.bf16.msra.mxu0 %v10809_v41 }
  0xfc   : > { %v2878_v41 = vld [vmem:[#allocation13 + $0x1b0] sm:$0xff] }
  0xfe   : > { %7953 = vmatmul.mubr.msk.f32.gmra.mrb[40].mxu0 %vm531_vm1, %v465_v44  ;;  %v4408_v44 = vld [vmem:[#allocation13 + $0x430] sm:$0xff] }
  0xff   : > { %7955 = vmatprep.mubr.msk.f32.mxu0 %vm531_vm1, %v466_v45  ;;  %v4409_v45 = vld [vmem:[#allocation13 + $0x438] sm:$0xff] }
 0x102   : > { %7956 = vmatmul.mubr.msk.f32.gmra.mrb[42].mxu0 %vm531_vm1, %v467_v46  ;;  %v10817_v46 = vpack.c.bf16 %v4409_v45, %v4408_v44 }
 0x103   : > { %7958 = vmatprep.mubr.msk.f32.mxu0 %vm531_vm1, %v468_v49  ;;  %v4410_v49 = vld [vmem:[#allocation13 + $0x440] sm:$0xff] }
 0x104   : > { %11875 = vst [vmem:[#allocation26_spill] sm:$0xff] %v10817_v46  ;;  %9565 = vmatprep.subr.bf16.mxu0 %v10817_v46 }
 0x105   : > { %9567 = vmatpush3.bf16.msra.mxu0 %v10817_v46 }
 0x106   : > { %7959 = vmatmul.mubr.msk.f32.gmra.mrb[44].mxu0 %vm531_vm1, %v469_v51  ;;  %v10825_v51 = vpack.c.bf16 %v4411_v50, %v4410_v49 }
 0x107   : > { %7961 = vmatprep.mubr.msk.f32.mxu0 %vm531_vm1, %v470_v54  ;;  %v4412_v54 = vld [vmem:[#allocation13 + $0x450] sm:$0xff] }
 0x108   : > { %11876 = vst [vmem:[#allocation27_spill] sm:$0xff] %v10825_v51  ;;  %9569 = vmatprep.subr.bf16.mxu0 %v10825_v51 }
 0x109   : > { %9571 = vmatpush3.bf16.msra.mxu0 %v10825_v51 }
 0x10a   : > { %7962 = vmatmul.mubr.msk.f32.gmra.mrb[46].mxu0 %vm531_vm1, %v471_v56  ;;  %v10833_v56 = vpack.c.bf16 %v4413_v55, %v4412_v54 }
 0x10b   : > { %7964 = vmatprep.mubr.msk.f32.mxu0 %vm531_vm1, %v472_v59  ;;  %v4414_v59 = vld [vmem:[#allocation13 + $0x460] sm:$0xff] }
 0x10c   : > { %11877 = vst [vmem:[#allocation28_spill] sm:$0xff] %v10833_v56  ;;  %9573 = vmatprep.subr.bf16.mxu0 %v10833_v56 }
 0x10d   : > { %9575 = vmatpush3.bf16.msra.mxu0 %v10833_v56 }
 0x10e   : > { %7965 = vmatmul.mubr.msk.f32.gmra.mrb[48].mxu0 %vm531_vm1, %v473_v61  ;;  %v10842_v61 = vpack.c.bf16 %v4415_v60, %v4414_v59 }
 0x10f   : > { %7967 = vmatprep.mubr.msk.f32.mxu0 %vm531_vm1, %v474_v0  ;;  %v4416_v0 = vld [vmem:[#allocation13 + $0x470] sm:$0xff] }
 0x110   : > { %11878 = vst [vmem:[#allocation29_spill] sm:$0xff] %v10842_v61  ;;  %9577 = vmatprep.subr.bf16.mxu0 %v10842_v61 }
 0x111   : > { %9579 = vmatpush3.bf16.msra.mxu0 %v10842_v61 }
 0x112   : > { %7968 = vmatmul.mubr.msk.f32.gmra.mrb[50].mxu0 %vm531_vm1, %v475_v2  ;;  %v10850_v2 = vpack.c.bf16 %v4417_v1, %v4416_v0 }
 0x113   : > { %7970 = vmatprep.mubr.msk.f32.mxu0 %vm531_vm1, %v476_v5  ;;  %v503_v5 = vld [vmem:[%s10657_s20 + $0x278] sm:$0xff] }
 0x114   : > { %11879 = vst [vmem:[#allocation30_spill] sm:$0xff] %v10850_v2  ;;  %9581 = vmatprep.subr.bf16.mxu0 %v10850_v2 }
 0x115   : > { %9583 = vmatpush3.bf16.msra.mxu0 %v10850_v2  ;;  %v2877_v2 = vld [vmem:[#allocation13 + $0x1a8] sm:$0xff] }
 0x116   : > { %7971 = vmatmul.mubr.msk.f32.gmra.mrb[52].mxu0 %vm531_vm1, %v477_v7  ;;  %v505_v7 = vld [vmem:[%s10657_s20 + $0x288] sm:$0xff] }
 0x117   : > { %7973 = vmatprep.mubr.msk.f32.mxu0 %vm531_vm1, %v478_v10  ;;  %v508_v10 = vld [vmem:[%s10657_s20 + $0x2a0] sm:$0xff] }
 0x11a   : > { %7974 = vmatmul.mubr.msk.f32.gmra.mrb[54].mxu0 %vm531_vm1, %v10770_v12  ;;  %v510_v12 = vld [vmem:[%s10657_s20 + $0x2b0] sm:$0xff] }
 0x11b   : > { %7976 = vmatprep.mubr.msk.f32.mxu0 %vm531_vm1, %v10773_v15  ;;  %v513_v15 = vld [vmem:[%s10657_s20 + $0x2c8] sm:$0xff] }
 0x11e   : > { %7977 = vmatmul.mubr.msk.f32.gmra.mrb[56].mxu0 %vm531_vm1, %v481_v18  ;;  %v516_v18 = vld [vmem:[%s10657_s20 + $0x2e0] sm:$0xff] }
 0x11f   : > { %7979 = vmatprep.mubr.msk.f32.mxu0 %vm531_vm1, %v482_v21  ;;  %v519_v21 = vld [vmem:[%s10657_s20 + $0x2f8] sm:$0xff] }
 0x122   : > { %7980 = vmatmul.mubr.msk.f32.gmra.mrb[58].mxu0 %vm531_vm1, %v483_v23  ;;  %v521_v23 = vld [vmem:[%s10657_s20 + $0x308] sm:$0xff] }
 0x123   : > { %7982 = vmatprep.mubr.msk.f32.mxu0 %vm531_vm1, %v484_v24  ;;  %v10897_v24 = vld [vmem:[#allocation11] ss:$0 sm:$0xff] }
 0x126   : > { %7983 = vmatmul.mubr.msk.f32.gmra.mrb[60].mxu0 %vm531_vm1, %v485_v27 }
 0x127   : > { %7985 = vmatprep.mubr.msk.f32.mxu0 %vm531_vm1, %v486_v28 }
 0x12a   : > { %7986 = vmatmul.mubr.msk.f32.gmra.mrb[62].mxu0 %vm531_vm1, %v487_v32 }
 0x12b   : > { %7988 = vmatprep.mubr.msk.f32.mxu0 %vm531_vm1, %v488_v33 }
 0x12e   : > { %7989 = vmatmul.mubr.msk.f32.gmra.mrb[64].mxu0 %vm531_vm1, %v489_v37 }
 0x12f   : > { %7991 = vmatprep.mubr.msk.f32.mxu0 %vm531_vm1, %v490_v38 }
 0x132   : > { %7992 = vmatmul.mubr.msk.f32.gmra.mrb[66].mxu0 %vm531_vm1, %v491_v42 }
 0x133   : > { %7994 = vmatprep.mubr.msk.f32.mxu0 %vm531_vm1, %v492_v43 }
 0x136   : > { %7995 = vmatmul.mubr.msk.f32.gmra.mrb[68].mxu0 %vm531_vm1, %v493_v47 }
 0x137   : > { %7997 = vmatprep.mubr.msk.f32.mxu0 %vm531_vm1, %v494_v48 }
 0x13a   : > { %7998 = vmatmul.mubr.msk.f32.gmra.mrb[70].mxu0 %vm531_vm1, %v495_v52 }
 0x13b   : > { %8000 = vmatprep.mubr.msk.f32.mxu0 %vm531_vm1, %v496_v53 }
 0x13e   : > { %8001 = vmatmul.mubr.msk.f32.gmra.mrb[72].mxu0 %vm531_vm1, %v497_v57 }
 0x13f   : > { %8003 = vmatprep.mubr.msk.f32.mxu0 %vm531_vm1, %v498_v58 }
 0x142   : > { %8004 = vmatmul.mubr.msk.f32.gmra.mrb[74].mxu0 %vm531_vm1, %v499_v62 }
 0x143   : > { %8006 = vmatprep.mubr.msk.f32.mxu0 %vm531_vm1, %v500_v63 }
 0x146   : > { %8007 = vmatmul.mubr.msk.f32.gmra.mrb[76].mxu0 %vm531_vm1, %v501_v3 }
 0x147   : > { %8009 = vmatprep.mubr.msk.f32.mxu0 %vm531_vm1, %v502_v4 }
 0x14a   : > { %8010 = vmatmul.mubr.msk.f32.gmra.mrb[78].mxu0 %vm531_vm1, %v503_v5 }
 0x14b   : > { %8012 = vmatprep.mubr.msk.f32.mxu0 %vm531_vm1, %v504_v6 }
 0x14e   : > { %8013 = vmatmul.mubr.msk.f32.gmra.mrb[80].mxu0 %vm531_vm1, %v505_v7 }
 0x14f   : > { %8015 = vmatprep.mubr.msk.f32.mxu0 %vm531_vm1, %v506_v8 }
 0x152   : > { %8016 = vmatmul.mubr.msk.f32.gmra.mrb[82].mxu0 %vm531_vm1, %v507_v9 }
 0x153   : > { %8018 = vmatprep.mubr.msk.f32.mxu0 %vm531_vm1, %v508_v10 }
 0x156   : > { %8019 = vmatmul.mubr.msk.f32.gmra.mrb[84].mxu0 %vm531_vm1, %v509_v11 }
 0x157   : > { %8021 = vmatprep.mubr.msk.f32.mxu0 %vm531_vm1, %v510_v12 }
 0x15a   : > { %8022 = vmatmul.mubr.msk.f32.gmra.mrb[86].mxu0 %vm531_vm1, %v511_v13 }
 0x15b   : > { %8024 = vmatprep.mubr.msk.f32.mxu0 %vm531_vm1, %v512_v14 }
 0x15e   : > { %8025 = vmatmul.mubr.msk.f32.gmra.mrb[88].mxu0 %vm531_vm1, %v513_v15 }
 0x15f   : > { %8027 = vmatprep.mubr.msk.f32.mxu0 %vm531_vm1, %v514_v16 }
 0x162   : > { %8028 = vmatmul.mubr.msk.f32.gmra.mrb[90].mxu0 %vm531_vm1, %v515_v17 }
 0x163   : > { %8030 = vmatprep.mubr.msk.f32.mxu0 %vm531_vm1, %v516_v18 }
 0x166   : > { %8031 = vmatmul.mubr.msk.f32.gmra.mrb[92].mxu0 %vm531_vm1, %v517_v19 }
 0x167   : > { %8033 = vmatprep.mubr.msk.f32.mxu0 %vm531_vm1, %v518_v20 }
 0x16a   : > { %8034 = vmatmul.mubr.msk.f32.gmra.mrb[94].mxu0 %vm531_vm1, %v519_v21 }
 0x16b   : > { %8036 = vmatprep.mubr.msk.f32.mxu0 %vm531_vm1, %v520_v22 }
 0x16e   : > { %8037 = vmatmul.mubr.msk.f32.gmra.mrb[96].mxu0 %vm531_vm1, %v521_v23 }
 0x181   : > { %v7894_v25 = vpop.f32.mrb[0].mxu0 }
 0x182   : > { %v902_v26 = vadd.f32 %v7894_v25, %v10897_v24  ;;  %v896_v27 = vpop.f32.mrb[1].mxu0 }
 0x183   : > { %v897_v28 = vadd.f32 %v10897_v24, %v896_v27 }
 0x184   : > { %v1386_v29 = vmax.f32 %v902_v26, 0.0 }
 0x185   : > { %v1385_v30 = vmax.f32 %v897_v28, 0.0  ;;  %v7897_v32 = vpop.f32.mrb[2].mxu0 }
 0x186   : > { %1484 = vst [vmem:[#allocation2 + $0x8] sm:$0xff] %v1386_v29  ;;  %v912_v33 = vadd.f32 %v7897_v32, %v10897_v24  ;;  %v906_v34 = vpop.f32.mrb[3].mxu0 }
 0x187   : > { %1483 = vst [vmem:[#allocation2] sm:$0xff] %v1385_v30  ;;  %v907_v35 = vadd.f32 %v10897_v24, %v906_v34 }
 0x188   : > { %v1388_v37 = vmax.f32 %v912_v33, 0.0 }
 0x189   : > { %v1387_v38 = vmax.f32 %v907_v35, 0.0  ;;  %v7900_v39 = vpop.f32.mrb[4].mxu0 }
 0x18a   : > { %1486 = vst [vmem:[#allocation2 + $0x18] sm:$0xff] %v1388_v37  ;;  %v922_v40 = vadd.f32 %v7900_v39, %v10897_v24  ;;  %v916_v42 = vpop.f32.mrb[5].mxu0 }
 0x18b   : > { %1485 = vst [vmem:[#allocation2 + $0x10] sm:$0xff] %v1387_v38  ;;  %v917_v43 = vadd.f32 %v10897_v24, %v916_v42 }
 0x18c   : > { %v1390_v44 = vmax.f32 %v922_v40, 0.0 }
 0x18d   : > { %v1389_v45 = vmax.f32 %v917_v43, 0.0  ;;  %v7903_v47 = vpop.f32.mrb[6].mxu0 }
 0x18e   : > { %v1581_v48 = vld [vmem:[#allocation2] ss:$2 sm:$0xff]  ;;  %v1679_v49 = vld [vmem:[#allocation2 + $0x1] ss:$2 sm:$0xff]  ;;  %1488 = vst [vmem:[#allocation2 + $0x28] sm:$0xff] %v1390_v44  ;;  %v932_v50 = vadd.f32 %v7903_v47, %v10897_v24  ;;  %v926_v52 = vpop.f32.mrb[7].mxu0 }
 0x18f   : > { %v1776_v53 = vmax.f32 %v1581_v48, %v1679_v49  ;;  %1487 = vst [vmem:[#allocation2 + $0x20] sm:$0xff] %v1389_v45  ;;  %v927_v54 = vadd.f32 %v10897_v24, %v926_v52 }
 0x190   : > { %v1392_v55 = vmax.f32 %v932_v50, 0.0 }
 0x191   : > { %v1391_v57 = vmax.f32 %v927_v54, 0.0  ;;  %v7906_v58 = vpop.f32.mrb[8].mxu0 }
 0x192   : > { %v1583_v59 = vld [vmem:[#allocation2 + $0x10] ss:$2 sm:$0xff]  ;;  %v1681_v60 = vld [vmem:[#allocation2 + $0x11] ss:$2 sm:$0xff]  ;;  %1490 = vst [vmem:[#allocation2 + $0x38] sm:$0xff] %v1392_v55  ;;  %v942_v62 = vadd.f32 %v7906_v58, %v10897_v24  ;;  %v936_v63 = vpop.f32.mrb[9].mxu0 }
 0x193   : > { %v1777_v0 = vmax.f32 %v1583_v59, %v1681_v60  ;;  %1489 = vst [vmem:[#allocation2 + $0x30] sm:$0xff] %v1391_v57  ;;  %v937_v1 = vadd.f32 %v10897_v24, %v936_v63 }
 0x194   : > { %v1394_v3 = vmax.f32 %v942_v62, 0.0 }
 0x195   : > { %1826 = vst [vmem:[#allocation3 + $0x8] sm:$0xff] %v1777_v0  ;;  %v1393_v4 = vmax.f32 %v937_v1, 0.0  ;;  %v7909_v5 = vpop.f32.mrb[10].mxu0 }
 0x196   : > { %v1585_v6 = vld [vmem:[#allocation2 + $0x20] ss:$2 sm:$0xff]  ;;  %v1683_v7 = vld [vmem:[#allocation2 + $0x21] ss:$2 sm:$0xff]  ;;  %1492 = vst [vmem:[#allocation2 + $0x48] sm:$0xff] %v1394_v3  ;;  %v952_v8 = vadd.f32 %v7909_v5, %v10897_v24  ;;  %v946_v9 = vpop.f32.mrb[11].mxu0 }
 0x197   : > { %v1778_v10 = vmax.f32 %v1585_v6, %v1683_v7  ;;  %1491 = vst [vmem:[#allocation2 + $0x40] sm:$0xff] %v1393_v4  ;;  %v947_v11 = vadd.f32 %v10897_v24, %v946_v9 }
 0x198   : > { %v1396_v12 = vmax.f32 %v952_v8, 0.0 }
 0x199   : > { %1827 = vst [vmem:[#allocation3 + $0x10] sm:$0xff] %v1778_v10  ;;  %v1395_v13 = vmax.f32 %v947_v11, 0.0  ;;  %v7912_v14 = vpop.f32.mrb[12].mxu0 }
 0x19a   : > { %v1587_v15 = vld [vmem:[#allocation2 + $0x30] ss:$2 sm:$0xff]  ;;  %v1685_v16 = vld [vmem:[#allocation2 + $0x31] ss:$2 sm:$0xff]  ;;  %1494 = vst [vmem:[#allocation2 + $0x58] sm:$0xff] %v1396_v12  ;;  %v962_v17 = vadd.f32 %v7912_v14, %v10897_v24  ;;  %v956_v18 = vpop.f32.mrb[13].mxu0 }
 0x19b   : > { %v1779_v19 = vmax.f32 %v1587_v15, %v1685_v16  ;;  %1493 = vst [vmem:[#allocation2 + $0x50] sm:$0xff] %v1395_v13  ;;  %v957_v20 = vadd.f32 %v10897_v24, %v956_v18 }
 0x19c   : > { %v1398_v21 = vmax.f32 %v962_v17, 0.0  ;;  %v1875_v47 = vld [vmem:[#allocation3 + $0x8] sm:$0x3f] }
 0x19d   : > { %1828 = vst [vmem:[#allocation3 + $0x18] sm:$0xff] %v1779_v19  ;;  %v1397_v22 = vmax.f32 %v957_v20, 0.0  ;;  %v7915_v23 = vpop.f32.mrb[14].mxu0 }
 0x19e   : > { %v1589_v25 = vld [vmem:[#allocation2 + $0x40] ss:$2 sm:$0xff]  ;;  %v1687_v26 = vld [vmem:[#allocation2 + $0x41] ss:$2 sm:$0xff]  ;;  %1496 = vst [vmem:[#allocation2 + $0x68] sm:$0xff] %v1398_v21  ;;  %v972_v27 = vadd.f32 %v7915_v23, %v10897_v24  ;;  %v966_v28 = vpop.f32.mrb[15].mxu0 }
 0x19f   : > { %v1780_v29 = vmax.f32 %v1589_v25, %v1687_v26  ;;  %1495 = vst [vmem:[#allocation2 + $0x60] sm:$0xff] %v1397_v22  ;;  %v967_v30 = vadd.f32 %v10897_v24, %v966_v28 }
 0x1a0   : > { %v1400_v32 = vmax.f32 %v972_v27, 0.0  ;;  %v1876_v33 = vld [vmem:[#allocation3 + $0xe] sm:$0xff] }
 0x1a1   : > { %1829 = vst [vmem:[#allocation3 + $0x20] sm:$0xff] %v1780_v29  ;;  %v1399_v34 = vmax.f32 %v967_v30, 0.0  ;;  %v7918_v35 = vpop.f32.mrb[16].mxu0  ;;  %v1878_v37 = vmax.f32 %v1776_v53, %v1876_v33 }
 0x1a2   : > { %v1591_v38 = vld [vmem:[#allocation2 + $0x50] ss:$2 sm:$0xff]  ;;  %v1689_v39 = vld [vmem:[#allocation2 + $0x51] ss:$2 sm:$0xff]  ;;  %1498 = vst [vmem:[#allocation2 + $0x78] sm:$0xff] %v1400_v32  ;;  %v982_v40 = vadd.f32 %v7918_v35, %v10897_v24  ;;  %v976_v42 = vpop.f32.mrb[17].mxu0 }
 0x1a3   : > { %v1781_v43 = vmax.f32 %v1591_v38, %v1689_v39  ;;  %1497 = vst [vmem:[#allocation2 + $0x70] sm:$0xff] %v1399_v34  ;;  %v977_v44 = vadd.f32 %v10897_v24, %v976_v42  ;;  %1880 = vst [vmem:[#allocation4 + $0x11] sm:$0xff] %v1878_v37  ;;  %8074 = vmatprep.mubr.f32.mxu1 %v1878_v37 }
 0x1a4   : > { %v1402_v45 = vmax.f32 %v982_v40, 0.0  ;;  %v1877_v48 = vld [vmem:[#allocation3 + $0x16] sm:$0x3f] }
 0x1a5   : > { %1830 = vst [vmem:[#allocation3 + $0x28] sm:$0xff] %v1781_v43  ;;  %v1401_v49 = vmax.f32 %v977_v44, 0.0  ;;  %v7921_v50 = vpop.f32.mrb[18].mxu0  ;;  %v1879_v52 = vmax.f32 %v1875_v47, %v1877_v48 }
 0x1a6   : > { %v1593_v53 = vld [vmem:[#allocation2 + $0x60] ss:$2 sm:$0xff]  ;;  %v1691_v54 = vld [vmem:[#allocation2 + $0x61] ss:$2 sm:$0xff]  ;;  %1500 = vst [vmem:[#allocation2 + $0x88] sm:$0xff] %v1402_v45  ;;  %v992_v55 = vadd.f32 %v7921_v50, %v10897_v24  ;;  %v986_v57 = vpop.f32.mrb[19].mxu0 }
 0x1a7   : > { %v1782_v58 = vmax.f32 %v1593_v53, %v1691_v54  ;;  %1499 = vst [vmem:[#allocation2 + $0x80] sm:$0xff] %v1401_v49  ;;  %v987_v59 = vadd.f32 %v10897_v24, %v986_v57  ;;  %1881 = vst [vmem:[#allocation4 + $0x19] sm:$0x3f] %v1879_v52  ;;  %v2018_v49 = vld [vmem:[#allocation13] sm:$0xff]  ;;  %v2019_v50 = vld [vmem:[#allocation13 + $0x8] sm:$0xff] }
 0x1a8   : > { %v1404_v60 = vmax.f32 %v992_v55, 0.0  ;;  %v1882_v17 = vld [vmem:[#allocation3 + $0x1c] sm:$0xff] }
 0x1a9   : > { %1831 = vst [vmem:[#allocation3 + $0x30] sm:$0xff] %v1782_v58  ;;  %v1403_v62 = vmax.f32 %v987_v59, 0.0  ;;  %v7924_v63 = vpop.f32.mrb[20].mxu0  ;;  %v9328_v58 = vpack.c.bf16 %v2019_v50, %v2018_v49 }
 0x1aa   : > { %v10919_v0 = vld [vmem:[#allocation2 + $0x70] ss:$2 sm:$0xff]  ;;  %v10921_v1 = vld [vmem:[#allocation2 + $0x71] ss:$2 sm:$0xff]  ;;  %1502 = vst [vmem:[#allocation2 + $0x98] sm:$0xff] %v1404_v60  ;;  %v1002_v3 = vadd.f32 %v7924_v63, %v10897_v24  ;;  %v996_v4 = vpop.f32.mrb[21].mxu0 }
 0x1ab   : > { %v1783_v5 = vmax.f32 %v10919_v0, %v10921_v1  ;;  %1501 = vst [vmem:[#allocation2 + $0x90] sm:$0xff] %v1403_v62  ;;  %v997_v6 = vadd.f32 %v10897_v24, %v996_v4  ;;  %9329 = vmatprep.subr.bf16.mxu1 %v9328_v58 }
 0x1ac   : > { %v1406_v7 = vmax.f32 %v1002_v3, 0.0  ;;  %v1883_v20 = vld [vmem:[#allocation3 + $0x24] sm:$0x3f]  ;;  %9331 = vmatpush3.bf16.msra.mxu1 %v9328_v58 }
 0x1ad   : > { %v1405_v8 = vmax.f32 %v997_v6, 0.0  ;;  %v7927_v9 = vpop.f32.mrb[22].mxu0 }
 0x1ae   : > { %v1597_v10 = vld [vmem:[#allocation2 + $0x80] ss:$2 sm:$0xff]  ;;  %v1695_v11 = vld [vmem:[#allocation2 + $0x81] ss:$2 sm:$0xff]  ;;  %1504 = vst [vmem:[#allocation2 + $0xa8] sm:$0xff] %v1406_v7  ;;  %v1012_v12 = vadd.f32 %v7927_v9, %v10897_v24  ;;  %v1006_v13 = vpop.f32.mrb[23].mxu0 }
 0x1af   : > { %v2037_v14 = vld [vmem:[#allocation4 + $0x19] sm:$0xff]  ;;  %v1784_v15 = vmax.f32 %v1597_v10, %v1695_v11  ;;  %1503 = vst [vmem:[#allocation2 + $0xa0] sm:$0xff] %v1405_v8  ;;  %v1007_v16 = vadd.f32 %v10897_v24, %v1006_v13 }
 0x1b0   : > { %8075 = vmatmul.mubr.f32.gmra.mrb[2].mxu1 %v2037_v14  ;;  %v1408_v18 = vmax.f32 %v1012_v12, 0.0  ;;  %v1884_v19 = vld [vmem:[#allocation3 + $0x2a] sm:$0xff]  ;;  %v1885_v21 = vld [vmem:[#allocation3 + $0x32] sm:$0x3f]  ;;  %v11215_v56 = vld [vmem:[#allocation4 + $0x12] sm:$0xff] }
 0x1b1   : > { %1833 = vst [vmem:[#allocation3 + $0x40] sm:$0xff] %v1784_v15  ;;  %v1407_v22 = vmax.f32 %v1007_v16, 0.0  ;;  %v7930_v23 = vpop.f32.mrb[24].mxu0  ;;  %v1886_v25 = vmax.f32 %v1882_v17, %v1884_v19  ;;  %v1887_v26 = vmax.f32 %v1883_v20, %v1885_v21 }
 0x1b2   : > { %v1599_v27 = vld [vmem:[#allocation2 + $0x90] ss:$2 sm:$0xff]  ;;  %v1697_v28 = vld [vmem:[#allocation2 + $0x91] ss:$2 sm:$0xff]  ;;  %1506 = vst [vmem:[#allocation2 + $0xb8] sm:$0xff] %v1408_v18  ;;  %v1022_v29 = vadd.f32 %v7930_v23, %v10897_v24  ;;  %v1016_v30 = vpop.f32.mrb[25].mxu0 }
 0x1b3   : > { %v1785_v32 = vmax.f32 %v1599_v27, %v1697_v28  ;;  %1505 = vst [vmem:[#allocation2 + $0xb0] sm:$0xff] %v1407_v22  ;;  %v1017_v33 = vadd.f32 %v10897_v24, %v1016_v30  ;;  %1888 = vst [vmem:[#allocation4 + $0x21] sm:$0xff] %v1886_v25  ;;  %8077 = vmatprep.mubr.f32.mxu1 %v1886_v25  ;;  %v2021_v18 = vld [vmem:[#allocation13 + $0x18] sm:$0xff] }
 0x1b4   : > { %1889 = vst [vmem:[#allocation4 + $0x29] sm:$0x3f] %v1887_v26  ;;  %v1410_v34 = vmax.f32 %v1022_v29, 0.0 }
 0x1b5   : > { %1834 = vst [vmem:[#allocation3 + $0x48] sm:$0xff] %v1785_v32  ;;  %v1409_v35 = vmax.f32 %v1017_v33, 0.0  ;;  %v7933_v37 = vpop.f32.mrb[26].mxu0 }
 0x1b6   : > { %v1601_v38 = vld [vmem:[#allocation2 + $0xa0] ss:$2 sm:$0xff]  ;;  %v1699_v39 = vld [vmem:[#allocation2 + $0xa1] ss:$2 sm:$0xff]  ;;  %1508 = vst [vmem:[#allocation2 + $0xc8] sm:$0xff] %v1410_v34  ;;  %v1032_v40 = vadd.f32 %v7933_v37, %v10897_v24  ;;  %v1026_v42 = vpop.f32.mrb[27].mxu0 }
 0x1b7   : > { %v1786_v43 = vmax.f32 %v1601_v38, %v1699_v39  ;;  %1507 = vst [vmem:[#allocation2 + $0xc0] sm:$0xff] %v1409_v35  ;;  %v1027_v44 = vadd.f32 %v10897_v24, %v1026_v42 }
 0x1b8   : > { %v1412_v45 = vmax.f32 %v1032_v40, 0.0  ;;  %v1891_v15 = vld [vmem:[#allocation3 + $0x40] sm:$0x3f] }
 0x1b9   : > { %1835 = vst [vmem:[#allocation3 + $0x50] sm:$0xff] %v1786_v43  ;;  %v1411_v47 = vmax.f32 %v1027_v44, 0.0  ;;  %v7936_v48 = vpop.f32.mrb[28].mxu0  ;;  %v2022_v43 = vld [vmem:[#allocation13 + $0x20] sm:$0xff]  ;;  %v2023_v44 = vld [vmem:[#allocation13 + $0x28] sm:$0xff] }
 0x1ba   : > { %v1603_v52 = vld [vmem:[#allocation2 + $0xb0] ss:$2 sm:$0xff]  ;;  %v1701_v53 = vld [vmem:[#allocation2 + $0xb1] ss:$2 sm:$0xff]  ;;  %1510 = vst [vmem:[#allocation2 + $0xd8] sm:$0xff] %v1412_v45  ;;  %v1042_v54 = vadd.f32 %v7936_v48, %v10897_v24  ;;  %v1036_v55 = vpop.f32.mrb[29].mxu0 }
 0x1bb   : > { %v4369_v57 = vld [vmem:[#allocation4 + $0x22] sm:$0xff]  ;;  %v1787_v59 = vmax.f32 %v1603_v52, %v1701_v53  ;;  %1509 = vst [vmem:[#allocation2 + $0xd0] sm:$0xff] %v1411_v47  ;;  %v1037_v60 = vadd.f32 %v10897_v24, %v1036_v55  ;;  %v9336_v52 = vpack.c.bf16 %v2023_v44, %v2022_v43  ;;  %v11218_v46 = vld [vmem:[#allocation4 + $0x1a] sm:$0xff] }
 0x1bc   : > { %8711 = vmatprep.mubr.f32.mxu0 %v4369_v57  ;;  %v2039_v62 = vld [vmem:[#allocation4 + $0x29] sm:$0xff]  ;;  %v1414_v63 = vmax.f32 %v1042_v54, 0.0  ;;  %v1892_v3 = vld [vmem:[#allocation3 + $0x46] sm:$0xff] }
 0x1bd   : > { %8078 = vmatmul.mubr.f32.gmra.mrb[4].mxu1 %v2039_v62  ;;  %1836 = vst [vmem:[#allocation3 + $0x58] sm:$0xff] %v1787_v59  ;;  %v1413_v4 = vmax.f32 %v1037_v60, 0.0  ;;  %v7939_v6 = vpop.f32.mrb[30].mxu0  ;;  %v1894_v7 = vmax.f32 %v1783_v5, %v1892_v3  ;;  %v2020_v5 = vld [vmem:[#allocation13 + $0x10] sm:$0xff] }
 0x1be   : > { %v1605_v8 = vld [vmem:[#allocation2 + $0xc0] ss:$2 sm:$0xff]  ;;  %v1703_v9 = vld [vmem:[#allocation2 + $0xc1] ss:$2 sm:$0xff]  ;;  %1512 = vst [vmem:[#allocation2 + $0xe8] sm:$0xff] %v1414_v63  ;;  %v1052_v10 = vadd.f32 %v7939_v6, %v10897_v24  ;;  %v1046_v11 = vpop.f32.mrb[31].mxu0  ;;  %v9332_v23 = vpack.c.bf16 %v2021_v18, %v2020_v5 }
 0x1bf   : > { %v1788_v12 = vmax.f32 %v1605_v8, %v1703_v9  ;;  %1511 = vst [vmem:[#allocation2 + $0xe0] sm:$0xff] %v1413_v4  ;;  %v1047_v13 = vadd.f32 %v10897_v24, %v1046_v11  ;;  %1896 = vst [vmem:[#allocation4 + $0x31] sm:$0xff] %v1894_v7  ;;  %8080 = vmatprep.mubr.f32.mxu1 %v1894_v7 }
 0x1c0   : > { %v1416_v14 = vmax.f32 %v1052_v10, 0.0  ;;  %v1893_v16 = vld [vmem:[#allocation3 + $0x4e] sm:$0x3f]  ;;  %9333 = vmatprep.subr.bf16.mxu1 %v9332_v23 }
 0x1c1   : > { %1837 = vst [vmem:[#allocation3 + $0x60] sm:$0xff] %v1788_v12  ;;  %v1415_v17 = vmax.f32 %v1047_v13, 0.0  ;;  %v7942_v0 = vpop.f32.mrb[32].mxu0  ;;  %v1895_v1 = vmax.f32 %v1891_v15, %v1893_v16  ;;  %9335 = vmatpush3.bf16.msra.mxu1 %v9332_v23  ;;  %v2024_v16 = vld [vmem:[#allocation13 + $0x30] sm:$0xff] }
 0x1c2   : > { %v1607_v19 = vld [vmem:[#allocation2 + $0xd0] ss:$2 sm:$0xff]  ;;  %v1705_v20 = vld [vmem:[#allocation2 + $0xd1] ss:$2 sm:$0xff]  ;;  %1514 = vst [vmem:[#allocation2 + $0xf8] sm:$0xff] %v1416_v14  ;;  %v1062_v21 = vadd.f32 %v7942_v0, %v10897_v24  ;;  %v1056_v22 = vpop.f32.mrb[33].mxu0  ;;  %9337 = vmatprep.subr.bf16.mxu1 %v9336_v52 }
 0x1c3   : > { %v1789_v25 = vmax.f32 %v1607_v19, %v1705_v20  ;;  %1513 = vst [vmem:[#allocation2 + $0xf0] sm:$0xff] %v1415_v17  ;;  %v1057_v26 = vadd.f32 %v10897_v24, %v1056_v22  ;;  %1897 = vst [vmem:[#allocation4 + $0x39] sm:$0x3f] %v1895_v1  ;;  %v2025_v17 = vld [vmem:[#allocation13 + $0x38] sm:$0xff]  ;;  %v2026_v0 = vld [vmem:[#allocation13 + $0x40] sm:$0xff] }
 0x1c4   : > { %v1418_v27 = vmax.f32 %v1062_v21, 0.0  ;;  %v1898_v57 = vld [vmem:[#allocation3 + $0x54] sm:$0xff]  ;;  %v9340_v20 = vpack.c.bf16 %v2025_v17, %v2024_v16  ;;  %v2027_v21 = vld [vmem:[#allocation13 + $0x48] sm:$0xff] }
 0x1c5   : > { %1838 = vst [vmem:[#allocation3 + $0x68] sm:$0xff] %v1789_v25  ;;  %v1417_v28 = vmax.f32 %v1057_v26, 0.0  ;;  %v7945_v29 = vpop.f32.mrb[34].mxu0  ;;  %9339 = vmatpush3.bf16.msra.mxu1 %v9336_v52  ;;  %v9344_v25 = vpack.c.bf16 %v2027_v21, %v2026_v0  ;;  %v2028_v26 = vld [vmem:[#allocation13 + $0x50] sm:$0xff]  ;;  %v2031_v52 = vld [vmem:[#allocation13 + $0x68] sm:$0xff] }
 0x1c6   : > { %v10942_v30 = vld [vmem:[#allocation2 + $0xe0] ss:$2 sm:$0xff]  ;;  %v10944_v32 = vld [vmem:[#allocation2 + $0xe1] ss:$2 sm:$0xff]  ;;  %1516 = vst [vmem:[#allocation2 + $0x108] sm:$0xff] %v1418_v27  ;;  %v1072_v33 = vadd.f32 %v7945_v29, %v10897_v24  ;;  %v1066_v34 = vpop.f32.mrb[35].mxu0  ;;  %9341 = vmatprep.subr.bf16.mxu1 %v9340_v20 }
 0x1c7   : > { %v4370_v35 = vld [vmem:[#allocation4 + $0x2a] sm:$0xff]  ;;  %v1790_v37 = vmax.f32 %v10942_v30, %v10944_v32  ;;  %1515 = vst [vmem:[#allocation2 + $0x100] sm:$0xff] %v1417_v28  ;;  %v1067_v38 = vadd.f32 %v10897_v24, %v1066_v34 }
 0x1c8   : > { %8712 = vmatmul.mubr.f32.vlgmr.msra.gmra.mrb[98].mxu0 %v4370_v35  ;;  %v1420_v39 = vmax.f32 %v1072_v33, 0.0  ;;  %v1899_v60 = vld [vmem:[#allocation3 + $0x5c] sm:$0x3f]  ;;  %v2029_v27 = vld [vmem:[#allocation13 + $0x58] sm:$0xff] }
 0x1c9   : > { %v1419_v40 = vmax.f32 %v1067_v38, 0.0  ;;  %v7948_v42 = vpop.f32.mrb[36].mxu0  ;;  %9343 = vmatpush3.bf16.msra.mxu1 %v9340_v20 }
 0x1ca   : > { %v1611_v45 = vld [vmem:[#allocation2 + $0xf0] ss:$2 sm:$0xff]  ;;  %v1709_v47 = vld [vmem:[#allocation2 + $0xf1] ss:$2 sm:$0xff]  ;;  %1518 = vst [vmem:[#allocation2 + $0x118] sm:$0xff] %v1420_v39  ;;  %v1082_v48 = vadd.f32 %v7948_v42, %v10897_v24  ;;  %v1076_v49 = vpop.f32.mrb[37].mxu0  ;;  %9345 = vmatprep.subr.bf16.mxu1 %v9344_v25  ;;  %v9348_v42 = vpack.c.bf16 %v2029_v27, %v2028_v26 }
 0x1cb   : > { %v2041_v50 = vld [vmem:[#allocation4 + $0x39] sm:$0xff]  ;;  %v1791_v53 = vmax.f32 %v1611_v45, %v1709_v47  ;;  %1517 = vst [vmem:[#allocation2 + $0x110] sm:$0xff] %v1419_v40  ;;  %v1077_v54 = vadd.f32 %v10897_v24, %v1076_v49 }
 0x1cc   : > { %8081 = vmatmul.mubr.f32.gmra.mrb[6].mxu1 %v2041_v50  ;;  %v4371_v55 = vld [vmem:[#allocation4 + $0x32] sm:$0xff]  ;;  %v1422_v58 = vmax.f32 %v1082_v48, 0.0  ;;  %v1900_v59 = vld [vmem:[#allocation3 + $0x62] sm:$0xff]  ;;  %v1901_v62 = vld [vmem:[#allocation3 + $0x6a] sm:$0x3f] }
 0x1cd   : > { %8714 = vmatprep.mubr.f32.mxu0 %v4371_v55  ;;  %1840 = vst [vmem:[#allocation3 + $0x78] sm:$0xff] %v1791_v53  ;;  %v1421_v63 = vmax.f32 %v1077_v54, 0.0  ;;  %v7951_v3 = vpop.f32.mrb[38].mxu0  ;;  %v1902_v4 = vmax.f32 %v1898_v57, %v1900_v59  ;;  %v1903_v6 = vmax.f32 %v1899_v60, %v1901_v62  ;;  %v2030_v48 = vld [vmem:[#allocation13 + $0x60] sm:$0xff]  ;;  %9347 = vmatpush3.bf16.msra.mxu1 %v9344_v25 }
 0x1ce   : > { %v1613_v7 = vld [vmem:[#allocation2 + $0x100] ss:$2 sm:$0xff]  ;;  %v1711_v8 = vld [vmem:[#allocation2 + $0x101] ss:$2 sm:$0xff]  ;;  %1520 = vst [vmem:[#allocation2 + $0x128] sm:$0xff] %v1422_v58  ;;  %v1092_v9 = vadd.f32 %v7951_v3, %v10897_v24  ;;  %v1086_v10 = vpop.f32.mrb[39].mxu0  ;;  %9349 = vmatprep.subr.bf16.mxu1 %v9348_v42  ;;  %v9352_v62 = vpack.c.bf16 %v2031_v52, %v2030_v48 }
 0x1cf   : > { %v1792_v11 = vmax.f32 %v1613_v7, %v1711_v8  ;;  %1519 = vst [vmem:[#allocation2 + $0x120] sm:$0xff] %v1421_v63  ;;  %v1087_v12 = vadd.f32 %v10897_v24, %v1086_v10  ;;  %1904 = vst [vmem:[#allocation4 + $0x41] sm:$0xff] %v1902_v4  ;;  %8083 = vmatprep.mubr.f32.mxu1 %v1902_v4  ;;  %v2032_v4 = vld [vmem:[#allocation13 + $0x70] sm:$0xff]  ;;  %v2566_v48 = vld [vmem:[#allocation13 + $0x100] sm:$0xff] }
 0x1d0   : > { %1905 = vst [vmem:[#allocation4 + $0x49] sm:$0x3f] %v1903_v6  ;;  %v1424_v13 = vmax.f32 %v1092_v9, 0.0  ;;  %v2033_v6 = vld [vmem:[#allocation13 + $0x78] sm:$0xff] }
 0x1d1   : > { %1841 = vst [vmem:[#allocation3 + $0x80] sm:$0xff] %v1792_v11  ;;  %v1423_v14 = vmax.f32 %v1087_v12, 0.0  ;;  %v7954_v15 = vpop.f32.mrb[40].mxu0  ;;  %9351 = vmatpush3.bf16.msra.mxu1 %v9348_v42 }
 0x1d2   : > { %v1615_v1 = vld [vmem:[#allocation2 + $0x110] ss:$2 sm:$0xff]  ;;  %v1713_v5 = vld [vmem:[#allocation2 + $0x111] ss:$2 sm:$0xff]  ;;  %1522 = vst [vmem:[#allocation2 + $0x138] sm:$0xff] %v1424_v13  ;;  %v1102_v18 = vadd.f32 %v7954_v15, %v10897_v24  ;;  %v1096_v19 = vpop.f32.mrb[41].mxu0  ;;  %9353 = vmatprep.subr.bf16.mxu1 %v9352_v62 }
 0x1d3   : > { %v1793_v22 = vmax.f32 %v1615_v1, %v1713_v5  ;;  %1521 = vst [vmem:[#allocation2 + $0x130] sm:$0xff] %v1423_v14  ;;  %v1097_v23 = vadd.f32 %v10897_v24, %v1096_v19  ;;  %v9356_v14 = vpack.c.bf16 %v2033_v6, %v2032_v4 }
 0x1d4   : > { %v1426_v28 = vmax.f32 %v1102_v18, 0.0  ;;  %v1907_v30 = vld [vmem:[#allocation3 + $0x78] sm:$0x3f] }
 0x1d5   : > { %1842 = vst [vmem:[#allocation3 + $0x88] sm:$0xff] %v1793_v22  ;;  %v1425_v29 = vmax.f32 %v1097_v23, 0.0  ;;  %v7957_v33 = vpop.f32.mrb[42].mxu0  ;;  %9355 = vmatpush3.bf16.msra.mxu1 %v9352_v62 }
 0x1d6   : > { %v1617_v34 = vld [vmem:[#allocation2 + $0x120] ss:$2 sm:$0xff]  ;;  %v1715_v35 = vld [vmem:[#allocation2 + $0x121] ss:$2 sm:$0xff]  ;;  %1524 = vst [vmem:[#allocation2 + $0x148] sm:$0xff] %v1426_v28  ;;  %v1112_v38 = vadd.f32 %v7957_v33, %v10897_v24  ;;  %v1106_v39 = vpop.f32.mrb[43].mxu0  ;;  %9357 = vmatprep.subr.bf16.mxu1 %v9356_v14 }
 0x1d7   : > { %v4372_v40 = vld [vmem:[#allocation4 + $0x3a] sm:$0xff]  ;;  %v1794_v43 = vmax.f32 %v1617_v34, %v1715_v35  ;;  %1523 = vst [vmem:[#allocation2 + $0x140] sm:$0xff] %v1425_v29  ;;  %v1107_v44 = vadd.f32 %v10897_v24, %v1106_v39  ;;  %v2043_v45 = vld [vmem:[#allocation4 + $0x49] sm:$0xff] }
 0x1d8   : > { %8715 = vmatmul.mubr.f32.gmra.mrb[100].mxu0 %v4372_v40  ;;  %v4373_v47 = vld [vmem:[#allocation4 + $0x42] sm:$0xff]  ;;  %v1428_v49 = vmax.f32 %v1112_v38, 0.0  ;;  %8084 = vmatmul.mubr.f32.gmra.mrb[8].mxu1 %v2043_v45  ;;  %v1908_v50 = vld [vmem:[#allocation3 + $0x7e] sm:$0xff] }
 0x1d9   : > { %8717 = vmatprep.mubr.f32.mxu0 %v4373_v47  ;;  %1843 = vst [vmem:[#allocation3 + $0x90] sm:$0xff] %v1794_v43  ;;  %v1427_v53 = vmax.f32 %v1107_v44, 0.0  ;;  %v7960_v54 = vpop.f32.mrb[44].mxu0  ;;  %v1910_v55 = vmax.f32 %v1790_v37, %v1908_v50  ;;  %9359 = vmatpush3.bf16.msra.mxu1 %v9356_v14  ;;  %v11232_v36 = vld [vmem:[#allocation4 + $0x3a] sm:$0xff] }
 0x1da   : > { %v1619_v57 = vld [vmem:[#allocation2 + $0x130] ss:$2 sm:$0xff]  ;;  %v1717_v58 = vld [vmem:[#allocation2 + $0x131] ss:$2 sm:$0xff]  ;;  %1526 = vst [vmem:[#allocation2 + $0x158] sm:$0xff] %v1428_v49  ;;  %v1122_v59 = vadd.f32 %v7960_v54, %v10897_v24  ;;  %v1116_v60 = vpop.f32.mrb[45].mxu0 }
 0x1db   : > { %v1795_v63 = vmax.f32 %v1619_v57, %v1717_v58  ;;  %1525 = vst [vmem:[#allocation2 + $0x150] sm:$0xff] %v1427_v53  ;;  %v1117_v3 = vadd.f32 %v10897_v24, %v1116_v60  ;;  %1912 = vst [vmem:[#allocation4 + $0x51] sm:$0xff] %v1910_v55  ;;  %8086 = vmatprep.mubr.f32.mxu1 %v1910_v55  ;;  %v2567_v54 = vld [vmem:[#allocation13 + $0x108] sm:$0xff] }
 0x1dc   : > { %v1430_v7 = vmax.f32 %v1122_v59, 0.0  ;;  %v1909_v32 = vld [vmem:[#allocation3 + $0x86] sm:$0x3f]  ;;  %v10976_v60 = vpack.c.bf16 %v2567_v54, %v2566_v48  ;;  %11887 = vst [vmem:[#allocation38_spill] sm:$0xff] %v11232_v36 }
 0x1dd   : > { %1844 = vst [vmem:[#allocation3 + $0x98] sm:$0xff] %v1795_v63  ;;  %v1429_v37 = vmax.f32 %v1117_v3, 0.0  ;;  %v7963_v8 = vpop.f32.mrb[46].mxu0  ;;  %v1911_v9 = vmax.f32 %v1907_v30, %v1909_v32 }
 0x1de   : > { %v1621_v10 = vld [vmem:[#allocation2 + $0x140] ss:$2 sm:$0xff]  ;;  %v1719_v11 = vld [vmem:[#allocation2 + $0x141] ss:$2 sm:$0xff]  ;;  %1528 = vst [vmem:[#allocation2 + $0x168] sm:$0xff] %v1430_v7  ;;  %v1132_v12 = vadd.f32 %v7963_v8, %v10897_v24  ;;  %v1126_v13 = vpop.f32.mrb[47].mxu0  ;;  %9361 = vmatprep.subr.bf16.mxu1 %v10976_v60 }
 0x1df   : > { %v1796_v15 = vmax.f32 %v1621_v10, %v1719_v11  ;;  %1527 = vst [vmem:[#allocation2 + $0x160] sm:$0xff] %v1429_v37  ;;  %v1127_v16 = vadd.f32 %v10897_v24, %v1126_v13  ;;  %1913 = vst [vmem:[#allocation4 + $0x59] sm:$0x3f] %v1911_v9 }
 0x1e0   : > { %v1432_v17 = vmax.f32 %v1132_v12, 0.0  ;;  %v1914_v42 = vld [vmem:[#allocation3 + $0x8c] sm:$0xff] }
 0x1e1   : > { %1845 = vst [vmem:[#allocation3 + $0xa0] sm:$0xff] %v1796_v15  ;;  %v1431_v0 = vmax.f32 %v1127_v16, 0.0  ;;  %v7966_v1 = vpop.f32.mrb[48].mxu0 }
 0x1e2   : > { %v10965_v5 = vld [vmem:[#allocation2 + $0x150] ss:$2 sm:$0xff]  ;;  %v10967_v18 = vld [vmem:[#allocation2 + $0x151] ss:$2 sm:$0xff]  ;;  %1530 = vst [vmem:[#allocation2 + $0x178] sm:$0xff] %v1432_v17  ;;  %v1142_v19 = vadd.f32 %v7966_v1, %v10897_v24  ;;  %v1136_v20 = vpop.f32.mrb[49].mxu0 }
 0x1e3   : > { %v4374_v21 = vld [vmem:[#allocation4 + $0x4a] sm:$0xff]  ;;  %v1797_v22 = vmax.f32 %v10965_v5, %v10967_v18  ;;  %1529 = vst [vmem:[#allocation2 + $0x170] sm:$0xff] %v1431_v0  ;;  %v1137_v23 = vadd.f32 %v10897_v24, %v1136_v20 }
 0x1e4   : > { %8718 = vmatmul.mubr.f32.gmra.mrb[102].mxu0 %v4374_v21  ;;  %v1434_v25 = vmax.f32 %v1142_v19, 0.0  ;;  %v1915_v43 = vld [vmem:[#allocation3 + $0x94] sm:$0x3f] }
 0x1e5   : > { %v1433_v26 = vmax.f32 %v1137_v23, 0.0  ;;  %v7969_v27 = vpop.f32.mrb[50].mxu0 }
 0x1e6   : > { %v1625_v28 = vld [vmem:[#allocation2 + $0x160] ss:$2 sm:$0xff]  ;;  %v1723_v29 = vld [vmem:[#allocation2 + $0x161] ss:$2 sm:$0xff]  ;;  %1532 = vst [vmem:[#allocation2 + $0x188] sm:$0xff] %v1434_v25  ;;  %v1152_v33 = vadd.f32 %v7969_v27, %v10897_v24  ;;  %v1146_v34 = vpop.f32.mrb[51].mxu0 }
 0x1e7   : > { %v2045_v35 = vld [vmem:[#allocation4 + $0x59] sm:$0xff]  ;;  %v1798_v38 = vmax.f32 %v1625_v28, %v1723_v29  ;;  %1531 = vst [vmem:[#allocation2 + $0x180] sm:$0xff] %v1433_v26  ;;  %v1147_v39 = vadd.f32 %v10897_v24, %v1146_v34 }
 0x1e8   : > { %8087 = vmatmul.mubr.f32.gmra.mrb[10].mxu1 %v2045_v35  ;;  %v4375_v40 = vld [vmem:[#allocation4 + $0x52] sm:$0xff]  ;;  %v1436_v44 = vmax.f32 %v1152_v33, 0.0  ;;  %v1917_v47 = vld [vmem:[#allocation3 + $0xa2] sm:$0x3f] }
 0x1e9   : > { %8720 = vmatprep.mubr.f32.mxu0 %v4375_v40  ;;  %v1916_v45 = vld [vmem:[#allocation3 + $0x9a] sm:$0xff]  ;;  %1847 = vst [vmem:[#allocation3 + $0xb0] sm:$0xff] %v1798_v38  ;;  %v1435_v49 = vmax.f32 %v1147_v39, 0.0  ;;  %v7972_v50 = vpop.f32.mrb[52].mxu0  ;;  %v1919_v53 = vmax.f32 %v1915_v43, %v1917_v47 }
 0x1ea   : > { %v1918_v52 = vmax.f32 %v1914_v42, %v1916_v45  ;;  %v1627_v55 = vld [vmem:[#allocation2 + $0x170] ss:$2 sm:$0xff]  ;;  %v1725_v57 = vld [vmem:[#allocation2 + $0x171] ss:$2 sm:$0xff]  ;;  %1534 = vst [vmem:[#allocation2 + $0x198] sm:$0xff] %v1436_v44  ;;  %v1162_v58 = vadd.f32 %v7972_v50, %v10897_v24  ;;  %v1156_v59 = vpop.f32.mrb[53].mxu0 }
 0x1eb   : > { %v1799_v62 = vmax.f32 %v1627_v55, %v1725_v57  ;;  %1533 = vst [vmem:[#allocation2 + $0x190] sm:$0xff] %v1435_v49  ;;  %v1157_v63 = vadd.f32 %v10897_v24, %v1156_v59  ;;  %1921 = vst [vmem:[#allocation4 + $0x69] sm:$0x3f] %v1919_v53 }
 0x1ec   : > { %1920 = vst [vmem:[#allocation4 + $0x61] sm:$0xff] %v1918_v52  ;;  %8089 = vmatprep.mubr.f32.mxu1 %v1918_v52  ;;  %v1438_v3 = vmax.f32 %v1162_v58, 0.0 }
 0x1ed   : > { %1848 = vst [vmem:[#allocation3 + $0xb8] sm:$0xff] %v1799_v62  ;;  %v1437_v4 = vmax.f32 %v1157_v63, 0.0  ;;  %v7975_v6 = vpop.f32.mrb[54].mxu0 }
 0x1ee   : > { %v1629_v7 = vld [vmem:[#allocation2 + $0x180] ss:$2 sm:$0xff]  ;;  %v1727_v30 = vld [vmem:[#allocation2 + $0x181] ss:$2 sm:$0xff]  ;;  %1536 = vst [vmem:[#allocation2 + $0x1a8] sm:$0xff] %v1438_v3  ;;  %v1172_v32 = vadd.f32 %v7975_v6, %v10897_v24  ;;  %v1166_v37 = vpop.f32.mrb[55].mxu0 }
 0x1ef   : > { %v1800_v8 = vmax.f32 %v1629_v7, %v1727_v30  ;;  %1535 = vst [vmem:[#allocation2 + $0x1a0] sm:$0xff] %v1437_v4  ;;  %v1167_v9 = vadd.f32 %v10897_v24, %v1166_v37 }
 0x1f0   : > { %v1440_v10 = vmax.f32 %v1172_v32, 0.0  ;;  %v1923_v40 = vld [vmem:[#allocation3 + $0xb0] sm:$0x3f] }
 0x1f1   : > { %1849 = vst [vmem:[#allocation3 + $0xc0] sm:$0xff] %v1800_v8  ;;  %v1439_v11 = vmax.f32 %v1167_v9, 0.0  ;;  %v7978_v12 = vpop.f32.mrb[56].mxu0 }
 0x1f2   : > { %v1631_v13 = vld [vmem:[#allocation2 + $0x190] ss:$2 sm:$0xff]  ;;  %v1729_v14 = vld [vmem:[#allocation2 + $0x191] ss:$2 sm:$0xff]  ;;  %1538 = vst [vmem:[#allocation2 + $0x1b8] sm:$0xff] %v1440_v10  ;;  %v1182_v15 = vadd.f32 %v7978_v12, %v10897_v24  ;;  %v1176_v16 = vpop.f32.mrb[57].mxu0 }
 0x1f3   : > { %v4376_v17 = vld [vmem:[#allocation4 + $0x5a] sm:$0xff]  ;;  %v1801_v0 = vmax.f32 %v1631_v13, %v1729_v14  ;;  %1537 = vst [vmem:[#allocation2 + $0x1b0] sm:$0xff] %v1439_v11  ;;  %v1177_v1 = vadd.f32 %v10897_v24, %v1176_v16  ;;  %v2047_v19 = vld [vmem:[#allocation4 + $0x69] sm:$0xff] }
 0x1f4   : > { %8721 = vmatmul.mubr.f32.gmra.mrb[104].mxu0 %v4376_v17  ;;  %v4377_v20 = vld [vmem:[#allocation4 + $0x62] sm:$0xff]  ;;  %v1442_v21 = vmax.f32 %v1182_v15, 0.0  ;;  %8090 = vmatmul.mubr.f32.gmra.mrb[12].mxu1 %v2047_v19  ;;  %v1924_v23 = vld [vmem:[#allocation3 + $0xb6] sm:$0xff] }
 0x1f5   : > { %8723 = vmatprep.mubr.f32.mxu0 %v4377_v20  ;;  %1850 = vst [vmem:[#allocation3 + $0xc8] sm:$0xff] %v1801_v0  ;;  %v1441_v25 = vmax.f32 %v1177_v1, 0.0  ;;  %v7981_v26 = vpop.f32.mrb[58].mxu0  ;;  %v1926_v27 = vmax.f32 %v1797_v22, %v1924_v23  ;;  %v11000_v10 = vld [vmem:[#allocation11] ss:$0 sm:$0xff] }
 0x1f6   : > { %v1633_v28 = vld [vmem:[#allocation2 + $0x1a0] ss:$2 sm:$0xff]  ;;  %v1731_v29 = vld [vmem:[#allocation2 + $0x1a1] ss:$2 sm:$0xff]  ;;  %1540 = vst [vmem:[#allocation2 + $0x1c8] sm:$0xff] %v1442_v21  ;;  %v1192_v33 = vadd.f32 %v7981_v26, %v10897_v24  ;;  %v1186_v34 = vpop.f32.mrb[59].mxu0 }
 0x1f7   : > { %v1802_v35 = vmax.f32 %v1633_v28, %v1731_v29  ;;  %1539 = vst [vmem:[#allocation2 + $0x1c0] sm:$0xff] %v1441_v25  ;;  %v1187_v38 = vadd.f32 %v10897_v24, %v1186_v34  ;;  %1928 = vst [vmem:[#allocation4 + $0x71] sm:$0xff] %v1926_v27  ;;  %8092 = vmatprep.mubr.f32.mxu1 %v1926_v27 }
 0x1f8   : > { %v1444_v39 = vmax.f32 %v1192_v33, 0.0  ;;  %v1925_v42 = vld [vmem:[#allocation3 + $0xbe] sm:$0x3f] }
 0x1f9   : > { %1851 = vst [vmem:[#allocation3 + $0xd0] sm:$0xff] %v1802_v35  ;;  %v1443_v43 = vmax.f32 %v1187_v38, 0.0  ;;  %v7984_v44 = vpop.f32.mrb[60].mxu0  ;;  %v1927_v5 = vmax.f32 %v1923_v40, %v1925_v42 }
 0x1fa   : > { %v1635_v18 = vld [vmem:[#allocation2 + $0x1b0] ss:$2 sm:$0xff]  ;;  %v1733_v22 = vld [vmem:[#allocation2 + $0x1b1] ss:$2 sm:$0xff]  ;;  %1542 = vst [vmem:[#allocation2 + $0x1d8] sm:$0xff] %v1444_v39  ;;  %v1202_v45 = vadd.f32 %v7984_v44, %v10897_v24  ;;  %v1196_v47 = vpop.f32.mrb[61].mxu0 }
 0x1fb   : > { %v1803_v48 = vmax.f32 %v1635_v18, %v1733_v22  ;;  %1541 = vst [vmem:[#allocation2 + $0x1d0] sm:$0xff] %v1443_v43  ;;  %v1197_v49 = vadd.f32 %v10897_v24, %v1196_v47  ;;  %1929 = vst [vmem:[#allocation4 + $0x79] sm:$0x3f] %v1927_v5 }
 0x1fc   : > { %v1446_v50 = vmax.f32 %v1202_v45, 0.0  ;;  %v1930_v13 = vld [vmem:[#allocation3 + $0xc4] sm:$0xff] }
 0x1fd   : > { %1852 = vst [vmem:[#allocation3 + $0xd8] sm:$0xff] %v1803_v48  ;;  %v1445_v52 = vmax.f32 %v1197_v49, 0.0  ;;  %v7987_v53 = vpop.f32.mrb[62].mxu0 }
 0x1fe   : > { %v10991_v54 = vld [vmem:[#allocation2 + $0x1c0] ss:$2 sm:$0xff]  ;;  %v10993_v55 = vld [vmem:[#allocation2 + $0x1c1] ss:$2 sm:$0xff]  ;;  %1544 = vst [vmem:[#allocation2 + $0x1e8] sm:$0xff] %v1446_v50  ;;  %v1212_v57 = vadd.f32 %v7987_v53, %v10897_v24  ;;  %v1206_v58 = vpop.f32.mrb[63].mxu0 }
 0x1ff   : > { %v4378_v59 = vld [vmem:[#allocation4 + $0x6a] sm:$0xff]  ;;  %v1804_v62 = vmax.f32 %v10991_v54, %v10993_v55  ;;  %1543 = vst [vmem:[#allocation2 + $0x1e0] sm:$0xff] %v1445_v52  ;;  %v1207_v63 = vadd.f32 %v10897_v24, %v1206_v58 }
 0x200   : > { %8724 = vmatmul.mubr.f32.gmra.mrb[106].mxu0 %v4378_v59  ;;  %v1448_v3 = vmax.f32 %v1212_v57, 0.0  ;;  %v1931_v16 = vld [vmem:[#allocation3 + $0xcc] sm:$0x3f] }
 0x201   : > { %v1447_v4 = vmax.f32 %v1207_v63, 0.0  ;;  %v7990_v6 = vpop.f32.mrb[64].mxu0 }
 0x202   : > { %v1639_v7 = vld [vmem:[#allocation2 + $0x1d0] ss:$2 sm:$0xff]  ;;  %v1737_v30 = vld [vmem:[#allocation2 + $0x1d1] ss:$2 sm:$0xff]  ;;  %1546 = vst [vmem:[#allocation2 + $0x1f8] sm:$0xff] %v1448_v3  ;;  %v1222_v32 = vadd.f32 %v7990_v6, %v10897_v24  ;;  %v1216_v37 = vpop.f32.mrb[65].mxu0 }
 0x203   : > { %v2049_v8 = vld [vmem:[#allocation4 + $0x79] sm:$0xff]  ;;  %v1805_v9 = vmax.f32 %v1639_v7, %v1737_v30  ;;  %1545 = vst [vmem:[#allocation2 + $0x1f0] sm:$0xff] %v1447_v4  ;;  %v1217_v11 = vadd.f32 %v11000_v10, %v1216_v37 }
 0x204   : > { %8093 = vmatmul.mubr.f32.gmra.mrb[14].mxu1 %v2049_v8  ;;  %v11003_v12 = vld [vmem:[#allocation4 + $0x72] sm:$0xff]  ;;  %v1450_v14 = vmax.f32 %v1222_v32, 0.0  ;;  %v1932_v15 = vld [vmem:[#allocation3 + $0xd2] sm:$0xff] }
 0x205   : > { %8726 = vmatprep.mubr.f32.mxu0 %v11003_v12  ;;  %v1933_v17 = vld [vmem:[#allocation3 + $0xda] sm:$0x3f]  ;;  %1854 = vst [vmem:[#allocation3 + $0xe8] sm:$0xff] %v1805_v9  ;;  %v1449_v24 = vmax.f32 %v1217_v11, 0.0  ;;  %v7993_v0 = vpop.f32.mrb[66].mxu0  ;;  %v1934_v1 = vmax.f32 %v1930_v13, %v1932_v15 }
 0x206   : > { %v1935_v19 = vmax.f32 %v1931_v16, %v1933_v17  ;;  %v1641_v20 = vld [vmem:[#allocation2 + $0x1e0] ss:$2 sm:$0xff]  ;;  %v1739_v21 = vld [vmem:[#allocation2 + $0x1e1] ss:$2 sm:$0xff]  ;;  %1548 = vst [vmem:[#allocation2 + $0x208] sm:$0xff] %v1450_v14  ;;  %v1232_v23 = vadd.f32 %v11000_v10, %v7993_v0  ;;  %v1226_v25 = vpop.f32.mrb[67].mxu0 }
 0x207   : > { %v1806_v26 = vmax.f32 %v1641_v20, %v1739_v21  ;;  %1547 = vst [vmem:[#allocation2 + $0x200] sm:$0xff] %v1449_v24  ;;  %v1227_v27 = vadd.f32 %v11000_v10, %v1226_v25  ;;  %1936 = vst [vmem:[#allocation4 + $0x81] sm:$0xff] %v1934_v1  ;;  %8095 = vmatprep.mubr.f32.mxu1 %v1934_v1 }
 0x208   : > { %1937 = vst [vmem:[#allocation4 + $0x89] sm:$0x3f] %v1935_v19  ;;  %v1452_v28 = vmax.f32 %v1232_v23, 0.0 }
 0x209   : > { %1855 = vst [vmem:[#allocation3 + $0xf0] sm:$0xff] %v1806_v26  ;;  %v1451_v29 = vmax.f32 %v1227_v27, 0.0  ;;  %v7996_v33 = vpop.f32.mrb[68].mxu0 }
 0x20a   : > { %v1643_v34 = vld [vmem:[#allocation2 + $0x1f0] ss:$2 sm:$0xff]  ;;  %v1741_v35 = vld [vmem:[#allocation2 + $0x1f1] ss:$2 sm:$0xff]  ;;  %1550 = vst [vmem:[#allocation2 + $0x218] sm:$0xff] %v1452_v28  ;;  %v1242_v38 = vadd.f32 %v11000_v10, %v7996_v33  ;;  %v1236_v39 = vpop.f32.mrb[69].mxu0 }
 0x20b   : > { %v1807_v40 = vmax.f32 %v1643_v34, %v1741_v35  ;;  %1549 = vst [vmem:[#allocation2 + $0x210] sm:$0xff] %v1451_v29  ;;  %v1237_v42 = vadd.f32 %v11000_v10, %v1236_v39 }
 0x20c   : > { %v1454_v43 = vmax.f32 %v1242_v38, 0.0  ;;  %v1939_v9 = vld [vmem:[#allocation3 + $0xe8] sm:$0x3f] }
 0x20d   : > { %1856 = vst [vmem:[#allocation3 + $0xf8] sm:$0xff] %v1807_v40  ;;  %v1453_v44 = vmax.f32 %v1237_v42, 0.0  ;;  %v7999_v5 = vpop.f32.mrb[70].mxu0 }
 0x20e   : > { %v1645_v18 = vld [vmem:[#allocation2 + $0x200] ss:$2 sm:$0xff]  ;;  %v1743_v22 = vld [vmem:[#allocation2 + $0x201] ss:$2 sm:$0xff]  ;;  %1552 = vst [vmem:[#allocation2 + $0x228] sm:$0xff] %v1454_v43  ;;  %v1252_v45 = vadd.f32 %v11000_v10, %v7999_v5  ;;  %v1246_v47 = vpop.f32.mrb[71].mxu0 }
 0x20f   : > { %v11011_v48 = vld [vmem:[#allocation4 + $0x7a] sm:$0xff]  ;;  %v1808_v49 = vmax.f32 %v1645_v18, %v1743_v22  ;;  %1551 = vst [vmem:[#allocation2 + $0x220] sm:$0xff] %v1453_v44  ;;  %v1247_v50 = vadd.f32 %v11000_v10, %v1246_v47  ;;  %v2051_v52 = vld [vmem:[#allocation4 + $0x89] sm:$0xff] }
 0x210   : > { %8727 = vmatmul.mubr.f32.gmra.mrb[108].mxu0 %v11011_v48  ;;  %v11015_v53 = vld [vmem:[#allocation4 + $0x82] sm:$0xff]  ;;  %v1456_v57 = vmax.f32 %v1252_v45, 0.0  ;;  %8096 = vmatmul.mubr.f32.gmra.mrb[16].mxu1 %v2051_v52 }
 0x211   : > { %8729 = vmatprep.mubr.f32.mxu0 %v11015_v53  ;;  %v1940_v58 = vld [vmem:[#allocation3 + $0xee] sm:$0xff]  ;;  %1857 = vst [vmem:[#allocation3 + $0x100] sm:$0xff] %v1808_v49  ;;  %v1455_v59 = vmax.f32 %v1247_v50, 0.0  ;;  %v8002_v63 = vpop.f32.mrb[72].mxu0 }
 0x212   : > { %v1942_v3 = vmax.f32 %v1804_v62, %v1940_v58  ;;  %v1647_v4 = vld [vmem:[#allocation2 + $0x210] ss:$2 sm:$0xff]  ;;  %v1745_v6 = vld [vmem:[#allocation2 + $0x211] ss:$2 sm:$0xff]  ;;  %1554 = vst [vmem:[#allocation2 + $0x238] sm:$0xff] %v1456_v57  ;;  %v1262_v7 = vadd.f32 %v11000_v10, %v8002_v63  ;;  %v1256_v30 = vpop.f32.mrb[73].mxu0 }
 0x213   : > { %v1809_v32 = vmax.f32 %v1647_v4, %v1745_v6  ;;  %1553 = vst [vmem:[#allocation2 + $0x230] sm:$0xff] %v1455_v59  ;;  %v1257_v37 = vadd.f32 %v11000_v10, %v1256_v30 }
 0x214   : > { %1944 = vst [vmem:[#allocation4 + $0x91] sm:$0xff] %v1942_v3  ;;  %8098 = vmatprep.mubr.f32.mxu1 %v1942_v3  ;;  %v1458_v8 = vmax.f32 %v1262_v7, 0.0  ;;  %v1941_v11 = vld [vmem:[#allocation3 + $0xf6] sm:$0x3f] }
 0x215   : > { %1858 = vst [vmem:[#allocation3 + $0x108] sm:$0xff] %v1809_v32  ;;  %v1457_v13 = vmax.f32 %v1257_v37, 0.0  ;;  %v8005_v14 = vpop.f32.mrb[74].mxu0  ;;  %v1943_v54 = vmax.f32 %v1939_v9, %v1941_v11 }
 0x216   : > { %v1649_v55 = vld [vmem:[#allocation2 + $0x220] ss:$2 sm:$0xff]  ;;  %v1747_v62 = vld [vmem:[#allocation2 + $0x221] ss:$2 sm:$0xff]  ;;  %1556 = vst [vmem:[#allocation2 + $0x248] sm:$0xff] %v1458_v8  ;;  %v1272_v15 = vadd.f32 %v11000_v10, %v8005_v14  ;;  %v1266_v16 = vpop.f32.mrb[75].mxu0 }
 0x217   : > { %v1810_v17 = vmax.f32 %v1649_v55, %v1747_v62  ;;  %1555 = vst [vmem:[#allocation2 + $0x240] sm:$0xff] %v1457_v13  ;;  %v1267_v24 = vadd.f32 %v11000_v10, %v1266_v16  ;;  %1945 = vst [vmem:[#allocation4 + $0x99] sm:$0x3f] %v1943_v54 }
 0x218   : > { %v1460_v0 = vmax.f32 %v1272_v15, 0.0  ;;  %v1946_v18 = vld [vmem:[#allocation3 + $0xfc] sm:$0xff] }
 0x219   : > { %1859 = vst [vmem:[#allocation3 + $0x110] sm:$0xff] %v1810_v17  ;;  %v1459_v1 = vmax.f32 %v1267_v24, 0.0  ;;  %v8008_v19 = vpop.f32.mrb[76].mxu0 }
 0x21a   : > { %v11025_v20 = vld [vmem:[#allocation2 + $0x230] ss:$2 sm:$0xff]  ;;  %v11027_v21 = vld [vmem:[#allocation2 + $0x231] ss:$2 sm:$0xff]  ;;  %1558 = vst [vmem:[#allocation2 + $0x258] sm:$0xff] %v1460_v0  ;;  %v1282_v23 = vadd.f32 %v11000_v10, %v8008_v19  ;;  %v1276_v25 = vpop.f32.mrb[77].mxu0 }
 0x21b   : > { %v11030_v26 = vld [vmem:[#allocation4 + $0x8a] sm:$0xff]  ;;  %v1811_v27 = vmax.f32 %v11025_v20, %v11027_v21  ;;  %1557 = vst [vmem:[#allocation2 + $0x250] sm:$0xff] %v1459_v1  ;;  %v1277_v28 = vadd.f32 %v11000_v10, %v1276_v25 }
 0x21c   : > { %8730 = vmatmul.mubr.f32.gmra.mrb[110].mxu0 %v11030_v26  ;;  %v1462_v29 = vmax.f32 %v1282_v23, 0.0  ;;  %v1947_v47 = vld [vmem:[#allocation3 + $0x104] sm:$0x3f] }
 0x21d   : > { %v1461_v33 = vmax.f32 %v1277_v28, 0.0  ;;  %v8011_v34 = vpop.f32.mrb[78].mxu0 }
 0x21e   : > { %v1653_v35 = vld [vmem:[#allocation2 + $0x240] ss:$2 sm:$0xff]  ;;  %v1751_v38 = vld [vmem:[#allocation2 + $0x241] ss:$2 sm:$0xff]  ;;  %1560 = vst [vmem:[#allocation2 + $0x268] sm:$0xff] %v1462_v29  ;;  %v1292_v39 = vadd.f32 %v11000_v10, %v8011_v34  ;;  %v1286_v40 = vpop.f32.mrb[79].mxu0 }
 0x21f   : > { %v2053_v42 = vld [vmem:[#allocation4 + $0x99] sm:$0xff]  ;;  %v1812_v43 = vmax.f32 %v1653_v35, %v1751_v38  ;;  %1559 = vst [vmem:[#allocation2 + $0x260] sm:$0xff] %v1461_v33  ;;  %v1287_v44 = vadd.f32 %v11000_v10, %v1286_v40 }
 0x220   : > { %8099 = vmatmul.mubr.f32.gmra.mrb[18].mxu1 %v2053_v42  ;;  %v11038_v5 = vld [vmem:[#allocation4 + $0x92] sm:$0xff]  ;;  %v1464_v22 = vmax.f32 %v1292_v39, 0.0  ;;  %v1948_v45 = vld [vmem:[#allocation3 + $0x10a] sm:$0xff]  ;;  %v1949_v49 = vld [vmem:[#allocation3 + $0x112] sm:$0x3f] }
 0x221   : > { %8732 = vmatprep.mubr.f32.mxu0 %v11038_v5  ;;  %1861 = vst [vmem:[#allocation3 + $0x120] sm:$0xff] %v1812_v43  ;;  %v1463_v50 = vmax.f32 %v1287_v44, 0.0  ;;  %v8014_v52 = vpop.f32.mrb[80].mxu0  ;;  %v1950_v57 = vmax.f32 %v1946_v18, %v1948_v45  ;;  %v1951_v58 = vmax.f32 %v1947_v47, %v1949_v49 }
 0x222   : > { %v1655_v59 = vld [vmem:[#allocation2 + $0x250] ss:$2 sm:$0xff]  ;;  %v1753_v63 = vld [vmem:[#allocation2 + $0x251] ss:$2 sm:$0xff]  ;;  %1562 = vst [vmem:[#allocation2 + $0x278] sm:$0xff] %v1464_v22  ;;  %v1302_v3 = vadd.f32 %v11000_v10, %v8014_v52  ;;  %v1296_v4 = vpop.f32.mrb[81].mxu0 }
 0x223   : > { %v1813_v6 = vmax.f32 %v1655_v59, %v1753_v63  ;;  %1561 = vst [vmem:[#allocation2 + $0x270] sm:$0xff] %v1463_v50  ;;  %v1297_v7 = vadd.f32 %v11000_v10, %v1296_v4  ;;  %1952 = vst [vmem:[#allocation4 + $0xa1] sm:$0xff] %v1950_v57  ;;  %8101 = vmatprep.mubr.f32.mxu1 %v1950_v57 }
 0x224   : > { %1953 = vst [vmem:[#allocation4 + $0xa9] sm:$0x3f] %v1951_v58  ;;  %v1466_v30 = vmax.f32 %v1302_v3, 0.0 }
 0x225   : > { %1862 = vst [vmem:[#allocation3 + $0x128] sm:$0xff] %v1813_v6  ;;  %v1465_v32 = vmax.f32 %v1297_v7, 0.0  ;;  %v8017_v37 = vpop.f32.mrb[82].mxu0 }
 0x226   : > { %v1657_v8 = vld [vmem:[#allocation2 + $0x260] ss:$2 sm:$0xff]  ;;  %v1755_v9 = vld [vmem:[#allocation2 + $0x261] ss:$2 sm:$0xff]  ;;  %1564 = vst [vmem:[#allocation2 + $0x288] sm:$0xff] %v1466_v30  ;;  %v1312_v11 = vadd.f32 %v11000_v10, %v8017_v37  ;;  %v1306_v13 = vpop.f32.mrb[83].mxu0 }
 0x227   : > { %v1814_v14 = vmax.f32 %v1657_v8, %v1755_v9  ;;  %1563 = vst [vmem:[#allocation2 + $0x280] sm:$0xff] %v1465_v32  ;;  %v1307_v54 = vadd.f32 %v11000_v10, %v1306_v13 }
 0x228   : > { %v1468_v55 = vmax.f32 %v1312_v11, 0.0  ;;  %v1955_v45 = vld [vmem:[#allocation3 + $0x120] sm:$0x3f] }
 0x229   : > { %1863 = vst [vmem:[#allocation3 + $0x130] sm:$0xff] %v1814_v14  ;;  %v1467_v62 = vmax.f32 %v1307_v54, 0.0  ;;  %v8020_v15 = vpop.f32.mrb[84].mxu0 }
 0x22a   : > { %v1659_v16 = vld [vmem:[#allocation2 + $0x270] ss:$2 sm:$0xff]  ;;  %v1757_v17 = vld [vmem:[#allocation2 + $0x271] ss:$2 sm:$0xff]  ;;  %1566 = vst [vmem:[#allocation2 + $0x298] sm:$0xff] %v1468_v55  ;;  %v1322_v24 = vadd.f32 %v11000_v10, %v8020_v15  ;;  %v1316_v0 = vpop.f32.mrb[85].mxu0 }
 0x22b   : > { %v11046_v1 = vld [vmem:[#allocation4 + $0x9a] sm:$0xff]  ;;  %v1815_v19 = vmax.f32 %v1659_v16, %v1757_v17  ;;  %1565 = vst [vmem:[#allocation2 + $0x290] sm:$0xff] %v1467_v62  ;;  %v1317_v23 = vadd.f32 %v11000_v10, %v1316_v0  ;;  %v2055_v25 = vld [vmem:[#allocation4 + $0xa9] sm:$0xff] }
 0x22c   : > { %8733 = vmatmul.mubr.f32.gmra.mrb[112].mxu0 %v11046_v1  ;;  %v11050_v28 = vld [vmem:[#allocation4 + $0xa2] sm:$0xff]  ;;  %v1470_v29 = vmax.f32 %v1322_v24, 0.0  ;;  %8102 = vmatmul.mubr.f32.gmra.mrb[20].mxu1 %v2055_v25 }
 0x22d   : > { %8735 = vmatprep.mubr.f32.mxu0 %v11050_v28  ;;  %v1956_v33 = vld [vmem:[#allocation3 + $0x126] sm:$0xff]  ;;  %1864 = vst [vmem:[#allocation3 + $0x138] sm:$0xff] %v1815_v19  ;;  %v1469_v34 = vmax.f32 %v1317_v23, 0.0  ;;  %v8023_v35 = vpop.f32.mrb[86].mxu0 }
 0x22e   : > { %v1958_v38 = vmax.f32 %v1811_v27, %v1956_v33  ;;  %v1661_v39 = vld [vmem:[#allocation2 + $0x280] ss:$2 sm:$0xff]  ;;  %v1759_v40 = vld [vmem:[#allocation2 + $0x281] ss:$2 sm:$0xff]  ;;  %1568 = vst [vmem:[#allocation2 + $0x2a8] sm:$0xff] %v1470_v29  ;;  %v1332_v42 = vadd.f32 %v11000_v10, %v8023_v35  ;;  %v1326_v43 = vpop.f32.mrb[87].mxu0 }
 0x22f   : > { %v1816_v44 = vmax.f32 %v1661_v39, %v1759_v40  ;;  %1567 = vst [vmem:[#allocation2 + $0x2a0] sm:$0xff] %v1469_v34  ;;  %v1327_v18 = vadd.f32 %v11000_v10, %v1326_v43 }
 0x230   : > { %1960 = vst [vmem:[#allocation4 + $0xb1] sm:$0xff] %v1958_v38  ;;  %8104 = vmatprep.mubr.f32.mxu1 %v1958_v38  ;;  %v1472_v22 = vmax.f32 %v1332_v42, 0.0  ;;  %v1957_v47 = vld [vmem:[#allocation3 + $0x12e] sm:$0x3f] }
 0x231   : > { %1865 = vst [vmem:[#allocation3 + $0x140] sm:$0xff] %v1816_v44  ;;  %v1471_v49 = vmax.f32 %v1327_v18, 0.0  ;;  %v8026_v50 = vpop.f32.mrb[88].mxu0  ;;  %v1959_v20 = vmax.f32 %v1955_v45, %v1957_v47 }
 0x232   : > { %v1663_v21 = vld [vmem:[#allocation2 + $0x290] ss:$2 sm:$0xff]  ;;  %v1761_v27 = vld [vmem:[#allocation2 + $0x291] ss:$2 sm:$0xff]  ;;  %1570 = vst [vmem:[#allocation2 + $0x2b8] sm:$0xff] %v1472_v22  ;;  %v1342_v52 = vadd.f32 %v11000_v10, %v8026_v50  ;;  %v1336_v57 = vpop.f32.mrb[89].mxu0 }
 0x233   : > { %v1817_v58 = vmax.f32 %v1663_v21, %v1761_v27  ;;  %1569 = vst [vmem:[#allocation2 + $0x2b0] sm:$0xff] %v1471_v49  ;;  %v1337_v59 = vadd.f32 %v11000_v10, %v1336_v57  ;;  %1961 = vst [vmem:[#allocation4 + $0xb9] sm:$0x3f] %v1959_v20 }
 0x234   : > { %v1474_v63 = vmax.f32 %v1342_v52, 0.0  ;;  %v1962_v19 = vld [vmem:[#allocation3 + $0x134] sm:$0xff] }
 0x235   : > { %1866 = vst [vmem:[#allocation3 + $0x148] sm:$0xff] %v1817_v58  ;;  %v1473_v3 = vmax.f32 %v1337_v59, 0.0  ;;  %v8029_v4 = vpop.f32.mrb[90].mxu0 }
 0x236   : > { %v11060_v6 = vld [vmem:[#allocation2 + $0x2a0] ss:$2 sm:$0xff]  ;;  %v11062_v7 = vld [vmem:[#allocation2 + $0x2a1] ss:$2 sm:$0xff]  ;;  %1572 = vst [vmem:[#allocation2 + $0x2c8] sm:$0xff] %v1474_v63  ;;  %v1352_v30 = vadd.f32 %v11000_v10, %v8029_v4  ;;  %v1346_v32 = vpop.f32.mrb[91].mxu0 }
 0x237   : > { %v11065_v37 = vld [vmem:[#allocation4 + $0xaa] sm:$0xff]  ;;  %v1818_v8 = vmax.f32 %v11060_v6, %v11062_v7  ;;  %1571 = vst [vmem:[#allocation2 + $0x2c0] sm:$0xff] %v1473_v3  ;;  %v1347_v9 = vadd.f32 %v11000_v10, %v1346_v32 }
 0x238   : > { %8736 = vmatmul.mubr.f32.gmra.mrb[114].mxu0 %v11065_v37  ;;  %v1476_v11 = vmax.f32 %v1352_v30, 0.0  ;;  %v1963_v29 = vld [vmem:[#allocation3 + $0x13c] sm:$0x3f] }
 0x239   : > { %v1475_v13 = vmax.f32 %v1347_v9, 0.0  ;;  %v8032_v14 = vpop.f32.mrb[92].mxu0 }
 0x23a   : > { %v1667_v54 = vld [vmem:[#allocation2 + $0x2b0] ss:$2 sm:$0xff]  ;;  %v1765_v55 = vld [vmem:[#allocation2 + $0x2b1] ss:$2 sm:$0xff]  ;;  %1574 = vst [vmem:[#allocation2 + $0x2d8] sm:$0xff] %v1476_v11  ;;  %v1362_v62 = vadd.f32 %v11000_v10, %v8032_v14  ;;  %v1356_v15 = vpop.f32.mrb[93].mxu0 }
 0x23b   : > { %v11072_v16 = vld [vmem:[#allocation4 + $0xb9] sm:$0xff]  ;;  %v1819_v17 = vmax.f32 %v1667_v54, %v1765_v55  ;;  %1573 = vst [vmem:[#allocation2 + $0x2d0] sm:$0xff] %v1475_v13  ;;  %v1357_v24 = vadd.f32 %v11000_v10, %v1356_v15 }
 0x23c   : > { %8105 = vmatmul.mubr.f32.gmra.mrb[22].mxu1 %v11072_v16  ;;  %v11076_v0 = vld [vmem:[#allocation4 + $0xb2] sm:$0xff]  ;;  %v1478_v23 = vmax.f32 %v1362_v62, 0.0  ;;  %v1964_v25 = vld [vmem:[#allocation3 + $0x142] sm:$0xff]  ;;  %v1965_v33 = vld [vmem:[#allocation3 + $0x14a] sm:$0x3f] }
 0x23d   : > { %8738 = vmatprep.mubr.f32.mxu0 %v11076_v0  ;;  %1868 = vst [vmem:[#allocation3 + $0x158] sm:$0xff] %v1819_v17  ;;  %v1477_v34 = vmax.f32 %v1357_v24, 0.0  ;;  %v8035_v35 = vpop.f32.mrb[94].mxu0  ;;  %v11079_v38 = vmax.f32 %v1962_v19, %v1964_v25  ;;  %v1967_v39 = vmax.f32 %v1963_v29, %v1965_v33  ;;  %v11107_v33 = vld [vmem:[#allocation4 + $0xf1] sm:$0xff] }
 0x23e   : > { %v1669_v40 = vld [vmem:[#allocation2 + $0x2c0] ss:$2 sm:$0xff]  ;;  %v1767_v42 = vld [vmem:[#allocation2 + $0x2c1] ss:$2 sm:$0xff]  ;;  %1576 = vst [vmem:[#allocation2 + $0x2e8] sm:$0xff] %v1478_v23  ;;  %v1372_v43 = vadd.f32 %v11000_v10, %v8035_v35  ;;  %v1366_v44 = vpop.f32.mrb[95].mxu0 }
 0x23f   : > { %v1820_v18 = vmax.f32 %v1669_v40, %v1767_v42  ;;  %1575 = vst [vmem:[#allocation2 + $0x2e0] sm:$0xff] %v1477_v34  ;;  %v1367_v22 = vadd.f32 %v11000_v10, %v1366_v44  ;;  %1968 = vst [vmem:[#allocation4 + $0xc1] sm:$0xff] %v11079_v38  ;;  %8107 = vmatprep.mubr.f32.mxu1 %v11079_v38  ;;  %v11113_v35 = vld [vmem:[#allocation4 + $0xf9] sm:$0xff]  ;;  %v2569_v40 = vld [vmem:[#allocation13 + $0x118] sm:$0xff] }
 0x240   : > { %1969 = vst [vmem:[#allocation4 + $0xc9] sm:$0x3f] %v1967_v39  ;;  %v1480_v45 = vmax.f32 %v1372_v43, 0.0  ;;  %v2568_v39 = vld [vmem:[#allocation13 + $0x110] sm:$0xff]  ;;  %v2570_v44 = vld [vmem:[#allocation13 + $0x120] sm:$0xff] }
 0x241   : > { %1869 = vst [vmem:[#allocation3 + $0x160] sm:$0xff] %v1820_v18  ;;  %v1479_v47 = vmax.f32 %v1367_v22, 0.0  ;;  %v8038_v49 = vpop.f32.mrb[96].mxu0  ;;  %v11116_v42 = vld [vmem:[#allocation4] sm:$0xff]  ;;  %v9364_v43 = vpack.c.bf16 %v2569_v40, %v2568_v39  ;;  %v11120_v22 = vld [vmem:[#allocation4 + $0x10] sm:$0xff]  ;;  %v11160_v40 = vld [vmem:[#allocation4 + $0x78] sm:$0xff] }
 0x242   : > { %v1671_v50 = vld [vmem:[#allocation2 + $0x2d0] ss:$2 sm:$0xff]  ;;  %v1769_v20 = vld [vmem:[#allocation2 + $0x2d1] ss:$2 sm:$0xff]  ;;  %1578 = vst [vmem:[#allocation2 + $0x2f8] sm:$0xff] %v1480_v45  ;;  %v1382_v21 = vadd.f32 %v11000_v10, %v8038_v49  ;;  %v1376_v27 = vpop.f32.mrb[97].mxu0 }
 0x243   : > { %v1821_v52 = vmax.f32 %v1671_v50, %v1769_v20  ;;  %1577 = vst [vmem:[#allocation2 + $0x2f0] sm:$0xff] %v1479_v47  ;;  %v1377_v57 = vadd.f32 %v11000_v10, %v1376_v27  ;;  %v2571_v18 = vld [vmem:[#allocation13 + $0x128] sm:$0xff]  ;;  %v2572_v49 = vld [vmem:[#allocation13 + $0x130] sm:$0xff]  ;;  %v2573_v50 = vld [vmem:[#allocation13 + $0x138] sm:$0xff] }
 0x244   : > { %v1482_v58 = vmax.f32 %v1382_v21, 0.0  ;;  %v1971_v54 = vld [vmem:[#allocation3 + $0x158] sm:$0x3f]  ;;  %v9368_v45 = vpack.c.bf16 %v2571_v18, %v2570_v44  ;;  %v11124_v47 = vld [vmem:[#allocation4 + $0x18] sm:$0xff]  ;;  %v11127_v20 = vld [vmem:[#allocation4 + $0x20] sm:$0xff]  ;;  %v9372_v21 = vpack.c.bf16 %v2573_v50, %v2572_v49 }
 0x245   : > { %1870 = vst [vmem:[#allocation3 + $0x168] sm:$0xff] %v1821_v52  ;;  %v1481_v59 = vmax.f32 %v1377_v57, 0.0  ;;  %v11130_v27 = vld [vmem:[#allocation4 + $0x28] sm:$0xff]  ;;  %v2575_v52 = vld [vmem:[#allocation13 + $0x148] sm:$0xff]  ;;  %v11133_v57 = vld [vmem:[#allocation4 + $0x30] sm:$0xff] }
 0x246   : > { %v1673_v63 = vld [vmem:[#allocation2 + $0x2e0] ss:$2 sm:$0xff]  ;;  %v1771_v3 = vld [vmem:[#allocation2 + $0x2e1] ss:$2 sm:$0xff]  ;;  %1580 = vst [vmem:[#allocation2 + $0x308] sm:$0xff] %v1482_v58  ;;  %v11087_v4 = vld [vmem:[#allocation4 + $0xba] sm:$0xff] }
 0x247   : > { %v1822_v30 = vmax.f32 %v1673_v63, %v1771_v3  ;;  %1579 = vst [vmem:[#allocation2 + $0x300] sm:$0xff] %v1481_v59  ;;  %8739 = vmatmul.mubr.f32.gmra.mrb[116].mxu0 %v11087_v4  ;;  %v11090_v32 = vld [vmem:[#allocation4 + $0xc9] sm:$0xff]  ;;  %v11136_v59 = vld [vmem:[#allocation4 + $0x38] sm:$0xff]  ;;  %v11175_v49 = vld [vmem:[#allocation4 + $0xa0] sm:$0xff] }
 0x248   : > { %8108 = vmatmul.mubr.f32.gmra.mrb[24].mxu1 %v11090_v32  ;;  %v1972_v9 = vld [vmem:[#allocation3 + $0x15e] sm:$0xff]  ;;  %v2576_v63 = vld [vmem:[#allocation13 + $0x150] sm:$0xff]  ;;  %v2577_v3 = vld [vmem:[#allocation13 + $0x158] sm:$0xff] }
 0x249   : > { %1871 = vst [vmem:[#allocation3 + $0x170] sm:$0xff] %v1822_v30  ;;  %v11096_v10 = vmax.f32 %v1818_v8, %v1972_v9  ;;  %v11139_v30 = vld [vmem:[#allocation4 + $0x40] sm:$0xff]  ;;  %v9380_v9 = vpack.c.bf16 %v2577_v3, %v2576_v63  ;;  %v11166_v44 = vld [vmem:[#allocation4 + $0x88] sm:$0xff]  ;;  %v11169_v18 = vld [vmem:[#allocation4 + $0x90] sm:$0xff] }
 0x24a   : > { %v1675_v11 = vld [vmem:[#allocation2 + $0x2f0] ss:$2 sm:$0xff]  ;;  %v1773_v13 = vld [vmem:[#allocation2 + $0x2f1] ss:$2 sm:$0xff]  ;;  %v11178_v50 = vld [vmem:[#allocation4 + $0xa8] sm:$0xff] }
 0x24b   : > { %v1823_v14 = vmax.f32 %v1675_v11, %v1773_v13  ;;  %1976 = vst [vmem:[#allocation4 + $0xd1] sm:$0xff] %v11096_v10  ;;  %8110 = vmatprep.mubr.f32.mxu1 %v11096_v10  ;;  %v11142_v11 = vld [vmem:[#allocation4 + $0x48] sm:$0xff]  ;;  %v2578_v13 = vld [vmem:[#allocation13 + $0x160] sm:$0xff] }
 0x24c   : > { %v1973_v55 = vld [vmem:[#allocation3 + $0x166] sm:$0x3f]  ;;  %v11192_v63 = vld [vmem:[#allocation4 + $0xc8] sm:$0xff] }
 0x24d   : > { %1872 = vst [vmem:[#allocation3 + $0x178] sm:$0xff] %v1823_v14  ;;  %v1975_v62 = vmax.f32 %v1971_v54, %v1973_v55  ;;  %v2579_v14 = vld [vmem:[#allocation13 + $0x168] sm:$0xff]  ;;  %v11145_v54 = vld [vmem:[#allocation4 + $0x50] sm:$0xff] }
 0x24e   : > { %v1677_v15 = vld [vmem:[#allocation2 + $0x300] ss:$2 sm:$0xff]  ;;  %v1775_v17 = vld [vmem:[#allocation2 + $0x301] ss:$2 sm:$0xff]  ;;  %v9384_v55 = vpack.c.bf16 %v2579_v14, %v2578_v13 }
 0x24f   : > { %v1824_v24 = vmax.f32 %v1677_v15, %v1775_v17  ;;  %1977 = vst [vmem:[#allocation4 + $0xd9] sm:$0x3f] %v1975_v62  ;;  %v11148_v62 = vld [vmem:[#allocation4 + $0x58] sm:$0xff]  ;;  %v2580_v15 = vld [vmem:[#allocation13 + $0x170] sm:$0xff]  ;;  %v2581_v17 = vld [vmem:[#allocation13 + $0x178] sm:$0xff] }
 0x250   : > { %v1978_v6 = vld [vmem:[#allocation3 + $0x16c] sm:$0xff] }
 0x251   : > { %1873 = vst [vmem:[#allocation3 + $0x180] sm:$0xff] %v1824_v24  ;;  %v11151_v24 = vld [vmem:[#allocation4 + $0x60] sm:$0xff] }
 0x254   : > { %v1979_v8 = vld [vmem:[#allocation3 + $0x174] sm:$0x3f] }
 0x256   : > { %v11100_v19 = vld [vmem:[#allocation4 + $0xd9] sm:$0xff] }
 0x257   : > { %8111 = vmatmul.mubr.f32.gmra.mrb[26].mxu1 %v11100_v19  ;;  %v11200_v13 = vld [vmem:[#allocation4 + $0xd8] sm:$0xff] }
 0x258   : > { %v1980_v7 = vld [vmem:[#allocation3 + $0x17a] sm:$0xff]  ;;  %v1981_v23 = vld [vmem:[#allocation3 + $0x182] sm:$0x3f] }
 0x259   : > { %v11103_v25 = vmax.f32 %v1978_v6, %v1980_v7  ;;  %v1983_v29 = vmax.f32 %v1979_v8, %v1981_v23  ;;  %v9388_v6 = vpack.c.bf16 %v2581_v17, %v2580_v15  ;;  %v11154_v7 = vld [vmem:[#allocation4 + $0x68] sm:$0xff]  ;;  %v2872_v8 = vld [vmem:[#allocation13 + $0x180] sm:$0xff]  ;;  %v2873_v23 = vld [vmem:[#allocation13 + $0x188] sm:$0xff] }
 0x25a   : > { %v9392_v39 = vpack.c.bf16 %v2873_v23, %v2872_v8  ;;  %v2533_v15 = vld [vmem:[#allocation4 + $0x2] sm:$0xff] }
 0x25b   : > { %1984 = vst [vmem:[#allocation4 + $0xe1] sm:$0xff] %v11103_v25  ;;  %8113 = vmatprep.mubr.f32.mxu1 %v11103_v25  ;;  %1985 = vst [vmem:[#allocation4 + $0xe9] sm:$0x3f] %v1983_v29  ;;  %v11157_v29 = vld [vmem:[#allocation4 + $0x70] sm:$0xff]  ;;  %v2874_v17 = vld [vmem:[#allocation13 + $0x190] sm:$0xff] }
 0x262   : > { %v11109_v34 = vld [vmem:[#allocation4 + $0xe9] sm:$0xff]  ;;  %v11203_v14 = vld [vmem:[#allocation4 + $0xe0] sm:$0xff] }
 0x263   : > { %8114 = vmatmul.mubr.f32.gmra.mrb[28].mxu1 %v11109_v34 }
 0x264   : > { %8116 = vmatprep.mubr.f32.mxu1 %v11107_v33 }
 0x267   : > { %8117 = vmatmul.mubr.f32.gmra.mrb[30].mxu1 %v11113_v35 }
 0x268   : > { %8151 = vmatprep.mubr.f32.mxu1 %v11116_v42 }
 0x26b   : > { %8152 = vmatmul.mubr.f32.vlgmr.msra.gmra.mrb[0].mxu1 %v11116_v42 }
 0x26c   : > { %9363 = vmatpush3.bf16.msra.mxu1 %v10976_v60  ;;  %8154 = vmatprep.mubr.f32.mxu1 %v11120_v22  ;;  %v2574_v60 = vld [vmem:[#allocation13 + $0x140] sm:$0xff] }
 0x26d   : > { %9365 = vmatprep.subr.bf16.mxu1 %v9364_v43  ;;  %v9376_v58 = vpack.c.bf16 %v2575_v52, %v2574_v60  ;;  %v11184_v60 = vld [vmem:[#allocation4 + $0xb8] sm:$0xff]  ;;  %v11187_v52 = vld [vmem:[#allocation4 + $0xc0] sm:$0xff] }
 0x26f   : > { %8155 = vmatmul.mubr.f32.gmra.mrb[2].mxu1 %v11124_v47 }
 0x270   : > { %8157 = vmatprep.mubr.f32.mxu1 %v11127_v20  ;;  %9367 = vmatpush3.bf16.msra.mxu1 %v9364_v43  ;;  %v11163_v43 = vld [vmem:[#allocation4 + $0x80] sm:$0xff] }
 0x271   : > { %9369 = vmatprep.subr.bf16.mxu1 %v9368_v45 }
 0x273   : > { %8158 = vmatmul.mubr.f32.gmra.mrb[4].mxu1 %v11130_v27 }
 0x274   : > { %8160 = vmatprep.mubr.f32.mxu1 %v11133_v57  ;;  %9371 = vmatpush3.bf16.msra.mxu1 %v9368_v45  ;;  %v11172_v45 = vld [vmem:[#allocation4 + $0x98] sm:$0xff] }
 0x275   : > { %9373 = vmatprep.subr.bf16.mxu1 %v9372_v21 }
 0x277   : > { %8161 = vmatmul.mubr.f32.gmra.mrb[6].mxu1 %v11136_v59 }
 0x278   : > { %8163 = vmatprep.mubr.f32.mxu1 %v11139_v30  ;;  %9375 = vmatpush3.bf16.msra.mxu1 %v9372_v21  ;;  %v11181_v21 = vld [vmem:[#allocation4 + $0xb0] sm:$0xff] }
 0x279   : > { %9377 = vmatprep.subr.bf16.mxu1 %v9376_v58 }
 0x27b   : > { %8164 = vmatmul.mubr.f32.gmra.mrb[8].mxu1 %v11142_v11 }
 0x27c   : > { %8166 = vmatprep.mubr.f32.mxu1 %v11145_v54  ;;  %9379 = vmatpush3.bf16.msra.mxu1 %v9376_v58 }
 0x27d   : > { %9381 = vmatprep.subr.bf16.mxu1 %v9380_v9 }
 0x27f   : > { %8167 = vmatmul.mubr.f32.gmra.mrb[10].mxu1 %v11148_v62 }
 0x280   : > { %8169 = vmatprep.mubr.f32.mxu1 %v11151_v24  ;;  %9383 = vmatpush3.bf16.msra.mxu1 %v9380_v9  ;;  %v11197_v9 = vld [vmem:[#allocation4 + $0xd0] sm:$0xff] }
 0x281   : > { %9385 = vmatprep.subr.bf16.mxu1 %v9384_v55 }
 0x283   : > { %8170 = vmatmul.mubr.f32.gmra.mrb[12].mxu1 %v11154_v7 }
 0x284   : > { %8172 = vmatprep.mubr.f32.mxu1 %v11157_v29  ;;  %9387 = vmatpush3.bf16.msra.mxu1 %v9384_v55  ;;  %v11206_v55 = vld [vmem:[#allocation4 + $0xe8] sm:$0xff] }
 0x285   : > { %9389 = vmatprep.subr.bf16.mxu1 %v9388_v6 }
 0x287   : > { %8173 = vmatmul.mubr.f32.gmra.mrb[14].mxu1 %v11160_v40 }
 0x288   : > { %8175 = vmatprep.mubr.f32.mxu1 %v11163_v43  ;;  %9391 = vmatpush3.bf16.msra.mxu1 %v9388_v6  ;;  %v2875_v6 = vld [vmem:[#allocation13 + $0x198] sm:$0xff] }
 0x289   : > { %9393 = vmatprep.subr.bf16.mxu1 %v9392_v39  ;;  %v9396_v8 = vpack.c.bf16 %v2875_v6, %v2874_v17  ;;  %v11221_v17 = vld [vmem:[#allocation4 + $0x22] sm:$0xff]  ;;  %v11224_v6 = vld [vmem:[#allocation4 + $0x2a] sm:$0xff] }
 0x28a   : > { %11884 = vst [vmem:[#allocation35_spill] sm:$0xff] %v11224_v6 }
 0x28b   : > { %8176 = vmatmul.mubr.f32.gmra.mrb[16].mxu1 %v11166_v44 }
 0x28c   : > { %8178 = vmatprep.mubr.f32.mxu1 %v11169_v18 }
 0x28f   : > { %8179 = vmatmul.mubr.f32.gmra.mrb[18].mxu1 %v11172_v45 }
 0x290   : > { %8181 = vmatprep.mubr.f32.mxu1 %v11175_v49 }
 0x293   : > { %8182 = vmatmul.mubr.f32.gmra.mrb[20].mxu1 %v11178_v50 }
 0x294   : > { %8184 = vmatprep.mubr.f32.mxu1 %v11181_v21 }
 0x297   : > { %8185 = vmatmul.mubr.f32.gmra.mrb[22].mxu1 %v11184_v60 }
 0x298   : > { %8187 = vmatprep.mubr.f32.mxu1 %v11187_v52 }
 0x29b   : > { %v11190_v58 = vpop.f32.mrb[98].mxu0  ;;  %8188 = vmatmul.mubr.f32.gmra.mrb[24].mxu1 %v11192_v63 }
 0x29c   : > { %11880 = vst [vmem:[#allocation31_spill] sm:$0xff] %v11190_v58  ;;  %v11194_v3 = vpop.f32.mrb[99].mxu0  ;;  %8190 = vmatprep.mubr.f32.mxu1 %v11197_v9  ;;  %v2876_v58 = vld [vmem:[#allocation13 + $0x1a0] sm:$0xff] }
 0x29d   : > { %11881 = vst [vmem:[#allocation32_spill] sm:$0xff] %v11194_v3  ;;  %v2534_v3 = vld [vmem:[#allocation4 + $0xa] sm:$0xff]  ;;  %v9400_v51 = vpack.c.bf16 %v2877_v2, %v2876_v58  ;;  %v11227_v2 = vld [vmem:[#allocation4 + $0x32] sm:$0xff] }
 0x29e   : > { %11885 = vst [vmem:[#allocation36_spill] sm:$0xff] %v11227_v2 }
 0x29f   : > { %8191 = vmatmul.mubr.f32.gmra.mrb[26].mxu1 %v11200_v13 }
 0x2a0   : > { %8193 = vmatprep.mubr.f32.mxu1 %v11203_v14 }
 0x2a3   : > { %8194 = vmatmul.mubr.f32.gmra.mrb[28].mxu1 %v11206_v55 }
 0x2a4   : > { %8196 = vmatprep.mubr.f32.mxu1 %v11116_v42 }
 0x2a7   : > { %8197 = vmatmul.mubr.f32.gmra.mrb[30].mxu1 %v11116_v42 }
 0x2a8   : > { %8231 = vmatprep.mubr.f32.mxu1 %v2533_v15  ;;  %v2879_v15 = vld [vmem:[#allocation13 + $0x1b8] sm:$0xff] }
 0x2ab   : > { %v11211_v23 = vpop.f32.mrb[100].mxu0  ;;  %8232 = vmatmul.mubr.f32.vlgmr.msra.gmra.mrb[0].mxu1 %v2534_v3  ;;  %v9404_v3 = vpack.c.bf16 %v2879_v15, %v2878_v41  ;;  %v11237_v15 = vld [vmem:[#allocation4 + $0x42] sm:$0xff] }
 0x2ac   : > { %11882 = vst [vmem:[#allocation33_spill] sm:$0xff] %v11211_v23  ;;  %v11213_v61 = vpop.f32.mrb[101].mxu0  ;;  %9395 = vmatpush3.bf16.msra.mxu1 %v9392_v39  ;;  %8234 = vmatprep.mubr.f32.mxu1 %v11215_v56  ;;  %v2880_v39 = vld [vmem:[#allocation13 + $0x1c0] sm:$0xff]  ;;  %11889 = vst [vmem:[#allocation40_spill] sm:$0xff] %v11237_v15 }
 0x2ad   : > { %11883 = vst [vmem:[#allocation34_spill] sm:$0xff] %v11213_v61  ;;  %9397 = vmatprep.subr.bf16.mxu1 %v9396_v8  ;;  %v2881_v61 = vld [vmem:[#allocation13 + $0x1c8] sm:$0xff] }
 0x2ae   : > { %v9408_v58 = vpack.c.bf16 %v2881_v61, %v2880_v39  ;;  %v2884_v61 = vld [vmem:[#allocation13 + $0x1e0] sm:$0xff]  ;;  %v2885_v39 = vld [vmem:[#allocation13 + $0x1e8] sm:$0xff] }
 0x2af   : > { %8235 = vmatmul.mubr.f32.gmra.mrb[2].mxu1 %v11218_v46 }
 0x2b0   : > { %8237 = vmatprep.mubr.f32.mxu1 %v11221_v17  ;;  %9399 = vmatpush3.bf16.msra.mxu1 %v9396_v8  ;;  %v2882_v8 = vld [vmem:[#allocation13 + $0x1d0] sm:$0xff] }
 0x2b1   : > { %9401 = vmatprep.subr.bf16.mxu1 %v9400_v51 }
 0x2b3   : > { %8238 = vmatmul.mubr.f32.gmra.mrb[4].mxu1 %v11224_v6  ;;  %v2886_v6 = vld [vmem:[#allocation13 + $0x1f0] sm:$0xff] }
 0x2b4   : > { %8240 = vmatprep.mubr.f32.mxu1 %v11227_v2  ;;  %9403 = vmatpush3.bf16.msra.mxu1 %v9400_v51  ;;  %v9412_v2 = vpack.c.bf16 %v2883_v31, %v2882_v8  ;;  %v11240_v51 = vld [vmem:[#allocation4 + $0x4a] sm:$0xff]  ;;  %v11249_v31 = vld [vmem:[#allocation4 + $0x62] sm:$0xff] }
 0x2b5   : > { %9405 = vmatprep.subr.bf16.mxu1 %v9404_v3  ;;  %11890 = vst [vmem:[#allocation41_spill] sm:$0xff] %v11240_v51  ;;  %v11252_v8 = vld [vmem:[#allocation4 + $0x6a] sm:$0xff] }
 0x2b7   : > { %v11230_v23 = vpop.f32.mrb[102].mxu0  ;;  %8241 = vmatmul.mubr.f32.gmra.mrb[6].mxu1 %v11232_v36  ;;  %v11246_v36 = vld [vmem:[#allocation4 + $0x5a] sm:$0xff] }
 0x2b8   : > { %11886 = vst [vmem:[#allocation37_spill] sm:$0xff] %v11230_v23  ;;  %v11234_v41 = vpop.f32.mrb[103].mxu0  ;;  %8243 = vmatprep.mubr.f32.mxu1 %v11237_v15  ;;  %9407 = vmatpush3.bf16.msra.mxu1 %v9404_v3  ;;  %v11243_v23 = vld [vmem:[#allocation4 + $0x52] sm:$0xff]  ;;  %v2887_v15 = vld [vmem:[#allocation13 + $0x1f8] sm:$0xff] }
 0x2b9   : > { %11888 = vst [vmem:[#allocation39_spill] sm:$0xff] %v11234_v41  ;;  %9409 = vmatprep.subr.bf16.mxu1 %v9408_v58  ;;  %11891 = vst [vmem:[#allocation42_spill] sm:$0xff] %v11243_v23  ;;  %v9416_v41 = vpack.c.bf16 %v2885_v39, %v2884_v61  ;;  %v9420_v3 = vpack.c.bf16 %v2887_v15, %v2886_v6  ;;  %v11298_v6 = vld [vmem:[#allocation4 + $0xfa] sm:$0xff] }
 0x2bb   : > { %8244 = vmatmul.mubr.f32.gmra.mrb[8].mxu1 %v11240_v51  ;;  %v3178_v51 = vld [vmem:[#allocation13 + $0x200] sm:$0xff] }
 0x2bc   : > { %8246 = vmatprep.mubr.f32.mxu1 %v11243_v23  ;;  %9411 = vmatpush3.bf16.msra.mxu1 %v9408_v58  ;;  %v3179_v23 = vld [vmem:[#allocation13 + $0x208] sm:$0xff] }
 0x2bd   : > { %9413 = vmatprep.subr.bf16.mxu1 %v9412_v2  ;;  %v9424_v58 = vpack.c.bf16 %v3179_v23, %v3178_v51  ;;  %v3182_v51 = vld [vmem:[#allocation13 + $0x220] sm:$0xff] }
 0x2bf   : > { %8247 = vmatmul.mubr.f32.gmra.mrb[10].mxu1 %v11246_v36 }
 0x2c0   : > { %8249 = vmatprep.mubr.f32.mxu1 %v11249_v31  ;;  %9415 = vmatpush3.bf16.msra.mxu1 %v9412_v2  ;;  %v3180_v2 = vld [vmem:[#allocation13 + $0x210] sm:$0xff] }
 0x2c1   : > { %9417 = vmatprep.subr.bf16.mxu1 %v9416_v41 }
 0x2c3   : > { %8250 = vmatmul.mubr.f32.gmra.mrb[12].mxu1 %v11252_v8 }
 0x2c4   : > { %8252 = vmatprep.mubr.f32.mxu1 %v11003_v12  ;;  %9419 = vmatpush3.bf16.msra.mxu1 %v9416_v41  ;;  %v3181_v41 = vld [vmem:[#allocation13 + $0x218] sm:$0xff] }
 0x2c5   : > { %9421 = vmatprep.subr.bf16.mxu1 %v9420_v3  ;;  %v9428_v15 = vpack.c.bf16 %v3181_v41, %v3180_v2  ;;  %v3186_v2 = vld [vmem:[#allocation13 + $0x240] sm:$0xff]  ;;  %v3189_v41 = vld [vmem:[#allocation13 + $0x258] sm:$0xff] }
 0x2c7   : > { %v11256_v61 = vpop.f32.mrb[104].mxu0  ;;  %8253 = vmatmul.mubr.f32.gmra.mrb[14].mxu1 %v11011_v48  ;;  %v11273_v48 = vld [vmem:[#allocation4 + $0xc2] sm:$0xff] }
 0x2c8   : > { %v11258_v39 = vpop.f32.mrb[105].mxu0  ;;  %8255 = vmatprep.mubr.f32.mxu1 %v11015_v53  ;;  %9423 = vmatpush3.bf16.msra.mxu1 %v9420_v3  ;;  %v11276_v53 = vld [vmem:[#allocation4 + $0xca] sm:$0xff]  ;;  %v3183_v3 = vld [vmem:[#allocation13 + $0x228] sm:$0xff] }
 0x2c9   : > { %11892 = vst [vmem:[#allocation43_spill] sm:$0xff] %v11258_v39  ;;  %9425 = vmatprep.subr.bf16.mxu1 %v9424_v58 }
 0x2cb   : > { %8256 = vmatmul.mubr.f32.gmra.mrb[16].mxu1 %v11030_v26  ;;  %v11279_v26 = vld [vmem:[#allocation4 + $0xd2] sm:$0xff] }
 0x2cc   : > { %8258 = vmatprep.mubr.f32.mxu1 %v11038_v5  ;;  %v11282_v5 = vld [vmem:[#allocation4 + $0xda] sm:$0xff] }
 0x2cf   : > { %8259 = vmatmul.mubr.f32.gmra.mrb[18].mxu1 %v11046_v1  ;;  %v11285_v1 = vld [vmem:[#allocation4 + $0xe2] sm:$0xff] }
 0x2d0   : > { %8261 = vmatprep.mubr.f32.mxu1 %v11050_v28  ;;  %v11288_v28 = vld [vmem:[#allocation4 + $0xf2] sm:$0xff] }
 0x2d3   : > { %v11266_v12 = vpop.f32.mrb[106].mxu0  ;;  %8262 = vmatmul.mubr.f32.gmra.mrb[20].mxu1 %v11065_v37 }
 0x2d4   : > { %11893 = vst [vmem:[#allocation44_spill] sm:$0xff] %v11266_v12  ;;  %v11268_v23 = vpop.f32.mrb[107].mxu0  ;;  %8264 = vmatprep.mubr.f32.mxu1 %v11076_v0  ;;  %v11292_v0 = vld [vmem:[#allocation4 + $0xea] sm:$0xff] }
 0x2d5   : > { %11894 = vst [vmem:[#allocation45_spill] sm:$0xff] %v11268_v23  ;;  %v3184_v23 = vld [vmem:[#allocation13 + $0x230] sm:$0xff]  ;;  %v3185_v12 = vld [vmem:[#allocation13 + $0x238] sm:$0xff] }
 0x2d7   : > { %8265 = vmatmul.mubr.f32.gmra.mrb[22].mxu1 %v11087_v4 }
 0x2d8   : > { %8267 = vmatprep.mubr.f32.mxu1 %v11273_v48 }
 0x2db   : > { %8268 = vmatmul.mubr.f32.gmra.mrb[24].mxu1 %v11276_v53 }
 0x2dc   : > { %8270 = vmatprep.mubr.f32.mxu1 %v11279_v26 }
 0x2df   : > { %8271 = vmatmul.mubr.f32.gmra.mrb[26].mxu1 %v11282_v5 }
 0x2e0   : > { %8273 = vmatprep.mubr.f32.mxu1 %v11285_v1 }
 0x2e3   : > { %v11290_v37 = vpop.f32.mrb[108].mxu0  ;;  %8274 = vmatmul.mubr.f32.gmra.mrb[28].mxu1 %v11292_v0 }
 0x2e4   : > { %11895 = vst [vmem:[#allocation46_spill] sm:$0xff] %v11290_v37  ;;  %v11294_v4 = vpop.f32.mrb[109].mxu0  ;;  %8276 = vmatprep.mubr.f32.mxu1 %v11288_v28 }
 0x2e5   : > { %11896 = vst [vmem:[#allocation47_spill] sm:$0xff] %v11294_v4  ;;  %v9432_v4 = vpack.c.bf16 %v3183_v3, %v3182_v51  ;;  %v11358_v51 = vld [vmem:[#allocation4 + $0x39] sm:$0xff] }
 0x2e6   : > { %v3492_v3 = vld [vmem:[#allocation13 + $0x2c0] sm:$0xff] }
 0x2e7   : > { %8277 = vmatmul.mubr.f32.gmra.mrb[30].mxu1 %v11298_v6 }
 0x2e8   : > { %8311 = vmatprep.mubr.f32.mxu1 %v11120_v22  ;;  %v9436_v22 = vpack.c.bf16 %v3185_v12, %v3184_v23  ;;  %v3191_v12 = vld [vmem:[#allocation13 + $0x268] sm:$0xff]  ;;  %v3192_v23 = vld [vmem:[#allocation13 + $0x270] sm:$0xff] }
 0x2eb   : > { %8312 = vmatmul.mubr.f32.vlgmr.msra.gmra.mrb[0].mxu1 %v11124_v47  ;;  %v3187_v47 = vld [vmem:[#allocation13 + $0x248] sm:$0xff] }
 0x2ec   : > { %9427 = vmatpush3.bf16.msra.mxu1 %v9424_v58  ;;  %8314 = vmatprep.mubr.f32.mxu1 %v11127_v20  ;;  %v9440_v20 = vpack.c.bf16 %v3187_v47, %v3186_v2  ;;  %v3188_v58 = vld [vmem:[#allocation13 + $0x250] sm:$0xff] }
 0x2ed   : > { %9429 = vmatprep.subr.bf16.mxu1 %v9428_v15  ;;  %v11361_v2 = vld [vmem:[#allocation4 + $0x41] sm:$0xff] }
 0x2ef   : > { %v11304_v37 = vpop.f32.mrb[110].mxu0  ;;  %8315 = vmatmul.mubr.f32.gmra.mrb[2].mxu1 %v11130_v27  ;;  %v9444_v27 = vpack.c.bf16 %v3189_v41, %v3188_v58  ;;  %v3494_v58 = vld [vmem:[#allocation13 + $0x2d0] sm:$0xff]  ;;  %v3495_v41 = vld [vmem:[#allocation13 + $0x2d8] sm:$0xff] }
 0x2f0   : > { %v11306_v39 = vpop.f32.mrb[111].mxu0  ;;  %8317 = vmatprep.mubr.f32.mxu1 %v11133_v57  ;;  %9431 = vmatpush3.bf16.msra.mxu1 %v9428_v15  ;;  %v3190_v57 = vld [vmem:[#allocation13 + $0x260] sm:$0xff] }
 0x2f1   : > { %9433 = vmatprep.subr.bf16.mxu1 %v9432_v4 }
 0x2f3   : > { %8318 = vmatmul.mubr.f32.gmra.mrb[4].mxu1 %v11136_v59  ;;  %v9448_v59 = vpack.c.bf16 %v3191_v12, %v3190_v57  ;;  %v9476_v57 = vpack.c.bf16 %v3495_v41, %v3494_v58  ;;  %v11370_v12 = vld [vmem:[#allocation4 + $0x59] sm:$0xff] }
 0x2f4   : > { %8320 = vmatprep.mubr.f32.mxu1 %v11139_v30  ;;  %9435 = vmatpush3.bf16.msra.mxu1 %v9432_v4  ;;  %v3193_v4 = vld [vmem:[#allocation13 + $0x278] sm:$0xff]  ;;  %v11897_v58 = vld [vmem:[#allocation35_spill] sm:$0xff]  ;;  %v11898_v41 = vld [vmem:[#allocation36_spill] sm:$0xff] }
 0x2f5   : > { %9437 = vmatprep.subr.bf16.mxu1 %v9436_v22 }
 0x2f7   : > { %8321 = vmatmul.mubr.f32.gmra.mrb[6].mxu1 %v11142_v11  ;;  %v9452_v11 = vpack.c.bf16 %v3193_v4, %v3192_v23  ;;  %v3497_v23 = vld [vmem:[#allocation13 + $0x2e8] sm:$0xff] }
 0x2f8   : > { %8323 = vmatprep.mubr.f32.mxu1 %v11145_v54  ;;  %9439 = vmatpush3.bf16.msra.mxu1 %v9436_v22  ;;  %v3484_v54 = vld [vmem:[#allocation13 + $0x280] sm:$0xff]  ;;  %v3493_v22 = vld [vmem:[#allocation13 + $0x2c8] sm:$0xff] }
 0x2f9   : > { %9441 = vmatprep.subr.bf16.mxu1 %v9440_v20  ;;  %v9472_v47 = vpack.c.bf16 %v3493_v22, %v3492_v3  ;;  %v11373_v4 = vld [vmem:[#allocation4 + $0x61] sm:$0xff]  ;;  %v11400_v3 = vld [vmem:[#allocation4 + $0xa9] sm:$0xff]  ;;  %v11403_v22 = vld [vmem:[#allocation4 + $0xb1] sm:$0xff] }
 0x2fb   : > { %8324 = vmatmul.mubr.f32.gmra.mrb[8].mxu1 %v11148_v62  ;;  %v3485_v62 = vld [vmem:[#allocation13 + $0x288] sm:$0xff] }
 0x2fc   : > { %8326 = vmatprep.mubr.f32.mxu1 %v11151_v24  ;;  %9443 = vmatpush3.bf16.msra.mxu1 %v9440_v20  ;;  %v9456_v24 = vpack.c.bf16 %v3485_v62, %v3484_v54  ;;  %v11364_v20 = vld [vmem:[#allocation4 + $0x49] sm:$0xff] }
 0x2fd   : > { %9445 = vmatprep.subr.bf16.mxu1 %v9444_v27  ;;  %v11376_v54 = vld [vmem:[#allocation4 + $0x69] sm:$0xff] }
 0x2fe   : > { %v3498_v62 = vld [vmem:[#allocation13 + $0x2f0] sm:$0xff] }
 0x2ff   : > { %v11316_v30 = vpop.f32.mrb[112].mxu0  ;;  %8327 = vmatmul.mubr.f32.gmra.mrb[10].mxu1 %v11154_v7 }
 0x300   : > { %v11318_v15 = vpop.f32.mrb[113].mxu0  ;;  %8329 = vmatprep.mubr.f32.mxu1 %v11157_v29  ;;  %9447 = vmatpush3.bf16.msra.mxu1 %v9444_v27  ;;  %v11367_v27 = vld [vmem:[#allocation4 + $0x51] sm:$0xff] }
 0x301   : > { %9449 = vmatprep.subr.bf16.mxu1 %v9448_v59 }
 0x303   : > { %8330 = vmatmul.mubr.f32.gmra.mrb[12].mxu1 %v11160_v40 }
 0x304   : > { %8332 = vmatprep.mubr.f32.mxu1 %v11163_v43  ;;  %9451 = vmatpush3.bf16.msra.mxu1 %v9448_v59  ;;  %v3496_v59 = vld [vmem:[#allocation13 + $0x2e0] sm:$0xff] }
 0x305   : > { %9453 = vmatprep.subr.bf16.mxu1 %v9452_v11 }
 0x307   : > { %8333 = vmatmul.mubr.f32.gmra.mrb[14].mxu1 %v11166_v44  ;;  %v3486_v44 = vld [vmem:[#allocation13 + $0x290] sm:$0xff] }
 0x308   : > { %8335 = vmatprep.mubr.f32.mxu1 %v11169_v18  ;;  %9455 = vmatpush3.bf16.msra.mxu1 %v9452_v11  ;;  %v3487_v18 = vld [vmem:[#allocation13 + $0x298] sm:$0xff]  ;;  %v9480_v11 = vpack.c.bf16 %v3497_v23, %v3496_v59  ;;  %v3799_v59 = vld [vmem:[#allocation13 + $0x348] sm:$0xff] }
 0x309   : > { %9457 = vmatprep.subr.bf16.mxu1 %v9456_v24  ;;  %v11899_v23 = vld [vmem:[#allocation38_spill] sm:$0xff] }
 0x30b   : > { %v11326_v7 = vpop.f32.mrb[114].mxu0  ;;  %8336 = vmatmul.mubr.f32.gmra.mrb[16].mxu1 %v11172_v45  ;;  %v3145_v45 = vld [vmem:[#allocation4 + $0x11] sm:$0xff] }
 0x30c   : > { %v11328_v29 = vpop.f32.mrb[115].mxu0  ;;  %8338 = vmatprep.mubr.f32.mxu1 %v11175_v49  ;;  %v9460_v49 = vpack.c.bf16 %v3487_v18, %v3486_v44  ;;  %v11379_v44 = vld [vmem:[#allocation4 + $0x71] sm:$0xff] }
 0x30f   : > { %8339 = vmatmul.mubr.f32.gmra.mrb[18].mxu1 %v11178_v50  ;;  %v3146_v50 = vld [vmem:[#allocation4 + $0x19] sm:$0xff] }
 0x310   : > { %8341 = vmatprep.mubr.f32.mxu1 %v11181_v21  ;;  %v3488_v21 = vld [vmem:[#allocation13 + $0x2a0] sm:$0xff] }
 0x313   : > { %8342 = vmatmul.mubr.f32.gmra.mrb[20].mxu1 %v11184_v60  ;;  %v3489_v60 = vld [vmem:[#allocation13 + $0x2a8] sm:$0xff] }
 0x314   : > { %8344 = vmatprep.mubr.f32.mxu1 %v11187_v52  ;;  %v11349_v52 = vld [vmem:[#allocation4 + $0x21] sm:$0xff] }
 0x317   : > { %8345 = vmatmul.mubr.f32.gmra.mrb[22].mxu1 %v11192_v63  ;;  %v9464_v63 = vpack.c.bf16 %v3489_v60, %v3488_v21  ;;  %v11385_v21 = vld [vmem:[#allocation4 + $0x81] sm:$0xff] }
 0x318   : > { %8347 = vmatprep.mubr.f32.mxu1 %v11197_v9  ;;  %v11352_v9 = vld [vmem:[#allocation4 + $0x29] sm:$0xff] }
 0x31a   : > { %v11338_v40 = vpop.f32.mrb[116].mxu0 }
 0x31b   : > { %v11340_v43 = vpop.f32.mrb[117].mxu0  ;;  %8348 = vmatmul.mubr.f32.gmra.mrb[24].mxu1 %v11200_v13  ;;  %v3490_v13 = vld [vmem:[#allocation13 + $0x2b0] sm:$0xff] }
 0x31c   : > { %8350 = vmatprep.mubr.f32.mxu1 %v11203_v14  ;;  %v3491_v14 = vld [vmem:[#allocation13 + $0x2b8] sm:$0xff] }
 0x31f   : > { %8351 = vmatmul.mubr.f32.gmra.mrb[26].mxu1 %v11206_v55  ;;  %v9468_v55 = vpack.c.bf16 %v3491_v14, %v3490_v13  ;;  %v11391_v13 = vld [vmem:[#allocation4 + $0x91] sm:$0xff]  ;;  %v11394_v14 = vld [vmem:[#allocation4 + $0x99] sm:$0xff] }
 0x320   : > { %8353 = vmatprep.mubr.f32.mxu1 %v11116_v42 }
 0x323   : > { %8354 = vmatmul.mubr.f32.gmra.mrb[28].mxu1 %v11116_v42 }
 0x324   : > { %8356 = vmatprep.mubr.f32.mxu1 %v11116_v42 }
 0x327   : > { %8357 = vmatmul.mubr.f32.gmra.mrb[30].mxu1 %v11116_v42  ;;  %v11355_v42 = vld [vmem:[#allocation4 + $0x31] sm:$0xff] }
 0x328   : > { %8391 = vmatprep.mubr.f32.mxu1 %v3145_v45  ;;  %v11382_v45 = vld [vmem:[#allocation4 + $0x79] sm:$0xff] }
 0x32b   : > { %8392 = vmatmul.mubr.f32.vlgmr.msra.gmra.mrb[0].mxu1 %v3146_v50  ;;  %v3791_v50 = vld [vmem:[#allocation13 + $0x308] sm:$0xff] }
 0x32c   : > { %9459 = vmatpush3.bf16.msra.mxu1 %v9456_v24  ;;  %8394 = vmatprep.mubr.f32.mxu1 %v11349_v52  ;;  %v3499_v24 = vld [vmem:[#allocation13 + $0x2f8] sm:$0xff] }
 0x32d   : > { %9461 = vmatprep.subr.bf16.mxu1 %v9460_v49  ;;  %v9484_v18 = vpack.c.bf16 %v3499_v24, %v3498_v62  ;;  %v3801_v62 = vld [vmem:[#allocation13 + $0x358] sm:$0xff] }
 0x32e   : > { %v11901_v24 = vld [vmem:[#allocation41_spill] sm:$0xff] }
 0x32f   : > { %8395 = vmatmul.mubr.f32.gmra.mrb[2].mxu1 %v11352_v9 }
 0x330   : > { %8397 = vmatprep.mubr.f32.mxu1 %v11355_v42  ;;  %9463 = vmatpush3.bf16.msra.mxu1 %v9460_v49  ;;  %v3790_v49 = vld [vmem:[#allocation13 + $0x300] sm:$0xff] }
 0x331   : > { %9465 = vmatprep.subr.bf16.mxu1 %v9464_v63  ;;  %v9488_v60 = vpack.c.bf16 %v3791_v50, %v3790_v49  ;;  %v3802_v50 = vld [vmem:[#allocation13 + $0x360] sm:$0xff] }
 0x333   : > { %8398 = vmatmul.mubr.f32.gmra.mrb[4].mxu1 %v11358_v51 }
 0x334   : > { %8400 = vmatprep.mubr.f32.mxu1 %v11361_v2  ;;  %9467 = vmatpush3.bf16.msra.mxu1 %v9464_v63  ;;  %v11388_v63 = vld [vmem:[#allocation4 + $0x89] sm:$0xff] }
 0x335   : > { %9469 = vmatprep.subr.bf16.mxu1 %v9468_v55 }
 0x337   : > { %8401 = vmatmul.mubr.f32.gmra.mrb[6].mxu1 %v11364_v20 }
 0x338   : > { %8403 = vmatprep.mubr.f32.mxu1 %v11367_v27  ;;  %9471 = vmatpush3.bf16.msra.mxu1 %v9468_v55  ;;  %v11397_v55 = vld [vmem:[#allocation4 + $0xa1] sm:$0xff] }
 0x339   : > { %9473 = vmatprep.subr.bf16.mxu1 %v9472_v47 }
 0x33b   : > { %8404 = vmatmul.mubr.f32.gmra.mrb[8].mxu1 %v11370_v12 }
 0x33c   : > { %8406 = vmatprep.mubr.f32.mxu1 %v11373_v4  ;;  %9475 = vmatpush3.bf16.msra.mxu1 %v9472_v47  ;;  %v11414_v47 = vld [vmem:[#allocation4 + $0x101] sm:$0xff] }
 0x33d   : > { %9477 = vmatprep.subr.bf16.mxu1 %v9476_v57 }
 0x33f   : > { %8407 = vmatmul.mubr.f32.gmra.mrb[10].mxu1 %v11376_v54 }
 0x340   : > { %8409 = vmatprep.mubr.f32.mxu1 %v11379_v44  ;;  %9479 = vmatpush3.bf16.msra.mxu1 %v9476_v57 }
 0x341   : > { %9481 = vmatprep.subr.bf16.mxu1 %v9480_v11 }
 0x343   : > { %8410 = vmatmul.mubr.f32.gmra.mrb[12].mxu1 %v11382_v45 }
 0x344   : > { %8412 = vmatprep.mubr.f32.mxu1 %v11385_v21  ;;  %9483 = vmatpush3.bf16.msra.mxu1 %v9480_v11  ;;  %v11900_v11 = vld [vmem:[#allocation40_spill] sm:$0xff] }
 0x345   : > { %9485 = vmatprep.subr.bf16.mxu1 %v9484_v18 }
 0x347   : > { %8413 = vmatmul.mubr.f32.gmra.mrb[14].mxu1 %v11388_v63 }
 0x348   : > { %8415 = vmatprep.mubr.f32.mxu1 %v11391_v13  ;;  %9487 = vmatpush3.bf16.msra.mxu1 %v9484_v18  ;;  %v11902_v18 = vld [vmem:[#allocation42_spill] sm:$0xff] }
 0x349   : > { %9489 = vmatprep.subr.bf16.mxu1 %v9488_v60 }
 0x34b   : > { %8416 = vmatmul.mubr.f32.gmra.mrb[16].mxu1 %v11394_v14 }
 0x34c   : > { %8418 = vmatprep.mubr.f32.mxu1 %v11397_v55 }
 0x34f   : > { %8419 = vmatmul.mubr.f32.gmra.mrb[18].mxu1 %v11400_v3 }
 0x350   : > { %8421 = vmatprep.mubr.f32.mxu1 %v11403_v22 }
 0x353   : > { %8422 = vmatmul.mubr.f32.gmra.mrb[20].mxu1 %v11072_v16  ;;  %v11418_v16 = vld [vmem:[#allocation4 + $0x109] sm:$0xff] }
 0x354   : > { %8424 = vmatprep.mubr.f32.mxu1 %v11079_v38  ;;  %v3792_v38 = vld [vmem:[#allocation13 + $0x310] sm:$0xff] }
 0x357   : > { %8425 = vmatmul.mubr.f32.gmra.mrb[22].mxu1 %v11090_v32  ;;  %v3793_v32 = vld [vmem:[#allocation13 + $0x318] sm:$0xff] }
 0x358   : > { %8427 = vmatprep.mubr.f32.mxu1 %v11096_v10  ;;  %v9492_v10 = vpack.c.bf16 %v3793_v32, %v3792_v38  ;;  %v3804_v32 = vld [vmem:[#allocation13 + $0x370] sm:$0xff] }
 0x35b   : > { %8428 = vmatmul.mubr.f32.gmra.mrb[24].mxu1 %v11100_v19  ;;  %v3794_v19 = vld [vmem:[#allocation13 + $0x320] sm:$0xff] }
 0x35c   : > { %8430 = vmatprep.mubr.f32.mxu1 %v11103_v25  ;;  %v3795_v25 = vld [vmem:[#allocation13 + $0x328] sm:$0xff] }
 0x35f   : > { %8431 = vmatmul.mubr.f32.gmra.mrb[26].mxu1 %v11109_v34  ;;  %v3796_v34 = vld [vmem:[#allocation13 + $0x330] sm:$0xff] }
 0x360   : > { %8433 = vmatprep.mubr.f32.mxu1 %v11107_v33  ;;  %v9496_v33 = vpack.c.bf16 %v3795_v25, %v3794_v19  ;;  %v3463_v19 = vld [vmem:[#allocation4 + $0x72] sm:$0xff] }
 0x363   : > { %8434 = vmatmul.mubr.f32.gmra.mrb[28].mxu1 %v11113_v35  ;;  %v3797_v35 = vld [vmem:[#allocation13 + $0x338] sm:$0xff] }
 0x364   : > { %8436 = vmatprep.mubr.f32.mxu1 %v11414_v47  ;;  %v9500_v57 = vpack.c.bf16 %v3797_v35, %v3796_v34  ;;  %v4096_v34 = vld [vmem:[#allocation13 + $0x380] sm:$0xff]  ;;  %v4097_v35 = vld [vmem:[#allocation13 + $0x388] sm:$0xff] }
 0x367   : > { %8437 = vmatmul.mubr.f32.gmra.mrb[30].mxu1 %v11418_v16 }
 0x368   : > { %8471 = vmatprep.mubr.f32.mxu1 %v11215_v56  ;;  %v3798_v56 = vld [vmem:[#allocation13 + $0x340] sm:$0xff] }
 0x36b   : > { %8472 = vmatmul.mubr.f32.vlgmr.msra.gmra.mrb[0].mxu1 %v11218_v46  ;;  %v9504_v46 = vpack.c.bf16 %v3799_v59, %v3798_v56  ;;  %v3470_v56 = vld [vmem:[#allocation4 + $0xaa] sm:$0xff]  ;;  %v3471_v59 = vld [vmem:[#allocation4 + $0xb2] sm:$0xff] }
 0x36c   : > { %9491 = vmatpush3.bf16.msra.mxu1 %v9488_v60  ;;  %8474 = vmatprep.mubr.f32.mxu1 %v11221_v17  ;;  %v3800_v17 = vld [vmem:[#allocation13 + $0x350] sm:$0xff]  ;;  %v3803_v60 = vld [vmem:[#allocation13 + $0x368] sm:$0xff] }
 0x36d   : > { %9493 = vmatprep.subr.bf16.mxu1 %v9492_v10  ;;  %v9508_v49 = vpack.c.bf16 %v3801_v62, %v3800_v17  ;;  %v9512_v38 = vpack.c.bf16 %v3803_v60, %v3802_v50  ;;  %v4100_v17 = vld [vmem:[#allocation13 + $0x3a0] sm:$0xff]  ;;  %v3762_v60 = vld [vmem:[#allocation4 + $0x48] sm:$0xff] }
 0x36e   : > { %v3760_v62 = vld [vmem:[#allocation4 + $0x38] sm:$0xff] }
 0x36f   : > { %8475 = vmatmul.mubr.f32.gmra.mrb[2].mxu1 %v11897_v58  ;;  %v3465_v58 = vld [vmem:[#allocation4 + $0x82] sm:$0xff] }
 0x370   : > { %8477 = vmatprep.mubr.f32.mxu1 %v11898_v41  ;;  %9495 = vmatpush3.bf16.msra.mxu1 %v9492_v10  ;;  %v3805_v10 = vld [vmem:[#allocation13 + $0x378] sm:$0xff]  ;;  %v3467_v41 = vld [vmem:[#allocation4 + $0x92] sm:$0xff] }
 0x371   : > { %9497 = vmatprep.subr.bf16.mxu1 %v9496_v33  ;;  %v9516_v25 = vpack.c.bf16 %v3805_v10, %v3804_v32  ;;  %v4105_v32 = vld [vmem:[#allocation13 + $0x3c8] sm:$0xff]  ;;  %v3763_v10 = vld [vmem:[#allocation4 + $0x50] sm:$0xff] }
 0x373   : > { %8478 = vmatmul.mubr.f32.gmra.mrb[4].mxu1 %v11899_v23  ;;  %v3472_v23 = vld [vmem:[#allocation4 + $0xba] sm:$0xff] }
 0x374   : > { %8480 = vmatprep.mubr.f32.mxu1 %v11900_v11  ;;  %9499 = vmatpush3.bf16.msra.mxu1 %v9496_v33  ;;  %v3464_v33 = vld [vmem:[#allocation4 + $0x7a] sm:$0xff]  ;;  %v11440_v11 = vld [vmem:[#allocation4 + $0x102] sm:$0xff] }
 0x375   : > { %9501 = vmatprep.subr.bf16.mxu1 %v9500_v57 }
 0x377   : > { %8481 = vmatmul.mubr.f32.gmra.mrb[6].mxu1 %v11901_v24  ;;  %v4102_v24 = vld [vmem:[#allocation13 + $0x3b0] sm:$0xff] }
 0x378   : > { %8483 = vmatprep.mubr.f32.mxu1 %v11902_v18  ;;  %9503 = vmatpush3.bf16.msra.mxu1 %v9500_v57  ;;  %v3469_v57 = vld [vmem:[#allocation4 + $0xa2] sm:$0xff]  ;;  %v4103_v18 = vld [vmem:[#allocation13 + $0x3b8] sm:$0xff] }
 0x379   : > { %9505 = vmatprep.subr.bf16.mxu1 %v9504_v46  ;;  %v9532_v50 = vpack.c.bf16 %v4103_v18, %v4102_v24  ;;  %v3774_v24 = vld [vmem:[#allocation4 + $0xa8] sm:$0xff]  ;;  %v3775_v18 = vld [vmem:[#allocation4 + $0xb0] sm:$0xff] }
 0x37b   : > { %8484 = vmatmul.mubr.f32.gmra.mrb[8].mxu1 %v11246_v36  ;;  %v9520_v36 = vpack.c.bf16 %v4097_v35, %v4096_v34  ;;  %v4107_v34 = vld [vmem:[#allocation13 + $0x3d8] sm:$0xff]  ;;  %v3765_v35 = vld [vmem:[#allocation4 + $0x60] sm:$0xff] }
 0x37c   : > { %8486 = vmatprep.mubr.f32.mxu1 %v11249_v31  ;;  %9507 = vmatpush3.bf16.msra.mxu1 %v9504_v46  ;;  %v3466_v31 = vld [vmem:[#allocation4 + $0x8a] sm:$0xff] }
 0x37d   : > { %9509 = vmatprep.subr.bf16.mxu1 %v9508_v49  ;;  %v11444_v46 = vld [vmem:[#allocation4 + $0x10a] sm:$0xff] }
 0x37f   : > { %8487 = vmatmul.mubr.f32.gmra.mrb[10].mxu1 %v11252_v8  ;;  %v3468_v8 = vld [vmem:[#allocation4 + $0x9a] sm:$0xff] }
 0x380   : > { %8489 = vmatprep.mubr.f32.mxu1 %v3463_v19  ;;  %9511 = vmatpush3.bf16.msra.mxu1 %v9508_v49  ;;  %v3761_v49 = vld [vmem:[#allocation4 + $0x40] sm:$0xff] }
 0x381   : > { %9513 = vmatprep.subr.bf16.mxu1 %v9512_v38 }
 0x383   : > { %8490 = vmatmul.mubr.f32.gmra.mrb[12].mxu1 %v3464_v33  ;;  %v4106_v33 = vld [vmem:[#allocation13 + $0x3d0] sm:$0xff] }
 0x384   : > { %8492 = vmatprep.mubr.f32.mxu1 %v3465_v58  ;;  %9515 = vmatpush3.bf16.msra.mxu1 %v9512_v38  ;;  %v4104_v38 = vld [vmem:[#allocation13 + $0x3c0] sm:$0xff]  ;;  %v9540_v58 = vpack.c.bf16 %v4107_v34, %v4106_v33  ;;  %v11904_v33 = vld [vmem:[#allocation24_spill] sm:$0xff]  ;;  %v11905_v34 = vld [vmem:[#allocation25_spill] sm:$0xff] }
 0x385   : > { %9517 = vmatprep.subr.bf16.mxu1 %v9516_v25  ;;  %v9536_v19 = vpack.c.bf16 %v4105_v32, %v4104_v38  ;;  %v3779_v38 = vld [vmem:[#allocation4 + $0xd0] sm:$0xff]  ;;  %v3780_v32 = vld [vmem:[#allocation4 + $0xd8] sm:$0xff] }
 0x387   : > { %8493 = vmatmul.mubr.f32.gmra.mrb[14].mxu1 %v3466_v31  ;;  %v4108_v31 = vld [vmem:[#allocation13 + $0x3e0] sm:$0xff] }
 0x388   : > { %8495 = vmatprep.mubr.f32.mxu1 %v3467_v41  ;;  %9519 = vmatpush3.bf16.msra.mxu1 %v9516_v25  ;;  %v3764_v25 = vld [vmem:[#allocation4 + $0x58] sm:$0xff] }
 0x389   : > { %9521 = vmatprep.subr.bf16.mxu1 %v9520_v36  ;;  %v4109_v41 = vld [vmem:[#allocation13 + $0x3e8] sm:$0xff] }
 0x38b   : > { %8496 = vmatmul.mubr.f32.gmra.mrb[16].mxu1 %v3468_v8  ;;  %v3767_v8 = vld [vmem:[#allocation4 + $0x70] sm:$0xff] }
 0x38c   : > { %8498 = vmatprep.mubr.f32.mxu1 %v3469_v57  ;;  %v9544_v57 = vpack.c.bf16 %v4109_v41, %v4108_v31  ;;  %v4394_v31 = vld [vmem:[#allocation4 + $0xea] sm:$0xff]  ;;  %v4400_v41 = vld [vmem:[#allocation4 + $0x11a] sm:$0xff] }
 0x38f   : > { %8499 = vmatmul.mubr.f32.gmra.mrb[18].mxu1 %v3470_v56  ;;  %v3768_v56 = vld [vmem:[#allocation4 + $0x78] sm:$0xff] }
 0x390   : > { %8501 = vmatprep.mubr.f32.mxu1 %v3471_v59  ;;  %v4110_v59 = vld [vmem:[#allocation13 + $0x3f0] sm:$0xff] }
 0x393   : > { %8502 = vmatmul.mubr.f32.gmra.mrb[20].mxu1 %v3472_v23  ;;  %v4111_v23 = vld [vmem:[#allocation13 + $0x3f8] sm:$0xff] }
 0x394   : > { %8504 = vmatprep.mubr.f32.mxu1 %v11273_v48  ;;  %v4098_v48 = vld [vmem:[#allocation13 + $0x390] sm:$0xff] }
 0x397   : > { %8505 = vmatmul.mubr.f32.gmra.mrb[22].mxu1 %v11276_v53  ;;  %v4099_v53 = vld [vmem:[#allocation13 + $0x398] sm:$0xff] }
 0x398   : > { %8507 = vmatprep.mubr.f32.mxu1 %v11279_v26  ;;  %v3757_v26 = vld [vmem:[#allocation4 + $0x20] sm:$0xff] }
 0x39b   : > { %8508 = vmatmul.mubr.f32.gmra.mrb[24].mxu1 %v11282_v5  ;;  %v9524_v5 = vpack.c.bf16 %v4099_v53, %v4098_v48  ;;  %v3769_v48 = vld [vmem:[#allocation4 + $0x80] sm:$0xff]  ;;  %v4954_v53 = vld [vmem:[#allocation16 + $0x80] sm:$0xff] }
 0x39c   : > { %8510 = vmatprep.mubr.f32.mxu1 %v11285_v1  ;;  %v3758_v1 = vld [vmem:[#allocation4 + $0x28] sm:$0xff] }
 0x39f   : > { %8511 = vmatmul.mubr.f32.gmra.mrb[26].mxu1 %v11292_v0  ;;  %v4101_v0 = vld [vmem:[#allocation13 + $0x3a8] sm:$0xff] }
 0x3a0   : > { %8513 = vmatprep.mubr.f32.mxu1 %v11288_v28  ;;  %v3759_v28 = vld [vmem:[#allocation4 + $0x30] sm:$0xff] }
 0x3a3   : > { %8514 = vmatmul.mubr.f32.gmra.mrb[28].mxu1 %v11298_v6  ;;  %v9528_v6 = vpack.c.bf16 %v4101_v0, %v4100_v17  ;;  %v3770_v17 = vld [vmem:[#allocation4 + $0x88] sm:$0xff]  ;;  %v3771_v0 = vld [vmem:[#allocation4 + $0x90] sm:$0xff] }
 0x3a4   : > { %8516 = vmatprep.mubr.f32.mxu1 %v11440_v11 }
 0x3a7   : > { %8517 = vmatmul.mubr.f32.gmra.mrb[30].mxu1 %v11444_v46 }
 0x3a8   : > { %8551 = vmatprep.mubr.f32.mxu1 %v3757_v26  ;;  %v4955_v26 = vld [vmem:[#allocation16 + $0x88] sm:$0xff] }
 0x3ab   : > { %8552 = vmatmul.mubr.f32.vlgmr.msra.gmra.mrb[0].mxu1 %v3758_v1  ;;  %v9548_v1 = vpack.c.bf16 %v4111_v23, %v4110_v59  ;;  %v4958_v59 = vld [vmem:[#allocation16 + $0xa0] sm:$0xff]  ;;  %v4959_v23 = vld [vmem:[#allocation16 + $0xa8] sm:$0xff] }
 0x3ac   : > { %9523 = vmatpush3.bf16.msra.mxu1 %v9520_v36  ;;  %8554 = vmatprep.mubr.f32.mxu1 %v3759_v28  ;;  %v3766_v36 = vld [vmem:[#allocation4 + $0x68] sm:$0xff]  ;;  %v3772_v28 = vld [vmem:[#allocation4 + $0x98] sm:$0xff] }
 0x3ad   : > { %9525 = vmatprep.subr.bf16.mxu1 %v9524_v5 }
 0x3af   : > { %8555 = vmatmul.mubr.f32.gmra.mrb[2].mxu1 %v3760_v62  ;;  %v11903_v62 = vld [vmem:[#allocation23_spill] sm:$0xff] }
 0x3b0   : > { %8557 = vmatprep.mubr.f32.mxu1 %v3761_v49  ;;  %9527 = vmatpush3.bf16.msra.mxu1 %v9524_v5  ;;  %v9584_v5 = vpack.c.bf16 %v4955_v26, %v4954_v53  ;;  %v3776_v49 = vld [vmem:[#allocation4 + $0xb8] sm:$0xff]  ;;  %v4960_v53 = vld [vmem:[#allocation16 + $0xb0] sm:$0xff]  ;;  %v4961_v26 = vld [vmem:[#allocation16 + $0xb8] sm:$0xff] }
 0x3b1   : > { %9529 = vmatprep.subr.bf16.mxu1 %v9528_v6 }
 0x3b2   : > { %9585 = vmatprep.subr.bf16.mxu0 %v9584_v5 }
 0x3b3   : > { %8558 = vmatmul.mubr.f32.gmra.mrb[4].mxu1 %v3762_v60  ;;  %9587 = vmatpush3.bf16.msra.mxu0 %v9584_v5  ;;  %v3778_v60 = vld [vmem:[#allocation4 + $0xc8] sm:$0xff]  ;;  %v9596_v5 = vpack.c.bf16 %v4961_v26, %v4960_v53 }
 0x3b4   : > { %8560 = vmatprep.mubr.f32.mxu1 %v3763_v10  ;;  %9531 = vmatpush3.bf16.msra.mxu1 %v9528_v6  ;;  %v3773_v6 = vld [vmem:[#allocation4 + $0xa0] sm:$0xff] }
 0x3b5   : > { %9533 = vmatprep.subr.bf16.mxu1 %v9532_v50  ;;  %v3781_v10 = vld [vmem:[#allocation4 + $0xe0] sm:$0xff] }
 0x3b6   : > { %v11913_v26 = vld [vmem:[#allocation33_spill] sm:$0xff] }
 0x3b7   : > { %8561 = vmatmul.mubr.f32.gmra.mrb[6].mxu1 %v3764_v25  ;;  %v11448_v25 = vld [vmem:[#allocation4] sm:$0xff] }
 0x3b8   : > { %8563 = vmatprep.mubr.f32.mxu1 %v3765_v35  ;;  %9535 = vmatpush3.bf16.msra.mxu1 %v9532_v50  ;;  %v3777_v50 = vld [vmem:[#allocation4 + $0xc0] sm:$0xff] }
 0x3b9   : > { %9537 = vmatprep.subr.bf16.mxu1 %v9536_v19  ;;  %v4392_v35 = vld [vmem:[#allocation4 + $0xda] sm:$0xff] }
 0x3bb   : > { %8564 = vmatmul.mubr.f32.gmra.mrb[8].mxu1 %v3766_v36  ;;  %v4395_v36 = vld [vmem:[#allocation4 + $0xf2] sm:$0xff] }
 0x3bc   : > { %8566 = vmatprep.mubr.f32.mxu1 %v3767_v8  ;;  %9539 = vmatpush3.bf16.msra.mxu1 %v9536_v19  ;;  %v3782_v19 = vld [vmem:[#allocation4 + $0xe8] sm:$0xff] }
 0x3bd   : > { %9541 = vmatprep.subr.bf16.mxu1 %v9540_v58  ;;  %v4956_v8 = vld [vmem:[#allocation16 + $0x90] sm:$0xff] }
 0x3bf   : > { %8567 = vmatmul.mubr.f32.gmra.mrb[10].mxu1 %v3768_v56 }
 0x3c0   : > { %8569 = vmatprep.mubr.f32.mxu1 %v3769_v48  ;;  %9543 = vmatpush3.bf16.msra.mxu1 %v9540_v58  ;;  %v4393_v58 = vld [vmem:[#allocation4 + $0xe2] sm:$0xff]  ;;  %v9592_v48 = vpack.c.bf16 %v4959_v23, %v4958_v59 }
 0x3c1   : > { %9545 = vmatprep.subr.bf16.mxu1 %v9544_v57 }
 0x3c3   : > { %8570 = vmatmul.mubr.f32.gmra.mrb[12].mxu1 %v3770_v17  ;;  %v4964_v17 = vld [vmem:[#allocation16 + $0xd0] sm:$0xff] }
 0x3c4   : > { %8572 = vmatprep.mubr.f32.mxu1 %v3771_v0  ;;  %9547 = vmatpush3.bf16.msra.mxu1 %v9544_v57  ;;  %v4957_v57 = vld [vmem:[#allocation16 + $0x98] sm:$0xff] }
 0x3c5   : > { %9549 = vmatprep.subr.bf16.mxu1 %v9548_v1  ;;  %v9588_v56 = vpack.c.bf16 %v4957_v57, %v4956_v8  ;;  %v4965_v0 = vld [vmem:[#allocation16 + $0xd8] sm:$0xff]  ;;  %v11912_v57 = vld [vmem:[#allocation32_spill] sm:$0xff] }
 0x3c7   : > { %8573 = vmatmul.mubr.f32.gmra.mrb[14].mxu1 %v3772_v28  ;;  %9589 = vmatprep.subr.bf16.mxu0 %v9588_v56  ;;  %v9604_v28 = vpack.c.bf16 %v4965_v0, %v4964_v17 }
 0x3c8   : > { %8575 = vmatprep.mubr.f32.mxu1 %v3773_v6  ;;  %9551 = vmatpush3.bf16.msra.mxu1 %v9548_v1  ;;  %v4966_v6 = vld [vmem:[#allocation16 + $0xe0] sm:$0xff] }
 0x3c9   : > { %9872 = vmatprep.subr.bf16.mxu1 %v11903_v62  ;;  %9591 = vmatpush3.bf16.msra.mxu0 %v9588_v56 }
 0x3ca   : > { %9593 = vmatprep.subr.bf16.mxu0 %v9592_v48 }
 0x3cb   : > { %8576 = vmatmul.mubr.f32.gmra.mrb[16].mxu1 %v3774_v24 }
 0x3cc   : > { %8578 = vmatprep.mubr.f32.mxu1 %v3775_v18  ;;  %v4968_v18 = vld [vmem:[#allocation16 + $0xf0] sm:$0xff] }
 0x3cd   : > { %9595 = vmatpush3.bf16.msra.mxu0 %v9592_v48 }
 0x3ce   : > { %9597 = vmatprep.subr.bf16.mxu0 %v9596_v5 }
 0x3cf   : > { %8579 = vmatmul.mubr.f32.gmra.mrb[18].mxu1 %v3776_v49  ;;  %v4969_v49 = vld [vmem:[#allocation16 + $0xf8] sm:$0xff] }
 0x3d0   : > { %8581 = vmatprep.mubr.f32.mxu1 %v3777_v50  ;;  %v9612_v50 = vpack.c.bf16 %v4969_v49, %v4968_v18 }
 0x3d1   : > { %9599 = vmatpush3.bf16.msra.mxu0 %v9596_v5 }
 0x3d3   : > { %8582 = vmatmul.mubr.f32.gmra.mrb[20].mxu1 %v3778_v60  ;;  %v4935_v60 = vld [vmem:[#allocation7 + $0x1] sm:$0xff] }
 0x3d4   : > { %8584 = vmatprep.mubr.f32.mxu1 %v3779_v38  ;;  %8791 = vmatprep.mubr.f32.mxu0 %v4935_v60  ;;  %v4936_v38 = vld [vmem:[#allocation7 + $0x9] sm:$0xff] }
 0x3d5   : > { %v11916_v60 = vld [vmem:[#allocation39_spill] sm:$0xff] }
 0x3d7   : > { %8585 = vmatmul.mubr.f32.gmra.mrb[22].mxu1 %v3780_v32  ;;  %v4919_v32 = vld [vmem:[#allocation16] sm:$0xff] }
 0x3d8   : > { %8587 = vmatprep.mubr.f32.mxu1 %v3781_v10  ;;  %v4920_v10 = vld [vmem:[#allocation16 + $0x8] sm:$0xff] }
 0x3db   : > { %8588 = vmatmul.mubr.f32.gmra.mrb[24].mxu1 %v3782_v19  ;;  %v9616_v19 = vpack.c.bf16 %v4920_v10, %v4919_v32 }
 0x3dc   : > { %8590 = vmatprep.mubr.f32.mxu1 %v11448_v25 }
 0x3df   : > { %8591 = vmatmul.mubr.f32.gmra.mrb[26].mxu1 %v11448_v25 }
 0x3e0   : > { %8593 = vmatprep.mubr.f32.mxu1 %v11448_v25 }
 0x3e3   : > { %8594 = vmatmul.mubr.f32.gmra.mrb[28].mxu1 %v11448_v25 }
 0x3e4   : > { %8596 = vmatprep.mubr.f32.mxu1 %v11448_v25 }
 0x3e7   : > { %8597 = vmatmul.mubr.f32.gmra.mrb[30].mxu1 %v11448_v25 }
 0x3e8   : > { %8631 = vmatprep.mubr.f32.mxu1 %v11349_v52  ;;  %v11906_v52 = vld [vmem:[#allocation26_spill] sm:$0xff] }
 0x3eb   : > { %8632 = vmatmul.mubr.f32.vlgmr.msra.gmra.mrb[0].mxu1 %v11352_v9  ;;  %v11907_v9 = vld [vmem:[#allocation27_spill] sm:$0xff] }
 0x3ec   : > { %9880 = vmatpush3.bf16.msra.mxu1 %v11903_v62  ;;  %8634 = vmatprep.mubr.f32.mxu1 %v11355_v42  ;;  %v11908_v42 = vld [vmem:[#allocation28_spill] sm:$0xff] }
 0x3ed   : > { %9873 = vmatprep.subr.bf16.mxu1 %v11904_v33  ;;  %v4967_v62 = vld [vmem:[#allocation16 + $0xe8] sm:$0xff] }
 0x3ee   : > { %v9608_v24 = vpack.c.bf16 %v4967_v62, %v4966_v6 }
 0x3ef   : > { %8635 = vmatmul.mubr.f32.gmra.mrb[2].mxu1 %v11358_v51  ;;  %v11909_v51 = vld [vmem:[#allocation29_spill] sm:$0xff] }
 0x3f0   : > { %8637 = vmatprep.mubr.f32.mxu1 %v11361_v2  ;;  %9881 = vmatpush3.bf16.msra.mxu1 %v11904_v33  ;;  %v11910_v2 = vld [vmem:[#allocation30_spill] sm:$0xff]  ;;  %v4921_v33 = vld [vmem:[#allocation16 + $0x10] sm:$0xff] }
 0x3f1   : > { %9874 = vmatprep.subr.bf16.mxu1 %v11905_v34 }
 0x3f3   : > { %8638 = vmatmul.mubr.f32.gmra.mrb[4].mxu1 %v11364_v20  ;;  %v4082_v20 = vld [vmem:[#allocation4 + $0xb9] sm:$0xff] }
 0x3f4   : > { %8640 = vmatprep.mubr.f32.mxu1 %v11367_v27  ;;  %9882 = vmatpush3.bf16.msra.mxu1 %v11905_v34  ;;  %v4083_v27 = vld [vmem:[#allocation4 + $0xc1] sm:$0xff]  ;;  %v4922_v34 = vld [vmem:[#allocation16 + $0x18] sm:$0xff] }
 0x3f5   : > { %9875 = vmatprep.subr.bf16.mxu1 %v11906_v52 }
 0x3f7   : > { %8641 = vmatmul.mubr.f32.gmra.mrb[6].mxu1 %v11370_v12  ;;  %v4084_v12 = vld [vmem:[#allocation4 + $0xc9] sm:$0xff] }
 0x3f8   : > { %8643 = vmatprep.mubr.f32.mxu1 %v11373_v4  ;;  %9883 = vmatpush3.bf16.msra.mxu1 %v11906_v52  ;;  %v4085_v4 = vld [vmem:[#allocation4 + $0xd1] sm:$0xff]  ;;  %v9620_v52 = vpack.c.bf16 %v4922_v34, %v4921_v33 }
 0x3f9   : > { %9876 = vmatprep.subr.bf16.mxu1 %v11907_v9 }
 0x3fb   : > { %8644 = vmatmul.mubr.f32.gmra.mrb[8].mxu1 %v11376_v54  ;;  %v4086_v54 = vld [vmem:[#allocation4 + $0xd9] sm:$0xff] }
 0x3fc   : > { %8646 = vmatprep.mubr.f32.mxu1 %v11379_v44  ;;  %9884 = vmatpush3.bf16.msra.mxu1 %v11907_v9  ;;  %v4087_v44 = vld [vmem:[#allocation4 + $0xe1] sm:$0xff]  ;;  %v4923_v9 = vld [vmem:[#allocation16 + $0x20] sm:$0xff] }
 0x3fd   : > { %9877 = vmatprep.subr.bf16.mxu1 %v11908_v42 }
 0x3ff   : > { %8647 = vmatmul.mubr.f32.gmra.mrb[10].mxu1 %v11382_v45  ;;  %v4089_v45 = vld [vmem:[#allocation4 + $0xf1] sm:$0xff] }
 0x400   : > { %8649 = vmatprep.mubr.f32.mxu1 %v11385_v21  ;;  %9885 = vmatpush3.bf16.msra.mxu1 %v11908_v42  ;;  %v4088_v21 = vld [vmem:[#allocation4 + $0xe9] sm:$0xff]  ;;  %v4924_v42 = vld [vmem:[#allocation16 + $0x28] sm:$0xff] }
 0x401   : > { %9878 = vmatprep.subr.bf16.mxu1 %v11909_v51 }
 0x403   : > { %8650 = vmatmul.mubr.f32.gmra.mrb[12].mxu1 %v11388_v63  ;;  %v4090_v63 = vld [vmem:[#allocation4 + $0xf9] sm:$0xff] }
 0x404   : > { %8652 = vmatprep.mubr.f32.mxu1 %v11391_v13  ;;  %9886 = vmatpush3.bf16.msra.mxu1 %v11909_v51  ;;  %v4093_v13 = vld [vmem:[#allocation4 + $0x111] sm:$0xff]  ;;  %v9624_v51 = vpack.c.bf16 %v4924_v42, %v4923_v9 }
 0x405   : > { %9879 = vmatprep.subr.bf16.mxu1 %v11910_v2  ;;  %v11917_v42 = vld [vmem:[#allocation43_spill] sm:$0xff] }
 0x407   : > { %8653 = vmatmul.mubr.f32.gmra.mrb[14].mxu1 %v11394_v14  ;;  %v4094_v14 = vld [vmem:[#allocation4 + $0x119] sm:$0xff] }
 0x408   : > { %8655 = vmatprep.mubr.f32.mxu1 %v11397_v55  ;;  %9887 = vmatpush3.bf16.msra.mxu1 %v11910_v2  ;;  %v4389_v55 = vld [vmem:[#allocation4 + $0xc2] sm:$0xff] }
 0x409   : > { %v4925_v2 = vld [vmem:[#allocation16 + $0x30] sm:$0xff] }
 0x40b   : > { %8656 = vmatmul.mubr.f32.gmra.mrb[16].mxu1 %v11400_v3  ;;  %v4390_v3 = vld [vmem:[#allocation4 + $0xca] sm:$0xff] }
 0x40c   : > { %8658 = vmatprep.mubr.f32.mxu1 %v11403_v22  ;;  %v4391_v22 = vld [vmem:[#allocation4 + $0xd2] sm:$0xff] }
 0x40f   : > { %8659 = vmatmul.mubr.f32.gmra.mrb[18].mxu1 %v4082_v20  ;;  %v4926_v20 = vld [vmem:[#allocation16 + $0x38] sm:$0xff] }
 0x410   : > { %8661 = vmatprep.mubr.f32.mxu1 %v4083_v27  ;;  %v4927_v27 = vld [vmem:[#allocation16 + $0x40] sm:$0xff] }
 0x413   : > { %8662 = vmatmul.mubr.f32.gmra.mrb[20].mxu1 %v4084_v12  ;;  %v9628_v12 = vpack.c.bf16 %v4926_v20, %v4925_v2 }
 0x414   : > { %8664 = vmatprep.mubr.f32.mxu1 %v4085_v4  ;;  %v4928_v4 = vld [vmem:[#allocation16 + $0x48] sm:$0xff] }
 0x417   : > { %8665 = vmatmul.mubr.f32.gmra.mrb[22].mxu1 %v4086_v54  ;;  %v9632_v54 = vpack.c.bf16 %v4928_v4, %v4927_v27 }
 0x418   : > { %8667 = vmatprep.mubr.f32.mxu1 %v4087_v44  ;;  %v4929_v44 = vld [vmem:[#allocation16 + $0x50] sm:$0xff] }
 0x41b   : > { %8668 = vmatmul.mubr.f32.gmra.mrb[24].mxu1 %v4088_v21 }
 0x41c   : > { %8670 = vmatprep.mubr.f32.mxu1 %v4089_v45  ;;  %v4930_v45 = vld [vmem:[#allocation16 + $0x58] sm:$0xff] }
 0x41d   : > { %v9636_v21 = vpack.c.bf16 %v4930_v45, %v4929_v44  ;;  %v11918_v44 = vld [vmem:[#allocation44_spill] sm:$0xff] }
 0x41f   : > { %8671 = vmatmul.mubr.f32.gmra.mrb[26].mxu1 %v4090_v63  ;;  %v4931_v63 = vld [vmem:[#allocation16 + $0x60] sm:$0xff] }
 0x420   : > { %8673 = vmatprep.mubr.f32.mxu1 %v11414_v47  ;;  %v4396_v47 = vld [vmem:[#allocation4 + $0xfa] sm:$0xff] }
 0x423   : > { %8674 = vmatmul.mubr.f32.gmra.mrb[28].mxu1 %v11418_v16  ;;  %v4399_v16 = vld [vmem:[#allocation4 + $0x112] sm:$0xff] }
 0x424   : > { %8676 = vmatprep.mubr.f32.mxu1 %v4093_v13  ;;  %v4932_v13 = vld [vmem:[#allocation16 + $0x68] sm:$0xff] }
 0x427   : > { %8677 = vmatmul.mubr.f32.gmra.mrb[30].mxu1 %v4094_v14  ;;  %v9640_v14 = vpack.c.bf16 %v4932_v13, %v4931_v63  ;;  %v11919_v13 = vld [vmem:[#allocation45_spill] sm:$0xff] }
 0x428   : > { %8741 = vmatprep.mubr.f32.mxu1 %v4389_v55  ;;  %v4933_v55 = vld [vmem:[#allocation16 + $0x70] sm:$0xff] }
 0x42b   : > { %8742 = vmatmul.mubr.f32.vlgmr.msra.gmra.mrb[20].mxu1 %v4390_v3  ;;  %v4934_v3 = vld [vmem:[#allocation16 + $0x78] sm:$0xff] }
 0x42c   : > { %8744 = vmatprep.mubr.f32.mxu1 %v4391_v22  ;;  %v9644_v22 = vpack.c.bf16 %v4934_v3, %v4933_v55 }
 0x42f   : > { %8745 = vmatmul.mubr.f32.gmra.mrb[22].mxu1 %v4392_v35  ;;  %v5299_v35 = vld [vmem:[#allocation16 + $0x100] sm:$0xff] }
 0x430   : > { %8747 = vmatprep.mubr.f32.mxu1 %v4393_v58  ;;  %v5300_v58 = vld [vmem:[#allocation16 + $0x108] sm:$0xff] }
 0x433   : > { %8748 = vmatmul.mubr.f32.gmra.mrb[24].mxu1 %v4394_v31 }
 0x434   : > { %8750 = vmatprep.mubr.f32.mxu1 %v4395_v36  ;;  %v11494_v36 = vpack.c.bf16 %v5300_v58, %v5299_v35 }
 0x437   : > { %8751 = vmatmul.mubr.f32.gmra.mrb[26].mxu1 %v4396_v47  ;;  %v11497_v47 = vld [vmem:[#allocation14] ss:$0 sm:$0xff] }
 0x438   : > { %8753 = vmatprep.mubr.f32.mxu1 %v11440_v11  ;;  %v4962_v11 = vld [vmem:[#allocation16 + $0xc0] sm:$0xff] }
 0x43b   : > { %8754 = vmatmul.mubr.f32.gmra.mrb[28].mxu1 %v11444_v46  ;;  %v4963_v46 = vld [vmem:[#allocation16 + $0xc8] sm:$0xff] }
 0x43c   : > { %8756 = vmatprep.mubr.f32.mxu1 %v4399_v16  ;;  %v9600_v1 = vpack.c.bf16 %v4963_v46, %v4962_v11  ;;  %v11911_v16 = vld [vmem:[#allocation31_spill] sm:$0xff] }
 0x43e   : > { %9601 = vmatprep.subr.bf16.mxu0 %v9600_v1 }
 0x43f   : > { %8757 = vmatmul.mubr.f32.gmra.mrb[30].mxu1 %v4400_v41  ;;  %9603 = vmatpush3.bf16.msra.mxu0 %v9600_v1  ;;  %v11914_v1 = vld [vmem:[#allocation34_spill] sm:$0xff] }
 0x440   : > { %9605 = vmatprep.subr.bf16.mxu0 %v9604_v28 }
 0x443   : > { %9607 = vmatpush3.bf16.msra.mxu0 %v9604_v28 }
 0x444   : > { %9609 = vmatprep.subr.bf16.mxu0 %v9608_v24 }
 0x447   : > { %9611 = vmatpush3.bf16.msra.mxu0 %v9608_v24  ;;  %v11915_v24 = vld [vmem:[#allocation37_spill] sm:$0xff] }
 0x448   : > { %9613 = vmatprep.subr.bf16.mxu0 %v9612_v50 }
 0x44b   : > { %9615 = vmatpush3.bf16.msra.mxu0 %v9612_v50 }
 0x44c   : > { %9617 = vmatprep.subr.bf16.mxu0 %v9616_v19 }
 0x44e   : > { %8792 = vmatmul.mubr.f32.vlgmr.msra.gmra.mrb[118].mxu0 %v4936_v38 }
 0x44f   : > { %9619 = vmatpush3.bf16.msra.mxu0 %v9616_v19 }
 0x450   : > { %9621 = vmatprep.subr.bf16.mxu0 %v9620_v52 }
 0x453   : > { %9623 = vmatpush3.bf16.msra.mxu0 %v9620_v52 }
 0x454   : > { %9625 = vmatprep.subr.bf16.mxu0 %v9624_v51 }
 0x457   : > { %9627 = vmatpush3.bf16.msra.mxu0 %v9624_v51 }
 0x458   : > { %9629 = vmatprep.subr.bf16.mxu0 %v9628_v12 }
 0x45b   : > { %9631 = vmatpush3.bf16.msra.mxu0 %v9628_v12 }
 0x45c   : > { %9633 = vmatprep.subr.bf16.mxu0 %v9632_v54 }
 0x45f   : > { %9635 = vmatpush3.bf16.msra.mxu0 %v9632_v54 }
 0x460   : > { %9637 = vmatprep.subr.bf16.mxu0 %v9636_v21 }
 0x463   : > { %9639 = vmatpush3.bf16.msra.mxu0 %v9636_v21 }
 0x464   : > { %9641 = vmatprep.subr.bf16.mxu0 %v9640_v14 }
 0x467   : > { %9643 = vmatpush3.bf16.msra.mxu0 %v9640_v14 }
 0x468   : > { %9645 = vmatprep.subr.bf16.mxu0 %v9644_v22 }
 0x46b   : > { %9647 = vmatpush3.bf16.msra.mxu0 %v9644_v22 }
 0x46c   : > { %9649 = vmatprep.subr.bf16.mxu0 %v11494_v36 }
 0x4be   : > { %v8633_v31 = vpop.f32.mrb[0].mxu1 }
 0x4bf   : > { %v9888_v41 = vadd.f32 %v11911_v16, %v8633_v31  ;;  %v4178_v8 = vpop.f32.mrb[1].mxu1 }
 0x4c0   : > { %v9889_v56 = vadd.f32 %v11912_v57, %v4178_v8 }
 0x4c1   : > { %v4683_v59 = vadd.f32 %v9888_v41, %v11497_v47  ;;  %v11920_v41 = vld [vmem:[#allocation46_spill] sm:$0xff] }
 0x4c2   : > { %v4682_v23 = vadd.f32 %v9889_v56, %v11497_v47  ;;  %v8636_v48 = vpop.f32.mrb[2].mxu1 }
 0x4c3   : > { %v4715_v53 = vmax.f32 %v4683_v59, 0.0  ;;  %v9890_v5 = vadd.f32 %v11913_v26, %v8636_v48  ;;  %v4188_v11 = vpop.f32.mrb[3].mxu1  ;;  %v11921_v59 = vld [vmem:[#allocation47_spill] sm:$0xff] }
 0x4c4   : > { %v4714_v46 = vmax.f32 %v4682_v23, 0.0  ;;  %v9891_v17 = vadd.f32 %v11914_v1, %v4188_v11 }
 0x4c5   : > { %4747 = vst [vmem:[#allocation5 + $0x8] sm:$0xff] %v4715_v53  ;;  %v4685_v0 = vadd.f32 %v9890_v5, %v11497_v47 }
 0x4c6   : > { %4746 = vst [vmem:[#allocation5] sm:$0xff] %v4714_v46  ;;  %v4684_v28 = vadd.f32 %v9891_v17, %v11497_v47  ;;  %v8639_v6 = vpop.f32.mrb[4].mxu1 }
 0x4c7   : > { %v4717_v62 = vmax.f32 %v4685_v0, 0.0  ;;  %v9892_v18 = vadd.f32 %v11915_v24, %v8639_v6  ;;  %v4198_v49 = vpop.f32.mrb[5].mxu1 }
 0x4c8   : > { %v4716_v50 = vmax.f32 %v4684_v28, 0.0  ;;  %v9893_v38 = vadd.f32 %v11916_v60, %v4198_v49 }
 0x4c9   : > { %4749 = vst [vmem:[#allocation5 + $0x18] sm:$0xff] %v4717_v62  ;;  %v4687_v32 = vadd.f32 %v9892_v18, %v11497_v47 }
 0x4ca   : > { %4748 = vst [vmem:[#allocation5 + $0x10] sm:$0xff] %v4716_v50  ;;  %v4686_v10 = vadd.f32 %v9893_v38, %v11497_v47  ;;  %v8642_v19 = vpop.f32.mrb[6].mxu1 }
 0x4cb   : > { %v4719_v33 = vmax.f32 %v4687_v32, 0.0  ;;  %v9894_v34 = vadd.f32 %v11256_v61, %v8642_v19  ;;  %v4208_v52 = vpop.f32.mrb[7].mxu1 }
 0x4cc   : > { %v4718_v9 = vmax.f32 %v4686_v10, 0.0  ;;  %v9895_v51 = vadd.f32 %v11917_v42, %v4208_v52 }
 0x4cd   : > { %4751 = vst [vmem:[#allocation5 + $0x28] sm:$0xff] %v4719_v33  ;;  %v4689_v2 = vadd.f32 %v9894_v34, %v11497_v47  ;;  %v4778_v12 = vld [vmem:[#allocation5] ss:$2 sm:$0xff]  ;;  %v4810_v4 = vld [vmem:[#allocation5 + $0x1] ss:$2 sm:$0xff] }
 0x4ce   : > { %4750 = vst [vmem:[#allocation5 + $0x20] sm:$0xff] %v4718_v9  ;;  %v4688_v20 = vadd.f32 %v9895_v51, %v11497_v47  ;;  %v8645_v27 = vpop.f32.mrb[8].mxu1  ;;  %v4841_v22 = vmax.f32 %v4778_v12, %v4810_v4  ;;  %v11529_v34 = vld [vmem:[#allocation7 + $0x19] sm:$0xff] }
 0x4cf   : > { %v4721_v54 = vmax.f32 %v4689_v2, 0.0  ;;  %v9896_v45 = vadd.f32 %v11918_v44, %v8645_v27  ;;  %v4218_v21 = vpop.f32.mrb[9].mxu1 }
 0x4d0   : > { %v4720_v63 = vmax.f32 %v4688_v20, 0.0  ;;  %v9897_v61 = vadd.f32 %v11919_v13, %v4218_v21 }
 0x4d1   : > { %v4780_v14 = vld [vmem:[#allocation5 + $0x10] ss:$2 sm:$0xff]  ;;  %v4812_v55 = vld [vmem:[#allocation5 + $0x11] ss:$2 sm:$0xff]  ;;  %4753 = vst [vmem:[#allocation5 + $0x38] sm:$0xff] %v4721_v54  ;;  %v4691_v3 = vadd.f32 %v9896_v45, %v11497_v47 }
 0x4d2   : > { %v4842_v35 = vmax.f32 %v4780_v14, %v4812_v55  ;;  %4752 = vst [vmem:[#allocation5 + $0x30] sm:$0xff] %v4720_v63  ;;  %v4690_v58 = vadd.f32 %v9897_v61, %v11497_v47  ;;  %v8648_v31 = vpop.f32.mrb[10].mxu1 }
 0x4d3   : > { %v4723_v16 = vmax.f32 %v4691_v3, 0.0  ;;  %v9898_v8 = vadd.f32 %v11920_v41, %v8648_v31  ;;  %v4228_v57 = vpop.f32.mrb[11].mxu1 }
 0x4d4   : > { %v4722_v56 = vmax.f32 %v4690_v58, 0.0  ;;  %v9899_v23 = vadd.f32 %v11921_v59, %v4228_v57  ;;  %v4875_v48 = vmax.f32 %v4841_v22, %v4842_v35  ;;  %v11543_v35 = vld [vmem:[#allocation7 + $0x29] sm:$0xff] }
 0x4d5   : > { %4755 = vst [vmem:[#allocation5 + $0x48] sm:$0xff] %v4723_v16  ;;  %v4693_v53 = vadd.f32 %v9898_v8, %v11497_v47  ;;  %v4782_v11 = vld [vmem:[#allocation5 + $0x20] ss:$2 sm:$0xff]  ;;  %v4814_v46 = vld [vmem:[#allocation5 + $0x21] ss:$2 sm:$0xff] }
 0x4d6   : > { %4754 = vst [vmem:[#allocation5 + $0x40] sm:$0xff] %v4722_v56  ;;  %v4692_v26 = vadd.f32 %v9899_v23, %v11497_v47  ;;  %v8651_v5 = vpop.f32.mrb[12].mxu1  ;;  %4876 = vst [vmem:[#allocation7 + $0x11] sm:$0x7f] %v4875_v48  ;;  %v4843_v49 = vmax.f32 %v4782_v11, %v4814_v46  ;;  %v11551_v48 = vld [vmem:[#allocation7 + $0x39] sm:$0xff] }
 0x4d7   : > { %v4725_v1 = vmax.f32 %v4693_v53, 0.0  ;;  %v9900_v17 = vadd.f32 %v11304_v37, %v8651_v5  ;;  %v4238_v0 = vpop.f32.mrb[13].mxu1 }
 0x4d8   : > { %v4724_v28 = vmax.f32 %v4692_v26, 0.0  ;;  %v9901_v6 = vadd.f32 %v11306_v39, %v4238_v0 }
 0x4d9   : > { %v4784_v62 = vld [vmem:[#allocation5 + $0x30] ss:$2 sm:$0xff]  ;;  %v4816_v24 = vld [vmem:[#allocation5 + $0x31] ss:$2 sm:$0xff]  ;;  %4757 = vst [vmem:[#allocation5 + $0x58] sm:$0xff] %v4725_v1  ;;  %v4695_v18 = vadd.f32 %v9900_v17, %v11497_v47 }
 0x4da   : > { %v4844_v50 = vmax.f32 %v4784_v62, %v4816_v24  ;;  %4756 = vst [vmem:[#allocation5 + $0x50] sm:$0xff] %v4724_v28  ;;  %v4694_v60 = vadd.f32 %v9901_v6, %v11497_v47  ;;  %v8654_v38 = vpop.f32.mrb[14].mxu1  ;;  %v11557_v28 = vld [vmem:[#allocation7 + $0x49] sm:$0xff]  ;;  %v11563_v24 = vld [vmem:[#allocation7 + $0x59] sm:$0xff] }
 0x4db   : > { %v4727_v32 = vmax.f32 %v4695_v18, 0.0  ;;  %v9902_v10 = vadd.f32 %v11316_v30, %v8654_v38  ;;  %v4248_v19 = vpop.f32.mrb[15].mxu1 }
 0x4dc   : > { %v4726_v37 = vmax.f32 %v4694_v60, 0.0  ;;  %v9903_v33 = vadd.f32 %v11318_v15, %v4248_v19  ;;  %v4879_v39 = vmax.f32 %v4843_v49, %v4844_v50 }
 0x4dd   : > { %4759 = vst [vmem:[#allocation5 + $0x68] sm:$0xff] %v4727_v32  ;;  %v4697_v52 = vadd.f32 %v9902_v10, %v11497_v47  ;;  %v11532_v9 = vld [vmem:[#allocation7 + $0x11] sm:$0xff]  ;;  %v4786_v30 = vld [vmem:[#allocation5 + $0x40] ss:$2 sm:$0xff]  ;;  %v4818_v2 = vld [vmem:[#allocation5 + $0x41] ss:$2 sm:$0xff] }
 0x4de   : > { %4758 = vst [vmem:[#allocation5 + $0x60] sm:$0xff] %v4726_v37  ;;  %v4696_v42 = vadd.f32 %v9903_v33, %v11497_v47  ;;  %v8657_v51 = vpop.f32.mrb[16].mxu1  ;;  %8794 = vmatprep.mubr.f32.mxu0 %v11532_v9  ;;  %4880 = vst [vmem:[#allocation7 + $0x21] sm:$0x7f] %v4879_v39  ;;  %v4845_v21 = vmax.f32 %v4786_v30, %v4818_v2 }
 0x4df   : > { %v4729_v20 = vmax.f32 %v4697_v52, 0.0  ;;  %v9904_v15 = vadd.f32 %v11326_v7, %v8657_v51  ;;  %v4258_v27 = vpop.f32.mrb[17].mxu1  ;;  %8795 = vmatmul.mubr.f32.gmra.mrb[120].mxu0 %v11529_v34 }
 0x4e0   : > { %v4728_v12 = vmax.f32 %v4696_v42, 0.0  ;;  %v9905_v4 = vadd.f32 %v11328_v29, %v4258_v27 }
 0x4e1   : > { %v4788_v54 = vld [vmem:[#allocation5 + $0x50] ss:$2 sm:$0xff]  ;;  %v4820_v44 = vld [vmem:[#allocation5 + $0x51] ss:$2 sm:$0xff]  ;;  %4761 = vst [vmem:[#allocation5 + $0x78] sm:$0xff] %v4729_v20  ;;  %v4699_v45 = vadd.f32 %v9904_v15, %v11497_v47 }
 0x4e2   : > { %v4846_v63 = vmax.f32 %v4788_v54, %v4820_v44  ;;  %4760 = vst [vmem:[#allocation5 + $0x70] sm:$0xff] %v4728_v12  ;;  %v4698_v13 = vadd.f32 %v9905_v4, %v11497_v47  ;;  %v8660_v61 = vpop.f32.mrb[18].mxu1 }
 0x4e3   : > { %v4731_v14 = vmax.f32 %v4699_v45, 0.0  ;;  %v9906_v7 = vadd.f32 %v11338_v40, %v8660_v61  ;;  %v4268_v55 = vpop.f32.mrb[19].mxu1 }
 0x4e4   : > { %v4730_v3 = vmax.f32 %v4698_v13, 0.0  ;;  %v9907_v22 = vadd.f32 %v11340_v43, %v4268_v55  ;;  %v4883_v29 = vmax.f32 %v4845_v21, %v4846_v63 }
 0x4e5   : > { %4763 = vst [vmem:[#allocation5 + $0x88] sm:$0xff] %v4731_v14  ;;  %v4701_v58 = vadd.f32 %v9906_v7, %v11497_v47  ;;  %v11546_v31 = vld [vmem:[#allocation7 + $0x21] sm:$0xff] }
 0x4e6   : > { %4762 = vst [vmem:[#allocation5 + $0x80] sm:$0xff] %v4730_v3  ;;  %v4700_v16 = vadd.f32 %v9907_v22, %v11497_v47  ;;  %8797 = vmatprep.mubr.f32.mxu0 %v11546_v31  ;;  %4884 = vst [vmem:[#allocation7 + $0x31] sm:$0x7f] %v4883_v29  ;;  %v4790_v41 = vld [vmem:[#allocation5 + $0x60] ss:$2 sm:$0xff] }
 0x4e7   : > { %v4822_v40 = vld [vmem:[#allocation5 + $0x61] ss:$2 sm:$0xff]  ;;  %v4733_v8 = vmax.f32 %v4701_v58, 0.0  ;;  %8798 = vmatmul.mubr.f32.gmra.mrb[122].mxu0 %v11543_v35 }
 0x4e8   : > { %v4732_v43 = vmax.f32 %v4700_v16, 0.0  ;;  %v4847_v59 = vmax.f32 %v4790_v41, %v4822_v40 }
 0x4e9   : > { %v4792_v57 = vld [vmem:[#allocation5 + $0x70] ss:$2 sm:$0xff]  ;;  %v4824_v56 = vld [vmem:[#allocation5 + $0x71] ss:$2 sm:$0xff]  ;;  %4765 = vst [vmem:[#allocation5 + $0x98] sm:$0xff] %v4733_v8 }
 0x4ea   : > { %v4848_v23 = vmax.f32 %v4792_v57, %v4824_v56  ;;  %4764 = vst [vmem:[#allocation5 + $0x90] sm:$0xff] %v4732_v43 }
 0x4ec   : > { %v4887_v53 = vmax.f32 %v4847_v59, %v4848_v23  ;;  %v11577_v59 = vld [vmem:[#allocation7 + $0x69] sm:$0xff] }
 0x4ed   : > { %v11553_v26 = vld [vmem:[#allocation7 + $0x31] sm:$0xff]  ;;  %v4794_v5 = vld [vmem:[#allocation5 + $0x80] ss:$2 sm:$0xff]  ;;  %v4826_v11 = vld [vmem:[#allocation5 + $0x81] ss:$2 sm:$0xff] }
 0x4ee   : > { %8800 = vmatprep.mubr.f32.mxu0 %v11553_v26  ;;  %4888 = vst [vmem:[#allocation7 + $0x41] sm:$0x7f] %v4887_v53  ;;  %v4849_v17 = vmax.f32 %v4794_v5, %v4826_v11  ;;  %v11583_v53 = vld [vmem:[#allocation7 + $0x79] sm:$0xff]  ;;  %v11587_v11 = vld [vmem:[#allocation7 + $0x81] sm:$0xff] }
 0x4ef   : > { %8801 = vmatmul.mubr.f32.gmra.mrb[124].mxu0 %v11551_v48 }
 0x4f1   : > { %v4796_v46 = vld [vmem:[#allocation5 + $0x90] ss:$2 sm:$0xff]  ;;  %v4828_v1 = vld [vmem:[#allocation5 + $0x91] ss:$2 sm:$0xff] }
 0x4f2   : > { %v4850_v0 = vmax.f32 %v4796_v46, %v4828_v1  ;;  %v11592_v46 = vld [vmem:[#allocation7 + $0x89] sm:$0xff]  ;;  %v5301_v1 = vld [vmem:[#allocation16 + $0x110] sm:$0xff] }
 0x4f4   : > { %v4891_v6 = vmax.f32 %v4849_v17, %v4850_v0  ;;  %v5302_v17 = vld [vmem:[#allocation16 + $0x118] sm:$0xff] }
 0x4f5   : > { %v11559_v62 = vld [vmem:[#allocation7 + $0x41] sm:$0xff]  ;;  %v9652_v0 = vpack.c.bf16 %v5302_v17, %v5301_v1  ;;  %v5516_v1 = vld [vmem:[#allocation16 + $0x1c8] sm:$0xff] }
 0x4f6   : > { %8803 = vmatprep.mubr.f32.mxu0 %v11559_v62  ;;  %4892 = vst [vmem:[#allocation7 + $0x51] sm:$0x7f] %v4891_v6  ;;  %v5303_v6 = vld [vmem:[#allocation16 + $0x120] sm:$0xff] }
 0x4f7   : > { %8804 = vmatmul.mubr.f32.gmra.mrb[126].mxu0 %v11557_v28  ;;  %v11640_v17 = vld [vmem:[#allocation7 + $0x32] sm:$0xff] }
 0x4fd   : > { %v11565_v18 = vld [vmem:[#allocation7 + $0x51] sm:$0xff] }
 0x4fe   : > { %v8743_v49 = vpop.f32.mrb[20].mxu1  ;;  %8806 = vmatprep.mubr.f32.mxu0 %v11565_v18 }
 0x4ff   : > { %v4703_v50 = vadd.f32 %v8743_v49, %v11497_v47  ;;  %v4584_v60 = vpop.f32.mrb[21].mxu1  ;;  %8807 = vmatmul.mubr.f32.gmra.mrb[128].mxu0 %v11563_v24  ;;  %v5304_v49 = vld [vmem:[#allocation16 + $0x128] sm:$0xff] }
 0x500   : > { %v4702_v38 = vadd.f32 %v11497_v47, %v4584_v60  ;;  %v9656_v60 = vpack.c.bf16 %v5304_v49, %v5303_v6  ;;  %v11645_v49 = vld [vmem:[#allocation7 + $0x3a] sm:$0xff] }
 0x501   : > { %v4735_v32 = vmax.f32 %v4703_v50, 0.0  ;;  %v11597_v50 = vld [vmem:[#allocation7 + $0x10] sm:$0xff] }
 0x502   : > { %v4734_v10 = vmax.f32 %v4702_v38, 0.0  ;;  %v8746_v19 = vpop.f32.mrb[22].mxu1  ;;  %v5305_v38 = vld [vmem:[#allocation16 + $0x130] sm:$0xff] }
 0x503   : > { %4767 = vst [vmem:[#allocation5 + $0xa8] sm:$0xff] %v4735_v32  ;;  %v4705_v37 = vadd.f32 %v8746_v19, %v11497_v47  ;;  %v4594_v33 = vpop.f32.mrb[23].mxu1  ;;  %v5306_v32 = vld [vmem:[#allocation16 + $0x138] sm:$0xff] }
 0x504   : > { %4766 = vst [vmem:[#allocation5 + $0xa0] sm:$0xff] %v4734_v10  ;;  %v4704_v39 = vadd.f32 %v11497_v47, %v4594_v33  ;;  %v11602_v10 = vld [vmem:[#allocation7 + $0x20] sm:$0xff]  ;;  %v9660_v19 = vpack.c.bf16 %v5306_v32, %v5305_v38  ;;  %v5308_v33 = vld [vmem:[#allocation16 + $0x148] sm:$0xff] }
 0x505   : > { %v4737_v52 = vmax.f32 %v4705_v37, 0.0  ;;  %v5307_v37 = vld [vmem:[#allocation16 + $0x140] sm:$0xff]  ;;  %v5518_v38 = vld [vmem:[#allocation16 + $0x1d8] sm:$0xff] }
 0x506   : > { %v4736_v42 = vmax.f32 %v4704_v39, 0.0  ;;  %v8749_v51 = vpop.f32.mrb[24].mxu1  ;;  %v9664_v39 = vpack.c.bf16 %v5308_v33, %v5307_v37  ;;  %v11648_v32 = vld [vmem:[#allocation7 + $0x42] sm:$0xff]  ;;  %v11651_v37 = vld [vmem:[#allocation7 + $0x4a] sm:$0xff] }
 0x507   : > { %4769 = vst [vmem:[#allocation5 + $0xb8] sm:$0xff] %v4737_v52  ;;  %v4707_v30 = vadd.f32 %v8749_v51, %v11497_v47  ;;  %v4604_v2 = vpop.f32.mrb[25].mxu1  ;;  %v5310_v51 = vld [vmem:[#allocation16 + $0x158] sm:$0xff]  ;;  %v5519_v33 = vld [vmem:[#allocation16 + $0x1e0] sm:$0xff] }
 0x508   : > { %4768 = vst [vmem:[#allocation5 + $0xb0] sm:$0xff] %v4736_v42  ;;  %v4706_v20 = vadd.f32 %v11497_v47, %v4604_v2  ;;  %v5309_v42 = vld [vmem:[#allocation16 + $0x150] sm:$0xff] }
 0x509   : > { %v4739_v15 = vmax.f32 %v4707_v30, 0.0  ;;  %v11610_v30 = vld [vmem:[#allocation7 + $0x40] sm:$0xff]  ;;  %v9668_v2 = vpack.c.bf16 %v5310_v51, %v5309_v42 }
 0x50a   : > { %v4738_v27 = vmax.f32 %v4706_v20, 0.0  ;;  %v8752_v12 = vpop.f32.mrb[26].mxu1  ;;  %v5311_v20 = vld [vmem:[#allocation16 + $0x160] sm:$0xff] }
 0x50b   : > { %4771 = vst [vmem:[#allocation5 + $0xc8] sm:$0xff] %v4739_v15  ;;  %v4709_v4 = vadd.f32 %v8752_v12, %v11497_v47  ;;  %v4614_v54 = vpop.f32.mrb[27].mxu1  ;;  %v4798_v45 = vld [vmem:[#allocation5 + $0xa0] ss:$2 sm:$0xff]  ;;  %v4830_v21 = vld [vmem:[#allocation5 + $0xa1] ss:$2 sm:$0xff] }
 0x50c   : > { %4770 = vst [vmem:[#allocation5 + $0xc0] sm:$0xff] %v4738_v27  ;;  %v4708_v44 = vadd.f32 %v11497_v47, %v4614_v54  ;;  %v4851_v3 = vmax.f32 %v4798_v45, %v4830_v21  ;;  %v5312_v15 = vld [vmem:[#allocation16 + $0x168] sm:$0xff]  ;;  %v5314_v54 = vld [vmem:[#allocation16 + $0x178] sm:$0xff]  ;;  %v5507_v21 = vld [vmem:[#allocation16 + $0x180] sm:$0xff] }
 0x50d   : > { %v4741_v63 = vmax.f32 %v4709_v4, 0.0  ;;  %v11614_v27 = vld [vmem:[#allocation7 + $0x50] sm:$0xff]  ;;  %v9672_v12 = vpack.c.bf16 %v5312_v15, %v5311_v20  ;;  %v5313_v4 = vld [vmem:[#allocation16 + $0x170] sm:$0xff]  ;;  %v5522_v20 = vld [vmem:[#allocation16 + $0x1f8] sm:$0xff] }
 0x50e   : > { %v4740_v13 = vmax.f32 %v4708_v44, 0.0  ;;  %v8755_v61 = vpop.f32.mrb[28].mxu1  ;;  %v9676_v45 = vpack.c.bf16 %v5314_v54, %v5313_v4  ;;  %v5715_v54 = vld [vmem:[#allocation16 + $0x200] sm:$0xff] }
 0x50f   : > { %v4800_v14 = vld [vmem:[#allocation5 + $0xb0] ss:$2 sm:$0xff]  ;;  %v4832_v7 = vld [vmem:[#allocation5 + $0xb1] ss:$2 sm:$0xff]  ;;  %4773 = vst [vmem:[#allocation5 + $0xd8] sm:$0xff] %v4741_v63  ;;  %v4624_v55 = vpop.f32.mrb[29].mxu1 }
 0x510   : > { %v4852_v22 = vmax.f32 %v4800_v14, %v4832_v7  ;;  %4772 = vst [vmem:[#allocation5 + $0xd0] sm:$0xff] %v4740_v13  ;;  %v5508_v63 = vld [vmem:[#allocation16 + $0x188] sm:$0xff]  ;;  %v5280_v14 = vld [vmem:[#allocation7 + $0x2] sm:$0xff] }
 0x511   : > { %v9680_v61 = vpack.c.bf16 %v5508_v63, %v5507_v21  ;;  %v5509_v7 = vld [vmem:[#allocation16 + $0x190] sm:$0xff]  ;;  %v5510_v55 = vld [vmem:[#allocation16 + $0x198] sm:$0xff] }
 0x512   : > { %v4895_v29 = vmax.f32 %v4851_v3, %v4852_v22  ;;  %v8758_v58 = vpop.f32.mrb[30].mxu1  ;;  %v9684_v3 = vpack.c.bf16 %v5510_v55, %v5509_v7  ;;  %v5281_v22 = vld [vmem:[#allocation7 + $0xa] sm:$0xff]  ;;  %v11669_v63 = vld [vmem:[#allocation7 + $0x7a] sm:$0xff] }
 0x513   : > { %v4634_v16 = vpop.f32.mrb[31].mxu1  ;;  %v4802_v41 = vld [vmem:[#allocation5 + $0xc0] ss:$2 sm:$0xff]  ;;  %v4834_v40 = vld [vmem:[#allocation5 + $0xc1] ss:$2 sm:$0xff]  ;;  %v5512_v58 = vld [vmem:[#allocation16 + $0x1a8] sm:$0xff] }
 0x514   : > { %4896 = vst [vmem:[#allocation7 + $0x61] sm:$0x7f] %v4895_v29  ;;  %v4853_v43 = vmax.f32 %v4802_v41, %v4834_v40  ;;  %v5511_v29 = vld [vmem:[#allocation16 + $0x1a0] sm:$0xff]  ;;  %v11631_v40 = vld [vmem:[#allocation7 + $0x1a] sm:$0xff] }
 0x515   : > { %v11628_v16 = vld [vmem:[#allocation7 + $0x12] sm:$0xff]  ;;  %v9688_v41 = vpack.c.bf16 %v5512_v58, %v5511_v29  ;;  %v11675_v7 = vld [vmem:[#allocation7 + $0x8a] sm:$0xff]  ;;  %v5717_v55 = vld [vmem:[#allocation16 + $0x210] sm:$0xff] }
 0x516   : > { %v5719_v29 = vld [vmem:[#allocation16 + $0x220] sm:$0xff]  ;;  %v5720_v58 = vld [vmem:[#allocation16 + $0x228] sm:$0xff] }
 0x517   : > { %v4804_v8 = vld [vmem:[#allocation5 + $0xd0] ss:$2 sm:$0xff]  ;;  %v4836_v47 = vld [vmem:[#allocation5 + $0xd1] ss:$2 sm:$0xff] }
 0x518   : > { %v4854_v57 = vmax.f32 %v4804_v8, %v4836_v47  ;;  %v5513_v8 = vld [vmem:[#allocation16 + $0x1b0] sm:$0xff]  ;;  %v5514_v47 = vld [vmem:[#allocation16 + $0x1b8] sm:$0xff] }
 0x51a   : > { %v4899_v56 = vmax.f32 %v4853_v43, %v4854_v57  ;;  %v9692_v43 = vpack.c.bf16 %v5514_v47, %v5513_v8  ;;  %v11637_v57 = vld [vmem:[#allocation7 + $0x2a] sm:$0xff]  ;;  %v9720_v8 = vpack.c.bf16 %v5720_v58, %v5719_v29  ;;  %v5721_v47 = vld [vmem:[#allocation16 + $0x230] sm:$0xff]  ;;  %v5928_v58 = vld [vmem:[#allocation16 + $0x2a8] sm:$0xff] }
 0x51b   : > { %v11579_v23 = vld [vmem:[#allocation7 + $0x61] sm:$0xff]  ;;  %v5927_v29 = vld [vmem:[#allocation16 + $0x2a0] sm:$0xff] }
 0x51c   : > { %4900 = vst [vmem:[#allocation7 + $0x71] sm:$0x7f] %v4899_v56  ;;  %8809 = vmatprep.mubr.f32.mxu0 %v11579_v23  ;;  %v11618_v44 = vld [vmem:[#allocation7 + $0x60] sm:$0xff]  ;;  %v5515_v56 = vld [vmem:[#allocation16 + $0x1c0] sm:$0xff] }
 0x51d   : > { %8810 = vmatmul.mubr.f32.gmra.mrb[130].mxu0 %v11577_v59  ;;  %v9696_v6 = vpack.c.bf16 %v5516_v1, %v5515_v56  ;;  %v11657_v51 = vld [vmem:[#allocation7 + $0x5a] sm:$0xff]  ;;  %v11660_v15 = vld [vmem:[#allocation7 + $0x62] sm:$0xff]  ;;  %v5723_v56 = vld [vmem:[#allocation16 + $0x240] sm:$0xff] }
 0x51e   : > { %v5724_v1 = vld [vmem:[#allocation16 + $0x248] sm:$0xff] }
 0x521   : > { %v8793_v52 = vpop.f32.mrb[118].mxu0 }
 0x522   : > { %v11654_v52 = vld [vmem:[#allocation7 + $0x52] sm:$0xff] }
 0x523   : > { %v11585_v5 = vld [vmem:[#allocation7 + $0x71] sm:$0xff] }
 0x524   : > { %8812 = vmatprep.mubr.f32.mxu0 %v11585_v5  ;;  %v11622_v13 = vld [vmem:[#allocation7 + $0x70] sm:$0xff] }
 0x525   : > { %8813 = vmatmul.mubr.f32.gmra.mrb[132].mxu0 %v11583_v53  ;;  %v11663_v4 = vld [vmem:[#allocation7 + $0x6a] sm:$0xff]  ;;  %v11666_v21 = vld [vmem:[#allocation7 + $0x72] sm:$0xff] }
 0x526   : > { %8815 = vmatprep.mubr.f32.mxu0 %v11587_v11 }
 0x529   : > { %8816 = vmatmul.mubr.f32.gmra.mrb[134].mxu0 %v11592_v46 }
 0x52a   : > { %8850 = vmatprep.mubr.f32.mxu0 %v11448_v25 }
 0x52d   : > { %8851 = vmatmul.mubr.f32.vlgmr.msra.gmra.mrb[136].mxu0 %v11448_v25 }
 0x52e   : > { %9651 = vmatpush3.bf16.msra.mxu0 %v11494_v36  ;;  %8853 = vmatprep.mubr.f32.mxu0 %v11597_v50  ;;  %v11606_v36 = vld [vmem:[#allocation7 + $0x30] sm:$0xff] }
 0x52f   : > { %9653 = vmatprep.subr.bf16.mxu0 %v9652_v0 }
 0x531   : > { %8854 = vmatmul.mubr.f32.gmra.mrb[138].mxu0 %v11448_v25 }
 0x532   : > { %8856 = vmatprep.mubr.f32.mxu0 %v11602_v10  ;;  %9655 = vmatpush3.bf16.msra.mxu0 %v9652_v0  ;;  %v11642_v0 = vpop.f32.mrb[119].mxu0 }
 0x533   : > { %9657 = vmatprep.subr.bf16.mxu0 %v9656_v60 }
 0x535   : > { %8857 = vmatmul.mubr.f32.gmra.mrb[140].mxu0 %v11448_v25 }
 0x536   : > { %8859 = vmatprep.mubr.f32.mxu0 %v11606_v36  ;;  %9659 = vmatpush3.bf16.msra.mxu0 %v9656_v60  ;;  %v5517_v60 = vld [vmem:[#allocation16 + $0x1d0] sm:$0xff] }
 0x537   : > { %9661 = vmatprep.subr.bf16.mxu0 %v9660_v19 }
 0x539   : > { %8860 = vmatmul.mubr.f32.gmra.mrb[142].mxu0 %v11448_v25 }
 0x53a   : > { %8862 = vmatprep.mubr.f32.mxu0 %v11610_v30  ;;  %9663 = vmatpush3.bf16.msra.mxu0 %v9660_v19  ;;  %v9700_v19 = vpack.c.bf16 %v5518_v38, %v5517_v60  ;;  %v5725_v60 = vld [vmem:[#allocation16 + $0x250] sm:$0xff]  ;;  %v5726_v38 = vld [vmem:[#allocation16 + $0x258] sm:$0xff] }
 0x53b   : > { %9665 = vmatprep.subr.bf16.mxu0 %v9664_v39 }
 0x53d   : > { %8863 = vmatmul.mubr.f32.gmra.mrb[144].mxu0 %v11448_v25 }
 0x53e   : > { %8865 = vmatprep.mubr.f32.mxu0 %v11614_v27  ;;  %9667 = vmatpush3.bf16.msra.mxu0 %v9664_v39  ;;  %v5520_v39 = vld [vmem:[#allocation16 + $0x1e8] sm:$0xff] }
 0x53f   : > { %9669 = vmatprep.subr.bf16.mxu0 %v9668_v2  ;;  %v9704_v42 = vpack.c.bf16 %v5520_v39, %v5519_v33  ;;  %v5727_v33 = vld [vmem:[#allocation16 + $0x260] sm:$0xff]  ;;  %v5728_v39 = vld [vmem:[#allocation16 + $0x268] sm:$0xff] }
 0x541   : > { %8866 = vmatmul.mubr.f32.gmra.mrb[146].mxu0 %v11448_v25 }
 0x542   : > { %8868 = vmatprep.mubr.f32.mxu0 %v11618_v44  ;;  %9671 = vmatpush3.bf16.msra.mxu0 %v9668_v2  ;;  %v5521_v2 = vld [vmem:[#allocation16 + $0x1f0] sm:$0xff] }
 0x543   : > { %9673 = vmatprep.subr.bf16.mxu0 %v9672_v12 }
 0x545   : > { %8869 = vmatmul.mubr.f32.gmra.mrb[148].mxu0 %v11448_v25 }
 0x546   : > { %8871 = vmatprep.mubr.f32.mxu0 %v11622_v13  ;;  %9675 = vmatpush3.bf16.msra.mxu0 %v9672_v12  ;;  %v9708_v12 = vpack.c.bf16 %v5522_v20, %v5521_v2  ;;  %v5729_v2 = vld [vmem:[#allocation16 + $0x270] sm:$0xff]  ;;  %v5730_v20 = vld [vmem:[#allocation16 + $0x278] sm:$0xff] }
 0x547   : > { %9677 = vmatprep.subr.bf16.mxu0 %v9676_v45 }
 0x549   : > { %8872 = vmatmul.mubr.f32.gmra.mrb[150].mxu0 %v11448_v25 }
 0x54a   : > { %8874 = vmatprep.mubr.f32.mxu0 %v11448_v25  ;;  %9679 = vmatpush3.bf16.msra.mxu0 %v9676_v45  ;;  %v5716_v45 = vld [vmem:[#allocation16 + $0x208] sm:$0xff] }
 0x54b   : > { %9681 = vmatprep.subr.bf16.mxu0 %v9680_v61 }
 0x54d   : > { %8875 = vmatmul.mubr.f32.gmra.mrb[152].mxu0 %v11448_v25  ;;  %v11634_v25 = vld [vmem:[#allocation7 + $0x22] sm:$0xff] }
 0x54e   : > { %8909 = vmatprep.mubr.f32.mxu0 %v5280_v14  ;;  %v9712_v14 = vpack.c.bf16 %v5716_v45, %v5715_v54  ;;  %v5923_v54 = vld [vmem:[#allocation16 + $0x280] sm:$0xff]  ;;  %v5924_v45 = vld [vmem:[#allocation16 + $0x288] sm:$0xff] }
 0x551   : > { %8910 = vmatmul.mubr.f32.vlgmr.msra.gmra.mrb[154].mxu0 %v5281_v22 }
 0x552   : > { %9683 = vmatpush3.bf16.msra.mxu0 %v9680_v61  ;;  %8912 = vmatprep.mubr.f32.mxu0 %v11628_v16  ;;  %v11671_v61 = vld [vmem:[#allocation7 + $0x82] sm:$0xff] }
 0x553   : > { %9685 = vmatprep.subr.bf16.mxu0 %v9684_v3 }
 0x555   : > { %8913 = vmatmul.mubr.f32.gmra.mrb[156].mxu0 %v11631_v40 }
 0x556   : > { %8915 = vmatprep.mubr.f32.mxu0 %v11634_v25  ;;  %9687 = vmatpush3.bf16.msra.mxu0 %v9684_v3  ;;  %v5718_v3 = vld [vmem:[#allocation16 + $0x218] sm:$0xff] }
 0x557   : > { %9689 = vmatprep.subr.bf16.mxu0 %v9688_v41  ;;  %v9716_v22 = vpack.c.bf16 %v5718_v3, %v5717_v55  ;;  %v5925_v55 = vld [vmem:[#allocation16 + $0x290] sm:$0xff]  ;;  %v5926_v3 = vld [vmem:[#allocation16 + $0x298] sm:$0xff] }
 0x559   : > { %8916 = vmatmul.mubr.f32.gmra.mrb[158].mxu0 %v11637_v57 }
 0x55a   : > { %8918 = vmatprep.mubr.f32.mxu0 %v11640_v17  ;;  %9691 = vmatpush3.bf16.msra.mxu0 %v9688_v41  ;;  %v11679_v41 = vld [vmem:[#allocation4] sm:$0xff] }
 0x55b   : > { %9693 = vmatprep.subr.bf16.mxu0 %v9692_v43 }
 0x55d   : > { %8919 = vmatmul.mubr.f32.gmra.mrb[160].mxu0 %v11645_v49 }
 0x55e   : > { %8921 = vmatprep.mubr.f32.mxu0 %v11648_v32  ;;  %9695 = vmatpush3.bf16.msra.mxu0 %v9692_v43  ;;  %v5722_v43 = vld [vmem:[#allocation16 + $0x238] sm:$0xff] }
 0x55f   : > { %9697 = vmatprep.subr.bf16.mxu0 %v9696_v6 }
 0x561   : > { %8922 = vmatmul.mubr.f32.gmra.mrb[162].mxu0 %v11651_v37 }
 0x562   : > { %8924 = vmatprep.mubr.f32.mxu0 %v11654_v52  ;;  %9699 = vmatpush3.bf16.msra.mxu0 %v9696_v6  ;;  %v9728_v6 = vpack.c.bf16 %v5724_v1, %v5723_v56  ;;  %v5932_v56 = vld [vmem:[#allocation16 + $0x2c8] sm:$0xff]  ;;  %v5934_v1 = vld [vmem:[#allocation16 + $0x2d8] sm:$0xff] }
 0x563   : > { %9701 = vmatprep.subr.bf16.mxu0 %v9700_v19 }
 0x565   : > { %8925 = vmatmul.mubr.f32.gmra.mrb[164].mxu0 %v11657_v51 }
 0x566   : > { %8927 = vmatprep.mubr.f32.mxu0 %v11660_v15  ;;  %9703 = vmatpush3.bf16.msra.mxu0 %v9700_v19  ;;  %v9732_v19 = vpack.c.bf16 %v5726_v38, %v5725_v60  ;;  %v5938_v60 = vld [vmem:[#allocation16 + $0x2f8] sm:$0xff]  ;;  %v6132_v38 = vld [vmem:[#allocation16 + $0x308] sm:$0xff] }
 0x567   : > { %9705 = vmatprep.subr.bf16.mxu0 %v9704_v42 }
 0x569   : > { %8928 = vmatmul.mubr.f32.gmra.mrb[166].mxu0 %v11663_v4 }
 0x56a   : > { %8930 = vmatprep.mubr.f32.mxu0 %v11666_v21  ;;  %9707 = vmatpush3.bf16.msra.mxu0 %v9704_v42  ;;  %v9736_v42 = vpack.c.bf16 %v5728_v39, %v5727_v33 }
 0x56b   : > { %9709 = vmatprep.subr.bf16.mxu0 %v9708_v12 }
 0x56d   : > { %8931 = vmatmul.mubr.f32.gmra.mrb[168].mxu0 %v11669_v63 }
 0x56e   : > { %8933 = vmatprep.mubr.f32.mxu0 %v11671_v61  ;;  %9711 = vmatpush3.bf16.msra.mxu0 %v9708_v12  ;;  %v9740_v12 = vpack.c.bf16 %v5730_v20, %v5729_v2  ;;  %v6135_v2 = vld [vmem:[#allocation16 + $0x320] sm:$0xff]  ;;  %v6136_v20 = vld [vmem:[#allocation16 + $0x328] sm:$0xff] }
 0x56f   : > { %9713 = vmatprep.subr.bf16.mxu0 %v9712_v14 }
 0x571   : > { %8934 = vmatmul.mubr.f32.gmra.mrb[170].mxu0 %v11675_v7 }
 0x572   : > { %8968 = vmatprep.mubr.f32.mxu0 %v11597_v50  ;;  %v9724_v50 = vpack.c.bf16 %v5722_v43, %v5721_v47  ;;  %v5929_v47 = vld [vmem:[#allocation16 + $0x2b0] sm:$0xff]  ;;  %v5930_v43 = vld [vmem:[#allocation16 + $0x2b8] sm:$0xff] }
 0x575   : > { %8969 = vmatmul.mubr.f32.vlgmr.msra.gmra.mrb[172].mxu0 %v11679_v41 }
 0x576   : > { %9715 = vmatpush3.bf16.msra.mxu0 %v9712_v14  ;;  %8971 = vmatprep.mubr.f32.mxu0 %v11602_v10  ;;  %v9744_v14 = vpack.c.bf16 %v5924_v45, %v5923_v54  ;;  %v6138_v54 = vld [vmem:[#allocation16 + $0x338] sm:$0xff] }
 0x577   : > { %9717 = vmatprep.subr.bf16.mxu0 %v9716_v22 }
 0x579   : > { %8972 = vmatmul.mubr.f32.gmra.mrb[174].mxu0 %v11679_v41 }
 0x57a   : > { %8974 = vmatprep.mubr.f32.mxu0 %v11606_v36  ;;  %9719 = vmatpush3.bf16.msra.mxu0 %v9716_v22  ;;  %v9748_v22 = vpack.c.bf16 %v5926_v3, %v5925_v55  ;;  %v6139_v55 = vld [vmem:[#allocation16 + $0x340] sm:$0xff]  ;;  %v6140_v3 = vld [vmem:[#allocation16 + $0x348] sm:$0xff] }
 0x57b   : > { %9721 = vmatprep.subr.bf16.mxu0 %v9720_v8 }
 0x57d   : > { %8975 = vmatmul.mubr.f32.gmra.mrb[176].mxu0 %v11679_v41 }
 0x57e   : > { %8977 = vmatprep.mubr.f32.mxu0 %v11610_v30  ;;  %9723 = vmatpush3.bf16.msra.mxu0 %v9720_v8  ;;  %v9752_v8 = vpack.c.bf16 %v5928_v58, %v5927_v29  ;;  %v6142_v29 = vld [vmem:[#allocation16 + $0x358] sm:$0xff] }
 0x57f   : > { %9725 = vmatprep.subr.bf16.mxu0 %v9724_v50 }
 0x581   : > { %8978 = vmatmul.mubr.f32.gmra.mrb[178].mxu0 %v11679_v41 }
 0x582   : > { %8980 = vmatprep.mubr.f32.mxu0 %v11614_v27  ;;  %9727 = vmatpush3.bf16.msra.mxu0 %v9724_v50  ;;  %v9756_v50 = vpack.c.bf16 %v5930_v43, %v5929_v47  ;;  %v6143_v43 = vld [vmem:[#allocation16 + $0x360] sm:$0xff] }
 0x583   : > { %9729 = vmatprep.subr.bf16.mxu0 %v9728_v6 }
 0x585   : > { %8981 = vmatmul.mubr.f32.gmra.mrb[180].mxu0 %v11679_v41 }
 0x586   : > { %8983 = vmatprep.mubr.f32.mxu0 %v11618_v44  ;;  %9731 = vmatpush3.bf16.msra.mxu0 %v9728_v6  ;;  %v5936_v6 = vld [vmem:[#allocation16 + $0x2e8] sm:$0xff] }
 0x587   : > { %9733 = vmatprep.subr.bf16.mxu0 %v9732_v19 }
 0x589   : > { %8984 = vmatmul.mubr.f32.gmra.mrb[182].mxu0 %v11679_v41 }
 0x58a   : > { %8986 = vmatprep.mubr.f32.mxu0 %v11622_v13  ;;  %9735 = vmatpush3.bf16.msra.mxu0 %v9732_v19 }
 0x58b   : > { %9737 = vmatprep.subr.bf16.mxu0 %v9736_v42 }
 0x58d   : > { %8987 = vmatmul.mubr.f32.gmra.mrb[184].mxu0 %v11679_v41 }
 0x58e   : > { %8989 = vmatprep.mubr.f32.mxu0 %v11679_v41  ;;  %9739 = vmatpush3.bf16.msra.mxu0 %v9736_v42 }
 0x58f   : > { %9741 = vmatprep.subr.bf16.mxu0 %v9740_v12 }
 0x591   : > { %8990 = vmatmul.mubr.f32.gmra.mrb[186].mxu0 %v11679_v41 }
 0x592   : > { %8992 = vmatprep.mubr.f32.mxu0 %v11679_v41  ;;  %9743 = vmatpush3.bf16.msra.mxu0 %v9740_v12  ;;  %v6137_v12 = vld [vmem:[#allocation16 + $0x330] sm:$0xff] }
 0x593   : > { %9745 = vmatprep.subr.bf16.mxu0 %v9744_v14  ;;  %v9788_v45 = vpack.c.bf16 %v6138_v54, %v6137_v12  ;;  %v6351_v54 = vld [vmem:[#allocation16 + $0x3e0] sm:$0xff] }
 0x595   : > { %8993 = vmatmul.mubr.f32.gmra.mrb[188].mxu0 %v11679_v41 }
 0x596   : > { %9027 = vmatprep.mubr.f32.mxu0 %v11532_v9  ;;  %v5931_v9 = vld [vmem:[#allocation16 + $0x2c0] sm:$0xff] }
 0x599   : > { %9028 = vmatmul.mubr.f32.vlgmr.msra.gmra.mrb[190].mxu0 %v11529_v34  ;;  %v9760_v34 = vpack.c.bf16 %v5932_v56, %v5931_v9  ;;  %v6145_v56 = vld [vmem:[#allocation16 + $0x370] sm:$0xff] }
 0x59a   : > { %9747 = vmatpush3.bf16.msra.mxu0 %v9744_v14  ;;  %9030 = vmatprep.mubr.f32.mxu0 %v11546_v31  ;;  %v5933_v31 = vld [vmem:[#allocation16 + $0x2d0] sm:$0xff] }
 0x59b   : > { %9749 = vmatprep.subr.bf16.mxu0 %v9748_v22 }
 0x59d   : > { %9031 = vmatmul.mubr.f32.gmra.mrb[192].mxu0 %v11543_v35  ;;  %v9764_v35 = vpack.c.bf16 %v5934_v1, %v5933_v31 }
 0x59e   : > { %9033 = vmatprep.mubr.f32.mxu0 %v11553_v26  ;;  %9751 = vmatpush3.bf16.msra.mxu0 %v9748_v22  ;;  %v5935_v26 = vld [vmem:[#allocation16 + $0x2e0] sm:$0xff]  ;;  %v6141_v22 = vld [vmem:[#allocation16 + $0x350] sm:$0xff] }
 0x59f   : > { %9753 = vmatprep.subr.bf16.mxu0 %v9752_v8 }
 0x5a1   : > { %9034 = vmatmul.mubr.f32.gmra.mrb[194].mxu0 %v11551_v48  ;;  %v9768_v48 = vpack.c.bf16 %v5936_v6, %v5935_v26  ;;  %v6339_v26 = vld [vmem:[#allocation16 + $0x380] sm:$0xff]  ;;  %v6340_v6 = vld [vmem:[#allocation16 + $0x388] sm:$0xff] }
 0x5a2   : > { %9036 = vmatprep.mubr.f32.mxu0 %v11559_v62  ;;  %9755 = vmatpush3.bf16.msra.mxu0 %v9752_v8  ;;  %v5937_v62 = vld [vmem:[#allocation16 + $0x2f0] sm:$0xff]  ;;  %v9796_v8 = vpack.c.bf16 %v6142_v29, %v6141_v22  ;;  %v6547_v22 = vld [vmem:[#allocation16 + $0x400] sm:$0xff]  ;;  %v6548_v29 = vld [vmem:[#allocation16 + $0x408] sm:$0xff] }
 0x5a3   : > { %9757 = vmatprep.subr.bf16.mxu0 %v9756_v50 }
 0x5a5   : > { %9037 = vmatmul.mubr.f32.gmra.mrb[196].mxu0 %v11557_v28  ;;  %v9772_v28 = vpack.c.bf16 %v5938_v60, %v5937_v62  ;;  %v9808_v62 = vpack.c.bf16 %v6340_v6, %v6339_v26  ;;  %v11749_v60 = vld [vmem:[#allocation7 + $0x9a] sm:$0xff]  ;;  %v6321_v26 = vld [vmem:[#allocation7 + $0x29] sm:$0xff] }
 0x5a6   : > { %9039 = vmatprep.mubr.f32.mxu0 %v11565_v18  ;;  %9759 = vmatpush3.bf16.msra.mxu0 %v9756_v50  ;;  %v6131_v18 = vld [vmem:[#allocation16 + $0x300] sm:$0xff]  ;;  %v6144_v50 = vld [vmem:[#allocation16 + $0x368] sm:$0xff] }
 0x5a7   : > { %9761 = vmatprep.subr.bf16.mxu0 %v9760_v34  ;;  %v9776_v19 = vpack.c.bf16 %v6132_v38, %v6131_v18  ;;  %v9800_v9 = vpack.c.bf16 %v6144_v50, %v6143_v43  ;;  %v6342_v18 = vld [vmem:[#allocation16 + $0x398] sm:$0xff] }
 0x5a9   : > { %9040 = vmatmul.mubr.f32.gmra.mrb[198].mxu0 %v11563_v24 }
 0x5aa   : > { %9042 = vmatprep.mubr.f32.mxu0 %v11579_v23  ;;  %9763 = vmatpush3.bf16.msra.mxu0 %v9760_v34  ;;  %v11713_v23 = vld [vmem:[#allocation7 + $0x91] sm:$0xff]  ;;  %v6146_v34 = vld [vmem:[#allocation16 + $0x378] sm:$0xff] }
 0x5ab   : > { %9765 = vmatprep.subr.bf16.mxu0 %v9764_v35  ;;  %v9804_v1 = vpack.c.bf16 %v6146_v34, %v6145_v56  ;;  %v6550_v56 = vld [vmem:[#allocation16 + $0x418] sm:$0xff] }
 0x5ad   : > { %9043 = vmatmul.mubr.f32.gmra.mrb[200].mxu0 %v11577_v59  ;;  %v11719_v59 = vld [vmem:[#allocation7 + $0x99] sm:$0xff] }
 0x5ae   : > { %9045 = vmatprep.mubr.f32.mxu0 %v11585_v5  ;;  %9767 = vmatpush3.bf16.msra.mxu0 %v9764_v35  ;;  %v6133_v5 = vld [vmem:[#allocation16 + $0x310] sm:$0xff] }
 0x5af   : > { %9769 = vmatprep.subr.bf16.mxu0 %v9768_v48 }
 0x5b1   : > { %9046 = vmatmul.mubr.f32.gmra.mrb[202].mxu0 %v11583_v53  ;;  %v6134_v53 = vld [vmem:[#allocation16 + $0x318] sm:$0xff] }
 0x5b2   : > { %9048 = vmatprep.mubr.f32.mxu0 %v11587_v11  ;;  %9771 = vmatpush3.bf16.msra.mxu0 %v9768_v48  ;;  %v8796_v24 = vpop.f32.mrb[120].mxu0  ;;  %v9780_v39 = vpack.c.bf16 %v6134_v53, %v6133_v5  ;;  %v11745_v48 = vld [vmem:[#allocation7 + $0x92] sm:$0xff]  ;;  %v6345_v53 = vld [vmem:[#allocation16 + $0x3b0] sm:$0xff] }
 0x5b3   : > { %9773 = vmatprep.subr.bf16.mxu0 %v9772_v28  ;;  %v11715_v33 = vpop.f32.mrb[121].mxu0  ;;  %v6343_v24 = vld [vmem:[#allocation16 + $0x3a0] sm:$0xff] }
 0x5b5   : > { %9049 = vmatmul.mubr.f32.gmra.mrb[204].mxu0 %v11592_v46  ;;  %v9784_v46 = vpack.c.bf16 %v6136_v20, %v6135_v2  ;;  %v6348_v2 = vld [vmem:[#allocation16 + $0x3c8] sm:$0xff]  ;;  %v6349_v20 = vld [vmem:[#allocation16 + $0x3d0] sm:$0xff] }
 0x5b6   : > { %9051 = vmatprep.mubr.f32.mxu0 %v11713_v23  ;;  %9775 = vmatpush3.bf16.msra.mxu0 %v9772_v28  ;;  %v6341_v28 = vld [vmem:[#allocation16 + $0x390] sm:$0xff] }
 0x5b7   : > { %9777 = vmatprep.subr.bf16.mxu0 %v9776_v19  ;;  %v9812_v38 = vpack.c.bf16 %v6342_v18, %v6341_v28  ;;  %v6551_v28 = vld [vmem:[#allocation16 + $0x420] sm:$0xff]  ;;  %v6552_v18 = vld [vmem:[#allocation16 + $0x428] sm:$0xff] }
 0x5b9   : > { %9052 = vmatmul.mubr.f32.gmra.mrb[206].mxu0 %v11719_v59 }
 0x5ba   : > { %9086 = vmatprep.mubr.f32.mxu0 %v11628_v16  ;;  %v8799_v11 = vpop.f32.mrb[122].mxu0 }
 0x5bb   : > { %v11723_v42 = vpop.f32.mrb[123].mxu0  ;;  %v6346_v11 = vld [vmem:[#allocation16 + $0x3b8] sm:$0xff] }
 0x5bd   : > { %9087 = vmatmul.mubr.f32.vlgmr.msra.gmra.mrb[208].mxu0 %v11631_v40  ;;  %v9792_v40 = vpack.c.bf16 %v6140_v3, %v6139_v55  ;;  %v6353_v55 = vld [vmem:[#allocation16 + $0x3f0] sm:$0xff]  ;;  %v6354_v3 = vld [vmem:[#allocation16 + $0x3f8] sm:$0xff] }
 0x5be   : > { %9779 = vmatpush3.bf16.msra.mxu0 %v9776_v19  ;;  %9089 = vmatprep.mubr.f32.mxu0 %v11634_v25  ;;  %v6344_v19 = vld [vmem:[#allocation16 + $0x3a8] sm:$0xff] }
 0x5bf   : > { %9781 = vmatprep.subr.bf16.mxu0 %v9780_v39  ;;  %v9816_v5 = vpack.c.bf16 %v6344_v19, %v6343_v24  ;;  %v6322_v24 = vld [vmem:[#allocation7 + $0x31] sm:$0xff] }
 0x5c1   : > { %9090 = vmatmul.mubr.f32.gmra.mrb[210].mxu0 %v11637_v57 }
 0x5c2   : > { %9092 = vmatprep.mubr.f32.mxu0 %v11640_v17  ;;  %9783 = vmatpush3.bf16.msra.mxu0 %v9780_v39  ;;  %v8802_v16 = vpop.f32.mrb[124].mxu0  ;;  %v9820_v39 = vpack.c.bf16 %v6346_v11, %v6345_v53  ;;  %v6554_v11 = vld [vmem:[#allocation16 + $0x438] sm:$0xff] }
 0x5c3   : > { %9785 = vmatprep.subr.bf16.mxu0 %v9784_v46  ;;  %v11729_v14 = vpop.f32.mrb[125].mxu0  ;;  %v6352_v16 = vld [vmem:[#allocation16 + $0x3e8] sm:$0xff] }
 0x5c5   : > { %9093 = vmatmul.mubr.f32.gmra.mrb[212].mxu0 %v11645_v49 }
 0x5c6   : > { %9095 = vmatprep.mubr.f32.mxu0 %v11648_v32  ;;  %9787 = vmatpush3.bf16.msra.mxu0 %v9784_v46  ;;  %v6350_v46 = vld [vmem:[#allocation16 + $0x3d8] sm:$0xff] }
 0x5c7   : > { %9789 = vmatprep.subr.bf16.mxu0 %v9788_v45 }
 0x5c9   : > { %9096 = vmatmul.mubr.f32.gmra.mrb[214].mxu0 %v11651_v37 }
 0x5ca   : > { %9098 = vmatprep.mubr.f32.mxu0 %v11654_v52  ;;  %9791 = vmatpush3.bf16.msra.mxu0 %v9788_v45  ;;  %v8805_v58 = vpop.f32.mrb[126].mxu0 }
 0x5cb   : > { %9793 = vmatprep.subr.bf16.mxu0 %v9792_v40  ;;  %v11735_v47 = vpop.f32.mrb[127].mxu0 }
 0x5cd   : > { %9099 = vmatmul.mubr.f32.gmra.mrb[216].mxu0 %v11657_v51 }
 0x5ce   : > { %9101 = vmatprep.mubr.f32.mxu0 %v11660_v15  ;;  %9795 = vmatpush3.bf16.msra.mxu0 %v9792_v40 }
 0x5cf   : > { %9797 = vmatprep.subr.bf16.mxu0 %v9796_v8 }
 0x5d1   : > { %9102 = vmatmul.mubr.f32.gmra.mrb[218].mxu0 %v11663_v4 }
 0x5d2   : > { %9104 = vmatprep.mubr.f32.mxu0 %v11666_v21  ;;  %9799 = vmatpush3.bf16.msra.mxu0 %v9796_v8  ;;  %v8808_v31 = vpop.f32.mrb[128].mxu0 }
 0x5d3   : > { %9801 = vmatprep.subr.bf16.mxu0 %v9800_v9  ;;  %v11741_v35 = vpop.f32.mrb[129].mxu0  ;;  %v6320_v31 = vld [vmem:[#allocation7 + $0x21] sm:$0xff] }
 0x5d5   : > { %9105 = vmatmul.mubr.f32.gmra.mrb[220].mxu0 %v11669_v63 }
 0x5d6   : > { %9107 = vmatprep.mubr.f32.mxu0 %v11671_v61  ;;  %9803 = vmatpush3.bf16.msra.mxu0 %v9800_v9  ;;  %v6549_v9 = vld [vmem:[#allocation16 + $0x410] sm:$0xff] }
 0x5d7   : > { %9805 = vmatprep.subr.bf16.mxu0 %v9804_v1  ;;  %v9844_v6 = vpack.c.bf16 %v6550_v56, %v6549_v9  ;;  %v6330_v9 = vld [vmem:[#allocation7 + $0x71] sm:$0xff] }
 0x5d9   : > { %9108 = vmatmul.mubr.f32.gmra.mrb[222].mxu0 %v11675_v7 }
 0x5da   : > { %9110 = vmatprep.mubr.f32.mxu0 %v11745_v48  ;;  %9807 = vmatpush3.bf16.msra.mxu0 %v9804_v1 }
 0x5db   : > { %9809 = vmatprep.subr.bf16.mxu0 %v9808_v62 }
 0x5dd   : > { %9111 = vmatmul.mubr.f32.gmra.mrb[224].mxu0 %v11749_v60 }
 0x5de   : > { %9145 = vmatprep.mubr.f32.mxu0 %v11602_v10  ;;  %v6347_v10 = vld [vmem:[#allocation16 + $0x3c0] sm:$0xff] }
 0x5e1   : > { %9146 = vmatmul.mubr.f32.vlgmr.msra.gmra.mrb[226].mxu0 %v11679_v41 }
 0x5e2   : > { %9811 = vmatpush3.bf16.msra.mxu0 %v9808_v62  ;;  %9148 = vmatprep.mubr.f32.mxu0 %v11606_v36  ;;  %v9824_v36 = vpack.c.bf16 %v6348_v2, %v6347_v10  ;;  %v6324_v10 = vld [vmem:[#allocation7 + $0x41] sm:$0xff] }
 0x5e3   : > { %9813 = vmatprep.subr.bf16.mxu0 %v9812_v38 }
 0x5e5   : > { %9149 = vmatmul.mubr.f32.gmra.mrb[228].mxu0 %v11679_v41 }
 0x5e6   : > { %9151 = vmatprep.mubr.f32.mxu0 %v11610_v30  ;;  %9815 = vmatpush3.bf16.msra.mxu0 %v9812_v38  ;;  %v9828_v30 = vpack.c.bf16 %v6350_v46, %v6349_v20  ;;  %v6555_v46 = vld [vmem:[#allocation16 + $0x440] sm:$0xff] }
 0x5e7   : > { %9817 = vmatprep.subr.bf16.mxu0 %v9816_v5 }
 0x5e9   : > { %9152 = vmatmul.mubr.f32.gmra.mrb[230].mxu0 %v11679_v41 }
 0x5ea   : > { %9154 = vmatprep.mubr.f32.mxu0 %v11614_v27  ;;  %9819 = vmatpush3.bf16.msra.mxu0 %v9816_v5  ;;  %v9832_v27 = vpack.c.bf16 %v6352_v16, %v6351_v54  ;;  %v6323_v5 = vld [vmem:[#allocation7 + $0x39] sm:$0xff]  ;;  %v6326_v54 = vld [vmem:[#allocation7 + $0x51] sm:$0xff] }
 0x5eb   : > { %9821 = vmatprep.subr.bf16.mxu0 %v9820_v39 }
 0x5ed   : > { %9155 = vmatmul.mubr.f32.gmra.mrb[232].mxu0 %v11679_v41 }
 0x5ee   : > { %9157 = vmatprep.mubr.f32.mxu0 %v11618_v44  ;;  %9823 = vmatpush3.bf16.msra.mxu0 %v9820_v39  ;;  %v9836_v44 = vpack.c.bf16 %v6354_v3, %v6353_v55  ;;  %v6557_v3 = vld [vmem:[#allocation16 + $0x450] sm:$0xff] }
 0x5ef   : > { %9825 = vmatprep.subr.bf16.mxu0 %v9824_v36 }
 0x5f0   : > { %v8811_v12 = vpop.f32.mrb[130].mxu0 }
 0x5f1   : > { %9158 = vmatmul.mubr.f32.gmra.mrb[234].mxu0 %v11679_v41  ;;  %v11762_v45 = vpop.f32.mrb[131].mxu0 }
 0x5f2   : > { %9160 = vmatprep.mubr.f32.mxu0 %v11622_v13  ;;  %9827 = vmatpush3.bf16.msra.mxu0 %v9824_v36  ;;  %v9840_v13 = vpack.c.bf16 %v6548_v29, %v6547_v22  ;;  %v6325_v36 = vld [vmem:[#allocation7 + $0x49] sm:$0xff]  ;;  %v6328_v22 = vld [vmem:[#allocation7 + $0x61] sm:$0xff] }
 0x5f3   : > { %9829 = vmatprep.subr.bf16.mxu0 %v9828_v30 }
 0x5f5   : > { %9161 = vmatmul.mubr.f32.gmra.mrb[236].mxu0 %v11679_v41 }
 0x5f6   : > { %9163 = vmatprep.mubr.f32.mxu0 %v11679_v41  ;;  %9831 = vmatpush3.bf16.msra.mxu0 %v9828_v30  ;;  %v6556_v30 = vld [vmem:[#allocation16 + $0x448] sm:$0xff] }
 0x5f7   : > { %9833 = vmatprep.subr.bf16.mxu0 %v9832_v27 }
 0x5f8   : > { %v8814_v40 = vpop.f32.mrb[132].mxu0 }
 0x5f9   : > { %v5106_v58 = vpop.f32.mrb[133].mxu0  ;;  %9164 = vmatmul.mubr.f32.gmra.mrb[238].mxu0 %v11679_v41 }
 0x5fa   : > { %9166 = vmatprep.mubr.f32.mxu0 %v11679_v41  ;;  %9835 = vmatpush3.bf16.msra.mxu0 %v9832_v27  ;;  %v6327_v27 = vld [vmem:[#allocation7 + $0x59] sm:$0xff]  ;;  %v6329_v58 = vld [vmem:[#allocation7 + $0x69] sm:$0xff] }
 0x5fb   : > { %9837 = vmatprep.subr.bf16.mxu0 %v9836_v44 }
 0x5fc   : > { %v8817_v8 = vpop.f32.mrb[134].mxu0 }
 0x5fd   : > { %v5116_v43 = vpop.f32.mrb[135].mxu0  ;;  %9167 = vmatmul.mubr.f32.gmra.mrb[240].mxu0 %v11679_v41  ;;  %v6559_v8 = vld [vmem:[#allocation16 + $0x460] sm:$0xff] }
 0x5fe   : > { %9169 = vmatprep.mubr.f32.mxu0 %v11679_v41  ;;  %9839 = vmatpush3.bf16.msra.mxu0 %v9836_v44  ;;  %v6558_v44 = vld [vmem:[#allocation16 + $0x458] sm:$0xff]  ;;  %v6560_v43 = vld [vmem:[#allocation16 + $0x468] sm:$0xff] }
 0x5ff   : > { %9841 = vmatprep.subr.bf16.mxu0 %v9840_v13 }
 0x600   : > { %v8852_v50 = vpop.f32.mrb[136].mxu0 }
 0x601   : > { %v5191_v34 = vpop.f32.mrb[137].mxu0  ;;  %9170 = vmatmul.mubr.f32.gmra.mrb[242].mxu0 %v11679_v41  ;;  %v9848_v41 = vpack.c.bf16 %v6552_v18, %v6551_v28 }
 0x602   : > { %v11773_v1 = vadd.f32 %v5191_v34, %v11642_v0  ;;  %9204 = vmatprep.mubr.f32.mxu0 %v6320_v31  ;;  %v6553_v0 = vld [vmem:[#allocation16 + $0x430] sm:$0xff] }
 0x603   : > { %v6331_v34 = vld [vmem:[#allocation7 + $0x79] sm:$0xff]  ;;  %v6332_v31 = vld [vmem:[#allocation7 + $0x81] sm:$0xff] }
 0x604   : > { %v8855_v62 = vpop.f32.mrb[138].mxu0 }
 0x605   : > { %v5201_v38 = vpop.f32.mrb[139].mxu0  ;;  %9205 = vmatmul.mubr.f32.vlgmr.msra.gmra.mrb[244].mxu0 %v6321_v26  ;;  %v6562_v62 = vld [vmem:[#allocation16 + $0x478] sm:$0xff] }
 0x606   : > { %v11776_v19 = vadd.f32 %v5201_v38, %v11715_v33  ;;  %9843 = vmatpush3.bf16.msra.mxu0 %v9840_v13  ;;  %9207 = vmatprep.mubr.f32.mxu0 %v6322_v24  ;;  %v9852_v33 = vpack.c.bf16 %v6554_v11, %v6553_v0  ;;  %v6333_v38 = vld [vmem:[#allocation7 + $0x89] sm:$0xff] }
 0x607   : > { %9845 = vmatprep.subr.bf16.mxu0 %v9844_v6  ;;  %v6337_v11 = vld [vmem:[#allocation7 + $0xa9] sm:$0xff] }
 0x608   : > { %v8858_v53 = vpop.f32.mrb[140].mxu0 }
 0x609   : > { %v5211_v39 = vpop.f32.mrb[141].mxu0  ;;  %9208 = vmatmul.mubr.f32.gmra.mrb[246].mxu0 %v6323_v5 }
 0x60a   : > { %v11779_v2 = vadd.f32 %v5211_v39, %v11723_v42  ;;  %9210 = vmatprep.mubr.f32.mxu0 %v6324_v10  ;;  %9847 = vmatpush3.bf16.msra.mxu0 %v9844_v6  ;;  %v9856_v42 = vpack.c.bf16 %v6556_v30, %v6555_v46  ;;  %v6561_v6 = vld [vmem:[#allocation16 + $0x470] sm:$0xff] }
 0x60b   : > { %9849 = vmatprep.subr.bf16.mxu0 %v9848_v41  ;;  %v9868_v24 = vpack.c.bf16 %v6562_v62, %v6561_v6 }
 0x60c   : > { %v8861_v20 = vpop.f32.mrb[142].mxu0 }
 0x60d   : > { %v5221_v12 = vpop.f32.mrb[143].mxu0  ;;  %9211 = vmatmul.mubr.f32.gmra.mrb[248].mxu0 %v6325_v36 }
 0x60e   : > { %v11782_v16 = vadd.f32 %v5221_v12, %v11729_v14  ;;  %9213 = vmatprep.mubr.f32.mxu0 %v6326_v54  ;;  %9851 = vmatpush3.bf16.msra.mxu0 %v9848_v41  ;;  %v9860_v14 = vpack.c.bf16 %v6558_v44, %v6557_v3  ;;  %v6336_v41 = vld [vmem:[#allocation7 + $0xa1] sm:$0xff] }
 0x60f   : > { %9853 = vmatprep.subr.bf16.mxu0 %v9852_v33 }
 0x610   : > { %v8864_v55 = vpop.f32.mrb[144].mxu0 }
 0x611   : > { %v5231_v40 = vpop.f32.mrb[145].mxu0  ;;  %9214 = vmatmul.mubr.f32.gmra.mrb[250].mxu0 %v6327_v27 }
 0x612   : > { %v11785_v29 = vadd.f32 %v5231_v40, %v11735_v47  ;;  %9216 = vmatprep.mubr.f32.mxu0 %v6328_v22  ;;  %9855 = vmatpush3.bf16.msra.mxu0 %v9852_v33  ;;  %v9864_v47 = vpack.c.bf16 %v6560_v43, %v6559_v8 }
 0x613   : > { %9857 = vmatprep.subr.bf16.mxu0 %v9856_v42 }
 0x614   : > { %v8867_v13 = vpop.f32.mrb[146].mxu0 }
 0x615   : > { %v5241_v50 = vpop.f32.mrb[147].mxu0  ;;  %9217 = vmatmul.mubr.f32.gmra.mrb[252].mxu0 %v6329_v58 }
 0x616   : > { %v5242_v56 = vadd.f32 %v5241_v50, %v11741_v35  ;;  %9219 = vmatprep.mubr.f32.mxu0 %v6330_v9  ;;  %9859 = vmatpush3.bf16.msra.mxu0 %v9856_v42 }
 0x617   : > { %9861 = vmatprep.subr.bf16.mxu0 %v9860_v14 }
 0x618   : > { %v8870_v26 = vpop.f32.mrb[148].mxu0 }
 0x619   : > { %v5251_v28 = vpop.f32.mrb[149].mxu0  ;;  %9220 = vmatmul.mubr.f32.gmra.mrb[254].mxu0 %v6331_v34 }
 0x61a   : > { %v5252_v18 = vadd.f32 %v5251_v28, %v11762_v45  ;;  %9222 = vmatprep.mubr.f32.mxu0 %v6332_v31  ;;  %9863 = vmatpush3.bf16.msra.mxu0 %v9860_v14 }
 0x61b   : > { %9865 = vmatprep.subr.bf16.mxu0 %v9864_v47 }
 0x61c   : > { %v8873_v5 = vpop.f32.mrb[150].mxu0 }
 0x61d   : > { %v5261_v35 = vpop.f32.mrb[151].mxu0  ;;  %9223 = vmatmul.mubr.f32.gmra.mrb[0].mxu0 %v6333_v38 }
 0x61e   : > { %9225 = vmatprep.mubr.f32.mxu0 %v11713_v23  ;;  %9867 = vmatpush3.bf16.msra.mxu0 %v9864_v47 }
 0x61f   : > { %9869 = vmatprep.subr.bf16.mxu0 %v9868_v24 }
 0x620   : > { %v8876_v53 = vpop.f32.mrb[152].mxu0 }
 0x621   : > { %v5271_v0 = vpop.f32.mrb[153].mxu0  ;;  %9226 = vmatmul.mubr.f32.gmra.mrb[2].mxu0 %v11719_v59 }
 0x622   : > { %9228 = vmatprep.mubr.f32.mxu0 %v6336_v41  ;;  %9871 = vmatpush3.bf16.msra.mxu0 %v9868_v24 }
 0x624   : > { %v8911_v45 = vpop.f32.mrb[154].mxu0 }
 0x625   : > { %v5381_v39 = vpop.f32.mrb[155].mxu0  ;;  %9229 = vmatmul.mubr.f32.gmra.mrb[4].mxu0 %v6337_v11 }
 0x626   : > { %v5470_v10 = vadd.f32 %v5381_v39, %v11773_v1  ;;  %9263 = vmatprep.mubr.f32.mxu0 %v11634_v25 }
 0x628   : > { %v8914_v36 = vpop.f32.mrb[156].mxu0 }
 0x629   : > { %v5391_v33 = vpop.f32.mrb[157].mxu0  ;;  %9264 = vmatmul.mubr.f32.vlgmr.msra.gmra.mrb[6].mxu0 %v11637_v57 }
 0x62a   : > { %v5472_v23 = vadd.f32 %v5391_v33, %v11776_v19  ;;  %9266 = vmatprep.mubr.f32.mxu0 %v11640_v17 }
 0x62c   : > { %v8917_v20 = vpop.f32.mrb[158].mxu0 }
 0x62d   : > { %v5401_v59 = vpop.f32.mrb[159].mxu0  ;;  %9267 = vmatmul.mubr.f32.gmra.mrb[8].mxu0 %v11645_v49 }
 0x62e   : > { %v5474_v46 = vadd.f32 %v5401_v59, %v11779_v2  ;;  %9269 = vmatprep.mubr.f32.mxu0 %v11648_v32 }
 0x630   : > { %v8920_v30 = vpop.f32.mrb[160].mxu0 }
 0x631   : > { %v5411_v1 = vpop.f32.mrb[161].mxu0  ;;  %9270 = vmatmul.mubr.f32.gmra.mrb[10].mxu0 %v11651_v37 }
 0x632   : > { %v5476_v25 = vadd.f32 %v5411_v1, %v11782_v16  ;;  %9272 = vmatprep.mubr.f32.mxu0 %v11654_v52 }
 0x634   : > { %v8923_v57 = vpop.f32.mrb[162].mxu0 }
 0x635   : > { %v5421_v19 = vpop.f32.mrb[163].mxu0  ;;  %9273 = vmatmul.mubr.f32.gmra.mrb[12].mxu0 %v11657_v51 }
 0x636   : > { %v5478_v17 = vadd.f32 %v5421_v19, %v11785_v29  ;;  %9275 = vmatprep.mubr.f32.mxu0 %v11660_v15  ;;  %v6544_v15 = vld [vmem:[#allocation7 + $0xa2] sm:$0xff] }
 0x638   : > { %v8926_v49 = vpop.f32.mrb[164].mxu0 }
 0x639   : > { %v5431_v2 = vpop.f32.mrb[165].mxu0  ;;  %9276 = vmatmul.mubr.f32.gmra.mrb[14].mxu0 %v11663_v4  ;;  %v6545_v4 = vld [vmem:[#allocation7 + $0xaa] sm:$0xff] }
 0x63a   : > { %v5480_v32 = vadd.f32 %v5431_v2, %v5242_v56  ;;  %9278 = vmatprep.mubr.f32.mxu0 %v11666_v21 }
 0x63c   : > { %v8929_v37 = vpop.f32.mrb[166].mxu0 }
 0x63d   : > { %v5441_v12 = vpop.f32.mrb[167].mxu0  ;;  %9279 = vmatmul.mubr.f32.gmra.mrb[16].mxu0 %v11669_v63 }
 0x63e   : > { %v5482_v52 = vadd.f32 %v5441_v12, %v5252_v18  ;;  %9281 = vmatprep.mubr.f32.mxu0 %v11671_v61 }
 0x640   : > { %v8932_v54 = vpop.f32.mrb[168].mxu0 }
 0x641   : > { %v5451_v51 = vpop.f32.mrb[169].mxu0  ;;  %9282 = vmatmul.mubr.f32.gmra.mrb[18].mxu0 %v11675_v7 }
 0x642   : > { %9284 = vmatprep.mubr.f32.mxu0 %v11745_v48 }
 0x644   : > { %v8935_v16 = vpop.f32.mrb[170].mxu0 }
 0x645   : > { %v5461_v27 = vpop.f32.mrb[171].mxu0  ;;  %9285 = vmatmul.mubr.f32.gmra.mrb[20].mxu0 %v11749_v60 }
 0x646   : > { %9287 = vmatprep.mubr.f32.mxu0 %v6544_v15 }
 0x648   : > { %v8970_v21 = vpop.f32.mrb[172].mxu0 }
 0x649   : > { %v5589_v42 = vpop.f32.mrb[173].mxu0  ;;  %9288 = vmatmul.mubr.f32.gmra.mrb[22].mxu0 %v6545_v4 }
 0x64a   : > { %v5678_v63 = vadd.f32 %v5589_v42, %v5470_v10 }
 0x64c   : > { %v8973_v55 = vpop.f32.mrb[174].mxu0 }
 0x64d   : > { %v5599_v3 = vpop.f32.mrb[175].mxu0 }
 0x64e   : > { %v5680_v61 = vadd.f32 %v5599_v3, %v5472_v23 }
 0x650   : > { %v8976_v44 = vpop.f32.mrb[176].mxu0 }
 0x651   : > { %v5609_v40 = vpop.f32.mrb[177].mxu0 }
 0x652   : > { %v5682_v22 = vadd.f32 %v5609_v40, %v5474_v46 }
 0x654   : > { %v8979_v7 = vpop.f32.mrb[178].mxu0 }
 0x655   : > { %v5619_v29 = vpop.f32.mrb[179].mxu0 }
 0x656   : > { %v5684_v48 = vadd.f32 %v5619_v29, %v5476_v25 }
 0x658   : > { %v8982_v58 = vpop.f32.mrb[180].mxu0 }
 0x659   : > { %v5629_v14 = vpop.f32.mrb[181].mxu0 }
 0x65a   : > { %v5686_v13 = vadd.f32 %v5629_v14, %v5478_v17 }
 0x65c   : > { %v8985_v8 = vpop.f32.mrb[182].mxu0 }
 0x65d   : > { %v5639_v60 = vpop.f32.mrb[183].mxu0 }
 0x65e   : > { %v5688_v43 = vadd.f32 %v5639_v60, %v5480_v32 }
 0x660   : > { %v8988_v50 = vpop.f32.mrb[184].mxu0 }
 0x661   : > { %v5649_v9 = vpop.f32.mrb[185].mxu0 }
 0x662   : > { %v5690_v56 = vadd.f32 %v5649_v9, %v5482_v52 }
 0x664   : > { %v8991_v34 = vpop.f32.mrb[186].mxu0 }
 0x665   : > { %v5659_v31 = vpop.f32.mrb[187].mxu0 }
 0x668   : > { %v8994_v47 = vpop.f32.mrb[188].mxu0 }
 0x669   : > { %v5669_v26 = vpop.f32.mrb[189].mxu0 }
 0x66c   : > { %v9029_v6 = vpop.f32.mrb[190].mxu0 }
 0x66d   : > { %v5797_v62 = vpop.f32.mrb[191].mxu0 }
 0x66e   : > { %v5886_v28 = vadd.f32 %v5797_v62, %v5678_v63 }
 0x670   : > { %v9032_v18 = vpop.f32.mrb[192].mxu0 }
 0x671   : > { %v5807_v38 = vpop.f32.mrb[193].mxu0 }
 0x672   : > { %v5888_v24 = vadd.f32 %v5807_v38, %v5680_v61 }
 0x674   : > { %v9035_v5 = vpop.f32.mrb[194].mxu0 }
 0x675   : > { %v5817_v35 = vpop.f32.mrb[195].mxu0 }
 0x676   : > { %v5890_v41 = vadd.f32 %v5817_v35, %v5682_v22 }
 0x678   : > { %v9038_v53 = vpop.f32.mrb[196].mxu0 }
 0x679   : > { %v5827_v0 = vpop.f32.mrb[197].mxu0 }
 0x67a   : > { %v5892_v11 = vadd.f32 %v5827_v0, %v5684_v48 }
 0x67c   : > { %v9041_v45 = vpop.f32.mrb[198].mxu0 }
 0x67d   : > { %v5837_v39 = vpop.f32.mrb[199].mxu0 }
 0x67e   : > { %v5894_v10 = vadd.f32 %v5837_v39, %v5686_v13 }
 0x680   : > { %v9044_v36 = vpop.f32.mrb[200].mxu0 }
 0x681   : > { %v5847_v33 = vpop.f32.mrb[201].mxu0 }
 0x682   : > { %v5896_v23 = vadd.f32 %v5847_v33, %v5688_v43 }
 0x684   : > { %v9047_v20 = vpop.f32.mrb[202].mxu0 }
 0x685   : > { %v5857_v59 = vpop.f32.mrb[203].mxu0 }
 0x686   : > { %v5898_v46 = vadd.f32 %v5857_v59, %v5690_v56 }
 0x688   : > { %v9050_v30 = vpop.f32.mrb[204].mxu0 }
 0x689   : > { %v5867_v1 = vpop.f32.mrb[205].mxu0 }
 0x68c   : > { %v9053_v25 = vpop.f32.mrb[206].mxu0 }
 0x68d   : > { %v5877_v57 = vpop.f32.mrb[207].mxu0 }
 0x690   : > { %v9088_v19 = vpop.f32.mrb[208].mxu0 }
 0x691   : > { %v6005_v17 = vpop.f32.mrb[209].mxu0 }
 0x692   : > { %v6094_v49 = vadd.f32 %v6005_v17, %v5886_v28 }
 0x694   : > { %v9091_v2 = vpop.f32.mrb[210].mxu0 }
 0x695   : > { %v6015_v32 = vpop.f32.mrb[211].mxu0 }
 0x696   : > { %v6096_v37 = vadd.f32 %v6015_v32, %v5888_v24 }
 0x698   : > { %v9094_v12 = vpop.f32.mrb[212].mxu0 }
 0x699   : > { %v6025_v52 = vpop.f32.mrb[213].mxu0 }
 0x69a   : > { %v6098_v54 = vadd.f32 %v6025_v52, %v5890_v41 }
 0x69c   : > { %v9097_v51 = vpop.f32.mrb[214].mxu0 }
 0x69d   : > { %v6035_v15 = vpop.f32.mrb[215].mxu0 }
 0x69e   : > { %v6100_v16 = vadd.f32 %v6035_v15, %v5892_v11 }
 0x6a0   : > { %v9100_v27 = vpop.f32.mrb[216].mxu0 }
 0x6a1   : > { %v6045_v4 = vpop.f32.mrb[217].mxu0 }
 0x6a2   : > { %v6102_v21 = vadd.f32 %v6045_v4, %v5894_v10  ;;  %v7047_v4 = vld [vmem:[#allocation17] ss:$0 sm:$0xff] }
 0x6a4   : > { %v9103_v42 = vpop.f32.mrb[218].mxu0 }
 0x6a5   : > { %v6055_v63 = vpop.f32.mrb[219].mxu0 }
 0x6a6   : > { %v6104_v55 = vadd.f32 %v6055_v63, %v5896_v23 }
 0x6a8   : > { %v9106_v3 = vpop.f32.mrb[220].mxu0 }
 0x6a9   : > { %v6065_v61 = vpop.f32.mrb[221].mxu0 }
 0x6aa   : > { %v6106_v44 = vadd.f32 %v6065_v61, %v5898_v46 }
 0x6ac   : > { %v9109_v40 = vpop.f32.mrb[222].mxu0 }
 0x6ad   : > { %v6075_v22 = vpop.f32.mrb[223].mxu0 }
 0x6b0   : > { %v9112_v7 = vpop.f32.mrb[224].mxu0 }
 0x6b1   : > { %v6085_v29 = vpop.f32.mrb[225].mxu0 }
 0x6b4   : > { %v9147_v48 = vpop.f32.mrb[226].mxu0 }
 0x6b5   : > { %v6213_v58 = vpop.f32.mrb[227].mxu0 }
 0x6b6   : > { %v6302_v14 = vadd.f32 %v6213_v58, %v6094_v49 }
 0x6b8   : > { %v9150_v13 = vpop.f32.mrb[228].mxu0 }
 0x6b9   : > { %v6223_v8 = vpop.f32.mrb[229].mxu0 }
 0x6ba   : > { %v6304_v60 = vadd.f32 %v6223_v8, %v6096_v37 }
 0x6bc   : > { %v9153_v43 = vpop.f32.mrb[230].mxu0 }
 0x6bd   : > { %v6233_v50 = vpop.f32.mrb[231].mxu0 }
 0x6be   : > { %v6306_v9 = vadd.f32 %v6233_v50, %v6098_v54 }
 0x6c0   : > { %v9156_v56 = vpop.f32.mrb[232].mxu0 }
 0x6c1   : > { %v6243_v34 = vpop.f32.mrb[233].mxu0 }
 0x6c2   : > { %v6308_v31 = vadd.f32 %v6243_v34, %v6100_v16 }
 0x6c4   : > { %v9159_v47 = vpop.f32.mrb[234].mxu0 }
 0x6c5   : > { %v6253_v26 = vpop.f32.mrb[235].mxu0 }
 0x6c6   : > { %v6310_v6 = vadd.f32 %v6253_v26, %v6102_v21 }
 0x6c8   : > { %v9162_v62 = vpop.f32.mrb[236].mxu0 }
 0x6c9   : > { %v6263_v28 = vpop.f32.mrb[237].mxu0 }
 0x6ca   : > { %v6312_v18 = vadd.f32 %v6263_v28, %v6104_v55 }
 0x6cc   : > { %v9165_v38 = vpop.f32.mrb[238].mxu0 }
 0x6cd   : > { %v6273_v24 = vpop.f32.mrb[239].mxu0 }
 0x6ce   : > { %v6314_v5 = vadd.f32 %v6273_v24, %v6106_v44 }
 0x6d0   : > { %v9168_v35 = vpop.f32.mrb[240].mxu0 }
 0x6d1   : > { %v6283_v41 = vpop.f32.mrb[241].mxu0 }
 0x6d4   : > { %v9171_v53 = vpop.f32.mrb[242].mxu0 }
 0x6d5   : > { %v6293_v0 = vpop.f32.mrb[243].mxu0 }
 0x6d8   : > { %v9206_v11 = vpop.f32.mrb[244].mxu0 }
 0x6d9   : > { %v6421_v45 = vpop.f32.mrb[245].mxu0 }
 0x6da   : > { %v6510_v39 = vadd.f32 %v6421_v45, %v6302_v14 }
 0x6dc   : > { %v9209_v10 = vpop.f32.mrb[246].mxu0 }
 0x6dd   : > { %v6431_v36 = vpop.f32.mrb[247].mxu0 }
 0x6de   : > { %v6512_v33 = vadd.f32 %v6431_v36, %v6304_v60 }
 0x6e0   : > { %v9212_v23 = vpop.f32.mrb[248].mxu0 }
 0x6e1   : > { %v6441_v20 = vpop.f32.mrb[249].mxu0 }
 0x6e2   : > { %v6514_v59 = vadd.f32 %v6441_v20, %v6306_v9 }
 0x6e4   : > { %v9215_v46 = vpop.f32.mrb[250].mxu0 }
 0x6e5   : > { %v6451_v30 = vpop.f32.mrb[251].mxu0 }
 0x6e6   : > { %v6516_v1 = vadd.f32 %v6451_v30, %v6308_v31 }
 0x6e8   : > { %v9218_v25 = vpop.f32.mrb[252].mxu0 }
 0x6e9   : > { %v6461_v57 = vpop.f32.mrb[253].mxu0 }
 0x6ea   : > { %v6518_v19 = vadd.f32 %v6461_v57, %v6310_v6 }
 0x6ec   : > { %v9221_v17 = vpop.f32.mrb[254].mxu0 }
 0x6ed   : > { %v6471_v49 = vpop.f32.mrb[255].mxu0 }
 0x6ee   : > { %v6520_v2 = vadd.f32 %v6471_v49, %v6312_v18 }
 0x6f0   : > { %v9224_v32 = vpop.f32.mrb[0].mxu0 }
 0x6f1   : > { %v6481_v37 = vpop.f32.mrb[1].mxu0 }
 0x6f2   : > { %v6522_v12 = vadd.f32 %v6481_v37, %v6314_v5 }
 0x6f4   : > { %v9227_v52 = vpop.f32.mrb[2].mxu0 }
 0x6f5   : > { %v6491_v54 = vpop.f32.mrb[3].mxu0 }
 0x6f8   : > { %v9230_v51 = vpop.f32.mrb[4].mxu0 }
 0x6f9   : > { %v6501_v15 = vpop.f32.mrb[5].mxu0 }
 0x6fc   : > { %v9265_v16 = vpop.f32.mrb[6].mxu0 }
 0x6fd   : > { %v6629_v27 = vpop.f32.mrb[7].mxu0 }
 0x6fe   : > { %v6718_v21 = vadd.f32 %v6629_v27, %v6510_v39 }
 0x700   : > { %v6743_v42 = vadd.f32 %v7047_v4, %v6718_v21  ;;  %v9268_v63 = vpop.f32.mrb[8].mxu0 }
 0x701   : > { %v6639_v55 = vpop.f32.mrb[9].mxu0 }
 0x702   : > { %v6761_v3 = vmax.f32 %v6743_v42, 0.0  ;;  %v6720_v61 = vadd.f32 %v6639_v55, %v6512_v33 }
 0x704   : > { %6798 = vst [vmem:[%s11816_s25] sm:$0xff] %v6761_v3  ;;  %v6745_v44 = vadd.f32 %v7047_v4, %v6720_v61  ;;  %v9271_v40 = vpop.f32.mrb[10].mxu0 }
 0x705   : > { %v6649_v22 = vpop.f32.mrb[11].mxu0 }
 0x706   : > { %v6763_v7 = vmax.f32 %v6745_v44, 0.0  ;;  %v6722_v29 = vadd.f32 %v6649_v22, %v6514_v59 }
 0x708   : > { %6800 = vst [vmem:[%s11816_s25 + $0x8] sm:$0xff] %v6763_v7  ;;  %v6747_v48 = vadd.f32 %v7047_v4, %v6722_v29  ;;  %v9274_v58 = vpop.f32.mrb[12].mxu0 }
 0x709   : > { %v6659_v14 = vpop.f32.mrb[13].mxu0 }
 0x70a   : > { %v6765_v13 = vmax.f32 %v6747_v48, 0.0  ;;  %v6724_v8 = vadd.f32 %v6659_v14, %v6516_v1 }
 0x70c   : > { %6802 = vst [vmem:[%s11816_s25 + $0x10] sm:$0xff] %v6765_v13  ;;  %v6749_v60 = vadd.f32 %v7047_v4, %v6724_v8  ;;  %v9277_v43 = vpop.f32.mrb[14].mxu0 }
 0x70d   : > { %v6669_v50 = vpop.f32.mrb[15].mxu0 }
 0x70e   : > { %v6767_v9 = vmax.f32 %v6749_v60, 0.0  ;;  %v6726_v56 = vadd.f32 %v6669_v50, %v6518_v19 }
 0x710   : > { %6804 = vst [vmem:[%s11816_s25 + $0x18] sm:$0xff] %v6767_v9  ;;  %v6751_v34 = vadd.f32 %v7047_v4, %v6726_v56  ;;  %v9280_v31 = vpop.f32.mrb[16].mxu0 }
 0x711   : > { %v6679_v47 = vpop.f32.mrb[17].mxu0 }
 0x712   : > { %v6769_v26 = vmax.f32 %v6751_v34, 0.0  ;;  %v6728_v6 = vadd.f32 %v6679_v47, %v6520_v2 }
 0x714   : > { %6806 = vst [vmem:[%s11816_s25 + $0x20] sm:$0xff] %v6769_v26  ;;  %v6753_v62 = vadd.f32 %v7047_v4, %v6728_v6  ;;  %v9283_v28 = vpop.f32.mrb[18].mxu0 }
 0x715   : > { %v6689_v18 = vpop.f32.mrb[19].mxu0 }
 0x716   : > { %v6771_v38 = vmax.f32 %v6753_v62, 0.0  ;;  %v6730_v24 = vadd.f32 %v6689_v18, %v6522_v12 }
 0x718   : > { %6808 = vst [vmem:[%s11816_s25 + $0x28] sm:$0xff] %v6771_v38  ;;  %v6755_v5 = vadd.f32 %v7047_v4, %v6730_v24  ;;  %v9286_v35 = vpop.f32.mrb[20].mxu0 }
 0x719   : > { %v6699_v41 = vpop.f32.mrb[21].mxu0 }
 0x71a   : > { %v6773_v53 = vmax.f32 %v6755_v5, 0.0 }
 0x71c   : > { %6810 = vst [vmem:[%s11816_s25 + $0x30] sm:$0xff] %v6773_v53  ;;  %v9289_v0 = vpop.f32.mrb[22].mxu0 }
 0x71d   : > { %v6709_v11 = vpop.f32.mrb[23].mxu0 }
 0x71e PF: > { %s21_s24 = sadd.s32 1, %s10411_s24  }
 0x71f   : > { %p18_p10 = scmp.ge.s32.totalorder %s21_s24, 4  }
 0x721   :  { %20 = sbr.rel (!%p18_p10) target bundleno = 4 (0x4), region = 247 }
 0x728   :  { %6833 = vsyncpa [#allocation10], 1 }
 0x729   :  { %6835 = vsyncpa [#allocation10 + $0x1], 1 }
 0x72a   :  { %6836 = vsyncpa [#allocation12], 1 }
 0x72b   :  { %6837 = vsyncpa [#allocation15], 1 }
 0x72c   :  { %6838 = vsyncpa [#allocation18], 1 }

</bundles_post_ra>
